<compile_context>
chip_gen: v7x
topology: tpu7x:2x2x1
jax: 0.10.0
libtpu: 0.0.40
codegen_flags: <defaults>
</compile_context>

<pallas_src>
import jax
import jax.numpy as jnp
from jax import lax
from jax.experimental import pallas as pl
from jax.experimental.pallas import tpu as pltpu


def _vmem_capacity_bytes():
    try:
        return int(pltpu.get_tpu_info().vmem_capacity_bytes)
    except Exception:
        return 64 << 20  # conservative fallback (v7x per-TC VMEM)


def _pick_strip_rows(Ho, Wo, dim, out_itemsize, K, compute_itemsize,
                     fixed_bytes, vmem_cap):
    """Output rows per grid step: divides Ho, keeps the (1, dim, To*Wo) output block legal
    (To*Wo % 128 == 0 or To == Ho), sized from the real VMEM budget."""
    budget = max(1 << 20, min(8 << 20, (vmem_cap - fixed_bytes) // 6))
    cand = [d for d in range(1, Ho + 1)
            if Ho % d == 0 and ((d * Wo) % 128 == 0 or d == Ho)]

    def per_strip_bytes(d):
        m = d * Wo
        return m * (2 * dim * out_itemsize + K * compute_itemsize)

    fit = [d for d in cand if per_strip_bytes(d) <= budget]
    return max(fit) if fit else min(cand)


def _make_kernel(*, C, H, W, P, s, p, dim, To, Wo, Tq, Wq, Hy, Hx, Wcp,
                 compute_dtype):

    def kernel(x_ref, wpf_ref, wim_ref, b_ref, o_ref, ysplit_ref, cols_ref):
        t = pl.program_id(1)

        # ---- load this strip's input rows (host pre-padded: +p+1 rows/cols of zeros).
        row0 = pl.multiple_of(t * (To * s), To * s)
        xp = x_ref[0, :, pl.ds(row0, Hx), :].astype(jnp.float32)      # (C, Hx, Wx)

        # Hoist the three dx-shifted blur operands once (static lane slices).
        xs = [xp[:, :, dx:dx + Wcp] for dx in range(3)]               # (C, Hx, Wcp) each

        # ---- depthwise 3x3 prefilter (generic per-channel weights), f32.
        acc = jnp.zeros((C, Hy, Wcp), jnp.float32)
        for dy in range(3):
            for dx in range(3):
                k = dy * 3 + dx
                wtap = wpf_ref[:, k:k + 1].reshape(C, 1, 1)
                acc = acc + xs[dx][:, dy:dy + Hy, :] * wtap

        # The embed conv zero-pads the *blurred* image: blur values computed over the
        # zero ring must themselves be zeroed before the patch gather.
        y_lo = t * (To * s) - p                                        # global y row of acc row 0
        row_g = lax.broadcasted_iota(jnp.int32, (1, Hy, 1), 1) + y_lo
        col_g = lax.broadcasted_iota(jnp.int32, (1, 1, Wcp), 2) - p
        valid = (row_g >= 0) & (row_g < H) & (col_g >= 0) & (col_g < W)
        acc = jnp.where(valid, acc, 0.0)

        # ---- stride-phase pre-split, ONCE per strip:
        #   ysplit[(ry*s+rx)*C + c, i, q] = y[c, (t*To+i)*s + ry - p, q*s + rx - p]
        accc = acc.reshape(C, Hy, Wq, s)                               # split columns by phase
        for rx in range(s):
            colp = accc[:, :, :, rx].reshape(C, Tq, s, Wq)             # split rows by phase
            for ry in range(s):
                b0 = (ry * s + rx) * C
                ysplit_ref[b0:b0 + C, :, :] = colp[:, :, ry, :].astype(compute_dtype)

        # ---- im2col: every tap is a contiguous slice of its phase plane; pieces are
        #      written straight into the preallocated cols scratch (no concatenate).
        for ky in range(P):
            qy, ry = divmod(ky, s)
            for kx in range(P):
                qx, rx = divmod(kx, s)
                b0 = (ry * s + rx) * C
                piece = ysplit_ref[b0:b0 + C, qy:qy + To, qx:qx + Wo]  # (C, To, Wo)
                kk = (ky * P + kx) * C
                cols_ref[kk:kk + C, :] = piece.reshape(C, To * Wo)

        # ---- one MXU matmul per strip (K = P*P*C), f32 accumulate, lane-dense store.
        out = jnp.dot(wim_ref[...], cols_ref[...],
                      preferred_element_type=jnp.float32) + b_ref[...]
        o_ref[0] = out.astype(o_ref.dtype)                             # (dim, To*Wo) NCHW plane

    return kernel


def patch_embedding_overlap(x, prefilter_w, embed_w, embed_b, patch,
                            stride=None, strip_rows=None,
                            compute_dtype=jnp.bfloat16):
    """Forward pass of PatchEmbeddingOverlap.

    x:           (N, C, H, W)    input, NCHW (PyTorch layout)
    prefilter_w: (C, 1, 3, 3)    depthwise 3x3 weight (module initialises it to 1/9)
    embed_w:     (dim, C, P, P)  patch-embedding conv weight (OIHW)
    embed_b:     (dim,)          patch-embedding conv bias
    returns:     (N, dim, Ho, Wo) in NCHW
    """
    P = int(patch)
    s = int(stride) if stride else P
    assert 1 <= s <= P, "stride must satisfy 1 <= stride <= patch"
    p = (P - s) // 2
    N, C, H, W = map(int, x.shape)
    dim = int(embed_w.shape[0])
    Ho = (H + 2 * p - P) // s + 1
    Wo = (W + 2 * p - P) // s + 1
    assert Ho >= 1 and Wo >= 1
    K = P * P * C

    x_itemsize = jnp.dtype(x.dtype).itemsize
    out_itemsize = x_itemsize
    c_itemsize = jnp.dtype(compute_dtype).itemsize
    qmax = (P - 1) // s                      # extra phase-plane rows/cols needed by overlap

    # Strip-independent geometry.
    Wq = max(Wo + qmax, -(-W // s))          # phase-plane width
    Wcp = Wq * s                             # blurred-strip width (lane axis)
    Wx = max(Wcp + 2, W + p + 2)             # host-padded input width
    RPAD = p + 1                             # top zero rows (blur halo + embed pad)
    Hpad = max((Ho + qmax) * s + 2, RPAD + H)

    vmem_cap = _vmem_capacity_bytes()
    fixed_bytes = (2 * C * Hpad * Wx * x_itemsize                 # padded input, double-buffered
                   + 2 * (C * 9 * 4 + dim * K * c_itemsize + dim * 4))

    if strip_rows is None:
        To = _pick_strip_rows(Ho, Wo, dim, out_itemsize, K, c_itemsize,
                              fixed_bytes, vmem_cap)
    else:
        To = int(strip_rows)
    assert Ho % To == 0 and ((To * Wo) % 128 == 0 or To == Ho), (
        "strip_rows must divide Ho and yield a 128-multiple (or full) lane block")

    Tq = To + qmax
    Hy = Tq * s                              # blurred rows per strip
    Hx = Hy + 2                              # input rows per strip (+1 blur halo each side)
    M = To * Wo

    # Host-side prep (all tiny, C-channel / weight tensors).
    x_pad = jnp.zeros((N, C, Hpad, Wx), x.dtype)
    x_pad = x_pad.at[:, :, RPAD:RPAD + H, p + 1:p + 1 + W].set(x)
    wpf = prefilter_w.reshape(C, 9).astype(jnp.float32)                   # (C, dy*3+dx)
    wim = jnp.transpose(embed_w, (0, 2, 3, 1)).reshape(dim, K).astype(compute_dtype)
    bias = embed_b.reshape(dim, 1).astype(jnp.float32)

    kernel = _make_kernel(C=C, H=H, W=W, P=P, s=s, p=p, dim=dim, To=To, Wo=Wo,
                          Tq=Tq, Wq=Wq, Hy=Hy, Hx=Hx, Wcp=Wcp,
                          compute_dtype=compute_dtype)

    # Explicit VMEM budget from the actual resident buffers (+ headroom).
    resident = (fixed_bytes
                + 2 * dim * M * out_itemsize             # output block, double-buffered
                + (s * s * C) * Tq * Wq * c_itemsize     # ysplit scratch
                + K * M * c_itemsize)                    # im2col cols scratch
    vmem_limit = int(min(vmem_cap, max(2 * resident + (4 << 20), 32 << 20)))

    out = pl.pallas_call(
        kernel,
        out_shape=jax.ShapeDtypeStruct((N, dim, Ho * Wo), x.dtype),
        grid_spec=pltpu.PrefetchScalarGridSpec(
            num_scalar_prefetch=0,
            grid=(N, Ho // To),
            in_specs=[
                pl.BlockSpec((1, C, Hpad, Wx), lambda n, t: (n, 0, 0, 0)),  # padded image (small)
                pl.BlockSpec((C, 9), lambda n, t: (0, 0)),                  # prefilter taps
                pl.BlockSpec((dim, K), lambda n, t: (0, 0)),                # embed weight (im2col)
                pl.BlockSpec((dim, 1), lambda n, t: (0, 0)),                # bias column
            ],
            out_specs=pl.BlockSpec((1, dim, M), lambda n, t: (n, 0, t)),
            scratch_shapes=[
                pltpu.VMEM((s * s * C, Tq, Wq), compute_dtype),   # phase-split blurred strip
                pltpu.VMEM((K, M), compute_dtype),                # im2col columns
            ],
        ),
        compiler_params=pltpu.CompilerParams(
            dimension_semantics=("parallel", "parallel"),
            vmem_limit_bytes=vmem_limit),
    )(x_pad, wpf, wim, bias)

    # Splitting the last dim is layout-preserving (no transpose over the big output).
    return out.reshape(N, dim, Ho, Wo)


# ---------------- pure-JAX reference (matches the PyTorch module) ----------------
def reference(x, prefilter_w, embed_w, embed_b, patch, stride=None):
    P = int(patch)
    s = int(stride) if stride else P
    p = (P - s) // 2
    C = x.shape[1]
    y = lax.conv_general_dilated(
        x, prefilter_w, window_strides=(1, 1), padding=((1, 1), (1, 1)),
        dimension_numbers=("NCHW", "OIHW", "NCHW"), feature_group_count=C)
    z = lax.conv_general_dilated(
        y, embed_w, window_strides=(s, s), padding=((p, p), (p, p)),
        dimension_numbers=("NCHW", "OIHW", "NCHW"))
    return z + embed_b.reshape(1, -1, 1, 1)


if __name__ == "__main__":
    key = jax.random.PRNGKey(0)
    k_x, k_w, k_b = jax.random.split(key, 3)

    # Module config: in_ch=4, dim=128, patch=4.  Input (2, 4, 32, 32).
    N, C, H, W = 2, 4, 32, 32
    dim, patch = 128, 4

    x = jax.random.normal(k_x, (N, C, H, W), jnp.float32)
    prefilter_w = jnp.full((C, 1, 3, 3), 1.0 / 9.0, jnp.float32)   # module's prefilter init
    embed_w = 0.1 * jax.random.normal(k_w, (dim, C, patch, patch), jnp.float32)
    embed_b = 0.1 * jax.random.normal(k_b, (dim,), jnp.float32)

    # Overlapping config (stride < patch -> padding 1); 2 row-strips per image to exercise
    # the tiled / per-strip-blur path with both grid axes parallel.
    out_ov = patch_embedding_overlap(x, prefilter_w, embed_w, embed_b,
                                     patch, stride=2, strip_rows=8)
    out_ov = jax.block_until_ready(out_ov)
    ref_ov = reference(x, prefilter_w, embed_w, embed_b, patch, stride=2)
    assert out_ov.shape == (N, dim, 16, 16), out_ov.shape
    assert jnp.allclose(out_ov, ref_ov, atol=2e-2, rtol=2e-2), (
        float(jnp.max(jnp.abs(out_ov - ref_ov))))

    # Default non-overlapping config (stride == patch, padding 0), auto strip size.
    out_nv = patch_embedding_overlap(x, prefilter_w, embed_w, embed_b, patch)
    out_nv = jax.block_until_ready(out_nv)
    ref_nv = reference(x, prefilter_w, embed_w, embed_b, patch)
    assert out_nv.shape == (N, dim, 8, 8), out_nv.shape
    assert jnp.allclose(out_nv, ref_nv, atol=2e-2, rtol=2e-2), (
        float(jnp.max(jnp.abs(out_nv - ref_nv))))

    print("KERNEL_OK")
</pallas_src>

<mosaic_0001>
module attributes {stable_mosaic.version = 11 : i64} {
  func.func @kernel(%arg0: i32, %arg1: i32, %arg2: memref<1x4x36x36xf32, #tpu.memory_space<vmem>>, %arg3: memref<4x9xf32, #tpu.memory_space<vmem>>, %arg4: memref<128x64xbf16, #tpu.memory_space<vmem>>, %arg5: memref<128x1xf32, #tpu.memory_space<vmem>>, %arg6: memref<1x128x128xf32, #tpu.memory_space<vmem>>, %arg7: memref<16x9x17xbf16, #tpu.memory_space<vmem>>, %arg8: memref<64x128xbf16, #tpu.memory_space<vmem>>) attributes {dimension_semantics = [#tpu.dimension_semantics<parallel>, #tpu.dimension_semantics<parallel>], iteration_bounds = array<i64: 2, 2>, scalar_prefetch = 0 : i64, scratch_operands = 2 : i64, tpu.core_type = #tpu.core_type<tc>, window_params = [{transform_indices = @transform_0, window_bounds = array<i64: 1, 4, 36, 36>}, {pipeline_mode = #tpu.pipeline_mode<synchronous>, transform_indices = @transform_1, window_bounds = array<i64: 4, 9>}, {pipeline_mode = #tpu.pipeline_mode<synchronous>, transform_indices = @transform_2, window_bounds = array<i64: 128, 64>}, {pipeline_mode = #tpu.pipeline_mode<synchronous>, transform_indices = @transform_3, window_bounds = array<i64: 128, 1>}, {transform_indices = @transform_4, window_bounds = array<i64: 1, 128, 128>}]} {
    %c16_i32 = arith.constant 16 : i32
    %0 = arith.muli %arg1, %c16_i32 : i32
    %1 = tpu.assume_multiple %0, 16 : i32
    %c0 = arith.constant 0 : index
    %c0_0 = arith.constant 0 : index
    %2 = arith.index_cast %1 : i32 to index
    %c0_1 = arith.constant 0 : index
    %3 = vector.load %arg2[%c0, %c0_0, %2, %c0_1] : memref<1x4x36x36xf32, #tpu.memory_space<vmem>>, vector<1x4x20x36xf32>
    %4 = vector.shape_cast %3 : vector<1x4x20x36xf32> to vector<4x20x36xf32>
    %5 = vector.extract_strided_slice %4 {offsets = [0, 0, 0], sizes = [4, 20, 34], strides = [1, 1, 1]} : vector<4x20x36xf32> to vector<4x20x34xf32>
    %6 = vector.extract_strided_slice %4 {offsets = [0, 0, 1], sizes = [4, 20, 34], strides = [1, 1, 1]} : vector<4x20x36xf32> to vector<4x20x34xf32>
    %7 = vector.extract_strided_slice %4 {offsets = [0, 0, 2], sizes = [4, 20, 34], strides = [1, 1, 1]} : vector<4x20x36xf32> to vector<4x20x34xf32>
    %cst = arith.constant 0.000000e+00 : f32
    %8 = vector.broadcast %cst : f32 to vector<4x18x34xf32>
    %c0_2 = arith.constant 0 : index
    %c0_3 = arith.constant 0 : index
    %9 = vector.load %arg3[%c0_2, %c0_3] : memref<4x9xf32, #tpu.memory_space<vmem>>, vector<4x1xf32>
    %10 = vector.shape_cast %9 : vector<4x1xf32> to vector<4x1x1xf32>
    %11 = vector.extract_strided_slice %5 {offsets = [0, 0, 0], sizes = [4, 18, 34], strides = [1, 1, 1]} : vector<4x20x34xf32> to vector<4x18x34xf32>
    %12 = vector.broadcast %10 : vector<4x1x1xf32> to vector<4x18x34xf32>
    %13 = arith.mulf %11, %12 : vector<4x18x34xf32>
    %14 = arith.addf %8, %13 : vector<4x18x34xf32>
    %c0_4 = arith.constant 0 : index
    %c1 = arith.constant 1 : index
    %15 = vector.load %arg3[%c0_4, %c1] : memref<4x9xf32, #tpu.memory_space<vmem>>, vector<4x1xf32>
    %16 = vector.shape_cast %15 : vector<4x1xf32> to vector<4x1x1xf32>
    %17 = vector.extract_strided_slice %6 {offsets = [0, 0, 0], sizes = [4, 18, 34], strides = [1, 1, 1]} : vector<4x20x34xf32> to vector<4x18x34xf32>
    %18 = vector.broadcast %16 : vector<4x1x1xf32> to vector<4x18x34xf32>
    %19 = arith.mulf %17, %18 : vector<4x18x34xf32>
    %20 = arith.addf %14, %19 : vector<4x18x34xf32>
    %c0_5 = arith.constant 0 : index
    %c2 = arith.constant 2 : index
    %21 = vector.load %arg3[%c0_5, %c2] : memref<4x9xf32, #tpu.memory_space<vmem>>, vector<4x1xf32>
    %22 = vector.shape_cast %21 : vector<4x1xf32> to vector<4x1x1xf32>
    %23 = vector.extract_strided_slice %7 {offsets = [0, 0, 0], sizes = [4, 18, 34], strides = [1, 1, 1]} : vector<4x20x34xf32> to vector<4x18x34xf32>
    %24 = vector.broadcast %22 : vector<4x1x1xf32> to vector<4x18x34xf32>
    %25 = arith.mulf %23, %24 : vector<4x18x34xf32>
    %26 = arith.addf %20, %25 : vector<4x18x34xf32>
    %c0_6 = arith.constant 0 : index
    %c3 = arith.constant 3 : index
    %27 = vector.load %arg3[%c0_6, %c3] : memref<4x9xf32, #tpu.memory_space<vmem>>, vector<4x1xf32>
    %28 = vector.shape_cast %27 : vector<4x1xf32> to vector<4x1x1xf32>
    %29 = vector.extract_strided_slice %5 {offsets = [0, 1, 0], sizes = [4, 18, 34], strides = [1, 1, 1]} : vector<4x20x34xf32> to vector<4x18x34xf32>
    %30 = vector.broadcast %28 : vector<4x1x1xf32> to vector<4x18x34xf32>
    %31 = arith.mulf %29, %30 : vector<4x18x34xf32>
    %32 = arith.addf %26, %31 : vector<4x18x34xf32>
    %c0_7 = arith.constant 0 : index
    %c4 = arith.constant 4 : index
    %33 = vector.load %arg3[%c0_7, %c4] : memref<4x9xf32, #tpu.memory_space<vmem>>, vector<4x1xf32>
    %34 = vector.shape_cast %33 : vector<4x1xf32> to vector<4x1x1xf32>
    %35 = vector.extract_strided_slice %6 {offsets = [0, 1, 0], sizes = [4, 18, 34], strides = [1, 1, 1]} : vector<4x20x34xf32> to vector<4x18x34xf32>
    %36 = vector.broadcast %34 : vector<4x1x1xf32> to vector<4x18x34xf32>
    %37 = arith.mulf %35, %36 : vector<4x18x34xf32>
    %38 = arith.addf %32, %37 : vector<4x18x34xf32>
    %c0_8 = arith.constant 0 : index
    %c5 = arith.constant 5 : index
    %39 = vector.load %arg3[%c0_8, %c5] : memref<4x9xf32, #tpu.memory_space<vmem>>, vector<4x1xf32>
    %40 = vector.shape_cast %39 : vector<4x1xf32> to vector<4x1x1xf32>
    %41 = vector.extract_strided_slice %7 {offsets = [0, 1, 0], sizes = [4, 18, 34], strides = [1, 1, 1]} : vector<4x20x34xf32> to vector<4x18x34xf32>
    %42 = vector.broadcast %40 : vector<4x1x1xf32> to vector<4x18x34xf32>
    %43 = arith.mulf %41, %42 : vector<4x18x34xf32>
    %44 = arith.addf %38, %43 : vector<4x18x34xf32>
    %c0_9 = arith.constant 0 : index
    %c6 = arith.constant 6 : index
    %45 = vector.load %arg3[%c0_9, %c6] : memref<4x9xf32, #tpu.memory_space<vmem>>, vector<4x1xf32>
    %46 = vector.shape_cast %45 : vector<4x1xf32> to vector<4x1x1xf32>
    %47 = vector.extract_strided_slice %5 {offsets = [0, 2, 0], sizes = [4, 18, 34], strides = [1, 1, 1]} : vector<4x20x34xf32> to vector<4x18x34xf32>
    %48 = vector.broadcast %46 : vector<4x1x1xf32> to vector<4x18x34xf32>
    %49 = arith.mulf %47, %48 : vector<4x18x34xf32>
    %50 = arith.addf %44, %49 : vector<4x18x34xf32>
    %c0_10 = arith.constant 0 : index
    %c7 = arith.constant 7 : index
    %51 = vector.load %arg3[%c0_10, %c7] : memref<4x9xf32, #tpu.memory_space<vmem>>, vector<4x1xf32>
    %52 = vector.shape_cast %51 : vector<4x1xf32> to vector<4x1x1xf32>
    %53 = vector.extract_strided_slice %6 {offsets = [0, 2, 0], sizes = [4, 18, 34], strides = [1, 1, 1]} : vector<4x20x34xf32> to vector<4x18x34xf32>
    %54 = vector.broadcast %52 : vector<4x1x1xf32> to vector<4x18x34xf32>
    %55 = arith.mulf %53, %54 : vector<4x18x34xf32>
    %56 = arith.addf %50, %55 : vector<4x18x34xf32>
    %c0_11 = arith.constant 0 : index
    %c8 = arith.constant 8 : index
    %57 = vector.load %arg3[%c0_11, %c8] : memref<4x9xf32, #tpu.memory_space<vmem>>, vector<4x1xf32>
    %58 = vector.shape_cast %57 : vector<4x1xf32> to vector<4x1x1xf32>
    %59 = vector.extract_strided_slice %7 {offsets = [0, 2, 0], sizes = [4, 18, 34], strides = [1, 1, 1]} : vector<4x20x34xf32> to vector<4x18x34xf32>
    %60 = vector.broadcast %58 : vector<4x1x1xf32> to vector<4x18x34xf32>
    %61 = arith.mulf %59, %60 : vector<4x18x34xf32>
    %62 = arith.addf %56, %61 : vector<4x18x34xf32>
    %c16_i32_12 = arith.constant 16 : i32
    %63 = arith.muli %arg1, %c16_i32_12 : i32
    %c1_i32 = arith.constant 1 : i32
    %64 = arith.subi %63, %c1_i32 : i32
    %65 = tpu.iota {dimensions = array<i32: 1>} : vector<1x18x1xi32>
    %66 = vector.broadcast %64 : i32 to vector<1x18x1xi32>
    %67 = arith.addi %65, %66 : vector<1x18x1xi32>
    %68 = tpu.iota {dimensions = array<i32: 2>} : vector<1x1x34xi32>
    %c1_i32_13 = arith.constant 1 : i32
    %69 = vector.broadcast %c1_i32_13 : i32 to vector<1x1x34xi32>
    %70 = arith.subi %68, %69 : vector<1x1x34xi32>
    %c0_i32 = arith.constant 0 : i32
    %71 = vector.broadcast %c0_i32 : i32 to vector<1x18x1xi32>
    %72 = arith.cmpi sge, %67, %71 : vector<1x18x1xi32>
    %c32_i32 = arith.constant 32 : i32
    %73 = vector.broadcast %c32_i32 : i32 to vector<1x18x1xi32>
    %74 = arith.cmpi slt, %67, %73 : vector<1x18x1xi32>
    %75 = arith.andi %72, %74 : vector<1x18x1xi1>
    %c0_i32_14 = arith.constant 0 : i32
    %76 = vector.broadcast %c0_i32_14 : i32 to vector<1x1x34xi32>
    %77 = arith.cmpi sge, %70, %76 : vector<1x1x34xi32>
    %78 = vector.broadcast %75 : vector<1x18x1xi1> to vector<1x18x34xi1>
    %79 = vector.broadcast %77 : vector<1x1x34xi1> to vector<1x18x34xi1>
    %80 = arith.andi %78, %79 : vector<1x18x34xi1>
    %c32_i32_15 = arith.constant 32 : i32
    %81 = vector.broadcast %c32_i32_15 : i32 to vector<1x1x34xi32>
    %82 = arith.cmpi slt, %70, %81 : vector<1x1x34xi32>
    %83 = vector.broadcast %82 : vector<1x1x34xi1> to vector<1x18x34xi1>
    %84 = arith.andi %80, %83 : vector<1x18x34xi1>
    %cst_16 = arith.constant 0.000000e+00 : f32
    %85 = vector.shape_cast %84 : vector<1x18x34xi1> to vector<1x18x34xi1>
    %86 = vector.broadcast %85 : vector<1x18x34xi1> to vector<4x18x34xi1>
    %87 = vector.broadcast %cst_16 : f32 to vector<4x18x34xf32>
    %88 = arith.select %86, %62, %87 : vector<4x18x34xi1>, vector<4x18x34xf32>
    %89 = vector.shape_cast %88 : vector<4x18x34xf32> to vector<4x18x17x2xf32>
    %90 = vector.extract_strided_slice %89 {offsets = [0, 0, 0, 0], sizes = [4, 18, 17, 1], strides = [1, 1, 1, 1]} : vector<4x18x17x2xf32> to vector<4x18x17x1xf32>
    %91 = vector.shape_cast %90 : vector<4x18x17x1xf32> to vector<4x18x17xf32>
    %92 = vector.shape_cast %91 : vector<4x18x17xf32> to vector<4x9x2x17xf32>
    %93 = vector.extract_strided_slice %92 {offsets = [0, 0, 0, 0], sizes = [4, 9, 1, 17], strides = [1, 1, 1, 1]} : vector<4x9x2x17xf32> to vector<4x9x1x17xf32>
    %94 = vector.shape_cast %93 : vector<4x9x1x17xf32> to vector<4x9x17xf32>
    %95 = arith.truncf %94 : vector<4x9x17xf32> to vector<4x9x17xbf16>
    %c0_17 = arith.constant 0 : index
    %c0_18 = arith.constant 0 : index
    %c0_19 = arith.constant 0 : index
    %96 = vector.load %arg7[%c0_17, %c0_18, %c0_19] : memref<16x9x17xbf16, #tpu.memory_space<vmem>>, vector<4x9x17xbf16>
    tpu.vector_store %arg7[%c0_17, %c0_18, %c0_19], %95 {strides = array<i32>} : memref<16x9x17xbf16, #tpu.memory_space<vmem>>, vector<4x9x17xbf16>,
    %97 = vector.extract_strided_slice %92 {offsets = [0, 0, 1, 0], sizes = [4, 9, 1, 17], strides = [1, 1, 1, 1]} : vector<4x9x2x17xf32> to vector<4x9x1x17xf32>
    %98 = vector.shape_cast %97 : vector<4x9x1x17xf32> to vector<4x9x17xf32>
    %99 = arith.truncf %98 : vector<4x9x17xf32> to vector<4x9x17xbf16>
    %c8_20 = arith.constant 8 : index
    %c0_21 = arith.constant 0 : index
    %c0_22 = arith.constant 0 : index
    %100 = vector.load %arg7[%c8_20, %c0_21, %c0_22] : memref<16x9x17xbf16, #tpu.memory_space<vmem>>, vector<4x9x17xbf16>
    tpu.vector_store %arg7[%c8_20, %c0_21, %c0_22], %99 {strides = array<i32>} : memref<16x9x17xbf16, #tpu.memory_space<vmem>>, vector<4x9x17xbf16>,
    %101 = vector.extract_strided_slice %89 {offsets = [0, 0, 0, 1], sizes = [4, 18, 17, 1], strides = [1, 1, 1, 1]} : vector<4x18x17x2xf32> to vector<4x18x17x1xf32>
    %102 = vector.shape_cast %101 : vector<4x18x17x1xf32> to vector<4x18x17xf32>
    %103 = vector.shape_cast %102 : vector<4x18x17xf32> to vector<4x9x2x17xf32>
    %104 = vector.extract_strided_slice %103 {offsets = [0, 0, 0, 0], sizes = [4, 9, 1, 17], strides = [1, 1, 1, 1]} : vector<4x9x2x17xf32> to vector<4x9x1x17xf32>
    %105 = vector.shape_cast %104 : vector<4x9x1x17xf32> to vector<4x9x17xf32>
    %106 = arith.truncf %105 : vector<4x9x17xf32> to vector<4x9x17xbf16>
    %c4_23 = arith.constant 4 : index
    %c0_24 = arith.constant 0 : index
    %c0_25 = arith.constant 0 : index
    %107 = vector.load %arg7[%c4_23, %c0_24, %c0_25] : memref<16x9x17xbf16, #tpu.memory_space<vmem>>, vector<4x9x17xbf16>
    tpu.vector_store %arg7[%c4_23, %c0_24, %c0_25], %106 {strides = array<i32>} : memref<16x9x17xbf16, #tpu.memory_space<vmem>>, vector<4x9x17xbf16>,
    %108 = vector.extract_strided_slice %103 {offsets = [0, 0, 1, 0], sizes = [4, 9, 1, 17], strides = [1, 1, 1, 1]} : vector<4x9x2x17xf32> to vector<4x9x1x17xf32>
    %109 = vector.shape_cast %108 : vector<4x9x1x17xf32> to vector<4x9x17xf32>
    %110 = arith.truncf %109 : vector<4x9x17xf32> to vector<4x9x17xbf16>
    %c12 = arith.constant 12 : index
    %c0_26 = arith.constant 0 : index
    %c0_27 = arith.constant 0 : index
    %111 = vector.load %arg7[%c12, %c0_26, %c0_27] : memref<16x9x17xbf16, #tpu.memory_space<vmem>>, vector<4x9x17xbf16>
    tpu.vector_store %arg7[%c12, %c0_26, %c0_27], %110 {strides = array<i32>} : memref<16x9x17xbf16, #tpu.memory_space<vmem>>, vector<4x9x17xbf16>,
    %c0_28 = arith.constant 0 : index
    %c0_29 = arith.constant 0 : index
    %c0_30 = arith.constant 0 : index
    %112 = vector.load %arg7[%c0_28, %c0_29, %c0_30] : memref<16x9x17xbf16, #tpu.memory_space<vmem>>, vector<4x8x16xbf16>
    %113 = vector.shape_cast %112 : vector<4x8x16xbf16> to vector<4x128xbf16>
    %c0_31 = arith.constant 0 : index
    %c0_32 = arith.constant 0 : index
    %114 = vector.load %arg8[%c0_31, %c0_32] : memref<64x128xbf16, #tpu.memory_space<vmem>>, vector<4x128xbf16>
    tpu.vector_store %arg8[%c0_31, %c0_32], %113 {strides = array<i32>} : memref<64x128xbf16, #tpu.memory_space<vmem>>, vector<4x128xbf16>,
    %c4_33 = arith.constant 4 : index
    %c0_34 = arith.constant 0 : index
    %c0_35 = arith.constant 0 : index
    %115 = vector.load %arg7[%c4_33, %c0_34, %c0_35] : memref<16x9x17xbf16, #tpu.memory_space<vmem>>, vector<4x8x16xbf16>
    %116 = vector.shape_cast %115 : vector<4x8x16xbf16> to vector<4x128xbf16>
    %c4_36 = arith.constant 4 : index
    %c0_37 = arith.constant 0 : index
    %117 = vector.load %arg8[%c4_36, %c0_37] : memref<64x128xbf16, #tpu.memory_space<vmem>>, vector<4x128xbf16>
    tpu.vector_store %arg8[%c4_36, %c0_37], %116 {strides = array<i32>} : memref<64x128xbf16, #tpu.memory_space<vmem>>, vector<4x128xbf16>,
    %c0_38 = arith.constant 0 : index
    %c0_39 = arith.constant 0 : index
    %c1_40 = arith.constant 1 : index
    %118 = vector.load %arg7[%c0_38, %c0_39, %c1_40] : memref<16x9x17xbf16, #tpu.memory_space<vmem>>, vector<4x8x16xbf16>
    %119 = vector.shape_cast %118 : vector<4x8x16xbf16> to vector<4x128xbf16>
    %c8_41 = arith.constant 8 : index
    %c0_42 = arith.constant 0 : index
    %120 = vector.load %arg8[%c8_41, %c0_42] : memref<64x128xbf16, #tpu.memory_space<vmem>>, vector<4x128xbf16>
    tpu.vector_store %arg8[%c8_41, %c0_42], %119 {strides = array<i32>} : memref<64x128xbf16, #tpu.memory_space<vmem>>, vector<4x128xbf16>,
    %c4_43 = arith.constant 4 : index
    %c0_44 = arith.constant 0 : index
    %c1_45 = arith.constant 1 : index
    %121 = vector.load %arg7[%c4_43, %c0_44, %c1_45] : memref<16x9x17xbf16, #tpu.memory_space<vmem>>, vector<4x8x16xbf16>
    %122 = vector.shape_cast %121 : vector<4x8x16xbf16> to vector<4x128xbf16>
    %c12_46 = arith.constant 12 : index
    %c0_47 = arith.constant 0 : index
    %123 = vector.load %arg8[%c12_46, %c0_47] : memref<64x128xbf16, #tpu.memory_space<vmem>>, vector<4x128xbf16>
    tpu.vector_store %arg8[%c12_46, %c0_47], %122 {strides = array<i32>} : memref<64x128xbf16, #tpu.memory_space<vmem>>, vector<4x128xbf16>,
    %c8_48 = arith.constant 8 : index
    %c0_49 = arith.constant 0 : index
    %c0_50 = arith.constant 0 : index
    %124 = vector.load %arg7[%c8_48, %c0_49, %c0_50] : memref<16x9x17xbf16, #tpu.memory_space<vmem>>, vector<4x8x16xbf16>
    %125 = vector.shape_cast %124 : vector<4x8x16xbf16> to vector<4x128xbf16>
    %c16 = arith.constant 16 : index
    %c0_51 = arith.constant 0 : index
    %126 = vector.load %arg8[%c16, %c0_51] : memref<64x128xbf16, #tpu.memory_space<vmem>>, vector<4x128xbf16>
    tpu.vector_store %arg8[%c16, %c0_51], %125 {strides = array<i32>} : memref<64x128xbf16, #tpu.memory_space<vmem>>, vector<4x128xbf16>,
    %c12_52 = arith.constant 12 : index
    %c0_53 = arith.constant 0 : index
    %c0_54 = arith.constant 0 : index
    %127 = vector.load %arg7[%c12_52, %c0_53, %c0_54] : memref<16x9x17xbf16, #tpu.memory_space<vmem>>, vector<4x8x16xbf16>
    %128 = vector.shape_cast %127 : vector<4x8x16xbf16> to vector<4x128xbf16>
    %c20 = arith.constant 20 : index
    %c0_55 = arith.constant 0 : index
    %129 = vector.load %arg8[%c20, %c0_55] : memref<64x128xbf16, #tpu.memory_space<vmem>>, vector<4x128xbf16>
    tpu.vector_store %arg8[%c20, %c0_55], %128 {strides = array<i32>} : memref<64x128xbf16, #tpu.memory_space<vmem>>, vector<4x128xbf16>,
    %c8_56 = arith.constant 8 : index
    %c0_57 = arith.constant 0 : index
    %c1_58 = arith.constant 1 : index
    %130 = vector.load %arg7[%c8_56, %c0_57, %c1_58] : memref<16x9x17xbf16, #tpu.memory_space<vmem>>, vector<4x8x16xbf16>
    %131 = vector.shape_cast %130 : vector<4x8x16xbf16> to vector<4x128xbf16>
    %c24 = arith.constant 24 : index
    %c0_59 = arith.constant 0 : index
    %132 = vector.load %arg8[%c24, %c0_59] : memref<64x128xbf16, #tpu.memory_space<vmem>>, vector<4x128xbf16>
    tpu.vector_store %arg8[%c24, %c0_59], %131 {strides = array<i32>} : memref<64x128xbf16, #tpu.memory_space<vmem>>, vector<4x128xbf16>,
    %c12_60 = arith.constant 12 : index
    %c0_61 = arith.constant 0 : index
    %c1_62 = arith.constant 1 : index
    %133 = vector.load %arg7[%c12_60, %c0_61, %c1_62] : memref<16x9x17xbf16, #tpu.memory_space<vmem>>, vector<4x8x16xbf16>
    %134 = vector.shape_cast %133 : vector<4x8x16xbf16> to vector<4x128xbf16>
    %c28 = arith.constant 28 : index
    %c0_63 = arith.constant 0 : index
    %135 = vector.load %arg8[%c28, %c0_63] : memref<64x128xbf16, #tpu.memory_space<vmem>>, vector<4x128xbf16>
    tpu.vector_store %arg8[%c28, %c0_63], %134 {strides = array<i32>} : memref<64x128xbf16, #tpu.memory_space<vmem>>, vector<4x128xbf16>,
    %c0_64 = arith.constant 0 : index
    %c1_65 = arith.constant 1 : index
    %c0_66 = arith.constant 0 : index
    %136 = vector.load %arg7[%c0_64, %c1_65, %c0_66] : memref<16x9x17xbf16, #tpu.memory_space<vmem>>, vector<4x8x16xbf16>
    %137 = vector.shape_cast %136 : vector<4x8x16xbf16> to vector<4x128xbf16>
    %c32 = arith.constant 32 : index
    %c0_67 = arith.constant 0 : index
    %138 = vector.load %arg8[%c32, %c0_67] : memref<64x128xbf16, #tpu.memory_space<vmem>>, vector<4x128xbf16>
    tpu.vector_store %arg8[%c32, %c0_67], %137 {strides = array<i32>} : memref<64x128xbf16, #tpu.memory_space<vmem>>, vector<4x128xbf16>,
    %c4_68 = arith.constant 4 : index
    %c1_69 = arith.constant 1 : index
    %c0_70 = arith.constant 0 : index
    %139 = vector.load %arg7[%c4_68, %c1_69, %c0_70] : memref<16x9x17xbf16, #tpu.memory_space<vmem>>, vector<4x8x16xbf16>
    %140 = vector.shape_cast %139 : vector<4x8x16xbf16> to vector<4x128xbf16>
    %c36 = arith.constant 36 : index
    %c0_71 = arith.constant 0 : index
    %141 = vector.load %arg8[%c36, %c0_71] : memref<64x128xbf16, #tpu.memory_space<vmem>>, vector<4x128xbf16>
    tpu.vector_store %arg8[%c36, %c0_71], %140 {strides = array<i32>} : memref<64x128xbf16, #tpu.memory_space<vmem>>, vector<4x128xbf16>,
    %c0_72 = arith.constant 0 : index
    %c1_73 = arith.constant 1 : index
    %c1_74 = arith.constant 1 : index
    %142 = vector.load %arg7[%c0_72, %c1_73, %c1_74] : memref<16x9x17xbf16, #tpu.memory_space<vmem>>, vector<4x8x16xbf16>
    %143 = vector.shape_cast %142 : vector<4x8x16xbf16> to vector<4x128xbf16>
    %c40 = arith.constant 40 : index
    %c0_75 = arith.constant 0 : index
    %144 = vector.load %arg8[%c40, %c0_75] : memref<64x128xbf16, #tpu.memory_space<vmem>>, vector<4x128xbf16>
    tpu.vector_store %arg8[%c40, %c0_75], %143 {strides = array<i32>} : memref<64x128xbf16, #tpu.memory_space<vmem>>, vector<4x128xbf16>,
    %c4_76 = arith.constant 4 : index
    %c1_77 = arith.constant 1 : index
    %c1_78 = arith.constant 1 : index
    %145 = vector.load %arg7[%c4_76, %c1_77, %c1_78] : memref<16x9x17xbf16, #tpu.memory_space<vmem>>, vector<4x8x16xbf16>
    %146 = vector.shape_cast %145 : vector<4x8x16xbf16> to vector<4x128xbf16>
    %c44 = arith.constant 44 : index
    %c0_79 = arith.constant 0 : index
    %147 = vector.load %arg8[%c44, %c0_79] : memref<64x128xbf16, #tpu.memory_space<vmem>>, vector<4x128xbf16>
    tpu.vector_store %arg8[%c44, %c0_79], %146 {strides = array<i32>} : memref<64x128xbf16, #tpu.memory_space<vmem>>, vector<4x128xbf16>,
    %c8_80 = arith.constant 8 : index
    %c1_81 = arith.constant 1 : index
    %c0_82 = arith.constant 0 : index
    %148 = vector.load %arg7[%c8_80, %c1_81, %c0_82] : memref<16x9x17xbf16, #tpu.memory_space<vmem>>, vector<4x8x16xbf16>
    %149 = vector.shape_cast %148 : vector<4x8x16xbf16> to vector<4x128xbf16>
    %c48 = arith.constant 48 : index
    %c0_83 = arith.constant 0 : index
    %150 = vector.load %arg8[%c48, %c0_83] : memref<64x128xbf16, #tpu.memory_space<vmem>>, vector<4x128xbf16>
    tpu.vector_store %arg8[%c48, %c0_83], %149 {strides = array<i32>} : memref<64x128xbf16, #tpu.memory_space<vmem>>, vector<4x128xbf16>,
    %c12_84 = arith.constant 12 : index
    %c1_85 = arith.constant 1 : index
    %c0_86 = arith.constant 0 : index
    %151 = vector.load %arg7[%c12_84, %c1_85, %c0_86] : memref<16x9x17xbf16, #tpu.memory_space<vmem>>, vector<4x8x16xbf16>
    %152 = vector.shape_cast %151 : vector<4x8x16xbf16> to vector<4x128xbf16>
    %c52 = arith.constant 52 : index
    %c0_87 = arith.constant 0 : index
    %153 = vector.load %arg8[%c52, %c0_87] : memref<64x128xbf16, #tpu.memory_space<vmem>>, vector<4x128xbf16>
    tpu.vector_store %arg8[%c52, %c0_87], %152 {strides = array<i32>} : memref<64x128xbf16, #tpu.memory_space<vmem>>, vector<4x128xbf16>,
    %c8_88 = arith.constant 8 : index
    %c1_89 = arith.constant 1 : index
    %c1_90 = arith.constant 1 : index
    %154 = vector.load %arg7[%c8_88, %c1_89, %c1_90] : memref<16x9x17xbf16, #tpu.memory_space<vmem>>, vector<4x8x16xbf16>
    %155 = vector.shape_cast %154 : vector<4x8x16xbf16> to vector<4x128xbf16>
    %c56 = arith.constant 56 : index
    %c0_91 = arith.constant 0 : index
    %156 = vector.load %arg8[%c56, %c0_91] : memref<64x128xbf16, #tpu.memory_space<vmem>>, vector<4x128xbf16>
    tpu.vector_store %arg8[%c56, %c0_91], %155 {strides = array<i32>} : memref<64x128xbf16, #tpu.memory_space<vmem>>, vector<4x128xbf16>,
    %c12_92 = arith.constant 12 : index
    %c1_93 = arith.constant 1 : index
    %c1_94 = arith.constant 1 : index
    %157 = vector.load %arg7[%c12_92, %c1_93, %c1_94] : memref<16x9x17xbf16, #tpu.memory_space<vmem>>, vector<4x8x16xbf16>
    %158 = vector.shape_cast %157 : vector<4x8x16xbf16> to vector<4x128xbf16>
    %c60 = arith.constant 60 : index
    %c0_95 = arith.constant 0 : index
    %159 = vector.load %arg8[%c60, %c0_95] : memref<64x128xbf16, #tpu.memory_space<vmem>>, vector<4x128xbf16>
    tpu.vector_store %arg8[%c60, %c0_95], %158 {strides = array<i32>} : memref<64x128xbf16, #tpu.memory_space<vmem>>, vector<4x128xbf16>,
    %c0_96 = arith.constant 0 : index
    %c0_97 = arith.constant 0 : index
    %160 = vector.load %arg4[%c0_96, %c0_97] : memref<128x64xbf16, #tpu.memory_space<vmem>>, vector<128x64xbf16>
    %c0_98 = arith.constant 0 : index
    %c0_99 = arith.constant 0 : index
    %161 = vector.load %arg8[%c0_98, %c0_99] : memref<64x128xbf16, #tpu.memory_space<vmem>>, vector<64x128xbf16>
    %cst_100 = arith.constant dense<0.000000e+00> : vector<128x128xf32>
    %162 = tpu.matmul %160, %161, %cst_100 {dimension_numbers = #tpu.dot_dimension_numbers<[1], [0], [0], [1], [0, 0, 1, 1], [], []>} : vector<128x64xbf16>, vector<64x128xbf16>, vector<128x128xf32> -> vector<128x128xf32>
    %c0_101 = arith.constant 0 : index
    %c0_102 = arith.constant 0 : index
    %163 = vector.load %arg5[%c0_101, %c0_102] : memref<128x1xf32, #tpu.memory_space<vmem>>, vector<128x1xf32>
    %164 = vector.broadcast %163 : vector<128x1xf32> to vector<128x128xf32>
    %165 = arith.addf %162, %164 : vector<128x128xf32>
    %c0_103 = arith.constant 0 : index
    %c0_104 = arith.constant 0 : index
    %c0_105 = arith.constant 0 : index
    %166 = vector.load %arg6[%c0_103, %c0_104, %c0_105] : memref<1x128x128xf32, #tpu.memory_space<vmem>>, vector<1x128x128xf32>
    %167 = vector.shape_cast %166 : vector<1x128x128xf32> to vector<128x128xf32>
    %168 = vector.shape_cast %165 : vector<128x128xf32> to vector<1x128x128xf32>
    tpu.vector_store %arg6[%c0_103, %c0_104, %c0_105], %168 {strides = array<i32>} : memref<1x128x128xf32, #tpu.memory_space<vmem>>, vector<1x128x128xf32>,
    return
  }
  func.func @transform_0(%arg0: i32, %arg1: i32) -> (i32, i32, i32, i32) {
    %c0_i32 = arith.constant 0 : i32
    %c0_i32_0 = arith.constant 0 : i32
    %c0_i32_1 = arith.constant 0 : i32
    %c0_i32_2 = arith.constant 0 : i32
    return %arg0, %c0_i32, %c0_i32_0, %c0_i32_1 : i32, i32, i32, i32
  }
  func.func @transform_1(%arg0: i32, %arg1: i32) -> (i32, i32) {
    %c0_i32 = arith.constant 0 : i32
    %c0_i32_0 = arith.constant 0 : i32
    %c0_i32_1 = arith.constant 0 : i32
    return %c0_i32, %c0_i32_0 : i32, i32
  }
  func.func @transform_2(%arg0: i32, %arg1: i32) -> (i32, i32) {
    %c0_i32 = arith.constant 0 : i32
    %c0_i32_0 = arith.constant 0 : i32
    %c0_i32_1 = arith.constant 0 : i32
    return %c0_i32, %c0_i32_0 : i32, i32
  }
  func.func @transform_3(%arg0: i32, %arg1: i32) -> (i32, i32) {
    %c0_i32 = arith.constant 0 : i32
    %c0_i32_0 = arith.constant 0 : i32
    %c0_i32_1 = arith.constant 0 : i32
    return %c0_i32, %c0_i32_0 : i32, i32
  }
  func.func @transform_4(%arg0: i32, %arg1: i32) -> (i32, i32, i32) {
    %c0_i32 = arith.constant 0 : i32
    %c0_i32_0 = arith.constant 0 : i32
    return %arg0, %c0_i32, %arg1 : i32, i32, i32
  }
}

</mosaic_0001>

<bundles_post_ra>
// kernel: tpu_custom_call.1
= control target key start
LH: loop header
LB: loop body
LE: loop exit
PB: predicated region body
PF: predicated region fallthrough
CT: control target
= control target key end

     0   :  { %9 = vsyncpa [#allocation5], 0  ;;  %s21538_s0 = inlined_call_operand.vmem [shape: f32[2,4,36,36], index: 0, kind: input, shape index: {}]   ;;  %s21539_s1 = inlined_call_operand.vmem [shape: f32[4,9], index: 1, kind: input, shape index: {}]   ;;  %s21540_s2 = inlined_call_operand.vmem [shape: bf16[128,64], index: 2, kind: input, shape index: {}]   ;;  %s21541_s3 = inlined_call_operand.vmem [shape: f32[128,1], index: 3, kind: input, shape index: {}]   ;;  %s21542_s4 = inlined_call_operand.hbm [shape: f32[2,128,256], index: 4, kind: output, shape index: {}]  }
   0x1   :  { %11 = vsyncpa [#allocation5 + $0x1], 0  ;;  %s13721_s15 = smov 0   ;;  %s13723_s16 = smov 0  }
   0x2   :  { %s13725_s17 = smov 0   ;;  %s13727_s18 = smov 0  }
   0x3   :  { %s13729_s19 = smov 0   ;;  %s13731_s20 = smov 0  }
   0x4   :  { %s13733_s21 = smov 0   ;;  %s13735_s22 = smov 0  }
   0x5 LB: > { %s12727_s23 = sadd.s32 4294967295, %s13655_s22   ;;  %s12728_s24 = sadd.s32 4294967294, %s13655_s22   ;;  %s13655_s22 = sphi %s13735_s22, %s17_s22   ;;  %s13651_s21 = sphi %s13733_s21, %s23346_s21   ;;  %s13647_s20 = sphi %s13731_s20, %s23345_s20   ;;  %s13643_s19 = sphi %s13729_s19, %s23344_s19   ;;  %s13639_s18 = sphi %s13727_s18, %s23343_s18   ;;  %s13635_s17 = sphi %s13725_s17, %s23342_s17   ;;  %s13631_s16 = sphi %s13723_s16, %s23341_s16   ;;  %s13627_s15 = sphi %s13721_s15, %s23340_s15  }
   0x6   : > { %s26_s25 = sadd.s32 1, %s13647_s20  ;;  %s29_s26 = sadd.s32 1, %s13651_s21 }
   0x7   : > { %p27_p0 = scmp.ge.s32.totalorder %s26_s25, 2  ;;  %p137_p1 = scmp.ne.s32.totalorder %s13635_s17, %s13631_s16 }
   0x8   : > { %p138_p2 = scmp.eq.s32.totalorder %s12727_s23, 3  ;;  %p143_p5 = scmp.ne.s32.totalorder %s13631_s16, %s13627_s15 }
   0x9   : > { %s23348_s25 = smov (%p27_p0, %s26_s25), 0  ;;  %s23350_s26 = smov (!%p27_p0, %s29_s26), %s13651_s21 }
   0xa   : > { %s123_s27 = ssub.s32 %s13647_s20, %s23348_s25  ;;  %p13772_p3 = por %p138_p2, %p137_p1 }
   0xb   : > { %p31_p4 = scmp.ge.s32.totalorder %s23350_s26, 2  ;;  %p144_p6 = scmp.eq.s32.totalorder %s12728_s24, 3 }
   0xc   : > { %p12731_p7 = scmp.ge.s32.totalorder %s13655_s22, 1  ;;  %p179_p9 = scmp.lt.s32.totalorder %s13655_s22, 5 }
   0xd   : > { %s23352_s26 = smov (%p31_p4, %s23350_s26), 0  ;;  %p13781_p8 = por %p144_p6, %p143_p5 }
   0xe   : > { %s122_s30 = ssub.s32 %s13651_s21, %s23352_s26  ;;  %s127_s5 = sadd.s32 1, %s13635_s17 }
   0xf   : > { %s124_s6 = sor.u32 %s123_s27, %s122_s30  ;;  %p180_p10 = pnand %p12731_p7, %p179_p9 }
  0x10   : > { %p125_p11 = scmp.eq.s32.totalorder %s124_s6, 0 }
  0x11   : > { %183 = sbr.rel (%p180_p10) target bundleno = 2863 (0xb2f), region = 36 }
  0x12   : > { %s13790_s7 = scalar_select %p125_p11, %s13635_s17, %s127_s5  }
  0x18   : > { %v21543_v0 = vlaneseq  ;;  %v21546_v1 = vmov 1   ;;  %v21544_v2 = vmov 0   ;;  %v13659_v3 = vmov 1966171168   ;;  %p205_p12 = scmp.lt.s32.totalorder %s13643_s19, 1  ;;  %s12734_s23 = sshll.u32 %s13639_s18, 4 }
  0x19   : > { %13531 = vset.pattern.permute.xlu1 %v21546_v1  ;;  %13529 = vset.pattern.permute.xlu0 %v21544_v2  ;;  %v236_v4 = vunpack.c.l.s4 %v13659_v3  ;;  %v12736_v5 = vld.sshfl [vmem:[%s21539_s1] sm:$0x33 pattern:$0x75316420]  ;;  %v13660_v19 = vmov 2   ;;  %v13661_v20 = vmov 3  }
  0x1a   : > { %v13798_v6 = vshrl.u32 %v21543_v0, 7  ;;  %v316_v8 = vcombine.high %v12736_v5, %v12736_v5  ;;  %v13662_v21 = vmov 4   ;;  %v13663_v22 = vmov 5   ;;  %s206_s10 = scalar_select %p205_p12, %s13643_s19, 1 }
  0x1b   : > { %v237_v7 = vunpack.c.0.s8 %v236_v4  ;;  %v13664_v23 = vmov 6   ;;  %s13665_s27 = smov 127   ;;  %s13666_s30 = smov 126   ;;  %vm649_vm0 = vcmask 1046528   ;;  %vm1076_vm1 = vcmask 1045504  }
  0x1c   : > { %21920 = vst [vmem:[#allocation7_spill] sm:$0xff] %v13798_v6  ;;  %v13801_v9 = vsub.s32 0, %v13798_v6  ;;  %s13419_s11 = smul.u32 160, %s206_s10  ;;  %s12744_s8 = sadd.s32 4294967295, %s12734_s23 }
  0x1d   : > { %v13804_v10 = vsub.s32 %v237_v7, %v13798_v6  ;;  %s13669_s9 = smov 124   ;;  %s13670_s10 = smov 122  }
  0x1e   : > { %s209_s14 = scalar_lea.vmem %s21538_s0, %s13419_s11  ;;  %s13671_s11 = smov 120  }
  0x1f   : > { %v330_v11 = vrot.slane %v316_v8, %v13804_v10  ;;  %v241_v12 = vrot.slane %v12736_v5, %v13804_v10  ;;  %s13861_s24 = scalar_lea.vmem %s209_s14, %s12734_s23  ;;  %s13672_s12 = smov 118  }
  0x20   : > { %v13864_v29 = vld [vmem:[%s13861_s24 + $0x8] sm:$0xff]  ;;  %v13867_v30 = vld [vmem:[%s13861_s24] sm:$0xff]  ;;  %v13879_v35 = vld [vmem:[%s13861_s24 + $0x10] sm:$0xf]  ;;  %s13673_s13 = smov 116   ;;  %s13674_s14 = smov 114  }
  0x21   : > { %v13809_v13 = vrot.slane %v330_v11, %v13801_v9  ;;  %v13812_v14 = vrot.slane %v241_v12, %v13801_v9  ;;  %v249_v15 = vcombine.high %v241_v12, %v241_v12  ;;  %v332_v16 = vcombine.high %v330_v11, %v330_v11  ;;  %v13874_v34 = vld [vmem:[%s13861_s24 + $0x28] sm:$0xff]  ;;  %v13884_v39 = vld [vmem:[%s13861_s24 + $0x38] sm:$0xf]  ;;  %v13887_v40 = vld [vmem:[%s13861_s24 + $0x30] sm:$0xff]  ;;  %s13676_s23 = smov 112   ;;  %s13679_s5 = smov 106  }
  0x22   : > { %v13910_v55 = vld [vmem:[%s13861_s24 + $0x58] sm:$0xff]  ;;  %v13913_v56 = vld [vmem:[%s13861_s24 + $0x50] sm:$0xff]  ;;  %v13922_v60 = vld [vmem:[%s13861_s24 + $0x60] sm:$0xf]  ;;  %s13681_s6 = smov 104  }
  0x23   : > { %354 = vperm.xlu1 %13531, %v13809_v13   ;;  %268 = vperm.xlu0 %13529, %v13812_v14   ;;  %v13817_v17 = vrot.slane %v249_v15, %v13801_v9  ;;  %v13823_v18 = vrot.slane %v332_v16, %v13801_v9  ;;  %v13925_v61 = vld [vmem:[%s13861_s24 + $0x78] sm:$0xff]  ;;  %v13934_v5 = vld [vmem:[%s13861_s24 + $0x88] sm:$0xf]  ;;  %v13937_v7 = vld [vmem:[%s13861_s24 + $0x80] sm:$0xff]  ;;  %s13677_s24 = smov 110  }
  0x27   : > { %13532 = vset.pattern.permute.xlu1 %v21544_v2  ;;  %272 = vperm.xlu0 %13529, %v13809_v13  }
  0x28   : > { %276 = vperm.xlu1 %13532, %v13817_v17  }
  0x2b   : > { %13530 = vset.pattern.permute.xlu0 %v21546_v1 }
  0x2c   : > { %350 = vperm.xlu0 %13530, %v13812_v14   ;;  %280 = vperm.xlu1 %13532, %v13823_v18  }
  0x30   : > { %362 = vperm.xlu0 %13530, %v13823_v18   ;;  %13533 = vset.pattern.permute.xlu1 %v21546_v1 }
  0x31   : > { %358 = vperm.xlu1 %13533, %v13817_v17  }
  0x34   : > { %13535 = vset.pattern.permute.xlu0 %v13660_v19 }
  0x35   : > { %13534 = vset.pattern.permute.xlu1 %v13660_v19  ;;  %484 = vperm.xlu0 %13535, %v13809_v13  }
  0x36   : > { %480 = vperm.xlu1 %13534, %v13812_v14  }
  0x39   : > { %13536 = vset.pattern.permute.xlu0 %v13661_v20 }
  0x3a   : > { %488 = vperm.xlu1 %13534, %v13817_v17   ;;  %610 = vperm.xlu0 %13536, %v13812_v14  }
  0x3e   : > { %492 = vperm.xlu1 %13534, %v13823_v18   ;;  %622 = vperm.xlu0 %13536, %v13823_v18  }
  0x42   : > { %13537 = vset.pattern.permute.xlu1 %v13661_v20  ;;  %13539 = vset.pattern.permute.xlu0 %v13662_v21 }
  0x43   : > { %614 = vperm.xlu1 %13537, %v13809_v13   ;;  %741 = vperm.xlu0 %13539, %v13809_v13  }
  0x47   : > { %618 = vperm.xlu1 %13537, %v13817_v17   ;;  %13540 = vset.pattern.permute.xlu0 %v13663_v22 }
  0x48   : > { %887 = vperm.xlu0 %13540, %v13812_v14  }
  0x4b   : > { %13538 = vset.pattern.permute.xlu1 %v13662_v21 }
  0x4c   : > { %737 = vperm.xlu1 %13538, %v13812_v14   ;;  %899 = vperm.xlu0 %13540, %v13823_v18  }
  0x50   : > { %745 = vperm.xlu1 %13538, %v13817_v17   ;;  %13543 = vset.pattern.permute.xlu0 %v13664_v23 }
  0x54   : > { %749 = vperm.xlu1 %13538, %v13823_v18  }
  0x58   : > { %13541 = vset.pattern.permute.xlu1 %v13663_v22 }
  0x59   : > { %891 = vperm.xlu1 %13541, %v13809_v13  }
  0x5d   : > { %895 = vperm.xlu1 %13541, %v13817_v17  }
  0x61   : > { %13542 = vset.pattern.permute.xlu1 %v13664_v23 }
  0xa2   : > { %v13849_v24 = vpop.permute.xlu0 %268  ;;  %v355_v25 = vpop.permute.xlu1 %354 }
  0xa3   : > { %v368_v37 = vmul.f32 %v355_v25, %v13874_v34  ;;  %v370_v42 = vmul.f32 %v355_v25, %v13884_v39  ;;  %v369_v43 = vmul.f32 %v355_v25, %v13887_v40 }
  0xa6   : > { %v13855_v26 = vpop.permute.xlu0 %272 }
  0xa7   : > { %v13857_v27 = vpop.permute.xlu1 %276 }
  0xab   : > { %v351_v28 = vpop.permute.xlu0 %350  ;;  %v13869_v31 = vpop.permute.xlu1 %280 }
  0xac   : > { %v366_v32 = vmul.f32 %v351_v28, %v13864_v29  ;;  %v365_v33 = vmul.f32 %v351_v28, %v13867_v30  ;;  %v367_v38 = vmul.f32 %v351_v28, %v13879_v35 }
  0xae   : > { %391 = vrot.lane.b32.xlu0 %v366_v32, %s13665_s27  ;;  %389 = vrot.lane.b32.xlu1 %v365_v33, %s13665_s27 }
  0xaf   : > { %v363_v41 = vpop.permute.xlu0 %362 }
  0xb0   : > { %v359_v36 = vpop.permute.xlu1 %358  ;;  %v374_v62 = vmul.f32 %v363_v41, %v13925_v61  ;;  %v376_v8 = vmul.f32 %v363_v41, %v13934_v5  ;;  %v375_v11 = vmul.f32 %v363_v41, %v13937_v7 }
  0xb1   : > { %v372_v57 = vmul.f32 %v359_v36, %v13910_v55  ;;  %v371_v58 = vmul.f32 %v359_v36, %v13913_v56  ;;  %v373_v63 = vmul.f32 %v359_v36, %v13922_v60 }
  0xb2   : > { %395 = vrot.lane.b32.xlu0 %v368_v37, %s13665_s27  ;;  %393 = vrot.lane.b32.xlu1 %v367_v38, %s13665_s27 }
  0xb4   : > { %v485_v47 = vpop.permute.xlu0 %484 }
  0xb5   : > { %v481_v44 = vpop.permute.xlu1 %480  ;;  %v498_v49 = vmul.f32 %v485_v47, %v13874_v34  ;;  %v499_v52 = vmul.f32 %v485_v47, %v13887_v40  ;;  %v500_v53 = vmul.f32 %v485_v47, %v13884_v39 }
  0xb6   : > { %399 = vrot.lane.b32.xlu0 %v370_v42, %s13665_s27  ;;  %397 = vrot.lane.b32.xlu1 %v369_v43, %s13665_s27  ;;  %v495_v45 = vmul.f32 %v481_v44, %v13867_v30  ;;  %v496_v46 = vmul.f32 %v481_v44, %v13864_v29  ;;  %v497_v50 = vmul.f32 %v481_v44, %v13879_v35 }
  0xb9   : > { %v489_v48 = vpop.permute.xlu1 %488  ;;  %v13929_v3 = vpop.permute.xlu0 %610 }
  0xba   : > { %519 = vrot.lane.b32.xlu0 %v495_v45, %s13666_s30  ;;  %521 = vrot.lane.b32.xlu1 %v496_v46, %s13666_s30  ;;  %v501_v16 = vmul.f32 %v489_v48, %v13913_v56  ;;  %v502_v19 = vmul.f32 %v489_v48, %v13910_v55  ;;  %v503_v21 = vmul.f32 %v489_v48, %v13922_v60 }
  0xbd   : > { %v493_v51 = vpop.permute.xlu1 %492  ;;  %v13943_v12 = vpop.permute.xlu0 %622 }
  0xbe   : > { %523 = vrot.lane.b32.xlu0 %v497_v50, %s13666_s30  ;;  %525 = vrot.lane.b32.xlu1 %v498_v49, %s13666_s30  ;;  %v504_v22 = vmul.f32 %v493_v51, %v13925_v61  ;;  %v505_v28 = vmul.f32 %v493_v51, %v13937_v7  ;;  %v506_v32 = vmul.f32 %v493_v51, %v13934_v5 }
  0xc2   : > { %527 = vrot.lane.b32.xlu0 %v499_v52, %s13666_s30  ;;  %529 = vrot.lane.b32.xlu1 %v500_v53, %s13666_s30  ;;  %v13907_v54 = vpop.permute.xlu1 %614  ;;  %v742_v20 = vpop.permute.xlu0 %741 }
  0xc3   : > { %v757_v25 = vmul.f32 %v742_v20, %v13884_v39  ;;  %v755_v48 = vmul.f32 %v742_v20, %v13874_v34  ;;  %v756_v49 = vmul.f32 %v742_v20, %v13887_v40 }
  0xc5   : > { %v784_v38 = vrot.slane %v757_v25, 1  ;;  %v782_v52 = vrot.slane %v756_v49, 1  ;;  %v781_v53 = vrot.slane %v755_v48, 1 }
  0xc6   : > { %403 = vrot.lane.b32.xlu0 %v372_v57, %s13665_s27  ;;  %401 = vrot.lane.b32.xlu1 %v371_v58, %s13665_s27  ;;  %v13919_v59 = vpop.permute.xlu1 %618 }
  0xc7   : > { %v888_v36 = vpop.permute.xlu0 %887 }
  0xc8   : > { %v904_v42 = vmul.f32 %v888_v36, %v13879_v35  ;;  %v902_v57 = vmul.f32 %v888_v36, %v13867_v30  ;;  %v903_v58 = vmul.f32 %v888_v36, %v13864_v29 }
  0xca   : > { %407 = vrot.lane.b32.xlu0 %v374_v62, %s13665_s27  ;;  %405 = vrot.lane.b32.xlu1 %v373_v63, %s13665_s27  ;;  %v929_v47 = vrot.slane %v904_v42, 1  ;;  %v926_v20 = vrot.slane %v902_v57, 1 }
  0xcb   : > { %v738_v4 = vpop.permute.xlu1 %737 }
  0xcc   : > { %v754_v33 = vmul.f32 %v738_v4, %v13879_v35  ;;  %v752_v44 = vmul.f32 %v738_v4, %v13867_v30  ;;  %v753_v45 = vmul.f32 %v738_v4, %v13864_v29  ;;  %v785_v4 = vsel %vm649_vm0, %v782_v52, %v784_v38 }
  0xce   : > { %411 = vrot.lane.b32.xlu0 %v376_v8, %s13665_s27  ;;  %409 = vrot.lane.b32.xlu1 %v375_v11, %s13665_s27  ;;  %v779_v43 = vrot.slane %v754_v33, 1  ;;  %v776_v50 = vrot.slane %v752_v44, 1  ;;  %v777_v51 = vrot.slane %v753_v45, 1  ;;  %v783_v8 = vsel %vm649_vm0, %v781_v53, %v782_v52 }
  0xcf   : > { %v746_v15 = vpop.permute.xlu1 %745 }
  0xd0   : > { %v778_v62 = vsel %vm649_vm0, %v776_v50, %v777_v51  ;;  %v780_v63 = vsel %vm649_vm0, %v777_v51, %v779_v43  ;;  %v758_v36 = vmul.f32 %v746_v15, %v13913_v56  ;;  %v900_v50 = vpop.permute.xlu0 %899 }
  0xd1   : > { %v911_v57 = vmul.f32 %v900_v50, %v13925_v61 }
  0xd2   : > { %531 = vrot.lane.b32.xlu0 %v501_v16, %s13666_s30  ;;  %533 = vrot.lane.b32.xlu1 %v502_v19, %s13666_s30  ;;  %v927_v19 = vrot.slane %v903_v58, 1  ;;  %v786_v48 = vrot.slane %v758_v36, 1  ;;  %v912_v58 = vmul.f32 %v900_v50, %v13937_v7  ;;  %v13667_v36 = vmov 7  }
  0xd3   : > { %v13951_v23 = vpop.permute.xlu1 %749 }
  0xd4   : > { %v763_v33 = vmul.f32 %v13951_v23, %v13934_v5 }
  0xd6   : > { %535 = vrot.lane.b32.xlu0 %v503_v21, %s13666_s30  ;;  %537 = vrot.lane.b32.xlu1 %v504_v22, %s13666_s30  ;;  %v930_v21 = vsel %vm649_vm0, %v927_v19, %v929_v47  ;;  %v928_v22 = vsel %vm649_vm0, %v926_v20, %v927_v19  ;;  %v794_v44 = vrot.slane %v763_v33, 1 }
  0xd8   : > { %v892_v37 = vpop.permute.xlu1 %891 }
  0xd9   : > { %v907_v41 = vmul.f32 %v892_v37, %v13884_v39  ;;  %v905_v11 = vmul.f32 %v892_v37, %v13874_v34  ;;  %v906_v16 = vmul.f32 %v892_v37, %v13887_v40  ;;  %v759_v37 = vmul.f32 %v746_v15, %v13910_v55 }
  0xda   : > { %539 = vrot.lane.b32.xlu0 %v505_v28, %s13666_s30  ;;  %541 = vrot.lane.b32.xlu1 %v506_v32, %s13666_s30  ;;  %v760_v32 = vmul.f32 %v746_v15, %v13922_v60 }
  0xdb   : > { %v934_v46 = vrot.slane %v907_v41, 1  ;;  %v931_v25 = vrot.slane %v905_v11, 1  ;;  %v932_v28 = vrot.slane %v906_v16, 1  ;;  %v787_v49 = vrot.slane %v759_v37, 1 }
  0xdc   : > { %v941_v11 = vrot.slane %v911_v57, 1  ;;  %v913_v16 = vmul.f32 %v900_v50, %v13934_v5 }
  0xdd   : > { %v933_v41 = vsel %vm649_vm0, %v931_v25, %v932_v28  ;;  %v935_v42 = vsel %vm649_vm0, %v932_v28, %v934_v46  ;;  %v788_v52 = vsel %vm649_vm0, %v786_v48, %v787_v49 }
  0xde   : > { %800 = vrot.lane.b32.xlu0 %v779_v43, %s13665_s27  ;;  %806 = vrot.lane.b32.xlu1 %v784_v38, %s13665_s27  ;;  %v896_v38 = vpop.permute.xlu1 %895  ;;  %v789_v43 = vrot.slane %v760_v32, 1  ;;  %v944_v32 = vrot.slane %v913_v16, 1 }
  0xdf   : > { %v910_v45 = vmul.f32 %v896_v38, %v13922_v60  ;;  %v909_v51 = vmul.f32 %v896_v38, %v13910_v55 }
  0xe1   : > { %v939_v15 = vrot.slane %v910_v45, 1  ;;  %v13668_v45 = vmov 8  }
  0xe2   : > { %956 = vrot.lane.b32.xlu0 %v934_v46, %s13666_s30  ;;  %950 = vrot.lane.b32.xlu1 %v929_v47, %s13666_s30  ;;  %v762_v47 = vmul.f32 %v13951_v23, %v13937_v7  ;;  %v761_v46 = vmul.f32 %v13951_v23, %v13925_v61 }
  0xe4   : > { %v792_v53 = vrot.slane %v762_v47, 1 }
  0xe6   : > { %796 = vrot.lane.b32.xlu0 %v778_v62, %s13665_s27  ;;  %798 = vrot.lane.b32.xlu1 %v780_v63, %s13665_s27  ;;  %v790_v62 = vsel %vm649_vm0, %v787_v49, %v789_v43  ;;  %v908_v63 = vmul.f32 %v896_v38, %v13913_v56  ;;  %v795_v23 = vsel %vm649_vm0, %v792_v53, %v794_v44 }
  0xea   : > { %804 = vrot.lane.b32.xlu0 %v785_v4, %s13665_s27  ;;  %802 = vrot.lane.b32.xlu1 %v783_v8, %s13665_s27  ;;  %v937_v4 = vrot.slane %v909_v51, 1  ;;  %v791_v8 = vrot.slane %v761_v46, 1 }
  0xec   : > { %v940_v19 = vsel %vm649_vm0, %v937_v4, %v939_v15  ;;  %v793_v20 = vsel %vm649_vm0, %v791_v8, %v792_v53 }
  0xee   : > { %948 = vrot.lane.b32.xlu0 %v930_v21, %s13666_s30  ;;  %946 = vrot.lane.b32.xlu1 %v928_v22, %s13666_s30  ;;  %v942_v21 = vrot.slane %v912_v58, 1  ;;  %v936_v22 = vrot.slane %v908_v63, 1 }
  0xf0   : > { %v943_v25 = vsel %vm649_vm0, %v941_v11, %v942_v21  ;;  %v938_v28 = vsel %vm649_vm0, %v936_v22, %v937_v4  ;;  %v945_v33 = vsel %vm649_vm0, %v942_v21, %v944_v32 }
  0xf2   : > { %952 = vrot.lane.b32.xlu0 %v933_v41, %s13666_s30  ;;  %954 = vrot.lane.b32.xlu1 %v935_v42, %s13666_s30 }
  0xf6   : > { %812 = vrot.lane.b32.xlu0 %v789_v43, %s13665_s27  ;;  %818 = vrot.lane.b32.xlu1 %v794_v44, %s13665_s27 }
  0xfa   : > { %808 = vrot.lane.b32.xlu0 %v788_v52, %s13665_s27  ;;  %962 = vrot.lane.b32.xlu1 %v939_v15, %s13666_s30 }
  0xfe   : > { %816 = vrot.lane.b32.xlu0 %v795_v23, %s13665_s27  ;;  %810 = vrot.lane.b32.xlu1 %v790_v62, %s13665_s27 }
 0x102   : > { %960 = vrot.lane.b32.xlu0 %v940_v19, %s13666_s30  ;;  %814 = vrot.lane.b32.xlu1 %v793_v20, %s13665_s27 }
 0x106   : > { %964 = vrot.lane.b32.xlu0 %v943_v25, %s13666_s30  ;;  %958 = vrot.lane.b32.xlu1 %v938_v28, %s13666_s30 }
 0x10a   : > { %968 = vrot.lane.b32.xlu0 %v944_v32, %s13666_s30  ;;  %966 = vrot.lane.b32.xlu1 %v945_v33, %s13666_s30 }
 0x10e   : > { %1041 = vperm.xlu0 %13543, %v13809_v13   ;;  %1037 = vperm.xlu1 %13542, %v13812_v14  }
 0x112   : > { %13544 = vset.pattern.permute.xlu0 %v13667_v36  ;;  %1045 = vperm.xlu1 %13542, %v13817_v17  }
 0x113   : > { %1164 = vperm.xlu0 %13544, %v13812_v14  }
 0x116   : > { %1049 = vperm.xlu1 %13542, %v13823_v18  }
 0x117   : > { %1176 = vperm.xlu0 %13544, %v13823_v18  }
 0x11a   : > { %13545 = vset.pattern.permute.xlu1 %v13667_v36 }
 0x11b   : > { %1168 = vperm.xlu1 %13545, %v13809_v13   ;;  %13547 = vset.pattern.permute.xlu0 %v13668_v45 }
 0x11f   : > { %1172 = vperm.xlu1 %13545, %v13817_v17  }
 0x120   : > { %v14034_v37 = vpop.permute.xlu0 %391  ;;  %v14036_v38 = vpop.permute.xlu1 %389 }
 0x123   : > { %13546 = vset.pattern.permute.xlu1 %v13668_v45 }
 0x124   : > { %v14038_v41 = vpop.permute.xlu0 %395  ;;  %v14040_v42 = vpop.permute.xlu1 %393 }
 0x128   : > { %v14042_v43 = vpop.permute.xlu0 %399  ;;  %v14044_v14 = vpop.permute.xlu1 %397 }
 0x12c   : > { %v14046_v44 = vpop.permute.xlu0 %519  ;;  %v14048_v18 = vpop.permute.xlu1 %521 }
 0x130   : > { %v14050_v13 = vpop.permute.xlu0 %523  ;;  %v14052_v17 = vpop.permute.xlu1 %525 }
 0x134   : > { %v14054_v47 = vpop.permute.xlu0 %527  ;;  %v14056_v48 = vpop.permute.xlu1 %529 }
 0x138   : > { %v14058_v49 = vpop.permute.xlu0 %403  ;;  %v14060_v15 = vpop.permute.xlu1 %401 }
 0x139   : > { %21921 = vst [vmem:[#allocation8_spill] sm:$0xff] %v14058_v49  ;;  %21922 = vst [vmem:[#allocation9_spill] sm:$0xff] %v14060_v15 }
 0x13c   : > { %v14062_v46 = vpop.permute.xlu0 %407  ;;  %v14064_v50 = vpop.permute.xlu1 %405 }
 0x13d   : > { %21923 = vst [vmem:[#allocation10_spill] sm:$0xff] %v14062_v46  ;;  %21924 = vst [vmem:[#allocation11_spill] sm:$0xff] %v14064_v50 }
 0x140   : > { %v14066_v51 = vpop.permute.xlu0 %411  ;;  %v14068_v52 = vpop.permute.xlu1 %409 }
 0x141   : > { %21925 = vst [vmem:[#allocation12_spill] sm:$0xff] %v14066_v51  ;;  %21926 = vst [vmem:[#allocation13_spill] sm:$0xff] %v14068_v52 }
 0x144   : > { %v14070_v53 = vpop.permute.xlu0 %531  ;;  %v14072_v57 = vpop.permute.xlu1 %533 }
 0x145   : > { %21927 = vst [vmem:[#allocation14_spill] sm:$0xff] %v14070_v53  ;;  %21928 = vst [vmem:[#allocation15_spill] sm:$0xff] %v14072_v57 }
 0x148   : > { %v14074_v58 = vpop.permute.xlu0 %535  ;;  %v14076_v62 = vpop.permute.xlu1 %537 }
 0x149   : > { %21929 = vst [vmem:[#allocation16_spill] sm:$0xff] %v14074_v58  ;;  %21930 = vst [vmem:[#allocation17_spill] sm:$0xff] %v14076_v62 }
 0x14c   : > { %v14078_v63 = vpop.permute.xlu0 %539  ;;  %v14080_v23 = vpop.permute.xlu1 %541 }
 0x14d   : > { %21931 = vst [vmem:[#allocation18_spill] sm:$0xff] %v14078_v63  ;;  %21932 = vst [vmem:[#allocation19_spill] sm:$0xff] %v14080_v23 }
 0x150   : > { %v14082_v4 = vpop.permute.xlu0 %800  ;;  %v14084_v8 = vpop.permute.xlu1 %806 }
 0x154   : > { %v14086_v11 = vpop.permute.xlu0 %956  ;;  %v14088_v16 = vpop.permute.xlu1 %950 }
 0x155   : > { %21933 = vst [vmem:[#allocation20_spill] sm:$0xff] %v14086_v11 }
 0x158   : > { %v14090_v19 = vpop.permute.xlu0 %796  ;;  %v14092_v20 = vpop.permute.xlu1 %798 }
 0x15c   : > { %v14094_v21 = vpop.permute.xlu0 %804  ;;  %v14096_v22 = vpop.permute.xlu1 %802 }
 0x160   : > { %v14098_v25 = vpop.permute.xlu0 %948  ;;  %v14100_v28 = vpop.permute.xlu1 %946 }
 0x164   : > { %v14102_v32 = vpop.permute.xlu0 %952  ;;  %v14104_v33 = vpop.permute.xlu1 %954 }
 0x165   : > { %21934 = vst [vmem:[#allocation21_spill] sm:$0xff] %v14104_v33 }
 0x168   : > { %v14106_v36 = vpop.permute.xlu0 %812  ;;  %v14108_v45 = vpop.permute.xlu1 %818 }
 0x169   : > { %21935 = vst [vmem:[#allocation22_spill] sm:$0xff] %v14106_v36  ;;  %21936 = vst [vmem:[#allocation23_spill] sm:$0xff] %v14108_v45 }
 0x16c   : > { %v14110_v0 = vpop.permute.xlu0 %808  ;;  %v14112_v2 = vpop.permute.xlu1 %962 }
 0x16d   : > { %21937 = vst [vmem:[#allocation24_spill] sm:$0xff] %v14110_v0  ;;  %21938 = vst [vmem:[#allocation25_spill] sm:$0xff] %v14112_v2 }
 0x170   : > { %v14114_v1 = vpop.permute.xlu0 %816  ;;  %v14116_v63 = vpop.permute.xlu1 %810 }
 0x171   : > { %21939 = vst [vmem:[#allocation26_spill] sm:$0xff] %v14114_v1  ;;  %21940 = vst [vmem:[#allocation27_spill] sm:$0xff] %v14116_v63 }
 0x174   : > { %v14118_v23 = vpop.permute.xlu0 %960  ;;  %v14120_v62 = vpop.permute.xlu1 %814 }
 0x175   : > { %21941 = vst [vmem:[#allocation28_spill] sm:$0xff] %v14118_v23  ;;  %21942 = vst [vmem:[#allocation29_spill] sm:$0xff] %v14120_v62 }
 0x178   : > { %v14122_v52 = vpop.permute.xlu0 %964  ;;  %v14124_v51 = vpop.permute.xlu1 %958 }
 0x179   : > { %21943 = vst [vmem:[#allocation30_spill] sm:$0xff] %v14122_v52  ;;  %21944 = vst [vmem:[#allocation31_spill] sm:$0xff] %v14124_v51 }
 0x17c   : > { %v14126_v58 = vpop.permute.xlu0 %968  ;;  %v14128_v36 = vpop.permute.xlu1 %966 }
 0x17d   : > { %21945 = vst [vmem:[#allocation32_spill] sm:$0xff] %v14126_v58  ;;  %21946 = vst [vmem:[#allocation33_spill] sm:$0xff] %v14128_v36 }
 0x18d   : > { %v14130_v45 = vpop.permute.xlu0 %1041  ;;  %v14132_v0 = vpop.permute.xlu1 %1037 }
 0x191   : > { %v14134_v2 = vpop.permute.xlu1 %1045 }
 0x192   : > { %21947 = vst [vmem:[#allocation34_spill] sm:$0xff] %v14134_v2  ;;  %v1165_v1 = vpop.permute.xlu0 %1164 }
 0x193   : > { %v1179_v63 = vmul.f32 %v1165_v1, %v13867_v30  ;;  %v1180_v23 = vmul.f32 %v1165_v1, %v13864_v29  ;;  %v1181_v62 = vmul.f32 %v1165_v1, %v13879_v35 }
 0x195   : > { %v14139_v52 = vpop.permute.xlu1 %1049  ;;  %v1204_v51 = vrot.slane %v1180_v23, 2  ;;  %v1206_v46 = vrot.slane %v1181_v62, 2  ;;  %v1203_v58 = vrot.slane %v1179_v63, 2 }
 0x196   : > { %21948 = vst [vmem:[#allocation35_spill] sm:$0xff] %v14139_v52  ;;  %v1177_v49 = vpop.permute.xlu0 %1176 }
 0x197   : > { %v1207_v36 = vsel %vm1076_vm1, %v1204_v51, %v1206_v46  ;;  %v1205_v57 = vsel %vm1076_vm1, %v1203_v58, %v1204_v51  ;;  %v1190_v33 = vmul.f32 %v1177_v49, %v13934_v5 }
 0x198   : > { %1225 = vrot.lane.b32.xlu0 %v1207_v36, %s13665_s27  ;;  %1223 = vrot.lane.b32.xlu1 %v1205_v57, %s13665_s27 }
 0x19a   : > { %v1169_v53 = vpop.permute.xlu1 %1168 }
 0x19b   : > { %v1182_v50 = vmul.f32 %v1169_v53, %v13874_v34  ;;  %v1183_v2 = vmul.f32 %v1169_v53, %v13887_v40  ;;  %v1184_v1 = vmul.f32 %v1169_v53, %v13884_v39  ;;  %v1188_v53 = vmul.f32 %v1177_v49, %v13925_v61 }
 0x19c   : > { %1227 = vrot.lane.b32.xlu1 %v1206_v46, %s13665_s27 }
 0x19d   : > { %v1209_v62 = vrot.slane %v1183_v2, 2  ;;  %v1211_v63 = vrot.slane %v1184_v1, 2  ;;  %v1208_v23 = vrot.slane %v1182_v50, 2  ;;  %v1189_v1 = vmul.f32 %v1177_v49, %v13937_v7 }
 0x19e   : > { %v1173_v52 = vpop.permute.xlu1 %1172 }
 0x19f   : > { %v1185_v15 = vmul.f32 %v1173_v52, %v13913_v56  ;;  %v1186_v36 = vmul.f32 %v1173_v52, %v13910_v55  ;;  %v1212_v51 = vsel %vm1076_vm1, %v1209_v62, %v1211_v63  ;;  %v1187_v57 = vmul.f32 %v1173_v52, %v13922_v60  ;;  %v12743_v52 = vld.sshfl [vmem:[%s21539_s1] sm:$0x33 pattern:$0x75316420] }
 0x1a0   : > { %v1210_v58 = vsel %vm1076_vm1, %v1208_v23, %v1209_v62  ;;  %1231 = vrot.lane.b32.xlu1 %v1212_v51, %s13665_s27  ;;  %v1218_v62 = vrot.slane %v1188_v53, 2  ;;  %v1219_v23 = vrot.slane %v1189_v1, 2  ;;  %v1287_v49 = vrot.slane %v12743_v52, %v13804_v10 }
 0x1a1   : > { %1229 = vrot.lane.b32.xlu0 %v1210_v58, %s13665_s27  ;;  %v1213_v46 = vrot.slane %v1185_v15, 2  ;;  %v1214_v2 = vrot.slane %v1186_v36, 2  ;;  %v1216_v11 = vrot.slane %v1187_v57, 2  ;;  %v1221_v36 = vrot.slane %v1190_v33, 2 }
 0x1a2   : > { %v1280_v51 = vcombine.high %v12743_v52, %v12743_v52  ;;  %v1300_v58 = vrot.slane %v1287_v49, %v13801_v9  ;;  %v1295_v33 = vcombine.high %v1287_v49, %v1287_v49  ;;  %v21949_v1 = vmov 1  }
 0x1a3   : > { %v1215_v50 = vsel %vm1076_vm1, %v1213_v46, %v1214_v2  ;;  %v1217_v15 = vsel %vm1076_vm1, %v1214_v2, %v1216_v11  ;;  %v1222_v57 = vsel %vm1076_vm1, %v1219_v23, %v1221_v36  ;;  %v21950_v52 = vmov 0  }
 0x1a4   : > { %1235 = vrot.lane.b32.xlu1 %v1215_v50, %s13665_s27  ;;  %v1294_v46 = vrot.slane %v1280_v51, %v13804_v10  ;;  %v1308_v50 = vrot.slane %v1295_v33, %v13801_v9 }
 0x1a5   : > { %1233 = vrot.lane.b32.xlu0 %v1211_v63, %s13665_s27  ;;  %v1220_v63 = vsel %vm1076_vm1, %v1218_v62, %v1219_v23 }
 0x1a6   : > { %v1304_v2 = vrot.slane %v1294_v46, %v13801_v9 }
 0x1a8   : > { %1239 = vrot.lane.b32.xlu1 %v1216_v11, %s13665_s27  ;;  %v1296_v11 = vcombine.high %v1294_v46, %v1294_v46 }
 0x1a9   : > { %1237 = vrot.lane.b32.xlu0 %v1217_v15, %s13665_s27 }
 0x1aa   : > { %v1312_v53 = vrot.slane %v1296_v11, %v13801_v9 }
 0x1ac   : > { %1243 = vrot.lane.b32.xlu1 %v1222_v57, %s13665_s27 }
 0x1ad   : > { %1241 = vrot.lane.b32.xlu0 %v1220_v63, %s13665_s27 }
 0x1b0   : > { %1314 = vperm.xlu1 %13546, %v1300_v58  }
 0x1b1   : > { %1245 = vrot.lane.b32.xlu0 %v1221_v36, %s13665_s27 }
 0x1b4   : > { %1322 = vperm.xlu1 %13546, %v1308_v50  }
 0x1b5   : > { %1318 = vperm.xlu0 %13547, %v1304_v2  }
 0x1b8   : > { %1326 = vperm.xlu1 %13546, %v1312_v53  }
 0x1b9   : > { %13550 = vset.pattern.permute.xlu0 %v21949_v1 }
 0x1bc   : > { %13548 = vset.pattern.permute.xlu1 %v21950_v52 }
 0x20a   : > { %v14181_v15 = vpop.permute.xlu1 %1223  ;;  %v14183_v10 = vpop.permute.xlu0 %1225 }
 0x20e   : > { %v14185_v62 = vpop.permute.xlu1 %1227 }
 0x20f   : > { %21951 = vst [vmem:[#allocation36_spill] sm:$0xff] %v14185_v62 }
 0x212   : > { %v14189_v36 = vpop.permute.xlu1 %1231 }
 0x213   : > { %v14187_v23 = vpop.permute.xlu0 %1229  ;;  %21953 = vst [vmem:[#allocation38_spill] sm:$0xff] %v14189_v36 }
 0x214   : > { %21952 = vst [vmem:[#allocation37_spill] sm:$0xff] %v14187_v23 }
 0x216   : > { %v14193_v51 = vpop.permute.xlu1 %1235 }
 0x217   : > { %v14191_v49 = vpop.permute.xlu0 %1233  ;;  %21955 = vst [vmem:[#allocation40_spill] sm:$0xff] %v14193_v51 }
 0x218   : > { %21954 = vst [vmem:[#allocation39_spill] sm:$0xff] %v14191_v49 }
 0x21a   : > { %v14197_v63 = vpop.permute.xlu1 %1239 }
 0x21b   : > { %v14195_v9 = vpop.permute.xlu0 %1237  ;;  %21957 = vst [vmem:[#allocation42_spill] sm:$0xff] %v14197_v63 }
 0x21c   : > { %21956 = vst [vmem:[#allocation41_spill] sm:$0xff] %v14195_v9 }
 0x21e   : > { %v14201_v58 = vpop.permute.xlu1 %1243 }
 0x21f   : > { %v14199_v57 = vpop.permute.xlu0 %1241  ;;  %21959 = vst [vmem:[#allocation44_spill] sm:$0xff] %v14201_v58 }
 0x220   : > { %21958 = vst [vmem:[#allocation43_spill] sm:$0xff] %v14199_v57 }
 0x223   : > { %v14203_v46 = vpop.permute.xlu0 %1245 }
 0x224   : > { %21960 = vst [vmem:[#allocation45_spill] sm:$0xff] %v14203_v46 }
 0x22f   : > { %v1315_v33 = vpop.permute.xlu1 %1314 }
 0x230   : > { %v1329_v11 = vmul.f32 %v1315_v33, %v13867_v30  ;;  %v1330_v2 = vmul.f32 %v1315_v33, %v13864_v29  ;;  %v1331_v50 = vmul.f32 %v1315_v33, %v13879_v35 }
 0x232   : > { %v1354_v53 = vrot.slane %v1330_v2, 2  ;;  %v1356_v1 = vrot.slane %v1331_v50, 2  ;;  %v1353_v52 = vrot.slane %v1329_v11, 2 }
 0x233   : > { %v1323_v58 = vpop.permute.xlu1 %1322 }
 0x234   : > { %v1319_v51 = vpop.permute.xlu0 %1318  ;;  %v1357_v46 = vsel %vm1076_vm1, %v1354_v53, %v1356_v1  ;;  %v1355_v49 = vsel %vm1076_vm1, %v1353_v52, %v1354_v53  ;;  %v1335_v11 = vmul.f32 %v1323_v58, %v13913_v56  ;;  %v1336_v50 = vmul.f32 %v1323_v58, %v13910_v55 }
 0x235   : > { %v1332_v9 = vmul.f32 %v1319_v51, %v13874_v34  ;;  %v1333_v63 = vmul.f32 %v1319_v51, %v13887_v40  ;;  %v1334_v57 = vmul.f32 %v1319_v51, %v13884_v39  ;;  %1375 = vrot.lane.b32.xlu1 %v1357_v46, %s13666_s30  ;;  %1373 = vrot.lane.b32.xlu0 %v1355_v49, %s13666_s30 }
 0x236   : > { %v1337_v51 = vmul.f32 %v1323_v58, %v13922_v60 }
 0x237   : > { %v1358_v36 = vrot.slane %v1332_v9, 2  ;;  %v1359_v23 = vrot.slane %v1333_v63, 2  ;;  %v1361_v33 = vrot.slane %v1334_v57, 2  ;;  %v1327_v62 = vpop.permute.xlu1 %1326  ;;  %v1363_v9 = vrot.slane %v1335_v11, 2 }
 0x238   : > { %v1364_v63 = vrot.slane %v1336_v50, 2  ;;  %v1366_v46 = vrot.slane %v1337_v51, 2  ;;  %v1338_v49 = vmul.f32 %v1327_v62, %v13925_v61  ;;  %v1339_v57 = vmul.f32 %v1327_v62, %v13937_v7 }
 0x239   : > { %v1360_v2 = vsel %vm1076_vm1, %v1358_v36, %v1359_v23  ;;  %1377 = vrot.lane.b32.xlu0 %v1356_v1, %s13666_s30  ;;  %v1362_v52 = vsel %vm1076_vm1, %v1359_v23, %v1361_v33  ;;  %v1340_v36 = vmul.f32 %v1327_v62, %v13934_v5  ;;  %v625_v62 = vmul.f32 %v13929_v3, %v13867_v30 }
 0x23a   : > { %1379 = vrot.lane.b32.xlu1 %v1360_v2, %s13666_s30  ;;  %v1368_v58 = vrot.slane %v1338_v49, 2  ;;  %v1369_v53 = vrot.slane %v1339_v57, 2  ;;  %v1367_v2 = vsel %vm1076_vm1, %v1364_v63, %v1366_v46  ;;  %v1365_v1 = vsel %vm1076_vm1, %v1363_v9, %v1364_v63 }
 0x23b   : > { %v1371_v23 = vrot.slane %v1340_v36, 2  ;;  %v626_v50 = vmul.f32 %v13929_v3, %v13864_v29  ;;  %v628_v51 = vmul.f32 %v13907_v54, %v13874_v34  ;;  %v627_v9 = vmul.f32 %v13929_v3, %v13879_v35 }
 0x23c   : > { %v1370_v11 = vsel %vm1076_vm1, %v1368_v58, %v1369_v53  ;;  %v284_v63 = vmul.f32 %v13849_v24, %v13864_v29  ;;  %v650_v49 = vrot.slane %v625_v62, 1  ;;  %v286_v36 = vmul.f32 %v13855_v26, %v13874_v34 }
 0x23d   : > { %1381 = vrot.lane.b32.xlu0 %v1362_v52, %s13666_s30  ;;  %v14245_v52 = vmul.f32 %v13907_v54, %v13887_v40  ;;  %v651_v57 = vrot.slane %v626_v50, 1  ;;  %v285_v58 = vmul.f32 %v13849_v24, %v13879_v35  ;;  %v14279_v62 = vmul.f32 %v13869_v31, %v13925_v61 }
 0x23e   : > { %1383 = vrot.lane.b32.xlu1 %v1361_v33, %s13666_s30  ;;  %v1372_v33 = vsel %vm1076_vm1, %v1369_v53, %v1371_v23  ;;  %v14259_v53 = vmul.f32 %v13907_v54, %v13884_v39  ;;  %v14283_v50 = vmul.f32 %v13857_v27, %v13922_v60  ;;  %v1426_v3 = vstv %s12744_s8  ;;  %s13682_s8 = smov 102  }
 0x23f   : > { %21963 = vst [vmem:[#allocation48_spill] sm:$0xff] %v14279_v62 }
 0x240   : > { %21964 = vst [vmem:[#allocation49_spill] sm:$0xff] %v14283_v50  ;;  %v658_v62 = vrot.slane %v14259_v53, 1  ;;  %v21967_v50 = vrot.slane %v14245_v52, 1  ;;  %v1053_v53 = vmul.f32 %v14132_v0, %v13864_v29 }
 0x241   : > { %1385 = vrot.lane.b32.xlu0 %v1365_v1, %s13666_s30  ;;  %v653_v1 = vrot.slane %v627_v9, 1  ;;  %v652_v9 = vsel %vm649_vm0, %v650_v49, %v651_v57  ;;  %v1052_v49 = vmul.f32 %v14132_v0, %v13867_v30 }
 0x242   : > { %1387 = vrot.lane.b32.xlu1 %v1367_v2, %s13666_s30  ;;  %v655_v2 = vrot.slane %v628_v51, 1  ;;  %v14291_v51 = vmul.f32 %v13869_v31, %v13937_v7 }
 0x244   : > { %21966 = vst [vmem:[#allocation51_spill] sm:$0xff] %v14291_v51  ;;  %v21968_v51 = vlaneseq }
 0x245   : > { %1389 = vrot.lane.b32.xlu0 %v1366_v46, %s13666_s30  ;;  %v283_v46 = vmul.f32 %v13849_v24, %v13867_v30  ;;  %v14274_v24 = vmul.f32 %v13857_v27, %v13913_v56  ;;  %v1425_v30 = vadd.s32 16, %v13798_v6 }
 0x246   : > { %1391 = vrot.lane.b32.xlu1 %v1370_v11, %s13666_s30  ;;  %v287_v11 = vmul.f32 %v13855_v26, %v13887_v40 }
 0x247   : > { %21962 = vst [vmem:[#allocation47_spill] sm:$0xff] %v14274_v24  ;;  %v425_v54 = vadd.f32 %v14036_v38, %v283_v46  ;;  %v1424_v38 = vadd.s32 8, %v13798_v6  ;;  %v657_v24 = vsel %vm649_vm0, %v655_v2, %v21967_v50  ;;  %v1427_v2 = vadd.s32 %v1426_v3, %v13798_v6 }
 0x249   : > { %1393 = vrot.lane.b32.xlu0 %v1372_v33, %s13666_s30  ;;  %v14270_v33 = vmul.f32 %v13857_v27, %v13910_v55  ;;  %v555_v46 = vadd.f32 %v14046_v44, %v425_v54  ;;  %v654_v27 = vsel %vm649_vm0, %v651_v57, %v653_v1  ;;  %v427_v44 = vadd.f32 %v14040_v42, %v285_v58 }
 0x24a   : > { %1395 = vrot.lane.b32.xlu1 %v1371_v23, %s13666_s30  ;;  %v288_v23 = vmul.f32 %v13855_v26, %v13884_v39  ;;  %v14287_v26 = vmul.f32 %v13869_v31, %v13934_v5  ;;  %v428_v31 = vadd.f32 %v14038_v41, %v286_v36  ;;  %v14313_v57 = vmul.f32 %v14132_v0, %v13879_v35 }
 0x24b   : > { %21961 = vst [vmem:[#allocation46_spill] sm:$0xff] %v14270_v33  ;;  %v14306_v33 = vand.u32 127, %v21968_v51  ;;  %v429_v36 = vadd.f32 %v14044_v14, %v287_v11  ;;  %v557_v42 = vadd.f32 %v14050_v13, %v427_v44  ;;  %v682_v29 = vadd.f32 %v652_v9, %v555_v46 }
 0x24c   : > { %21965 = vst [vmem:[#allocation50_spill] sm:$0xff] %v14287_v26  ;;  %v426_v26 = vadd.f32 %v14034_v37, %v284_v63  ;;  %v430_v37 = vadd.f32 %v14042_v43, %v288_v23  ;;  %v1428_v63 = vadd.s32 %v1426_v3, %v1424_v38  ;;  %v558_v58 = vadd.f32 %v14052_v17, %v428_v31 }
 0x24d   : > { %21969 = vst [vmem:[#allocation52_spill] sm:$0xff] %v14306_v33  ;;  %v1055_v0 = vmul.f32 %v14130_v45, %v13874_v34  ;;  %v14326_v35 = vmul.f32 %v14130_v45, %v13887_v40  ;;  %v1077_v43 = vrot.slane %v1052_v49, 2  ;;  %v1078_v23 = vrot.slane %v1053_v53, 2 }
 0x24e   : > { %v556_v41 = vadd.f32 %v14048_v18, %v426_v26  ;;  %v14329_v18 = vadd.s32 4294967295, %v14306_v33  ;;  %v1080_v54 = vrot.slane %v14313_v57, 2  ;;  %vm1433_vm2 = vcmp.ge.s32.totalorder %v1427_v2, 0 }
 0x24f   : > { %vm1436_vm3 = vcmp.lt.s32.totalorder %v1427_v2, 32  ;;  %vm1434_vm4 = vcmp.ge.s32.totalorder %v1428_v63, 0  ;;  %vm1437_vm5 = vcmp.lt.s32.totalorder %v1428_v63, 32  ;;  %v1429_v13 = vadd.s32 %v1426_v3, %v1425_v30 }
 0x250   : > { %v683_v14 = vadd.f32 %v654_v27, %v556_v41  ;;  %v559_v17 = vadd.f32 %v14054_v47, %v429_v36  ;;  %v560_v34 = vadd.f32 %v14056_v48, %v430_v37  ;;  %v684_v11 = vadd.f32 %v653_v1, %v557_v42  ;;  %vm1439_vm6 = vmand %vm1433_vm2, %vm1436_vm3 }
 0x251   : > { %v685_v40 = vadd.f32 %v657_v24, %v558_v58  ;;  %v832_v50 = vadd.f32 %v14090_v19, %v682_v29  ;;  %v14338_v51 = vmul.f32 %v14130_v45, %v13884_v39  ;;  %vm1442_vm7 = vcmp.ge.s32.totalorder %v14329_v18, 0  ;;  %vm1440_vm8 = vmand %vm1434_vm4, %vm1437_vm5 }
 0x252   : > { %v833_v26 = vadd.f32 %v14092_v20, %v683_v14  ;;  %v1082_v9 = vrot.slane %v1055_v0, 2  ;;  %v1083_v3 = vrot.slane %v14326_v35, 2  ;;  %v1081_v47 = vsel %vm1076_vm1, %v1078_v23, %v1080_v54  ;;  %vm14361_vm11 = vmand %vm1439_vm6, %vm1442_vm7  ;;  %v21982_v35 = vld [vmem:[#allocation21_spill] sm:$0xff]  ;;  %v21983_v14 = vld [vmem:[#allocation36_spill] sm:$0xff] }
 0x253   : > { %v1079_v48 = vsel %vm1076_vm1, %v1077_v43, %v1078_v23  ;;  %v982_v20 = vadd.f32 %v14100_v28, %v832_v50  ;;  %vm1435_vm9 = vcmp.ge.s32.totalorder %v1429_v13, 0  ;;  %vm1438_vm10 = vcmp.lt.s32.totalorder %v1429_v13, 32  ;;  %vm14370_vm13 = vmand %vm1440_vm8, %vm1442_vm7 }
 0x254   : > { %v983_v19 = vadd.f32 %v14098_v25, %v833_v26  ;;  %v14350_v39 = vmul.f32 %v13943_v12, %v13925_v61  ;;  %v14354_v45 = vmul.f32 %v13943_v12, %v13937_v7  ;;  %v21970_v1 = vrot.slane %v14245_v52, 1  ;;  %vm14378_vm14 = vmand %vm1435_vm9, %vm1438_vm10 }
 0x255   : > { %vm1454_vm12 = vcmp.lt.s32.totalorder %v14329_v18, 32  ;;  %v834_v28 = vadd.f32 %v14082_v4, %v684_v11  ;;  %v835_v38 = vadd.f32 %v14096_v22, %v685_v40  ;;  %v1109_v27 = vadd.f32 %v1079_v48, %v982_v20  ;;  %vm1453_vm3 = vmand %vm14378_vm14, %vm1442_vm7  ;;  %v21989_v20 = vld [vmem:[#allocation46_spill] sm:$0xff]  ;;  %v21991_v18 = vld [vmem:[#allocation47_spill] sm:$0xff] }
 0x256   : > { %v659_v24 = vsel %vm649_vm0, %v21970_v1, %v658_v62  ;;  %v1110_v46 = vadd.f32 %v1081_v47, %v983_v19  ;;  %v687_v31 = vadd.f32 %v658_v62, %v560_v34  ;;  %v1085_v44 = vrot.slane %v14338_v51, 2  ;;  %vm14390_vm15 = vmand %vm14361_vm11, %vm1454_vm12 }
 0x257   : > { %v686_v49 = vadd.f32 %v659_v24, %v559_v17  ;;  %v1084_v53 = vsel %vm1076_vm1, %v1082_v9, %v1083_v3  ;;  %v984_v22 = vadd.f32 %v14088_v16, %v834_v28  ;;  %v985_v57 = vadd.f32 %v14102_v32, %v835_v38  ;;  %vm14404_vm2 = vmand %vm14370_vm13, %vm1454_vm12  ;;  %v21992_v24 = vld [vmem:[#allocation9_spill] sm:$0xff]  ;;  %v21993_v38 = vld [vmem:[#allocation34_spill] sm:$0xff] }
 0x258   : > { %v1260_v2 = vadd.f32 %v14183_v10, %v1110_v46  ;;  %v1259_v37 = vadd.f32 %v14181_v15, %v1109_v27  ;;  %v631_v41 = vmul.f32 %v13919_v59, %v13913_v56  ;;  %v632_v16 = vmul.f32 %v13919_v59, %v13910_v55  ;;  %vm14434_vm4 = vmand %vm1453_vm3, %vm1454_vm12  ;;  %v21994_v27 = vld [vmem:[#allocation38_spill] sm:$0xff] }
 0x259   : > { %v837_v32 = vadd.f32 %v14084_v8, %v687_v31  ;;  %v836_v10 = vadd.f32 %v14094_v21, %v686_v49  ;;  %v1111_v36 = vadd.f32 %v1080_v54, %v984_v22  ;;  %v1112_v42 = vadd.f32 %v1084_v53, %v985_v57  ;;  %v21981_v21 = vld [vmem:[#allocation20_spill] sm:$0xff]  ;;  %v21984_v54 = vld [vmem:[#allocation37_spill] sm:$0xff]  ;;  %v21995_v31 = vld [vmem:[#allocation39_spill] sm:$0xff] }
 0x25a   : > { %v633_v8 = vmul.f32 %v13919_v59, %v13922_v60  ;;  %v1086_v23 = vsel %vm1076_vm1, %v1083_v3, %v1085_v44  ;;  %v660_v40 = vrot.slane %v631_v41, 1  ;;  %v661_v59 = vrot.slane %v632_v16, 1  ;;  %v21998_v22 = vld [vmem:[#allocation49_spill] sm:$0xff]  ;;  %v21999_v57 = vld [vmem:[#allocation11_spill] sm:$0xff] }
 0x25b   : > { %v987_v0 = vadd.f32 %v21981_v21, %v837_v32  ;;  %v986_v43 = vadd.f32 %v21982_v35, %v836_v10  ;;  %v1261_v13 = vadd.f32 %v21983_v14, %v1111_v36  ;;  %v1262_v17 = vadd.f32 %v21984_v54, %v1112_v42  ;;  %v22000_v32 = vld [vmem:[#allocation14_spill] sm:$0xff]  ;;  %v22001_v10 = vld [vmem:[#allocation15_spill] sm:$0xff]  ;;  %v22002_v42 = vld [vmem:[#allocation48_spill] sm:$0xff] }
 0x25c   : > { %v14429_v50 = vmul.f32 %v13943_v12, %v13934_v5  ;;  %v665_v26 = vrot.slane %v14350_v39, 1  ;;  %v21990_v39 = vld [vmem:[#allocation8_spill] sm:$0xff]  ;;  %v431_v25 = vadd.f32 %v21992_v24, %v21991_v18  ;;  %v663_v28 = vrot.slane %v633_v8, 1 }
 0x25d   : > { %v1113_v47 = vadd.f32 %v1086_v23, %v986_v43  ;;  %v1114_v48 = vadd.f32 %v1085_v44, %v987_v0  ;;  %v432_v1 = vadd.f32 %v21990_v39, %v21989_v20  ;;  %v1058_v46 = vmul.f32 %v21993_v38, %v13913_v56  ;;  %v22005_v0 = vld [vmem:[#allocation50_spill] sm:$0xff]  ;;  %v22006_v35 = vld [vmem:[#allocation12_spill] sm:$0xff] }
 0x25e   : > { %v666_v4 = vrot.slane %v14354_v45, 1  ;;  %v1059_v56 = vmul.f32 %v21993_v38, %v13910_v55  ;;  %v561_v45 = vadd.f32 %v22000_v32, %v431_v25  ;;  %v22003_v55 = vld [vmem:[#allocation10_spill] sm:$0xff]  ;;  %v662_v8 = vsel %vm649_vm0, %v660_v40, %v661_v59 }
 0x25f   : > { %v1263_v52 = vadd.f32 %v21994_v27, %v1113_v47  ;;  %v1264_v49 = vadd.f32 %v21995_v31, %v1114_v48  ;;  %v664_v21 = vsel %vm649_vm0, %v661_v59, %v663_v28  ;;  %v436_v43 = vadd.f32 %v22006_v35, %v22005_v0  ;;  %v22011_v47 = vld [vmem:[#allocation13_spill] sm:$0xff]  ;;  %v22014_v25 = vld [vmem:[#allocation18_spill] sm:$0xff] }
 0x260   : > { %v1087_v23 = vrot.slane %v1058_v46, 2  ;;  %v1088_v54 = vrot.slane %v1059_v56, 2  ;;  %v688_v20 = vadd.f32 %v662_v8, %v561_v45  ;;  %v22015_v46 = vld [vmem:[#allocation24_spill] sm:$0xff]  ;;  %v22019_v32 = vld [vmem:[#allocation22_spill] sm:$0xff]  ;;  %vm6366_vm5 = vcmask 1041409  }
 0x261   : > { %v22022_v0 = vld [vmem:[#allocation30_spill] sm:$0xff]  ;;  %vm6368_vm6 = vcmask 1042434   ;;  %vm6370_vm7 = vcmask 1043459   ;;  %vm6372_vm8 = vcmask 1044484   ;;  %vm6374_vm9 = vcmask 1045509  }
 0x262   : > { %v838_v27 = vadd.f32 %v22015_v46, %v688_v20  ;;  %vm6376_vm10 = vcmask 1046534   ;;  %vm6378_vm11 = vcmask 1047559   ;;  %vm6417_vm12 = vcmask 134144  }
 0x263   : > { %vm6419_vm13 = vcmask 131072   ;;  %vm6420_vm14 = vsmask.f32 256  ;;  %vm10736_vm3 = vsmask.f32 7440 }
 0x2a7   : > { %v1374_v63 = vpop.permute.xlu0 %1373  ;;  %v1376_v30 = vpop.permute.xlu1 %1375 }
 0x2a8   : > { %v1409_v58 = vadd.f32 %v1374_v63, %v1259_v37  ;;  %v1410_v29 = vadd.f32 %v1376_v30, %v1260_v2  ;;  %v433_v2 = vadd.f32 %v21999_v57, %v21998_v22  ;;  %v14465_v37 = vmul.f32 %v21993_v38, %v13922_v60 }
 0x2a9   : > { %v562_v63 = vadd.f32 %v22001_v10, %v432_v1  ;;  %v22013_v1 = vld [vmem:[#allocation19_spill] sm:$0xff] }
 0x2aa   : > { %v14421_v34 = vsel %vm14390_vm15, %v1409_v58, 0.0  ;;  %v14425_v11 = vsel %vm14404_vm2, %v1410_v29, 0.0  ;;  %v434_v58 = vadd.f32 %v22003_v55, %v22002_v42  ;;  %v22004_v29 = vld [vmem:[#allocation16_spill] sm:$0xff]  ;;  %v566_v18 = vadd.f32 %v22013_v1, %v436_v43 }
 0x2ab   : > { %21985 = vst [vmem:[#allocation20_spill] sm:$0xff] %v14421_v34  ;;  %21986 = vst [vmem:[#allocation21_spill] sm:$0xff] %v14425_v11  ;;  %v1378_v9 = vpop.permute.xlu0 %1377  ;;  %1492 = vrot.lane.b32.xlu1 %v14425_v11, %s13666_s30  ;;  %1490 = vrot.lane.b32.xlu0 %v14421_v34, %s13666_s30  ;;  %v563_v60 = vadd.f32 %v22004_v29, %v433_v2  ;;  %v689_v39 = vadd.f32 %v664_v21, %v562_v63  ;;  %v22021_v29 = vld [vmem:[#allocation25_spill] sm:$0xff]  ;;  %v22023_v43 = vld [vmem:[#allocation40_spill] sm:$0xff] }
 0x2ac   : > { %v1380_v3 = vpop.permute.xlu1 %1379  ;;  %v1411_v12 = vadd.f32 %v1378_v9, %v1261_v13  ;;  %v22009_v9 = vld [vmem:[#allocation35_spill] sm:$0xff]  ;;  %v1089_v2 = vsel %vm1076_vm1, %v1087_v23, %v1088_v54  ;;  %v22024_v23 = vld [vmem:[#allocation41_spill] sm:$0xff] }
 0x2ad   : > { %v1412_v19 = vadd.f32 %v1380_v3, %v1262_v17  ;;  %v1090_v17 = vrot.slane %v14465_v37, 2  ;;  %v1061_v40 = vmul.f32 %v22009_v9, %v13925_v61  ;;  %v1062_v59 = vmul.f32 %v22009_v9, %v13937_v7  ;;  %v22010_v3 = vld [vmem:[#allocation51_spill] sm:$0xff] }
 0x2ae   : > { %v14452_v53 = vsel %vm14434_vm4, %v1411_v12, 0.0  ;;  %v435_v48 = vadd.f32 %v22011_v47, %v22010_v3  ;;  %v22012_v12 = vld [vmem:[#allocation17_spill] sm:$0xff]  ;;  %v690_v24 = vadd.f32 %v663_v28, %v563_v60  ;;  %v668_v61 = vrot.slane %v14429_v50, 1  ;;  %v22017_v50 = vld [vmem:[#allocation28_spill] sm:$0xff] }
 0x2af   : > { %21996 = vst [vmem:[#allocation36_spill] sm:$0xff] %v14452_v53  ;;  %v14456_v44 = vsel %vm14390_vm15, %v1412_v19, 0.0  ;;  %v1382_v41 = vpop.permute.xlu0 %1381  ;;  %1494 = vrot.lane.b32.xlu0 %v14452_v53, %s13666_s30  ;;  %v564_v19 = vadd.f32 %v22012_v12, %v434_v58  ;;  %v667_v7 = vsel %vm649_vm0, %v665_v26, %v666_v4  ;;  %v1092_v22 = vrot.slane %v1061_v40, 2 }
 0x2b0   : > { %21997 = vst [vmem:[#allocation37_spill] sm:$0xff] %v14456_v44  ;;  %1496 = vrot.lane.b32.xlu1 %v14456_v44, %s13666_s30  ;;  %v1384_v16 = vpop.permute.xlu1 %1383  ;;  %v1413_v30 = vadd.f32 %v1382_v41, %v1263_v52  ;;  %v565_v38 = vadd.f32 %v22014_v25, %v435_v48  ;;  %v22016_v52 = vld [vmem:[#allocation27_spill] sm:$0xff]  ;;  %v1093_v57 = vrot.slane %v1062_v59, 2  ;;  %v1091_v56 = vsel %vm1076_vm1, %v1088_v54, %v1090_v17  ;;  %v22026_v59 = vld [vmem:[#allocation26_spill] sm:$0xff] }
 0x2b1   : > { %v1414_v36 = vadd.f32 %v1384_v16, %v1264_v49  ;;  %v839_v31 = vadd.f32 %v22016_v52, %v689_v39  ;;  %v1063_v49 = vmul.f32 %v22009_v9, %v13934_v5  ;;  %v691_v41 = vadd.f32 %v667_v7, %v564_v19  ;;  %v22018_v16 = vld [vmem:[#allocation31_spill] sm:$0xff]  ;;  %v22029_v25 = vld [vmem:[#allocation42_spill] sm:$0xff] }
 0x2b2   : > { %v14482_v14 = vsel %vm14404_vm2, %v1413_v30, 0.0  ;;  %v988_v5 = vadd.f32 %v22018_v16, %v838_v27  ;;  %v840_v45 = vadd.f32 %v22019_v32, %v690_v24  ;;  %v693_v10 = vadd.f32 %v668_v61, %v566_v18  ;;  %v22020_v30 = vld [vmem:[#allocation29_spill] sm:$0xff]  ;;  %v22025_v9 = vld [vmem:[#allocation23_spill] sm:$0xff]  ;;  %v22027_v18 = vld [vmem:[#allocation32_spill] sm:$0xff] }
 0x2b3   : > { %22007 = vst [vmem:[#allocation46_spill] sm:$0xff] %v14482_v14  ;;  %v14486_v13 = vsel %vm14434_vm4, %v1414_v36, 0.0  ;;  %1498 = vrot.lane.b32.xlu0 %v14482_v14, %s13666_s30  ;;  %v1386_v28 = vpop.permute.xlu0 %1385  ;;  %v989_v26 = vadd.f32 %v22017_v50, %v839_v31  ;;  %v669_v63 = vsel %vm649_vm0, %v666_v4, %v668_v61  ;;  %v841_v36 = vadd.f32 %v22020_v30, %v691_v41  ;;  %v22028_v61 = vld [vmem:[#allocation33_spill] sm:$0xff] }
 0x2b4   : > { %22008 = vst [vmem:[#allocation8_spill] sm:$0xff] %v14486_v13  ;;  %1500 = vrot.lane.b32.xlu1 %v14486_v13, %s13666_s30  ;;  %v1388_v37 = vpop.permute.xlu1 %1387  ;;  %v1095_v42 = vrot.slane %v1063_v49, 2  ;;  %v1115_v55 = vadd.f32 %v1089_v2, %v988_v5  ;;  %v990_v60 = vadd.f32 %v22021_v29, %v840_v45  ;;  %v692_v8 = vadd.f32 %v669_v63, %v565_v38  ;;  %v22032_v50 = vld [vmem:[#allocation45_spill] sm:$0xff] }
 0x2b5   : > { %v1116_v58 = vadd.f32 %v1091_v56, %v989_v26  ;;  %v1094_v21 = vsel %vm1076_vm1, %v1092_v22, %v1093_v57  ;;  %v991_v35 = vadd.f32 %v22022_v0, %v841_v36  ;;  %v843_v40 = vadd.f32 %v22025_v9, %v693_v10 }
 0x2b6   : > { %v1265_v4 = vadd.f32 %v22023_v43, %v1115_v55  ;;  %v842_v3 = vadd.f32 %v22026_v59, %v692_v8  ;;  %v1117_v47 = vadd.f32 %v1090_v17, %v990_v60  ;;  %v1096_v20 = vsel %vm1076_vm1, %v1093_v57, %v1095_v42  ;;  %v22030_v17 = vld [vmem:[#allocation43_spill] sm:$0xff] }
 0x2b7   : > { %1526 = vrot.lane.b32.xlu0 %v14421_v34, %s13669_s9  ;;  %v1266_v54 = vadd.f32 %v22024_v23, %v1116_v58  ;;  %v1390_v48 = vpop.permute.xlu0 %1389  ;;  %v1118_v19 = vadd.f32 %v1094_v21, %v991_v35  ;;  %v993_v24 = vadd.f32 %v22027_v18, %v843_v40  ;;  %v13675_v40 = vmov 1983009808  }
 0x2b8   : > { %1528 = vrot.lane.b32.xlu1 %v14425_v11, %s13669_s9  ;;  %v1392_v12 = vpop.permute.xlu1 %1391  ;;  %v1415_v39 = vadd.f32 %v1386_v28, %v1265_v4  ;;  %v992_v7 = vadd.f32 %v22028_v61, %v842_v3  ;;  %v1267_v38 = vadd.f32 %v22029_v25, %v1117_v47  ;;  %v22031_v28 = vld [vmem:[#allocation44_spill] sm:$0xff]  ;;  %v2065_v59 = vunpack.c.l.s4 %v13675_v40 }
 0x2b9   : > { %v1416_v1 = vadd.f32 %v1388_v37, %v1266_v54  ;;  %v1268_v46 = vadd.f32 %v22030_v17, %v1118_v19  ;;  %v1120_v52 = vadd.f32 %v1095_v42, %v993_v24  ;;  %vm5867_vm0 = vcmask 130112  }
 0x2ba   : > { %v1119_v27 = vadd.f32 %v1096_v20, %v992_v7  ;;  %v14541_v31 = vsel %vm14390_vm15, %v1415_v39, 0.0  ;;  %v1417_v22 = vadd.f32 %v1390_v48, %v1267_v38  ;;  %v2066_v48 = vunpack.c.0.s8 %v2065_v59 }
 0x2bb   : > { %1530 = vrot.lane.b32.xlu0 %v14452_v53, %s13669_s9  ;;  %v14545_v49 = vsel %vm14404_vm2, %v1416_v1, 0.0  ;;  %v1418_v57 = vadd.f32 %v1392_v12, %v1268_v46  ;;  %v1394_v2 = vpop.permute.xlu0 %1393  ;;  %v1270_v26 = vadd.f32 %v22032_v50, %v1120_v52  ;;  %vm5874_vm1 = vcmask 195712  }
 0x2bc   : > { %1532 = vrot.lane.b32.xlu1 %v14456_v44, %s13669_s9  ;;  %v1396_v56 = vpop.permute.xlu1 %1395  ;;  %v1269_v37 = vadd.f32 %v22031_v28, %v1119_v27  ;;  %v14555_v41 = vsel %vm14434_vm4, %v1417_v22, 0.0  ;;  %v14698_v20 = vsub.s32 %v2066_v48, %v13798_v6 }
 0x2bd   : > { %22033 = vst [vmem:[#allocation47_spill] sm:$0xff] %v14555_v41  ;;  %v14559_v16 = vsel %vm14390_vm15, %v1418_v57, 0.0  ;;  %v1420_v32 = vadd.f32 %v1396_v56, %v1270_v26  ;;  %vm18284_vm15 = vmand %vm6419_vm13, %vm6420_vm14 }
 0x2be   : > { %22034 = vst [vmem:[#allocation9_spill] sm:$0xff] %v14559_v16  ;;  %v1419_v5 = vadd.f32 %v1394_v2, %v1269_v37  ;;  %22040 = vst [vmem:[#allocation14_spill] sm:$0xff] %v14698_v20 }
 0x2bf   : > { %1534 = vrot.lane.b32.xlu0 %v14482_v14, %s13669_s9  ;;  %v14571_v10 = vsel %vm14434_vm4, %v1420_v32, 0.0 }
 0x2c0   : > { %1536 = vrot.lane.b32.xlu1 %v14486_v13, %s13669_s9  ;;  %v14567_v45 = vsel %vm14404_vm2, %v1419_v5, 0.0  ;;  %vm10735_vm2 = vsmask.f32 3328 }
 0x2c1   : > { %22035 = vst [vmem:[#allocation34_spill] sm:$0xff] %v14567_v45  ;;  %vm19814_vm4 = vmor %vm10735_vm2, %vm10736_vm3 }
 0x2c3   : > { %1502 = vrot.lane.b32.xlu0 %v14541_v31, %s13666_s30 }
 0x2c4   : > { %1504 = vrot.lane.b32.xlu1 %v14545_v49, %s13666_s30 }
 0x2c7   : > { %1506 = vrot.lane.b32.xlu0 %v14555_v41, %s13666_s30 }
 0x2c8   : > { %1508 = vrot.lane.b32.xlu1 %v14559_v16, %s13666_s30 }
 0x2cb   : > { %1510 = vrot.lane.b32.xlu0 %v14567_v45, %s13666_s30 }
 0x2cc   : > { %1512 = vrot.lane.b32.xlu1 %v14571_v10, %s13666_s30  ;;  %s13678_s30 = smov 108  }
 0x2cf   : > { %1538 = vrot.lane.b32.xlu0 %v14541_v31, %s13669_s9 }
 0x2d0   : > { %1540 = vrot.lane.b32.xlu1 %v14545_v49, %s13669_s9 }
 0x2d3   : > { %1542 = vrot.lane.b32.xlu0 %v14555_v41, %s13669_s9 }
 0x2d4   : > { %1544 = vrot.lane.b32.xlu1 %v14559_v16, %s13669_s9 }
 0x2d7   : > { %1546 = vrot.lane.b32.xlu0 %v14567_v45, %s13669_s9 }
 0x2d8   : > { %1548 = vrot.lane.b32.xlu1 %v14571_v10, %s13669_s9  ;;  %s13683_s9 = smov 100  }
 0x2db   : > { %1562 = vrot.lane.b32.xlu0 %v14421_v34, %s13670_s10 }
 0x2dc   : > { %1564 = vrot.lane.b32.xlu1 %v14425_v11, %s13670_s10 }
 0x2df   : > { %1566 = vrot.lane.b32.xlu0 %v14452_v53, %s13670_s10 }
 0x2e0   : > { %1568 = vrot.lane.b32.xlu1 %v14456_v44, %s13670_s10 }
 0x2e3   : > { %1570 = vrot.lane.b32.xlu0 %v14482_v14, %s13670_s10 }
 0x2e4   : > { %1572 = vrot.lane.b32.xlu1 %v14486_v13, %s13670_s10 }
 0x2e7   : > { %1574 = vrot.lane.b32.xlu0 %v14541_v31, %s13670_s10 }
 0x2e8   : > { %1576 = vrot.lane.b32.xlu1 %v14545_v49, %s13670_s10 }
 0x2eb   : > { %1578 = vrot.lane.b32.xlu0 %v14555_v41, %s13670_s10 }
 0x2ec   : > { %1580 = vrot.lane.b32.xlu1 %v14559_v16, %s13670_s10 }
 0x2ef   : > { %1582 = vrot.lane.b32.xlu0 %v14567_v45, %s13670_s10 }
 0x2f0   : > { %1584 = vrot.lane.b32.xlu1 %v14571_v10, %s13670_s10  ;;  %s13684_s10 = smov 98  }
 0x2f3   : > { %1598 = vrot.lane.b32.xlu0 %v14421_v34, %s13671_s11 }
 0x2f4   : > { %1600 = vrot.lane.b32.xlu1 %v14425_v11, %s13671_s11 }
 0x2f7   : > { %1602 = vrot.lane.b32.xlu0 %v14452_v53, %s13671_s11 }
 0x2f8   : > { %1604 = vrot.lane.b32.xlu1 %v14456_v44, %s13671_s11 }
 0x2fb   : > { %1606 = vrot.lane.b32.xlu0 %v14482_v14, %s13671_s11 }
 0x2fc   : > { %1608 = vrot.lane.b32.xlu1 %v14486_v13, %s13671_s11 }
 0x2ff   : > { %1610 = vrot.lane.b32.xlu0 %v14541_v31, %s13671_s11 }
 0x300   : > { %1612 = vrot.lane.b32.xlu1 %v14545_v49, %s13671_s11 }
 0x303   : > { %1614 = vrot.lane.b32.xlu0 %v14555_v41, %s13671_s11 }
 0x304   : > { %1616 = vrot.lane.b32.xlu1 %v14559_v16, %s13671_s11 }
 0x307   : > { %1618 = vrot.lane.b32.xlu0 %v14567_v45, %s13671_s11 }
 0x308   : > { %1620 = vrot.lane.b32.xlu1 %v14571_v10, %s13671_s11  ;;  %s13685_s11 = smov 96  }
 0x30b   : > { %1634 = vrot.lane.b32.xlu0 %v14421_v34, %s13672_s12 }
 0x30c   : > { %1636 = vrot.lane.b32.xlu1 %v14425_v11, %s13672_s12 }
 0x30f   : > { %1638 = vrot.lane.b32.xlu0 %v14452_v53, %s13672_s12 }
 0x310   : > { %1640 = vrot.lane.b32.xlu1 %v14456_v44, %s13672_s12 }
 0x313   : > { %1642 = vrot.lane.b32.xlu0 %v14482_v14, %s13672_s12 }
 0x314   : > { %1644 = vrot.lane.b32.xlu1 %v14486_v13, %s13672_s12 }
 0x317   : > { %1646 = vrot.lane.b32.xlu0 %v14541_v31, %s13672_s12 }
 0x318   : > { %1648 = vrot.lane.b32.xlu1 %v14545_v49, %s13672_s12 }
 0x31b   : > { %1650 = vrot.lane.b32.xlu0 %v14555_v41, %s13672_s12 }
 0x31c   : > { %1652 = vrot.lane.b32.xlu1 %v14559_v16, %s13672_s12 }
 0x31d   : > { %v14623_v62 = vpop.permute.xlu1 %1492  ;;  %v14625_v15 = vpop.permute.xlu0 %1490 }
 0x31f   : > { %1654 = vrot.lane.b32.xlu0 %v14567_v45, %s13672_s12 }
 0x320   : > { %1656 = vrot.lane.b32.xlu1 %v14571_v10, %s13672_s12  ;;  %s13687_s12 = smov 16  }
 0x321   : > { %v14631_v63 = vpop.permute.xlu0 %1494 }
 0x322   : > { %v14629_v51 = vpop.permute.xlu1 %1496 }
 0x323   : > { %1670 = vrot.lane.b32.xlu0 %v14421_v34, %s13673_s13 }
 0x324   : > { %1672 = vrot.lane.b32.xlu1 %v14425_v11, %s13673_s13 }
 0x325   : > { %v14637_v36 = vpop.permute.xlu0 %1498 }
 0x326   : > { %v14635_v30 = vpop.permute.xlu1 %1500 }
 0x327   : > { %22036 = vst [vmem:[#allocation38_spill] sm:$0xff] %v14635_v30  ;;  %1674 = vrot.lane.b32.xlu0 %v14452_v53, %s13673_s13 }
 0x328   : > { %1676 = vrot.lane.b32.xlu1 %v14456_v44, %s13673_s13 }
 0x329   : > { %v1527_v55 = vpop.permute.xlu0 %1526 }
 0x32a   : > { %v1529_v42 = vpop.permute.xlu1 %1528  ;;  %v2062_v18 = vcombine.low %v14421_v34, %v1527_v55  ;;  %v2063_v24 = vcombine.high %v14421_v34, %v1527_v55 }
 0x32b   : > { %1678 = vrot.lane.b32.xlu0 %v14482_v14, %s13673_s13  ;;  %v2383_v39 = vcombine.low %v14425_v11, %v1529_v42  ;;  %v2384_v1 = vcombine.high %v14425_v11, %v1529_v42 }
 0x32c   : > { %1680 = vrot.lane.b32.xlu1 %v14486_v13, %s13673_s13  ;;  %v14735_v28 = vrot.slane %v2062_v18, %v14698_v20  ;;  %v14738_v37 = vrot.slane %v2063_v24, %v14698_v20 }
 0x32d   : > { %v14645_v29 = vpop.permute.xlu0 %1530  ;;  %v14713_v27 = vrot.slane %v2383_v39, %v14698_v20  ;;  %v14716_v52 = vrot.slane %v2384_v1, %v14698_v20 }
 0x32e   : > { %v14643_v58 = vpop.permute.xlu1 %1532 }
 0x32f   : > { %1682 = vrot.lane.b32.xlu0 %v14541_v31, %s13673_s13  ;;  %v2814_v55 = vcombine.high %v14456_v44, %v14643_v58 }
 0x330   : > { %1684 = vrot.lane.b32.xlu1 %v14545_v49, %s13673_s13 }
 0x331   : > { %v14651_v8 = vpop.permute.xlu0 %1534 }
 0x332   : > { %v14649_v60 = vpop.permute.xlu1 %1536  ;;  %v3134_v40 = vcombine.low %v14482_v14, %v14651_v8 }
 0x333   : > { %22037 = vst [vmem:[#allocation39_spill] sm:$0xff] %v14649_v60  ;;  %1686 = vrot.lane.b32.xlu0 %v14555_v41, %s13673_s13 }
 0x334   : > { %1688 = vrot.lane.b32.xlu1 %v14559_v16, %s13673_s13 }
 0x335   : > { %v14657_v0 = vpop.permute.xlu0 %1502 }
 0x336   : > { %v14655_v21 = vpop.permute.xlu1 %1504 }
 0x337   : > { %1690 = vrot.lane.b32.xlu0 %v14567_v45, %s13673_s13 }
 0x338   : > { %1692 = vrot.lane.b32.xlu1 %v14571_v10, %s13673_s13  ;;  %s13688_s13 = smov 32  }
 0x339   : > { %v14663_v43 = vpop.permute.xlu0 %1506 }
 0x33a   : > { %v14661_v35 = vpop.permute.xlu1 %1508  ;;  %22038 = vst [vmem:[#allocation49_spill] sm:$0xff] %v14663_v43 }
 0x33b   : > { %1706 = vrot.lane.b32.xlu0 %v14421_v34, %s13674_s14 }
 0x33c   : > { %1708 = vrot.lane.b32.xlu1 %v14425_v11, %s13674_s14 }
 0x33d   : > { %v14671_v23 = vpop.permute.xlu0 %1510 }
 0x33e   : > { %v14669_v4 = vpop.permute.xlu1 %1512 }
 0x33f   : > { %22039 = vst [vmem:[#allocation11_spill] sm:$0xff] %v14669_v4  ;;  %1710 = vrot.lane.b32.xlu0 %v14452_v53, %s13674_s14 }
 0x340   : > { %1712 = vrot.lane.b32.xlu1 %v14456_v44, %s13674_s14 }
 0x341   : > { %v14679_v9 = vpop.permute.xlu0 %1538 }
 0x342   : > { %v14677_v54 = vpop.permute.xlu1 %1540 }
 0x343   : > { %1714 = vrot.lane.b32.xlu0 %v14482_v14, %s13674_s14 }
 0x344   : > { %1716 = vrot.lane.b32.xlu1 %v14486_v13, %s13674_s14 }
 0x345   : > { %v14687_v47 = vpop.permute.xlu0 %1542 }
 0x346   : > { %v14685_v3 = vpop.permute.xlu1 %1544 }
 0x347   : > { %1718 = vrot.lane.b32.xlu0 %v14541_v31, %s13674_s14 }
 0x348   : > { %1720 = vrot.lane.b32.xlu1 %v14545_v49, %s13674_s14 }
 0x349   : > { %v14695_v19 = vpop.permute.xlu0 %1546 }
 0x34a   : > { %v14693_v12 = vpop.permute.xlu1 %1548 }
 0x34b   : > { %1722 = vrot.lane.b32.xlu0 %v14555_v41, %s13674_s14 }
 0x34c   : > { %1724 = vrot.lane.b32.xlu1 %v14559_v16, %s13674_s14 }
 0x34d   : > { %v1563_v7 = vpop.permute.xlu0 %1562 }
 0x34e   : > { %v1565_v61 = vpop.permute.xlu1 %1564  ;;  %v2078_v17 = vcombine.low %v14625_v15, %v1563_v7  ;;  %v2079_v46 = vcombine.high %v14625_v15, %v1563_v7  ;;  %v3135_v7 = vcombine.high %v14482_v14, %v14651_v8 }
 0x34f   : > { %v2399_v25 = vcombine.low %v14623_v62, %v1565_v61  ;;  %v2400_v38 = vcombine.high %v14623_v62, %v1565_v61  ;;  %1726 = vrot.lane.b32.xlu0 %v14567_v45, %s13674_s14  ;;  %v2813_v62 = vcombine.low %v14456_v44, %v14643_v58  ;;  %v14772_v61 = vrot.slane %v2814_v55, %v14698_v20 }
 0x350   : > { %1728 = vrot.lane.b32.xlu1 %v14571_v10, %s13674_s14  ;;  %v14729_v2 = vrot.slane %v2078_v17, %v14698_v20  ;;  %v14732_v56 = vrot.slane %v2079_v46, %v14698_v20  ;;  %s13689_s14 = smov 48  }
 0x351   : > { %v14723_v22 = vrot.slane %v2399_v25, %v14698_v20  ;;  %v14726_v57 = vrot.slane %v2400_v38, %v14698_v20  ;;  %v14740_v26 = vpop.permute.xlu0 %1566  ;;  %v14765_v18 = vrot.slane %v2813_v62, %v14698_v20  ;;  %22043 = vst [vmem:[#allocation10_spill] sm:$0xff] %v14772_v61  ;;  %v3885_v38 = vcombine.low %v14545_v49, %v14677_v54 }
 0x352   : > { %v1569_v50 = vpop.permute.xlu1 %1568 }
 0x353   : > { %1742 = vrot.lane.b32.xlu0 %v14421_v34, %s13676_s23  ;;  %v2829_v39 = vcombine.low %v14629_v51, %v1569_v50  ;;  %v2830_v1 = vcombine.high %v14629_v51, %v1569_v50  ;;  %22042 = vst [vmem:[#allocation48_spill] sm:$0xff] %v14765_v18  ;;  %v3886_v50 = vcombine.high %v14545_v49, %v14677_v54 }
 0x354   : > { %1744 = vrot.lane.b32.xlu1 %v14425_v11, %s13676_s23  ;;  %v14811_v54 = vrot.slane %v3885_v38, %v14698_v20 }
 0x355   : > { %v1571_v48 = vpop.permute.xlu0 %1570  ;;  %v14777_v25 = vrot.slane %v2829_v39, %v14698_v20  ;;  %v14780_v51 = vrot.slane %v2830_v1, %v14698_v20  ;;  %v14806_v39 = vrot.slane %v3135_v7, %v14698_v20  ;;  %v3564_v1 = vcombine.low %v14541_v31, %v14679_v9 }
 0x356   : > { %v14760_v59 = vpop.permute.xlu1 %1572  ;;  %v3150_v24 = vcombine.low %v14637_v36, %v1571_v48  ;;  %v3151_v58 = vcombine.high %v14637_v36, %v1571_v48  ;;  %v14785_v36 = vrot.slane %v3134_v40, %v14698_v20  ;;  %22050 = vst [vmem:[#allocation17_spill] sm:$0xff] %v14811_v54  ;;  %v14820_v55 = vrot.slane %v3886_v50, %v14698_v20 }
 0x357   : > { %22041 = vst [vmem:[#allocation15_spill] sm:$0xff] %v14760_v59  ;;  %22044 = vst [vmem:[#allocation16_spill] sm:$0xff] %v14777_v25  ;;  %1746 = vrot.lane.b32.xlu0 %v14452_v53, %s13676_s23  ;;  %v4315_v50 = vcombine.low %v14559_v16, %v14685_v3  ;;  %v4316_v7 = vcombine.high %v14559_v16, %v14685_v3 }
 0x358   : > { %1748 = vrot.lane.b32.xlu1 %v14456_v44, %s13676_s23  ;;  %22045 = vst [vmem:[#allocation50_spill] sm:$0xff] %v14780_v51  ;;  %22046 = vst [vmem:[#allocation12_spill] sm:$0xff] %v14785_v36  ;;  %v14790_v17 = vrot.slane %v3150_v24, %v14698_v20  ;;  %v14799_v40 = vrot.slane %v3151_v58, %v14698_v20  ;;  %v3565_v24 = vcombine.high %v14541_v31, %v14679_v9 }
 0x359   : > { %v1575_v8 = vpop.permute.xlu0 %1574  ;;  %22049 = vst [vmem:[#allocation13_spill] sm:$0xff] %v14806_v39  ;;  %22052 = vst [vmem:[#allocation18_spill] sm:$0xff] %v14820_v55 }
 0x35a   : > { %22047 = vst [vmem:[#allocation35_spill] sm:$0xff] %v14790_v17  ;;  %v1577_v46 = vpop.permute.xlu1 %1576  ;;  %22048 = vst [vmem:[#allocation51_spill] sm:$0xff] %v14799_v40  ;;  %v3580_v42 = vcombine.low %v14657_v0, %v1575_v8  ;;  %v3581_v15 = vcombine.high %v14657_v0, %v1575_v8  ;;  %v14845_v0 = vrot.slane %v3564_v1, %v14698_v20 }
 0x35b   : > { %1750 = vrot.lane.b32.xlu0 %v14482_v14, %s13676_s23  ;;  %v3901_v62 = vcombine.low %v14655_v21, %v1577_v46  ;;  %v3902_v38 = vcombine.high %v14655_v21, %v1577_v46 }
 0x35c   : > { %1752 = vrot.lane.b32.xlu1 %v14486_v13, %s13676_s23  ;;  %22055 = vst [vmem:[#allocation28_spill] sm:$0xff] %v14845_v0  ;;  %v14851_v46 = vrot.slane %v3580_v42, %v14698_v20  ;;  %v14854_v3 = vrot.slane %v3581_v15, %v14698_v20  ;;  %v4637_v15 = vcombine.high %v14567_v45, %v14695_v19 }
 0x35d   : > { %v14817_v48 = vpop.permute.xlu0 %1578  ;;  %v14837_v5 = vrot.slane %v3901_v62, %v14698_v20  ;;  %v14840_v21 = vrot.slane %v3902_v38, %v14698_v20  ;;  %v14878_v38 = vrot.slane %v4316_v7, %v14698_v20 }
 0x35e   : > { %v1581_v58 = vpop.permute.xlu1 %1580  ;;  %22051 = vst [vmem:[#allocation19_spill] sm:$0xff] %v14817_v48  ;;  %22057 = vst [vmem:[#allocation22_spill] sm:$0xff] %v14851_v46 }
 0x35f   : > { %v4331_v32 = vcombine.low %v14661_v35, %v1581_v58  ;;  %v4332_v9 = vcombine.high %v14661_v35, %v1581_v58  ;;  %22053 = vst [vmem:[#allocation24_spill] sm:$0xff] %v14837_v5  ;;  %22054 = vst [vmem:[#allocation27_spill] sm:$0xff] %v14840_v21  ;;  %1754 = vrot.lane.b32.xlu0 %v14541_v31, %s13676_s23  ;;  %v14848_v35 = vrot.slane %v3565_v24, %v14698_v20 }
 0x360   : > { %1756 = vrot.lane.b32.xlu1 %v14545_v49, %s13676_s23  ;;  %22058 = vst [vmem:[#allocation29_spill] sm:$0xff] %v14854_v3  ;;  %v14875_v58 = vrot.slane %v4315_v50, %v14698_v20  ;;  %22063 = vst [vmem:[#allocation23_spill] sm:$0xff] %v14878_v38 }
 0x361   : > { %22056 = vst [vmem:[#allocation31_spill] sm:$0xff] %v14848_v35  ;;  %v1583_v62 = vpop.permute.xlu0 %1582  ;;  %v14863_v1 = vrot.slane %v4331_v32, %v14698_v20  ;;  %v14866_v24 = vrot.slane %v4332_v9, %v14698_v20  ;;  %v4636_v32 = vcombine.low %v14567_v45, %v14695_v19 }
 0x362   : > { %v14856_v8 = vpop.permute.xlu1 %1584  ;;  %22062 = vst [vmem:[#allocation41_spill] sm:$0xff] %v14875_v58  ;;  %v4652_v33 = vcombine.low %v14671_v23, %v1583_v62  ;;  %v4653_v60 = vcombine.high %v14671_v23, %v1583_v62  ;;  %v14914_v23 = vrot.slane %v4637_v15, %v14698_v20 }
 0x363   : > { %22059 = vst [vmem:[#allocation25_spill] sm:$0xff] %v14856_v8  ;;  %22060 = vst [vmem:[#allocation30_spill] sm:$0xff] %v14863_v1  ;;  %1758 = vrot.lane.b32.xlu0 %v14555_v41, %s13676_s23  ;;  %v14901_v4 = vrot.slane %v4636_v32, %v14698_v20 }
 0x364   : > { %22061 = vst [vmem:[#allocation40_spill] sm:$0xff] %v14866_v24  ;;  %1760 = vrot.lane.b32.xlu1 %v14559_v16, %s13676_s23  ;;  %v14904_v19 = vrot.slane %v4652_v33, %v14698_v20  ;;  %v14907_v50 = vrot.slane %v4653_v60, %v14698_v20  ;;  %22068 = vst [vmem:[#allocation43_spill] sm:$0xff] %v14914_v23 }
 0x365   : > { %v14886_v42 = vpop.permute.xlu0 %1598  ;;  %22064 = vst [vmem:[#allocation26_spill] sm:$0xff] %v14901_v4 }
 0x366   : > { %v14884_v9 = vpop.permute.xlu1 %1600  ;;  %22065 = vst [vmem:[#allocation32_spill] sm:$0xff] %v14904_v19  ;;  %22066 = vst [vmem:[#allocation33_spill] sm:$0xff] %v14907_v50 }
 0x367   : > { %1762 = vrot.lane.b32.xlu0 %v14567_v45, %s13676_s23 }
 0x368   : > { %1764 = vrot.lane.b32.xlu1 %v14571_v10, %s13676_s23 }
 0x369   : > { %v14911_v8 = vpop.permute.xlu0 %1602 }
 0x36a   : > { %v14909_v7 = vpop.permute.xlu1 %1604  ;;  %22067 = vst [vmem:[#allocation42_spill] sm:$0xff] %v14911_v8 }
 0x36b   : > { %1778 = vrot.lane.b32.xlu0 %v14421_v34, %s13677_s24 }
 0x36c   : > { %1780 = vrot.lane.b32.xlu1 %v14425_v11, %s13677_s24 }
 0x36d   : > { %v14924_v32 = vpop.permute.xlu0 %1606 }
 0x36e   : > { %v14922_v60 = vpop.permute.xlu1 %1608 }
 0x36f   : > { %22069 = vst [vmem:[#allocation44_spill] sm:$0xff] %v14922_v60  ;;  %1782 = vrot.lane.b32.xlu0 %v14452_v53, %s13677_s24 }
 0x370   : > { %1784 = vrot.lane.b32.xlu1 %v14456_v44, %s13677_s24 }
 0x371   : > { %v14930_v38 = vpop.permute.xlu0 %1610 }
 0x372   : > { %v14928_v15 = vpop.permute.xlu1 %1612 }
 0x373   : > { %1786 = vrot.lane.b32.xlu0 %v14482_v14, %s13677_s24 }
 0x374   : > { %1788 = vrot.lane.b32.xlu1 %v14486_v13, %s13677_s24 }
 0x375   : > { %v14936_v33 = vpop.permute.xlu0 %1614 }
 0x376   : > { %v14934_v62 = vpop.permute.xlu1 %1616  ;;  %22070 = vst [vmem:[#allocation45_spill] sm:$0xff] %v14936_v33 }
 0x377   : > { %1790 = vrot.lane.b32.xlu0 %v14541_v31, %s13677_s24 }
 0x378   : > { %1792 = vrot.lane.b32.xlu1 %v14545_v49, %s13677_s24 }
 0x379   : > { %v14942_v23 = vpop.permute.xlu0 %1618 }
 0x37a   : > { %v14940_v60 = vpop.permute.xlu1 %1620 }
 0x37b   : > { %22071 = vst [vmem:[#allocation53_spill] sm:$0xff] %v14940_v60  ;;  %1794 = vrot.lane.b32.xlu0 %v14555_v41, %s13677_s24 }
 0x37c   : > { %1796 = vrot.lane.b32.xlu1 %v14559_v16, %s13677_s24 }
 0x37d   : > { %v14948_v4 = vpop.permute.xlu0 %1634 }
 0x37e   : > { %v14946_v50 = vpop.permute.xlu1 %1636 }
 0x37f   : > { %1798 = vrot.lane.b32.xlu0 %v14567_v45, %s13677_s24 }
 0x380   : > { %1800 = vrot.lane.b32.xlu1 %v14571_v10, %s13677_s24  ;;  %s13691_s24 = smov 80  }
 0x381   : > { %v14954_v24 = vpop.permute.xlu0 %1638 }
 0x382   : > { %v14952_v19 = vpop.permute.xlu1 %1640  ;;  %22072 = vst [vmem:[#allocation54_spill] sm:$0xff] %v14954_v24 }
 0x383   : > { %1814 = vrot.lane.b32.xlu0 %v14421_v34, %s13678_s30 }
 0x384   : > { %1816 = vrot.lane.b32.xlu1 %v14425_v11, %s13678_s30 }
 0x385   : > { %v14960_v58 = vpop.permute.xlu0 %1642 }
 0x386   : > { %v14958_v60 = vpop.permute.xlu1 %1644 }
 0x387   : > { %22073 = vst [vmem:[#allocation55_spill] sm:$0xff] %v14958_v60  ;;  %1818 = vrot.lane.b32.xlu0 %v14452_v53, %s13678_s30 }
 0x388   : > { %1820 = vrot.lane.b32.xlu1 %v14456_v44, %s13678_s30 }
 0x389   : > { %v14966_v33 = vpop.permute.xlu0 %1646 }
 0x38a   : > { %v14964_v1 = vpop.permute.xlu1 %1648 }
 0x38b   : > { %1822 = vrot.lane.b32.xlu0 %v14482_v14, %s13678_s30 }
 0x38c   : > { %1824 = vrot.lane.b32.xlu1 %v14486_v13, %s13678_s30 }
 0x38d   : > { %v14972_v21 = vpop.permute.xlu0 %1650 }
 0x38e   : > { %v14970_v55 = vpop.permute.xlu1 %1652  ;;  %22074 = vst [vmem:[#allocation56_spill] sm:$0xff] %v14972_v21 }
 0x38f   : > { %1826 = vrot.lane.b32.xlu0 %v14541_v31, %s13678_s30 }
 0x390   : > { %1828 = vrot.lane.b32.xlu1 %v14545_v49, %s13678_s30 }
 0x391   : > { %v14978_v54 = vpop.permute.xlu0 %1654 }
 0x392   : > { %v14976_v60 = vpop.permute.xlu1 %1656 }
 0x393   : > { %22075 = vst [vmem:[#allocation57_spill] sm:$0xff] %v14976_v60  ;;  %1830 = vrot.lane.b32.xlu0 %v14555_v41, %s13678_s30 }
 0x394   : > { %1832 = vrot.lane.b32.xlu1 %v14559_v16, %s13678_s30 }
 0x395   : > { %v1671_v35 = vpop.permute.xlu0 %1670 }
 0x396   : > { %v1673_v5 = vpop.permute.xlu1 %1672  ;;  %v2095_v39 = vcombine.high %v14886_v42, %v1671_v35 }
 0x397   : > { %1834 = vrot.lane.b32.xlu0 %v14567_v45, %s13678_s30  ;;  %v2415_v0 = vcombine.low %v14884_v9, %v1673_v5  ;;  %v2416_v46 = vcombine.high %v14884_v9, %v1673_v5 }
 0x398   : > { %1836 = vrot.lane.b32.xlu1 %v14571_v10, %s13678_s30 }
 0x399   : > { %v14986_v21 = vpop.permute.xlu0 %1674  ;;  %v15033_v9 = vrot.slane %v2415_v0, %v14698_v20  ;;  %v15036_v61 = vrot.slane %v2416_v46, %v14698_v20  ;;  %v15058_v0 = vrot.slane %v2095_v39, %v14698_v20 }
 0x39a   : > { %v14984_v3 = vpop.permute.xlu1 %1676  ;;  %22076 = vst [vmem:[#allocation58_spill] sm:$0xff] %v14986_v21 }
 0x39b   : > { %1850 = vrot.lane.b32.xlu0 %v14421_v34, %s13679_s5  ;;  %22080 = vst [vmem:[#allocation62_spill] sm:$0xff] %v15036_v61  ;;  %22085 = vst [vmem:[#allocation67_spill] sm:$0xff] %v15058_v0  ;;  %v2845_v51 = vcombine.low %v14909_v7, %v14984_v3 }
 0x39c   : > { %1852 = vrot.lane.b32.xlu1 %v14425_v11, %s13679_s5 }
 0x39d   : > { %v14994_v30 = vpop.permute.xlu0 %1678 }
 0x39e   : > { %v14992_v60 = vpop.permute.xlu1 %1680 }
 0x39f   : > { %22077 = vst [vmem:[#allocation59_spill] sm:$0xff] %v14992_v60  ;;  %1854 = vrot.lane.b32.xlu0 %v14452_v53, %s13679_s5 }
 0x3a0   : > { %1856 = vrot.lane.b32.xlu1 %v14456_v44, %s13679_s5 }
 0x3a1   : > { %v15002_v8 = vpop.permute.xlu0 %1682 }
 0x3a2   : > { %v15000_v59 = vpop.permute.xlu1 %1684 }
 0x3a3   : > { %1858 = vrot.lane.b32.xlu0 %v14482_v14, %s13679_s5 }
 0x3a4   : > { %1860 = vrot.lane.b32.xlu1 %v14486_v13, %s13679_s5 }
 0x3a5   : > { %v15010_v60 = vpop.permute.xlu0 %1686 }
 0x3a6   : > { %v15008_v21 = vpop.permute.xlu1 %1688  ;;  %22078 = vst [vmem:[#allocation60_spill] sm:$0xff] %v15010_v60  ;;  %v2094_v60 = vcombine.low %v14886_v42, %v1671_v35 }
 0x3a7   : > { %1862 = vrot.lane.b32.xlu0 %v14541_v31, %s13679_s5 }
 0x3a8   : > { %1864 = vrot.lane.b32.xlu1 %v14545_v49, %s13679_s5 }
 0x3a9   : > { %v15018_v48 = vpop.permute.xlu0 %1690 }
 0x3aa   : > { %v15016_v43 = vpop.permute.xlu1 %1692 }
 0x3ab   : > { %22079 = vst [vmem:[#allocation61_spill] sm:$0xff] %v15016_v43  ;;  %1866 = vrot.lane.b32.xlu0 %v14555_v41, %s13679_s5 }
 0x3ac   : > { %1868 = vrot.lane.b32.xlu1 %v14559_v16, %s13679_s5 }
 0x3ad   : > { %v1707_v36 = vpop.permute.xlu0 %1706 }
 0x3ae   : > { %v1709_v40 = vpop.permute.xlu1 %1708  ;;  %v2110_v24 = vcombine.low %v14948_v4, %v1707_v36  ;;  %v2111_v5 = vcombine.high %v14948_v4, %v1707_v36  ;;  %v15055_v36 = vrot.slane %v2094_v60, %v14698_v20 }
 0x3af   : > { %v2431_v43 = vcombine.low %v14946_v50, %v1709_v40  ;;  %v2432_v17 = vcombine.high %v14946_v50, %v1709_v40  ;;  %1870 = vrot.lane.b32.xlu0 %v14567_v45, %s13679_s5  ;;  %v13680_v50 = vmov 1934713408  }
 0x3b0   : > { %1872 = vrot.lane.b32.xlu1 %v14571_v10, %s13679_s5  ;;  %v15047_v40 = vrot.slane %v2110_v24, %v14698_v20  ;;  %v15050_v4 = vrot.slane %v2111_v5, %v14698_v20  ;;  %22084 = vst [vmem:[#allocation66_spill] sm:$0xff] %v15055_v36  ;;  %v2129_v5 = vunpack.c.l.s4 %v13680_v50  ;;  %v3166_v50 = vcombine.low %v14924_v32, %v14994_v30 }
 0x3b1   : > { %v15041_v35 = vrot.slane %v2431_v43, %v14698_v20  ;;  %v15044_v42 = vrot.slane %v2432_v17, %v14698_v20  ;;  %v15060_v46 = vpop.permute.xlu0 %1710  ;;  %v2846_v17 = vcombine.high %v14909_v7, %v14984_v3 }
 0x3b2   : > { %22082 = vst [vmem:[#allocation64_spill] sm:$0xff] %v15047_v40  ;;  %22083 = vst [vmem:[#allocation65_spill] sm:$0xff] %v15050_v4  ;;  %v1713_v43 = vpop.permute.xlu1 %1712  ;;  %v2130_v36 = vunpack.c.0.s8 %v2129_v5  ;;  %v15085_v40 = vrot.slane %v2845_v51, %v14698_v20  ;;  %v3917_v51 = vcombine.low %v14928_v15, %v15000_v59 }
 0x3b3   : > { %22081 = vst [vmem:[#allocation63_spill] sm:$0xff] %v15044_v42  ;;  %1886 = vrot.lane.b32.xlu0 %v14421_v34, %s13681_s6  ;;  %v2861_v60 = vcombine.low %v14952_v19, %v1713_v43  ;;  %v2862_v39 = vcombine.high %v14952_v19, %v1713_v43  ;;  %v15092_v7 = vrot.slane %v2846_v17, %v14698_v20 }
 0x3b4   : > { %1888 = vrot.lane.b32.xlu1 %v14425_v11, %s13681_s6 }
 0x3b5   : > { %v1715_v61 = vpop.permute.xlu0 %1714  ;;  %22087 = vst [vmem:[#allocation69_spill] sm:$0xff] %v15092_v7  ;;  %v15097_v0 = vrot.slane %v2861_v60, %v14698_v20  ;;  %v15100_v19 = vrot.slane %v2862_v39, %v14698_v20  ;;  %v3596_v39 = vcombine.low %v14930_v38, %v15002_v8 }
 0x3b6   : > { %v15080_v24 = vpop.permute.xlu1 %1716  ;;  %v3182_v42 = vcombine.low %v14960_v58, %v1715_v61  ;;  %v3183_v3 = vcombine.high %v14960_v58, %v1715_v61  ;;  %v15105_v61 = vrot.slane %v3166_v50, %v14698_v20  ;;  %v4206_v50 = vcombine.low %v14555_v41, %v14687_v47 }
 0x3b7   : > { %22086 = vst [vmem:[#allocation68_spill] sm:$0xff] %v15080_v24  ;;  %v3167_v24 = vcombine.high %v14924_v32, %v14994_v30  ;;  %22088 = vst [vmem:[#allocation70_spill] sm:$0xff] %v15097_v0  ;;  %1890 = vrot.lane.b32.xlu0 %v14452_v53, %s13681_s6  ;;  %v3918_v32 = vcombine.high %v14928_v15, %v15000_v59  ;;  %v2704_v59 = vcombine.low %v14452_v53, %v14645_v29 }
 0x3b8   : > { %1892 = vrot.lane.b32.xlu1 %v14456_v44, %s13681_s6  ;;  %22089 = vst [vmem:[#allocation71_spill] sm:$0xff] %v15100_v19  ;;  %22090 = vst [vmem:[#allocation72_spill] sm:$0xff] %v15105_v61  ;;  %v15110_v58 = vrot.slane %v3182_v42, %v14698_v20  ;;  %v15119_v60 = vrot.slane %v3183_v3, %v14698_v20  ;;  %v15126_v42 = vsub.s32 %v2130_v36, %v13798_v6 }
 0x3b9   : > { %v1719_v30 = vpop.permute.xlu0 %1718  ;;  %v15131_v15 = vrot.slane %v3167_v24, %v14698_v20  ;;  %v15138_v3 = vrot.slane %v3917_v51, %v14698_v20  ;;  %v3597_v36 = vcombine.high %v14930_v38, %v15002_v8  ;;  %v15147_v24 = vrot.slane %v3918_v32, %v14698_v20 }
 0x3ba   : > { %22091 = vst [vmem:[#allocation73_spill] sm:$0xff] %v15110_v58  ;;  %v1721_v43 = vpop.permute.xlu1 %1720  ;;  %22092 = vst [vmem:[#allocation74_spill] sm:$0xff] %v15119_v60  ;;  %v3612_v6 = vcombine.low %v14966_v33, %v1719_v30  ;;  %v4347_v38 = vcombine.low %v14934_v62, %v15008_v21  ;;  %v4348_v32 = vcombine.high %v14934_v62, %v15008_v21 }
 0x3bb   : > { %22093 = vst [vmem:[#allocation75_spill] sm:$0xff] %v15126_v42  ;;  %22094 = vst [vmem:[#allocation76_spill] sm:$0xff] %v15131_v15  ;;  %1894 = vrot.lane.b32.xlu0 %v14482_v14, %s13681_s6  ;;  %v3933_v47 = vcombine.low %v14964_v1, %v1721_v43  ;;  %v3934_v51 = vcombine.high %v14964_v1, %v1721_v43  ;;  %v3613_v14 = vcombine.high %v14966_v33, %v1719_v30 }
 0x3bc   : > { %1896 = vrot.lane.b32.xlu1 %v14486_v13, %s13681_s6  ;;  %22095 = vst [vmem:[#allocation77_spill] sm:$0xff] %v15147_v24  ;;  %v15175_v33 = vrot.slane %v3597_v36, %v14698_v20  ;;  %v15178_v43 = vrot.slane %v3612_v6, %v14698_v20  ;;  %v4957_v6 = vcombine.low %v14571_v10, %v14693_v12 }
 0x3bd   : > { %v15144_v29 = vpop.permute.xlu0 %1722  ;;  %v15164_v17 = vrot.slane %v3933_v47, %v14698_v20  ;;  %v15167_v1 = vrot.slane %v3934_v51, %v14698_v20  ;;  %v15181_v21 = vrot.slane %v3613_v14, %v14698_v20  ;;  %v2712_v14 = vcombine.low %v14631_v63, %v14740_v26 }
 0x3be   : > { %v1725_v5 = vpop.permute.xlu1 %1724  ;;  %22097 = vst [vmem:[#allocation79_spill] sm:$0xff] %v15175_v33  ;;  %22098 = vst [vmem:[#allocation80_spill] sm:$0xff] %v15178_v43  ;;  %v15210_v12 = vrot.slane %v4347_v38, %v14698_v20  ;;  %v15213_v63 = vrot.slane %v4348_v32, %v14698_v20  ;;  %v2711_v26 = vrot.slane %v2704_v59, %v14698_v20 }
 0x3bf   : > { %v4363_v61 = vcombine.low %v14970_v55, %v1725_v5  ;;  %v4364_v8 = vcombine.high %v14970_v55, %v1725_v5  ;;  %1898 = vrot.lane.b32.xlu0 %v14541_v31, %s13681_s6  ;;  %v15172_v55 = vrot.slane %v3596_v39, %v14698_v20  ;;  %22099 = vst [vmem:[#allocation81_spill] sm:$0xff] %v15181_v21 }
 0x3c0   : > { %1900 = vrot.lane.b32.xlu1 %v14545_v49, %s13681_s6  ;;  %v15219_v47 = vrot.slane %v4206_v50, %v14698_v20  ;;  %v4668_v5 = vcombine.low %v14942_v23, %v15018_v48  ;;  %v2126_v38 = vcombine.low %v14735_v28, %v14729_v2  ;;  %v4669_v32 = vcombine.high %v14942_v23, %v15018_v48 }
 0x3c1   : > { %22096 = vst [vmem:[#allocation78_spill] sm:$0xff] %v15172_v55  ;;  %v1727_v30 = vpop.permute.xlu0 %1726  ;;  %v15190_v39 = vrot.slane %v4363_v61, %v14698_v20  ;;  %v15193_v36 = vrot.slane %v4364_v8, %v14698_v20  ;;  %v2447_v61 = vcombine.low %v14713_v27, %v14723_v22  ;;  %v2463_v8 = vcombine.low %v14716_v52, %v14726_v57 }
 0x3c2   : > { %v15183_v62 = vpop.permute.xlu1 %1728  ;;  %v15236_v50 = vrot.slane %v4957_v6, %v14698_v20  ;;  %v4685_v24 = vcombine.high %v14978_v54, %v1727_v30  ;;  %v22105_v23 = vcombine.high %v14713_v27, %v14723_v22 }
 0x3c3   : > { %22100 = vst [vmem:[#allocation82_spill] sm:$0xff] %v15183_v62  ;;  %1902 = vrot.lane.b32.xlu0 %v14555_v41, %s13681_s6  ;;  %v15244_v48 = vrot.slane %v2447_v61, %v15126_v42  ;;  %v15253_v6 = vrot.slane %v2463_v8, %v15126_v42  ;;  %v15266_v61 = vrot.slane %v4668_v5, %v14698_v20  ;;  %v22116_v62 = vld [vmem:[#allocation10_spill] sm:$0xff] }
 0x3c4   : > { %1904 = vrot.lane.b32.xlu1 %v14559_v16, %s13681_s6  ;;  %22103 = vst [vmem:[#allocation85_spill] sm:$0xff] %v15236_v50  ;;  %v2719_v16 = vrot.slane %v2712_v14, %v14698_v20  ;;  %v15250_v59 = vrot.slane %v22105_v23, %v15126_v42  ;;  %v2142_v14 = vcombine.low %v14738_v37, %v14732_v56 }
 0x3c5   : > { %v15233_v41 = vpop.permute.xlu0 %1742  ;;  %22104 = vst [vmem:[#allocation86_spill] sm:$0xff] %v15244_v48  ;;  %22107 = vst [vmem:[#allocation88_spill] sm:$0xff] %v15253_v6  ;;  %v15272_v22 = vrot.slane %v4685_v24, %v14698_v20  ;;  %v15277_v23 = vrot.slane %v2126_v38, %v15126_v42  ;;  %v2878_v5 = vcombine.high %v14765_v18, %v14777_v25  ;;  %v22115_v24 = vld [vmem:[#allocation50_spill] sm:$0xff]  ;;  %v22145_v25 = vld [vmem:[#allocation27_spill] sm:$0xff] }
 0x3c6   : > { %v15223_v51 = vpop.permute.xlu1 %1744  ;;  %22102 = vst [vmem:[#allocation84_spill] sm:$0xff] %v15233_v41  ;;  %22106 = vst [vmem:[#allocation87_spill] sm:$0xff] %v15250_v59  ;;  %v2736_v41 = vcombine.low %v2711_v26, %v2719_v16  ;;  %v22117_v38 = vld [vmem:[#allocation54_spill] sm:$0xff]  ;;  %v22122_v59 = vld [vmem:[#allocation13_spill] sm:$0xff] }
 0x3c7   : > { %22101 = vst [vmem:[#allocation83_spill] sm:$0xff] %v15223_v51  ;;  %v4684_v51 = vcombine.low %v14978_v54, %v1727_v30  ;;  %1906 = vrot.lane.b32.xlu0 %v14567_v45, %s13681_s6  ;;  %v22108_v54 = vcombine.high %v14716_v52, %v14726_v57  ;;  %22111 = vst [vmem:[#allocation91_spill] sm:$0xff] %v15277_v23  ;;  %v22112_v52 = vcombine.high %v14735_v28, %v14729_v2  ;;  %v22127_v23 = vld [vmem:[#allocation19_spill] sm:$0xff] }
 0x3c8   : > { %1908 = vrot.lane.b32.xlu1 %v14571_v10, %s13681_s6  ;;  %v2728_v50 = vcombine.low %v22117_v38, %v15060_v46  ;;  %v15301_v28 = vrot.slane %v2142_v14, %v15126_v42  ;;  %v22123_v46 = vcombine.high %v14738_v37, %v14732_v56  ;;  %v22125_v14 = vld [vmem:[#allocation22_spill] sm:$0xff]  ;;  %v22126_v38 = vld [vmem:[#allocation28_spill] sm:$0xff]  ;;  %v2479_v56 = vcombine.low %v15033_v9, %v15041_v35  ;;  %v22136_v37 = vld [vmem:[#allocation67_spill] sm:$0xff] }
 0x3c9   : > { %v15263_v30 = vrot.slane %v22108_v54, %v15126_v42  ;;  %v15269_v27 = vrot.slane %v4684_v51, %v14698_v20  ;;  %v15283_v57 = vrot.slane %v22112_v52, %v15126_v42  ;;  %v15288_v51 = vrot.slane %v4669_v32, %v14698_v20  ;;  %v15290_v54 = vpop.permute.xlu0 %1746  ;;  %v22119_v32 = vld [vmem:[#allocation35_spill] sm:$0xff]  ;;  %v22120_v52 = vld [vmem:[#allocation12_spill] sm:$0xff] }
 0x3ca   : > { %v15274_v8 = vpop.permute.xlu1 %1748  ;;  %22114 = vst [vmem:[#allocation93_spill] sm:$0xff] %v15290_v54  ;;  %22118 = vst [vmem:[#allocation54_spill] sm:$0xff] %v15301_v28  ;;  %v3199_v54 = vcombine.high %v22120_v52, %v22119_v32  ;;  %v15315_v26 = vrot.slane %v22123_v46, %v15126_v42  ;;  %v3628_v2 = vcombine.low %v22126_v38, %v22125_v14  ;;  %v22128_v32 = vld [vmem:[#allocation49_spill] sm:$0xff] }
 0x3cb   : > { %22109 = vst [vmem:[#allocation89_spill] sm:$0xff] %v15263_v30  ;;  %22110 = vst [vmem:[#allocation90_spill] sm:$0xff] %v15274_v8  ;;  %v2894_v8 = vcombine.high %v22116_v62, %v22115_v24  ;;  %v22121_v30 = vld [vmem:[#allocation51_spill] sm:$0xff]  ;;  %1922 = vrot.lane.b32.xlu0 %v14421_v34, %s13682_s8  ;;  %v4214_v52 = vcombine.low %v22128_v32, %v22127_v23  ;;  %v22129_v24 = vld [vmem:[#allocation58_spill] sm:$0xff]  ;;  %v2174_v46 = vcombine.low %v22136_v37, %v15050_v4 }
 0x3cc   : > { %22113 = vst [vmem:[#allocation92_spill] sm:$0xff] %v15283_v57  ;;  %1924 = vrot.lane.b32.xlu1 %v14425_v11, %s13682_s8  ;;  %v3215_v57 = vcombine.high %v22122_v59, %v22121_v30  ;;  %22124 = vst [vmem:[#allocation94_spill] sm:$0xff] %v15315_v26  ;;  %v22130_v30 = vld [vmem:[#allocation42_spill] sm:$0xff]  ;;  %v22134_v34 = vld [vmem:[#allocation29_spill] sm:$0xff]  ;;  %v15336_v23 = vrot.slane %v2878_v5, %v15126_v42  ;;  %v2735_v32 = vrot.slane %v2728_v50, %v14698_v20 }
 0x3cd   : > { %v2720_v59 = vcombine.low %v22130_v30, %v22129_v24  ;;  %v22135_v11 = vld [vmem:[#allocation31_spill] sm:$0xff]  ;;  %v15333_v14 = vpop.permute.xlu0 %1750  ;;  %v15339_v30 = vrot.slane %v2894_v8, %v15126_v42  ;;  %v15342_v24 = vrot.slane %v2736_v41, %v15126_v42  ;;  %v15348_v18 = vrot.slane %v3199_v54, %v15126_v42  ;;  %v22144_v5 = vld [vmem:[#allocation17_spill] sm:$0xff]  ;;  %v22146_v8 = vld [vmem:[#allocation18_spill] sm:$0xff] }
 0x3ce   : > { %v15323_v62 = vpop.permute.xlu1 %1752  ;;  %v3644_v45 = vcombine.low %v22135_v11, %v22134_v34  ;;  %22137 = vst [vmem:[#allocation49_spill] sm:$0xff] %v15333_v14  ;;  %22138 = vst [vmem:[#allocation58_spill] sm:$0xff] %v15336_v23  ;;  %v22143_v14 = vld [vmem:[#allocation24_spill] sm:$0xff]  ;;  %v15360_v41 = vrot.slane %v3628_v2, %v15126_v42  ;;  %v15363_v50 = vrot.slane %v4214_v52, %v14698_v20  ;;  %v22152_v26 = vld [vmem:[#allocation45_spill] sm:$0xff] }
 0x3cf   : > { %22131 = vst [vmem:[#allocation19_spill] sm:$0xff] %v15323_v62  ;;  %22139 = vst [vmem:[#allocation42_spill] sm:$0xff] %v15339_v30  ;;  %v15351_v62 = vrot.slane %v3215_v57, %v15126_v42  ;;  %1926 = vrot.lane.b32.xlu0 %v14452_v53, %s13682_s8  ;;  %v2727_v54 = vrot.slane %v2720_v59, %v14698_v20  ;;  %v22148_v57 = vld [vmem:[#allocation56_spill] sm:$0xff]  ;;  %v15376_v53 = vrot.slane %v2479_v56, %v15126_v42  ;;  %v22156_v59 = vld [vmem:[#allocation63_spill] sm:$0xff] }
 0x3d0   : > { %22140 = vst [vmem:[#allocation95_spill] sm:$0xff] %v15342_v24  ;;  %1928 = vrot.lane.b32.xlu1 %v14456_v44, %s13682_s8  ;;  %22141 = vst [vmem:[#allocation96_spill] sm:$0xff] %v15348_v18  ;;  %v4230_v11 = vcombine.low %v22148_v57, %v15144_v29  ;;  %v15371_v16 = vrot.slane %v3644_v45, %v15126_v42  ;;  %v22151_v34 = vld [vmem:[#allocation60_spill] sm:$0xff]  ;;  %v15379_v2 = vrot.slane %v2174_v46, %v15126_v42  ;;  %v22157_v4 = vld [vmem:[#allocation62_spill] sm:$0xff] }
 0x3d1   : > { %22142 = vst [vmem:[#allocation97_spill] sm:$0xff] %v15351_v62  ;;  %22147 = vst [vmem:[#allocation24_spill] sm:$0xff] %v15360_v41  ;;  %v4222_v44 = vcombine.low %v22152_v26, %v22151_v34  ;;  %v15381_v52 = vpop.permute.xlu0 %1754  ;;  %v2495_v37 = vcombine.low %v22157_v4, %v22156_v59  ;;  %v2910_v29 = vcombine.high %v15085_v40, %v15097_v0  ;;  %v22158_v34 = vld [vmem:[#allocation72_spill] sm:$0xff] }
 0x3d2   : > { %v15368_v38 = vpop.permute.xlu1 %1756  ;;  %22150 = vst [vmem:[#allocation27_spill] sm:$0xff] %v15371_v16  ;;  %22153 = vst [vmem:[#allocation18_spill] sm:$0xff] %v15376_v53  ;;  %v2926_v45 = vcombine.high %v15092_v7, %v15100_v19  ;;  %v2744_v57 = vcombine.low %v2727_v54, %v2735_v32  ;;  %v3231_v26 = vcombine.high %v22158_v34, %v15110_v58  ;;  %v22160_v19 = vld [vmem:[#allocation30_spill] sm:$0xff]  ;;  %v22161_v32 = vld [vmem:[#allocation41_spill] sm:$0xff] }
 0x3d3   : > { %22149 = vst [vmem:[#allocation17_spill] sm:$0xff] %v15368_v38  ;;  %22154 = vst [vmem:[#allocation56_spill] sm:$0xff] %v15379_v2  ;;  %v3247_v56 = vcombine.high %v15131_v15, %v15119_v60  ;;  %v3660_v46 = vcombine.low %v15172_v55, %v15178_v43  ;;  %v22159_v38 = vld [vmem:[#allocation46_spill] sm:$0xff]  ;;  %v4380_v54 = vcombine.high %v22161_v32, %v22160_v19  ;;  %v22162_v7 = vld [vmem:[#allocation40_spill] sm:$0xff] }
 0x3d4   : > { %22155 = vst [vmem:[#allocation60_spill] sm:$0xff] %v15381_v52  ;;  %1932 = vrot.lane.b32.xlu1 %v14486_v13, %s13682_s8  ;;  %v3676_v52 = vcombine.low %v15175_v33, %v15181_v21  ;;  %1930 = vrot.lane.b32.xlu0 %v22159_v38, %s13682_s8  ;;  %v22163_v13 = vld [vmem:[#allocation23_spill] sm:$0xff]  ;;  %v4238_v58 = vcombine.low %v15219_v47, %v15363_v50  ;;  %v22165_v43 = vld [vmem:[#allocation32_spill] sm:$0xff]  ;;  %v22166_v55 = vld [vmem:[#allocation26_spill] sm:$0xff] }
 0x3d5   : > { %v4396_v0 = vcombine.high %v22163_v13, %v22162_v7  ;;  %v4237_v60 = vrot.slane %v4230_v11, %v14698_v20  ;;  %v4701_v34 = vcombine.high %v22166_v55, %v22165_v43  ;;  %v4229_v21 = vrot.slane %v4222_v44, %v14698_v20  ;;  %v15413_v33 = vpop.permute.xlu0 %1758  ;;  %v22183_v55 = vld [vmem:[#allocation9_spill] sm:$0xff] }
 0x3d6   : > { %v15408_v15 = vpop.permute.xlu1 %1760  ;;  %22167 = vst [vmem:[#allocation63_spill] sm:$0xff] %v15413_v33  ;;  %v15417_v38 = vcombine.high %v15301_v28, %v15379_v2  ;;  %v15421_v7 = vcombine.high %v15244_v48, %v15376_v53  ;;  %v15424_v47 = vrot.slane %v2495_v37, %v15126_v42  ;;  %v15427_v11 = vrot.slane %v2910_v29, %v15126_v42  ;;  %v22181_v53 = vld [vmem:[#allocation43_spill] sm:$0xff] }
 0x3d7   : > { %22164 = vst [vmem:[#allocation45_spill] sm:$0xff] %v15408_v15  ;;  %v15430_v50 = vrot.slane %v2926_v45, %v15126_v42  ;;  %v15433_v44 = vrot.slane %v2744_v57, %v15126_v42  ;;  %v15444_v37 = vrot.slane %v3660_v46, %v15126_v42  ;;  %v15447_v29 = vrot.slane %v3676_v52, %v15126_v42  ;;  %v22178_v57 = vld [vmem:[#allocation77_spill] sm:$0xff] }
 0x3d8   : > { %22168 = vst [vmem:[#allocation62_spill] sm:$0xff] %v15417_v38  ;;  %22169 = vst [vmem:[#allocation30_spill] sm:$0xff] %v15421_v7  ;;  %1936 = vrot.lane.b32.xlu1 %v14545_v49, %s13682_s8  ;;  %v15438_v38 = vrot.slane %v3231_v26, %v15126_v42  ;;  %v15441_v7 = vrot.slane %v3247_v56, %v15126_v42  ;;  %1934 = vrot.lane.b32.xlu0 %v14541_v31, %s13682_s8  ;;  %v22180_v46 = vld [vmem:[#allocation33_spill] sm:$0xff] }
 0x3d9   : > { %22170 = vst [vmem:[#allocation41_spill] sm:$0xff] %v15424_v47  ;;  %22171 = vst [vmem:[#allocation23_spill] sm:$0xff] %v15427_v11  ;;  %v3981_v45 = vcombine.low %v15138_v3, %v15164_v17  ;;  %v3997_v33 = vcombine.low %v22178_v57, %v15167_v1  ;;  %v4428_v26 = vcombine.high %v15213_v63, %v15193_v36  ;;  %v15467_v43 = vpop.permute.xlu0 %1762 }
 0x3da   : > { %22172 = vst [vmem:[#allocation98_spill] sm:$0xff] %v15430_v50  ;;  %22173 = vst [vmem:[#allocation99_spill] sm:$0xff] %v15433_v44  ;;  %v4246_v56 = vcombine.low %v4229_v21, %v4237_v60  ;;  %v15457_v48 = vpop.permute.xlu1 %1764  ;;  %v4717_v28 = vcombine.high %v22181_v53, %v22180_v46  ;;  %v4412_v52 = vcombine.high %v15210_v12, %v15190_v39 }
 0x3db   : > { %22174 = vst [vmem:[#allocation100_spill] sm:$0xff] %v15438_v38  ;;  %22175 = vst [vmem:[#allocation101_spill] sm:$0xff] %v15441_v7  ;;  %v4733_v2 = vcombine.high %v15266_v61, %v15269_v27  ;;  %v4749_v15 = vcombine.high %v15288_v51, %v15272_v22  ;;  %v15473_v60 = vcombine.high %v15253_v6, %v15424_v47  ;;  %v22282_v47 = vld [vmem:[#allocation81_spill] sm:$0xff] }
 0x3dc   : > { %22176 = vst [vmem:[#allocation102_spill] sm:$0xff] %v15444_v37  ;;  %22177 = vst [vmem:[#allocation103_spill] sm:$0xff] %v15447_v29  ;;  %1940 = vrot.lane.b32.xlu1 %v22183_v55, %s13682_s8  ;;  %v15477_v21 = vcombine.high %v15342_v24, %v15433_v44  ;;  %v15485_v46 = vcombine.high %v15339_v30, %v15430_v50  ;;  %v15491_v55 = vcombine.high %v15348_v18, %v15438_v38  ;;  %v22211_v18 = vld [vmem:[#allocation11_spill] sm:$0xff] }
 0x3dd   : > { %22179 = vst [vmem:[#allocation77_spill] sm:$0xff] %v15457_v48  ;;  %22182 = vst [vmem:[#allocation43_spill] sm:$0xff] %v15467_v43  ;;  %v15481_v48 = vcombine.high %v15336_v23, %v15427_v11  ;;  %v22188_v43 = vld [vmem:[#allocation47_spill] sm:$0xff]  ;;  %v15509_v30 = vrot.slane %v3997_v33, %v15126_v42  ;;  %v15529_v33 = vrot.slane %v4733_v2, %v15126_v42  ;;  %v22208_v2 = vld [vmem:[#allocation66_spill] sm:$0xff] }
 0x3de   : > { %22184 = vst [vmem:[#allocation104_spill] sm:$0xff] %v15473_v60  ;;  %22185 = vst [vmem:[#allocation105_spill] sm:$0xff] %v15477_v21  ;;  %1938 = vrot.lane.b32.xlu0 %v22188_v43, %s13682_s8  ;;  %v15495_v60 = vcombine.high %v15351_v62, %v15441_v7  ;;  %v15499_v21 = vcombine.high %v15360_v41, %v15444_v37  ;;  %v15515_v62 = vrot.slane %v4246_v56, %v15126_v42  ;;  %v22207_v41 = vld [vmem:[#allocation64_spill] sm:$0xff]  ;;  %v22210_v7 = vld [vmem:[#allocation25_spill] sm:$0xff] }
 0x3df   : > { %22186 = vst [vmem:[#allocation106_spill] sm:$0xff] %v15481_v48  ;;  %22187 = vst [vmem:[#allocation107_spill] sm:$0xff] %v15485_v46  ;;  %v15503_v48 = vcombine.high %v15371_v16, %v15447_v29  ;;  %v15506_v46 = vrot.slane %v3981_v45, %v15126_v42  ;;  %v15526_v45 = vrot.slane %v4412_v52, %v15126_v42 }
 0x3e0   : > { %22189 = vst [vmem:[#allocation47_spill] sm:$0xff] %v15491_v55  ;;  %22190 = vst [vmem:[#allocation108_spill] sm:$0xff] %v15495_v60  ;;  %v15512_v55 = vrot.slane %v4428_v26, %v15126_v42  ;;  %v15517_v60 = vpop.permute.xlu1 %1780  ;;  %v15532_v26 = vrot.slane %v4749_v15, %v15126_v42  ;;  %v22203_v56 = vcombine.low %v22146_v8, %v22145_v25  ;;  %1944 = vrot.lane.b32.xlu1 %v14571_v10, %s13682_s8 }
 0x3e1   : > { %22191 = vst [vmem:[#allocation109_spill] sm:$0xff] %v15499_v21  ;;  %22192 = vst [vmem:[#allocation110_spill] sm:$0xff] %v15503_v48  ;;  %v22197_v21 = vcombine.low %v22144_v5, %v22143_v14  ;;  %v15534_v48 = vpop.permute.xlu0 %1778  ;;  %v15546_v52 = vrot.slane %v4238_v58, %v15126_v42  ;;  %v2158_v37 = vcombine.low %v22208_v2, %v22207_v41  ;;  %v22214_v58 = vld [vmem:[#allocation34_spill] sm:$0xff] }
 0x3e2   : > { %22193 = vst [vmem:[#allocation111_spill] sm:$0xff] %v15506_v46  ;;  %22194 = vst [vmem:[#allocation112_spill] sm:$0xff] %v15509_v30  ;;  %v15540_v29 = vrot.slane %v22203_v56, %v15126_v42  ;;  %v15553_v15 = vrot.slane %v4380_v54, %v15126_v42  ;;  %v4965_v38 = vcombine.low %v22211_v18, %v22210_v7  ;;  %1942 = vrot.lane.b32.xlu0 %v22214_v58, %s13682_s8 }
 0x3e3   : > { %22195 = vst [vmem:[#allocation113_spill] sm:$0xff] %v15512_v55  ;;  %22196 = vst [vmem:[#allocation114_spill] sm:$0xff] %v15515_v62  ;;  %v15523_v16 = vrot.slane %v22197_v21, %v15126_v42  ;;  %v15543_v21 = vrot.slane %v4396_v0, %v15126_v42  ;;  %v15558_v56 = vrot.slane %v4701_v34, %v15126_v42  ;;  %v22221_v34 = vld [vmem:[#allocation57_spill] sm:$0xff] }
 0x3e4   : > { %22199 = vst [vmem:[#allocation116_spill] sm:$0xff] %v15526_v45  ;;  %22200 = vst [vmem:[#allocation117_spill] sm:$0xff] %v15529_v33  ;;  %v15561_v0 = vrot.slane %v4717_v28, %v15126_v42  ;;  %v15565_v50 = vpop.permute.xlu1 %1784  ;;  %v15573_v54 = vcombine.high %v15540_v29, %v15509_v30  ;;  %v15577_v18 = vcombine.high %v15546_v52, %v15515_v62  ;;  %v22220_v28 = vld [vmem:[#allocation82_spill] sm:$0xff]  ;;  %v22253_v62 = vld [vmem:[#allocation53_spill] sm:$0xff] }
 0x3e5   : > { %22198 = vst [vmem:[#allocation115_spill] sm:$0xff] %v15523_v16  ;;  %22201 = vst [vmem:[#allocation118_spill] sm:$0xff] %v15532_v26  ;;  %v15569_v23 = vcombine.high %v15523_v16, %v15506_v46  ;;  %v15581_v7 = vcombine.high %v15543_v21, %v15512_v55  ;;  %v4981_v11 = vcombine.low %v22221_v34, %v22220_v28  ;;  %v15585_v24 = vpop.permute.xlu0 %1782 }
 0x3e6   : > { %22202 = vst [vmem:[#allocation119_spill] sm:$0xff] %v15534_v48  ;;  %22204 = vst [vmem:[#allocation120_spill] sm:$0xff] %v15540_v29  ;;  %v15606_v28 = vrot.slane %v2158_v37, %v15126_v42  ;;  %v22228_v34 = vcombine.high %v22208_v2, %v22207_v41  ;;  %v22234_v41 = vld [vmem:[#allocation70_spill] sm:$0xff] }
 0x3e7   : > { %22205 = vst [vmem:[#allocation121_spill] sm:$0xff] %v15543_v21  ;;  %22206 = vst [vmem:[#allocation122_spill] sm:$0xff] %v15546_v52  ;;  %v22235_v2 = vcombine.low %v15085_v40, %v22234_v41  ;;  %v22244_v40 = vld [vmem:[#allocation16_spill] sm:$0xff]  ;;  %v22252_v52 = vld [vmem:[#allocation61_spill] sm:$0xff] }
 0x3e8   : > { %22209 = vst [vmem:[#allocation64_spill] sm:$0xff] %v15553_v15  ;;  %22212 = vst [vmem:[#allocation66_spill] sm:$0xff] %v15558_v56  ;;  %v4973_v29 = vcombine.low %v22253_v62, %v22252_v52  ;;  %v15668_v30 = vpop.permute.xlu1 %1788  ;;  %v22260_v62 = vld [vmem:[#allocation37_spill] sm:$0xff]  ;;  %v22261_v52 = vld [vmem:[#allocation91_spill] sm:$0xff] }
 0x3e9   : > { %22213 = vst [vmem:[#allocation25_spill] sm:$0xff] %v15561_v0  ;;  %22215 = vst [vmem:[#allocation11_spill] sm:$0xff] %v15565_v50 }
 0x3ea   : > { %22216 = vst [vmem:[#allocation34_spill] sm:$0xff] %v15569_v23  ;;  %22217 = vst [vmem:[#allocation123_spill] sm:$0xff] %v15573_v54  ;;  %v15589_v23 = vcombine.high %v15553_v15, %v15526_v45  ;;  %v15593_v54 = vcombine.high %v15558_v56, %v15529_v33  ;;  %v22230_v56 = vld [vmem:[#allocation65_spill] sm:$0xff]  ;;  %v22249_v45 = vld [vmem:[#allocation12_spill] sm:$0xff] }
 0x3eb   : > { %22218 = vst [vmem:[#allocation124_spill] sm:$0xff] %v15577_v18  ;;  %22219 = vst [vmem:[#allocation125_spill] sm:$0xff] %v15581_v7  ;;  %v15597_v18 = vcombine.high %v15561_v0, %v15532_v26  ;;  %v22226_v7 = vcombine.high %v15033_v9, %v15041_v35  ;;  %v22232_v9 = vld [vmem:[#allocation21_spill] sm:$0xff]  ;;  %v22233_v35 = vcombine.high %v22157_v4, %v22156_v59  ;;  %v22239_v26 = vld [vmem:[#allocation72_spill] sm:$0xff] }
 0x3ec   : > { %22222 = vst [vmem:[#allocation82_spill] sm:$0xff] %v15585_v24  ;;  %22223 = vst [vmem:[#allocation57_spill] sm:$0xff] %v15589_v23  ;;  %v15612_v23 = vrot.slane %v22228_v34, %v15126_v42  ;;  %1960 = vrot.lane.b32.xlu1 %v22232_v9, %s13683_s9  ;;  %v22240_v33 = vld [vmem:[#allocation73_spill] sm:$0xff]  ;;  %v22242_v4 = vld [vmem:[#allocation20_spill] sm:$0xff] }
 0x3ed   : > { %22224 = vst [vmem:[#allocation126_spill] sm:$0xff] %v15593_v54  ;;  %22225 = vst [vmem:[#allocation127_spill] sm:$0xff] %v15597_v18  ;;  %v15603_v21 = vrot.slane %v22226_v7, %v15126_v42  ;;  %v22229_v54 = vld [vmem:[#allocation67_spill] sm:$0xff]  ;;  %v15626_v37 = vrot.slane %v22233_v35, %v15126_v42  ;;  %v15632_v7 = vrot.slane %v22235_v2, %v15126_v42  ;;  %1958 = vrot.lane.b32.xlu0 %v22242_v4, %s13683_s9  ;;  %v22243_v59 = vld [vmem:[#allocation48_spill] sm:$0xff] }
 0x3ee   : > { %22227 = vst [vmem:[#allocation128_spill] sm:$0xff] %v15606_v28  ;;  %v22231_v0 = vcombine.high %v22229_v54, %v22230_v56  ;;  %v22236_v56 = vld [vmem:[#allocation69_spill] sm:$0xff]  ;;  %v22241_v55 = vcombine.low %v22239_v26, %v22240_v33  ;;  %v22245_v35 = vcombine.low %v22243_v59, %v22244_v40  ;;  %v22246_v2 = vld [vmem:[#allocation10_spill] sm:$0xff]  ;;  %v22250_v33 = vld [vmem:[#allocation35_spill] sm:$0xff] }
 0x3ef   : > { %22254 = vst [vmem:[#allocation67_spill] sm:$0xff] %v15668_v30  ;;  %v22255_v59 = vld [vmem:[#allocation13_spill] sm:$0xff]  ;;  %v22256_v40 = vld [vmem:[#allocation51_spill] sm:$0xff]  ;;  %v22279_v30 = vld [vmem:[#allocation80_spill] sm:$0xff] }
 0x3f0   : > { %v15618_v18 = vrot.slane %v22231_v0, %v15126_v42  ;;  %v22237_v0 = vld [vmem:[#allocation71_spill] sm:$0xff]  ;;  %v15644_v15 = vrot.slane %v22241_v55, %v15126_v42  ;;  %v15652_v41 = vrot.slane %v22245_v35, %v15126_v42  ;;  %v22251_v55 = vcombine.low %v22249_v45, %v22250_v33  ;;  %v15684_v33 = vpop.permute.xlu0 %1786  ;;  %1964 = vrot.lane.b32.xlu1 %v22260_v62, %s13683_s9 }
 0x3f1   : > { %v22238_v54 = vcombine.low %v22236_v56, %v22237_v0  ;;  %v22247_v56 = vld [vmem:[#allocation50_spill] sm:$0xff]  ;;  %v22257_v35 = vcombine.low %v22255_v59, %v22256_v40  ;;  %v4972_v45 = vrot.slane %v4965_v38, %v14698_v20  ;;  %22259 = vst [vmem:[#allocation65_spill] sm:$0xff] %v15684_v33  ;;  %v22263_v59 = vld [vmem:[#allocation92_spill] sm:$0xff]  ;;  %v22267_v38 = vld [vmem:[#allocation87_spill] sm:$0xff] }
 0x3f2   : > { %v22248_v0 = vcombine.low %v22246_v2, %v22247_v56  ;;  %v15664_v26 = vrot.slane %v22251_v55, %v15126_v42  ;;  %v22258_v2 = vcombine.high %v22144_v5, %v22143_v14  ;;  %v15690_v55 = vcombine.low %v22261_v52, %v15606_v28  ;;  %v22265_v14 = vld [vmem:[#allocation94_spill] sm:$0xff]  ;;  %v22275_v52 = vld [vmem:[#allocation76_spill] sm:$0xff] }
 0x3f3   : > { %v15638_v34 = vrot.slane %v22238_v54, %v15126_v42  ;;  %v15674_v16 = vrot.slane %v22257_v35, %v15126_v42  ;;  %v15694_v40 = vcombine.low %v22263_v59, %v15612_v23  ;;  %v15698_v5 = vcombine.low %v22265_v14, %v15618_v18  ;;  %v22269_v35 = vld [vmem:[#allocation36_spill] sm:$0xff]  ;;  %v22276_v28 = vld [vmem:[#allocation74_spill] sm:$0xff] }
 0x3f4   : > { %v15658_v54 = vrot.slane %v22248_v0, %v15126_v42  ;;  %v15680_v56 = vrot.slane %v22258_v2, %v15126_v42  ;;  %v4988_v0 = vrot.slane %v4981_v11, %v14698_v20  ;;  %22262 = vst [vmem:[#allocation21_spill] sm:$0xff] %v15690_v55  ;;  %v15702_v11 = vcombine.low %v22267_v38, %v15603_v21  ;;  %v22270_v2 = vld [vmem:[#allocation89_spill] sm:$0xff] }
 0x3f5   : > { %22264 = vst [vmem:[#allocation70_spill] sm:$0xff] %v15694_v40  ;;  %22266 = vst [vmem:[#allocation69_spill] sm:$0xff] %v15698_v5  ;;  %1962 = vrot.lane.b32.xlu0 %v22269_v35, %s13683_s9  ;;  %v15708_v46 = vcombine.low %v22270_v2, %v15626_v37  ;;  %v15712_v55 = vcombine.low %v15652_v41, %v15632_v7  ;;  %v15720_v5 = vcombine.low %v15664_v26, %v15644_v15 }
 0x3f6   : > { %22268 = vst [vmem:[#allocation71_spill] sm:$0xff] %v15702_v11  ;;  %v15716_v40 = vcombine.low %v15658_v54, %v15638_v34  ;;  %v4980_v11 = vrot.slane %v4973_v29, %v14698_v20  ;;  %v22277_v24 = vcombine.low %v22275_v52, %v22276_v28  ;;  %v22285_v29 = vcombine.high %v15138_v3, %v15164_v17  ;;  %v15767_v17 = vpop.permute.xlu0 %1790 }
 0x3f7   : > { %22271 = vst [vmem:[#allocation72_spill] sm:$0xff] %v15708_v46  ;;  %22272 = vst [vmem:[#allocation73_spill] sm:$0xff] %v15712_v55  ;;  %v22278_v46 = vld [vmem:[#allocation78_spill] sm:$0xff]  ;;  %v22290_v3 = vcombine.high %v22146_v8, %v22145_v25  ;;  %v22298_v25 = vcombine.low %v22161_v32, %v22160_v19 }
 0x3f8   : > { %22273 = vst [vmem:[#allocation20_spill] sm:$0xff] %v15716_v40  ;;  %22274 = vst [vmem:[#allocation48_spill] sm:$0xff] %v15720_v5  ;;  %v15727_v44 = vrot.slane %v22277_v24, %v15126_v42  ;;  %v22280_v55 = vcombine.high %v22278_v46, %v22279_v30  ;;  %v22281_v40 = vld [vmem:[#allocation79_spill] sm:$0xff]  ;;  %v15741_v5 = vpop.permute.xlu1 %1792  ;;  %v15747_v24 = vrot.slane %v22285_v29, %v15126_v42  ;;  %v22295_v29 = vld [vmem:[#allocation29_spill] sm:$0xff] }
 0x3f9   : > { %v22283_v33 = vcombine.high %v22281_v40, %v22282_v47  ;;  %22284 = vst [vmem:[#allocation16_spill] sm:$0xff] %v15741_v5  ;;  %v22286_v30 = vcombine.high %v22178_v57, %v15167_v1  ;;  %v22287_v47 = vcombine.low %v15210_v12, %v15190_v39  ;;  %22289 = vst [vmem:[#allocation10_spill] sm:$0xff] %v15767_v17  ;;  %v22291_v57 = vld [vmem:[#allocation28_spill] sm:$0xff]  ;;  %v22294_v40 = vld [vmem:[#allocation31_spill] sm:$0xff] }
 0x3fa   : > { %v15733_v6 = vrot.slane %v22280_v55, %v15126_v42  ;;  %v15773_v1 = vrot.slane %v22290_v3, %v15126_v42  ;;  %v22292_v55 = vld [vmem:[#allocation22_spill] sm:$0xff]  ;;  %v15793_v8 = vrot.slane %v22298_v25, %v15126_v42  ;;  %v22306_v17 = vld [vmem:[#allocation55_spill] sm:$0xff]  ;;  %v15812_v32 = vcombine.low %v15674_v16, %v15727_v44  ;;  %v15822_v25 = vpop.permute.xlu0 %1794 }
 0x3fb   : > { %v15739_v50 = vrot.slane %v22283_v33, %v15126_v42  ;;  %v15753_v46 = vrot.slane %v22286_v30, %v15126_v42  ;;  %v15759_v28 = vrot.slane %v22287_v47, %v15126_v42  ;;  %v22288_v33 = vcombine.low %v15213_v63, %v15193_v36  ;;  %v22297_v47 = vld [vmem:[#allocation8_spill] sm:$0xff]  ;;  %22311 = vst [vmem:[#allocation53_spill] sm:$0xff] %v15822_v25  ;;  %v22328_v25 = vld [vmem:[#allocation15_spill] sm:$0xff] }
 0x3fc   : > { %v22293_v39 = vcombine.high %v22291_v57, %v22292_v55  ;;  %v22296_v36 = vcombine.high %v22294_v40, %v22295_v29  ;;  %v4997_v30 = vcombine.low %v4980_v11, %v4988_v0  ;;  %1968 = vrot.lane.b32.xlu1 %v22297_v47, %s13683_s9  ;;  %v22301_v55 = vld [vmem:[#allocation85_spill] sm:$0xff]  ;;  %v22302_v40 = vld [vmem:[#allocation59_spill] sm:$0xff]  ;;  %v22303_v29 = vld [vmem:[#allocation44_spill] sm:$0xff]  ;;  %v15808_v19 = vpop.permute.xlu1 %1796  ;;  %22308 = vst [vmem:[#allocation12_spill] sm:$0xff] %v15812_v32 }
 0x3fd   : > { %v15765_v52 = vrot.slane %v22288_v33, %v15126_v42  ;;  %v22299_v33 = vld [vmem:[#allocation40_spill] sm:$0xff]  ;;  %v3471_v0 = vcombine.low %v22303_v29, %v22302_v40  ;;  %v22304_v11 = vld [vmem:[#allocation46_spill] sm:$0xff]  ;;  %22307 = vst [vmem:[#allocation50_spill] sm:$0xff] %v15808_v19  ;;  %v22317_v29 = vcombine.low %v15266_v61, %v15269_v27  ;;  %v22323_v27 = vld [vmem:[#allocation33_spill] sm:$0xff] }
 0x3fe   : > { %v15779_v12 = vrot.slane %v22293_v39, %v15126_v42  ;;  %v15785_v63 = vrot.slane %v22296_v36, %v15126_v42  ;;  %v22300_v3 = vcombine.low %v22163_v13, %v22299_v33  ;;  %v4989_v39 = vcombine.low %v22301_v55, %v4972_v45  ;;  %1966 = vrot.lane.b32.xlu0 %v22304_v11, %s13683_s9  ;;  %v22305_v36 = vld [vmem:[#allocation68_spill] sm:$0xff]  ;;  %v22327_v32 = vld [vmem:[#allocation38_spill] sm:$0xff] }
 0x3ff   : > { %v3479_v5 = vcombine.low %v22306_v17, %v22305_v36  ;;  %v15826_v33 = vcombine.low %v15680_v56, %v15747_v24  ;;  %v15830_v17 = vcombine.low %v15773_v1, %v15753_v46  ;;  %v15841_v40 = vrot.slane %v4997_v30, %v15126_v42  ;;  %v22320_v30 = vld [vmem:[#allocation26_spill] sm:$0xff] }
 0x400   : > { %v15799_v57 = vrot.slane %v22300_v3, %v15126_v42  ;;  %v15816_v13 = vcombine.low %v15779_v12, %v15733_v6  ;;  %v15820_v45 = vcombine.low %v15785_v63, %v15739_v50  ;;  %v15834_v3 = vcombine.low %v15793_v8, %v15759_v28  ;;  %1972 = vrot.lane.b32.xlu1 %v14545_v49, %s13683_s9 }
 0x401   : > { %22312 = vst [vmem:[#allocation13_spill] sm:$0xff] %v15826_v33  ;;  %22313 = vst [vmem:[#allocation51_spill] sm:$0xff] %v15830_v17  ;;  %v4740_v36 = vrot.slane %v22317_v29, %v15126_v42  ;;  %v22318_v17 = vcombine.low %v15288_v51, %v15272_v22  ;;  %v22324_v29 = vcombine.low %v22181_v53, %v22323_v27  ;;  %v15866_v51 = vpop.permute.xlu1 %1800 }
 0x402   : > { %22309 = vst [vmem:[#allocation35_spill] sm:$0xff] %v15816_v13  ;;  %22310 = vst [vmem:[#allocation61_spill] sm:$0xff] %v15820_v45  ;;  %v15838_v55 = vcombine.low %v15799_v57, %v15765_v52  ;;  %1970 = vrot.lane.b32.xlu0 %v14541_v31, %s13683_s9  ;;  %v3478_v48 = vrot.slane %v3471_v0, %v14698_v20  ;;  %v15900_v0 = vcombine.high %v22267_v38, %v15603_v21 }
 0x403   : > { %22314 = vst [vmem:[#allocation37_spill] sm:$0xff] %v15834_v3  ;;  %22316 = vst [vmem:[#allocation94_spill] sm:$0xff] %v15841_v40  ;;  %v4756_v33 = vrot.slane %v22318_v17, %v15126_v42  ;;  %v22321_v3 = vld [vmem:[#allocation32_spill] sm:$0xff]  ;;  %v4724_v22 = vrot.slane %v22324_v29, %v15126_v42  ;;  %v22326_v17 = vld [vmem:[#allocation39_spill] sm:$0xff] }
 0x404   : > { %22315 = vst [vmem:[#allocation92_spill] sm:$0xff] %v15838_v55  ;;  %v15856_v55 = vrot.slane %v4989_v39, %v15126_v42  ;;  %v22322_v45 = vcombine.low %v22320_v30, %v22321_v3  ;;  %22325 = vst [vmem:[#allocation36_spill] sm:$0xff] %v15866_v51  ;;  %v3455_v13 = vcombine.low %v22297_v47, %v22326_v17  ;;  %v22330_v30 = vld [vmem:[#allocation9_spill] sm:$0xff] }
 0x405   : > { %v22329_v39 = vcombine.low %v22327_v32, %v22328_v25  ;;  %v3486_v3 = vrot.slane %v3479_v5, %v14698_v20  ;;  %1976 = vrot.lane.b32.xlu1 %v22330_v30, %s13683_s9  ;;  %v15882_v27 = vcombine.low %v4724_v22, %v4756_v33  ;;  %v15890_v32 = vcombine.high %v22263_v59, %v15612_v23  ;;  %v1817_v23 = vpop.permute.xlu1 %1816 }
 0x406   : > { %22319 = vst [vmem:[#allocation87_spill] sm:$0xff] %v15856_v55  ;;  %v4708_v61 = vrot.slane %v22322_v45, %v15126_v42  ;;  %v15876_v45 = vpop.permute.xlu0 %1798  ;;  %v15886_v29 = vcombine.low %v15856_v55, %v15841_v40  ;;  %1974 = vrot.lane.b32.xlu0 %v22188_v43, %s13683_s9  ;;  %v15896_v5 = vcombine.high %v22265_v14, %v15618_v18  ;;  %22336 = vst [vmem:[#allocation79_spill] sm:$0xff] %v15900_v0 }
 0x407   : > { %v3470_v19 = vrot.slane %v22329_v39, %v14698_v20  ;;  %22332 = vst [vmem:[#allocation76_spill] sm:$0xff] %v15882_v27  ;;  %22334 = vst [vmem:[#allocation78_spill] sm:$0xff] %v15890_v32  ;;  %v15904_v25 = vcombine.high %v22270_v2, %v15626_v37  ;;  %v15908_v17 = vcombine.high %v15652_v41, %v15632_v7 }
 0x408   : > { %v15880_v53 = vcombine.low %v4708_v61, %v4740_v36  ;;  %22333 = vst [vmem:[#allocation74_spill] sm:$0xff] %v15886_v29  ;;  %22335 = vst [vmem:[#allocation80_spill] sm:$0xff] %v15896_v5  ;;  %v3462_v59 = vrot.slane %v3455_v13, %v14698_v20  ;;  %v3495_v39 = vcombine.low %v3478_v48, %v3486_v3 }
 0x409   : > { %22337 = vst [vmem:[#allocation81_spill] sm:$0xff] %v15904_v25  ;;  %22338 = vst [vmem:[#allocation28_spill] sm:$0xff] %v15908_v17  ;;  %1980 = vrot.lane.b32.xlu1 %v14571_v10, %s13683_s9  ;;  %v15917_v21 = vpop.permute.xlu1 %1820  ;;  %v15928_v48 = vcombine.high %v15658_v54, %v15638_v34  ;;  %v15932_v41 = vcombine.high %v15664_v26, %v15644_v15  ;;  %v15936_v14 = vcombine.high %v15674_v16, %v15727_v44  ;;  %v22380_v25 = vld [vmem:[#allocation50_spill] sm:$0xff] }
 0x40a   : > { %22331 = vst [vmem:[#allocation89_spill] sm:$0xff] %v15880_v53  ;;  %v15911_v32 = vpop.permute.xlu0 %1814  ;;  %v3487_v18 = vcombine.low %v3462_v59, %v3470_v19  ;;  %1978 = vrot.lane.b32.xlu0 %v22214_v58, %s13683_s9  ;;  %v15920_v37 = vrot.slane %v3495_v39, %v15126_v42  ;;  %v15953_v15 = vcombine.high %v15779_v12, %v15733_v6  ;;  %v22357_v59 = vld [vmem:[#allocation119_spill] sm:$0xff] }
 0x40b   : > { %22341 = vst [vmem:[#allocation29_spill] sm:$0xff] %v15928_v48  ;;  %22342 = vst [vmem:[#allocation8_spill] sm:$0xff] %v15932_v41  ;;  %v15957_v16 = vcombine.high %v15785_v63, %v15739_v50  ;;  %v15967_v54 = vcombine.high %v15680_v56, %v15747_v24  ;;  %v15977_v6 = vcombine.high %v15773_v1, %v15753_v46 }
 0x40c   : > { %22339 = vst [vmem:[#allocation22_spill] sm:$0xff] %v15920_v37  ;;  %22343 = vst [vmem:[#allocation40_spill] sm:$0xff] %v15936_v14  ;;  %v15939_v38 = vrot.slane %v3487_v18, %v15126_v42  ;;  %v15981_v50 = vcombine.high %v15793_v8, %v15759_v28  ;;  %v15987_v56 = vcombine.high %v15799_v57, %v15765_v52  ;;  %v22355_v52 = vld [vmem:[#allocation83_spill] sm:$0xff]  ;;  %v22356_v57 = vld [vmem:[#allocation84_spill] sm:$0xff] }
 0x40d   : > { %1996 = vrot.lane.b32.xlu1 %v22232_v9, %s13684_s10  ;;  %v15943_v2 = vpop.permute.xlu1 %1824  ;;  %22346 = vst [vmem:[#allocation44_spill] sm:$0xff] %v15953_v15  ;;  %22347 = vst [vmem:[#allocation46_spill] sm:$0xff] %v15957_v16  ;;  %v15993_v63 = vcombine.high %v4708_v61, %v4740_v36  ;;  %v15995_v13 = vcombine.high %v4724_v22, %v4756_v33  ;;  %v2519_v1 = vcombine.low %v22355_v52, %v1817_v23 }
 0x40e   : > { %v15922_v7 = vpop.permute.xlu0 %1818  ;;  %22344 = vst [vmem:[#allocation85_spill] sm:$0xff] %v15939_v38  ;;  %1994 = vrot.lane.b32.xlu0 %v22242_v4, %s13684_s10  ;;  %v15949_v34 = vcombine.high %v15939_v38, %v15920_v37  ;;  %22348 = vst [vmem:[#allocation68_spill] sm:$0xff] %v15967_v54  ;;  %v2520_v8 = vcombine.high %v22355_v52, %v1817_v23  ;;  %v2199_v33 = vcombine.high %v22356_v57, %v15911_v32 }
 0x40f   : > { %22340 = vst [vmem:[#allocation31_spill] sm:$0xff] %v15922_v7  ;;  %22349 = vst [vmem:[#allocation55_spill] sm:$0xff] %v15977_v6  ;;  %v16020_v23 = vrot.slane %v2519_v1, %v14698_v20  ;;  %v22365_v6 = vld [vmem:[#allocation11_spill] sm:$0xff] }
 0x410   : > { %22345 = vst [vmem:[#allocation59_spill] sm:$0xff] %v15949_v34  ;;  %22350 = vst [vmem:[#allocation26_spill] sm:$0xff] %v15981_v50  ;;  %v16023_v18 = vrot.slane %v2520_v8, %v14698_v20 }
 0x411   : > { %2000 = vrot.lane.b32.xlu1 %v22260_v62, %s13684_s10  ;;  %v15963_v44 = vpop.permute.xlu1 %1828  ;;  %22351 = vst [vmem:[#allocation32_spill] sm:$0xff] %v15987_v56  ;;  %22353 = vst [vmem:[#allocation39_spill] sm:$0xff] %v15993_v63 }
 0x412   : > { %v15945_v19 = vpop.permute.xlu0 %1822  ;;  %1998 = vrot.lane.b32.xlu0 %v22269_v35, %s13684_s10  ;;  %22354 = vst [vmem:[#allocation38_spill] sm:$0xff] %v15995_v13  ;;  %22358 = vst [vmem:[#allocation15_spill] sm:$0xff] %v16020_v23 }
 0x415   : > { %2004 = vrot.lane.b32.xlu1 %v22297_v47, %s13684_s10  ;;  %v15983_v12 = vpop.permute.xlu1 %1832 }
 0x416   : > { %v15969_v26 = vpop.permute.xlu0 %1826  ;;  %2002 = vrot.lane.b32.xlu0 %v22304_v11, %s13684_s10 }
 0x419   : > { %2008 = vrot.lane.b32.xlu1 %v14545_v49, %s13684_s10  ;;  %v15999_v46 = vpop.permute.xlu1 %1836 }
 0x41a   : > { %v15989_v24 = vpop.permute.xlu0 %1830  ;;  %2006 = vrot.lane.b32.xlu0 %v14541_v31, %s13684_s10 }
 0x41b   : > { %22352 = vst [vmem:[#allocation33_spill] sm:$0xff] %v15989_v24 }
 0x41d   : > { %2012 = vrot.lane.b32.xlu1 %v22330_v30, %s13684_s10  ;;  %v1853_v36 = vpop.permute.xlu1 %1852 }
 0x41e   : > { %v16001_v28 = vpop.permute.xlu0 %1834  ;;  %2010 = vrot.lane.b32.xlu0 %v22188_v43, %s13684_s10  ;;  %v2535_v61 = vcombine.low %v15517_v60, %v1853_v36  ;;  %v2536_v22 = vcombine.high %v15517_v60, %v1853_v36  ;;  %v16034_v60 = vrot.slane %v2199_v33, %v14698_v20 }
 0x420   : > { %v16026_v52 = vrot.slane %v2535_v61, %v14698_v20  ;;  %v16029_v13 = vrot.slane %v2536_v22, %v14698_v20  ;;  %22360 = vst [vmem:[#allocation83_spill] sm:$0xff] %v16034_v60  ;;  %v22363_v22 = vld [vmem:[#allocation90_spill] sm:$0xff] }
 0x421   : > { %2016 = vrot.lane.b32.xlu1 %v14571_v10, %s13684_s10  ;;  %v1857_v1 = vpop.permute.xlu1 %1856  ;;  %v2949_v56 = vcombine.low %v22363_v22, %v15917_v21  ;;  %v2950_v33 = vcombine.high %v22363_v22, %v15917_v21 }
 0x422   : > { %v16013_v3 = vpop.permute.xlu0 %1850  ;;  %22359 = vst [vmem:[#allocation9_spill] sm:$0xff] %v16026_v52  ;;  %2014 = vrot.lane.b32.xlu0 %v22214_v58, %s13684_s10  ;;  %v2965_v54 = vcombine.low %v22365_v6, %v1857_v1  ;;  %v2966_v16 = vcombine.high %v22365_v6, %v1857_v1  ;;  %s13692_s10 = smov [#allocation4]  }
 0x423   : > { %v2215_v39 = vcombine.high %v22357_v59, %v16013_v3  ;;  %v16062_v15 = vrot.slane %v2949_v56, %v14698_v20 }
 0x424   : > { %v16074_v14 = vrot.slane %v2965_v54, %v14698_v20  ;;  %v16077_v6 = vrot.slane %v2966_v16, %v14698_v20 }
 0x425   : > { %v16037_v36 = vrot.slane %v2215_v39, %v14698_v20  ;;  %2032 = vrot.lane.b32.xlu1 %v22232_v9, %s13685_s11  ;;  %v22364_v39 = vld [vmem:[#allocation49_spill] sm:$0xff]  ;;  %v16057_v8 = vpop.permute.xlu1 %1860 }
 0x426   : > { %v16043_v63 = vpop.permute.xlu0 %1854  ;;  %2030 = vrot.lane.b32.xlu0 %v22242_v4, %s13685_s11  ;;  %v3270_v61 = vcombine.low %v22364_v39, %v15945_v19  ;;  %v22366_v9 = vld [vmem:[#allocation65_spill] sm:$0xff]  ;;  %v16069_v4 = vrot.slane %v2950_v33, %v14698_v20  ;;  %v3271_v22 = vcombine.high %v22364_v39, %v15945_v19  ;;  %22368 = vst [vmem:[#allocation49_spill] sm:$0xff] %v16077_v6 }
 0x427   : > { %22361 = vst [vmem:[#allocation84_spill] sm:$0xff] %v16037_v36  ;;  %22362 = vst [vmem:[#allocation119_spill] sm:$0xff] %v16043_v63 }
 0x428   : > { %22367 = vst [vmem:[#allocation90_spill] sm:$0xff] %v16069_v4 }
 0x429   : > { %2036 = vrot.lane.b32.xlu1 %v22260_v62, %s13685_s11  ;;  %v22370_v62 = vld [vmem:[#allocation17_spill] sm:$0xff]  ;;  %v1865_v33 = vpop.permute.xlu1 %1864 }
 0x42a   : > { %v1859_v50 = vpop.permute.xlu0 %1858  ;;  %2034 = vrot.lane.b32.xlu0 %v22269_v35, %s13685_s11  ;;  %v4021_v56 = vcombine.low %v22370_v62, %v15963_v44  ;;  %v4022_v19 = vcombine.high %v22370_v62, %v15963_v44 }
 0x42b   : > { %v3286_v34 = vcombine.low %v22366_v9, %v1859_v50  ;;  %v3287_v21 = vcombine.high %v22366_v9, %v1859_v50  ;;  %v16082_v50 = vrot.slane %v3270_v61, %v14698_v20  ;;  %v22375_v9 = vld [vmem:[#allocation60_spill] sm:$0xff] }
 0x42c   : > { %v16108_v44 = vrot.slane %v4021_v56, %v14698_v20  ;;  %v3701_v62 = vcombine.high %v22375_v9, %v15969_v26  ;;  %v16115_v39 = vrot.slane %v4022_v19, %v14698_v20  ;;  %v22379_v56 = vld [vmem:[#allocation10_spill] sm:$0xff]  ;;  %v22381_v19 = vld [vmem:[#allocation45_spill] sm:$0xff] }
 0x42d   : > { %22369 = vst [vmem:[#allocation11_spill] sm:$0xff] %v16082_v50  ;;  %v16087_v1 = vrot.slane %v3286_v34, %v14698_v20  ;;  %v16096_v35 = vrot.slane %v3287_v21, %v14698_v20  ;;  %2040 = vrot.lane.b32.xlu1 %v22297_v47, %s13685_s11  ;;  %v16103_v34 = vrot.slane %v3271_v22, %v14698_v20  ;;  %v1869_v54 = vpop.permute.xlu1 %1868  ;;  %v22377_v22 = vld [vmem:[#allocation16_spill] sm:$0xff] }
 0x42e   : > { %v1863_v61 = vpop.permute.xlu0 %1862  ;;  %2038 = vrot.lane.b32.xlu0 %v22304_v11, %s13685_s11  ;;  %22374 = vst [vmem:[#allocation130_spill] sm:$0xff] %v16108_v44  ;;  %v3700_v21 = vcombine.low %v22375_v9, %v15969_v26  ;;  %22376 = vst [vmem:[#allocation60_spill] sm:$0xff] %v16115_v39  ;;  %v4037_v16 = vcombine.low %v22377_v22, %v1865_v33  ;;  %v4038_v11 = vcombine.high %v22377_v22, %v1865_v33 }
 0x42f   : > { %22371 = vst [vmem:[#allocation65_spill] sm:$0xff] %v16087_v1  ;;  %22372 = vst [vmem:[#allocation17_spill] sm:$0xff] %v16096_v35  ;;  %v3716_v48 = vcombine.low %v22379_v56, %v1863_v61  ;;  %v3717_v17 = vcombine.high %v22379_v56, %v1863_v61  ;;  %v4467_v0 = vcombine.low %v22380_v25, %v1869_v54 }
 0x430   : > { %22373 = vst [vmem:[#allocation129_spill] sm:$0xff] %v16103_v34  ;;  %v4468_v26 = vcombine.high %v22380_v25, %v1869_v54  ;;  %v4451_v9 = vcombine.low %v22381_v19, %v15983_v12  ;;  %v4452_v47 = vcombine.high %v22381_v19, %v15983_v12  ;;  %v16134_v33 = vrot.slane %v4037_v16, %v14698_v20 }
 0x431   : > { %2044 = vrot.lane.b32.xlu1 %v14545_v49, %s13685_s11  ;;  %v16137_v22 = vrot.slane %v4038_v11, %v14698_v20  ;;  %v16142_v25 = vrot.slane %v3700_v21, %v14698_v20  ;;  %v16145_v49 = vrot.slane %v3701_v62, %v14698_v20  ;;  %v16148_v54 = vrot.slane %v3716_v48, %v14698_v20  ;;  %v16153_v16 = vpop.permute.xlu1 %1872 }
 0x432   : > { %v16121_v41 = vpop.permute.xlu0 %1866  ;;  %22382 = vst [vmem:[#allocation10_spill] sm:$0xff] %v16134_v33  ;;  %2042 = vrot.lane.b32.xlu0 %v14541_v31, %s13685_s11  ;;  %v16151_v12 = vrot.slane %v3717_v17, %v14698_v20  ;;  %22388 = vst [vmem:[#allocation134_spill] sm:$0xff] %v16153_v16  ;;  %v16160_v21 = vrot.slane %v4467_v0, %v14698_v20  ;;  %v16163_v62 = vrot.slane %v4468_v26, %v14698_v20  ;;  %v22393_v0 = vld [vmem:[#allocation43_spill] sm:$0xff] }
 0x433   : > { %22378 = vst [vmem:[#allocation16_spill] sm:$0xff] %v16121_v41  ;;  %22383 = vst [vmem:[#allocation50_spill] sm:$0xff] %v16137_v22  ;;  %v16172_v56 = vrot.slane %v4451_v9, %v14698_v20  ;;  %v16175_v19 = vrot.slane %v4452_v47, %v14698_v20  ;;  %v4772_v26 = vcombine.low %v22393_v0, %v16001_v28 }
 0x434   : > { %22384 = vst [vmem:[#allocation45_spill] sm:$0xff] %v16142_v25  ;;  %22385 = vst [vmem:[#allocation131_spill] sm:$0xff] %v16145_v49  ;;  %v4773_v61 = vcombine.high %v22393_v0, %v16001_v28 }
 0x435   : > { %22386 = vst [vmem:[#allocation132_spill] sm:$0xff] %v16148_v54  ;;  %22387 = vst [vmem:[#allocation133_spill] sm:$0xff] %v16151_v12  ;;  %2048 = vrot.lane.b32.xlu1 %v22330_v30, %s13685_s11  ;;  %v16181_v31 = vpop.permute.xlu1 %1888  ;;  %v16198_v28 = vrot.slane %v4772_v26, %v14698_v20 }
 0x436   : > { %22389 = vst [vmem:[#allocation135_spill] sm:$0xff] %v16160_v21  ;;  %22390 = vst [vmem:[#allocation136_spill] sm:$0xff] %v16163_v62  ;;  %v1871_v11 = vpop.permute.xlu0 %1870  ;;  %2046 = vrot.lane.b32.xlu0 %v22188_v43, %s13685_s11  ;;  %v16209_v30 = vrot.slane %v4773_v61, %v14698_v20 }
 0x437   : > { %22391 = vst [vmem:[#allocation137_spill] sm:$0xff] %v16172_v56  ;;  %22392 = vst [vmem:[#allocation138_spill] sm:$0xff] %v16175_v19  ;;  %v4788_v47 = vcombine.low %v15876_v45, %v1871_v11  ;;  %v4789_v43 = vcombine.high %v15876_v45, %v1871_v11  ;;  %v2198_v19 = vcombine.low %v22356_v57, %v15911_v32 }
 0x438   : > { %22394 = vst [vmem:[#allocation43_spill] sm:$0xff] %v16198_v28  ;;  %22397 = vst [vmem:[#allocation141_spill] sm:$0xff] %v16209_v30 }
 0x439   : > { %2052 = vrot.lane.b32.xlu1 %v14571_v10, %s13685_s11  ;;  %v16201_v0 = vrot.slane %v4788_v47, %v14698_v20  ;;  %v16204_v9 = vrot.slane %v4789_v43, %v14698_v20  ;;  %v16206_v48 = vpop.permute.xlu1 %1892  ;;  %v2206_v12 = vrot.slane %v2198_v19, %v14698_v20 }
 0x43a   : > { %v16189_v17 = vpop.permute.xlu0 %1886  ;;  %2050 = vrot.lane.b32.xlu0 %v22214_v58, %s13685_s11 }
 0x43b   : > { %22395 = vst [vmem:[#allocation139_spill] sm:$0xff] %v16201_v0  ;;  %22396 = vst [vmem:[#allocation140_spill] sm:$0xff] %v16204_v9 }
 0x43d   : > { %v16217_v11 = vpop.permute.xlu1 %1896 }
 0x43e   : > { %v16211_v45 = vpop.permute.xlu0 %1890 }
 0x43f   : > { %22398 = vst [vmem:[#allocation142_spill] sm:$0xff] %v16211_v45 }
 0x441   : > { %v16221_v47 = vpop.permute.xlu1 %1900 }
 0x442   : > { %v16219_v26 = vpop.permute.xlu0 %1894 }
 0x445   : > { %v16225_v5 = vpop.permute.xlu1 %1904 }
 0x446   : > { %v16223_v43 = vpop.permute.xlu0 %1898 }
 0x449   : > { %v16229_v29 = vpop.permute.xlu1 %1908 }
 0x44a   : > { %v16227_v61 = vpop.permute.xlu0 %1902  ;;  %22400 = vst [vmem:[#allocation144_spill] sm:$0xff] %v16229_v29 }
 0x44b   : > { %22399 = vst [vmem:[#allocation143_spill] sm:$0xff] %v16227_v61 }
 0x44d   : > { %v1925_v10 = vpop.permute.xlu1 %1924 }
 0x44e   : > { %v16231_v27 = vpop.permute.xlu0 %1906 }
 0x451   : > { %v16233_v38 = vpop.permute.xlu1 %1928 }
 0x452   : > { %v1923_v53 = vpop.permute.xlu0 %1922 }
 0x455   : > { %v16237_v37 = vpop.permute.xlu1 %1932 }
 0x456   : > { %v16235_v58 = vpop.permute.xlu0 %1926 }
 0x457   : > { %22401 = vst [vmem:[#allocation145_spill] sm:$0xff] %v16235_v58 }
 0x459   : > { %v16241_v40 = vpop.permute.xlu1 %1936 }
 0x45a   : > { %v16239_v55 = vpop.permute.xlu0 %1930 }
 0x45d   : > { %v16245_v41 = vpop.permute.xlu1 %1940 }
 0x45e   : > { %v16243_v24 = vpop.permute.xlu0 %1934 }
 0x461   : > { %v16249_v7 = vpop.permute.xlu1 %1944 }
 0x462   : > { %v16247_v61 = vpop.permute.xlu0 %1938  ;;  %22403 = vst [vmem:[#allocation147_spill] sm:$0xff] %v16249_v7  ;;  %v2214_v7 = vcombine.low %v22357_v59, %v16013_v3 }
 0x463   : > { %22402 = vst [vmem:[#allocation146_spill] sm:$0xff] %v16247_v61 }
 0x464   : > { %v2222_v56 = vrot.slane %v2214_v7, %v14698_v20 }
 0x465   : > { %v1961_v63 = vpop.permute.xlu1 %1960 }
 0x466   : > { %v16251_v45 = vpop.permute.xlu0 %1942  ;;  %v2551_v21 = vcombine.low %v16181_v31, %v1961_v63  ;;  %v2552_v49 = vcombine.high %v16181_v31, %v1961_v63  ;;  %v2262_v57 = vcombine.low %v2206_v12, %v2222_v56 }
 0x468   : > { %v16282_v22 = vrot.slane %v2551_v21, %v14698_v20  ;;  %v16285_v7 = vrot.slane %v2552_v49, %v14698_v20 }
 0x469   : > { %v1965_v9 = vpop.permute.xlu1 %1964 }
 0x46a   : > { %v1959_v30 = vpop.permute.xlu0 %1958  ;;  %22407 = vst [vmem:[#allocation151_spill] sm:$0xff] %v16282_v22  ;;  %22408 = vst [vmem:[#allocation152_spill] sm:$0xff] %v16285_v7  ;;  %v2981_v49 = vcombine.low %v16206_v48, %v1965_v9 }
 0x46b   : > { %v2231_v25 = vcombine.high %v16189_v17, %v1959_v30 }
 0x46d   : > { %v16295_v19 = vrot.slane %v2231_v25, %v14698_v20 }
 0x46e   : > { %v16253_v58 = vpop.permute.xlu0 %1962  ;;  %v16255_v28 = vpop.permute.xlu1 %1968 }
 0x46f   : > { %22404 = vst [vmem:[#allocation148_spill] sm:$0xff] %v16253_v58  ;;  %22411 = vst [vmem:[#allocation155_spill] sm:$0xff] %v16295_v19 }
 0x472   : > { %v16257_v0 = vpop.permute.xlu0 %1966  ;;  %v16259_v51 = vpop.permute.xlu1 %1972 }
 0x476   : > { %v16261_v16 = vpop.permute.xlu0 %1970 }
 0x477   : > { %v16263_v29 = vpop.permute.xlu1 %1976 }
 0x47a   : > { %v16265_v61 = vpop.permute.xlu0 %1974 }
 0x47b   : > { %22405 = vst [vmem:[#allocation149_spill] sm:$0xff] %v16265_v61  ;;  %v16271_v62 = vpop.permute.xlu1 %1980  ;;  %v2230_v61 = vcombine.low %v16189_v17, %v1959_v30 }
 0x47c   : > { %22406 = vst [vmem:[#allocation150_spill] sm:$0xff] %v16271_v62 }
 0x47d   : > { %v2238_v17 = vrot.slane %v2230_v61, %v14698_v20 }
 0x47e   : > { %v16273_v58 = vpop.permute.xlu0 %1978 }
 0x47f   : > { %v1997_v3 = vpop.permute.xlu1 %1996 }
 0x480   : > { %v2567_v59 = vcombine.low %v1925_v10, %v1997_v3  ;;  %v2568_v54 = vcombine.high %v1925_v10, %v1997_v3  ;;  %v2263_v10 = vcombine.high %v2206_v12, %v2222_v56  ;;  %v3302_v12 = vcombine.low %v16219_v26, %v16257_v0 }
 0x482   : > { %v1995_v32 = vpop.permute.xlu0 %1994  ;;  %v16288_v63 = vrot.slane %v2567_v59, %v14698_v20  ;;  %v16291_v31 = vrot.slane %v2568_v54, %v14698_v20  ;;  %v16322_v54 = vrot.slane %v2263_v10, %v15126_v42 }
 0x483   : > { %v2246_v62 = vcombine.low %v1923_v53, %v1995_v32  ;;  %v2247_v39 = vcombine.high %v1923_v53, %v1995_v32  ;;  %v2001_v21 = vpop.permute.xlu1 %2000  ;;  %v16312_v32 = vrot.slane %v2262_v57, %v15126_v42 }
 0x484   : > { %22409 = vst [vmem:[#allocation153_spill] sm:$0xff] %v16288_v63  ;;  %22410 = vst [vmem:[#allocation154_spill] sm:$0xff] %v16291_v31 }
 0x485   : > { %v2254_v30 = vrot.slane %v2246_v62, %v14698_v20  ;;  %v16299_v53 = vrot.slane %v2247_v39, %v14698_v20  ;;  %v2982_v39 = vcombine.high %v16206_v48, %v1965_v9  ;;  %22414 = vst [vmem:[#allocation158_spill] sm:$0xff] %v16312_v32  ;;  %22416 = vst [vmem:[#allocation160_spill] sm:$0xff] %v16322_v54 }
 0x486   : > { %v16306_v59 = vpop.permute.xlu0 %1998  ;;  %v2998_v48 = vcombine.high %v16233_v38, %v2001_v21 }
 0x487   : > { %22412 = vst [vmem:[#allocation156_spill] sm:$0xff] %v16299_v53  ;;  %22413 = vst [vmem:[#allocation157_spill] sm:$0xff] %v16306_v59  ;;  %v2294_v61 = vcombine.low %v2238_v17, %v2254_v30  ;;  %v2295_v25 = vcombine.high %v2238_v17, %v2254_v30  ;;  %v16319_v3 = vpop.permute.xlu1 %2004  ;;  %v16325_v17 = vrot.slane %v2981_v49, %v14698_v20 }
 0x488   : > { %v2997_v30 = vcombine.low %v16233_v38, %v2001_v21  ;;  %v16337_v10 = vrot.slane %v2982_v39, %v14698_v20  ;;  %v3303_v49 = vcombine.high %v16219_v26, %v16257_v0  ;;  %v16345_v38 = vrot.slane %v2998_v48, %v14698_v20 }
 0x489   : > { %v16317_v56 = vrot.slane %v2294_v61, %v15126_v42  ;;  %v16330_v57 = vrot.slane %v2295_v25, %v15126_v42  ;;  %v16348_v21 = vrot.slane %v3302_v12, %v14698_v20  ;;  %v4054_v25 = vcombine.high %v16221_v47, %v16259_v51  ;;  %v22421_v12 = vld [vmem:[#allocation56_spill] sm:$0xff] }
 0x48a   : > { %v2003_v9 = vpop.permute.xlu0 %2002  ;;  %22418 = vst [vmem:[#allocation162_spill] sm:$0xff] %v16337_v10  ;;  %v16342_v44 = vrot.slane %v2997_v30, %v14698_v20  ;;  %22419 = vst [vmem:[#allocation163_spill] sm:$0xff] %v16345_v38  ;;  %v3732_v0 = vcombine.low %v16223_v43, %v16261_v16  ;;  %v3733_v26 = vcombine.high %v16223_v43, %v16261_v16  ;;  %v22422_v10 = vld [vmem:[#allocation54_spill] sm:$0xff] }
 0x48b   : > { %22415 = vst [vmem:[#allocation159_spill] sm:$0xff] %v16317_v56  ;;  %22417 = vst [vmem:[#allocation161_spill] sm:$0xff] %v16330_v57  ;;  %v3318_v62 = vcombine.low %v16239_v55, %v2003_v9  ;;  %v3319_v61 = vcombine.high %v16239_v55, %v2003_v9  ;;  %v2326_v59 = vcombine.low %v16312_v32, %v16317_v56  ;;  %v2009_v9 = vpop.permute.xlu1 %2008 }
 0x48c   : > { %22420 = vst [vmem:[#allocation164_spill] sm:$0xff] %v16348_v21  ;;  %v4053_v55 = vcombine.low %v16221_v47, %v16259_v51  ;;  %v16371_v32 = vrot.slane %v3303_v49, %v14698_v20  ;;  %v2194_v38 = vcombine.low %v22422_v10, %v22421_v12  ;;  %v4069_v49 = vcombine.low %v16241_v40, %v2009_v9 }
 0x48d   : > { %v16355_v39 = vrot.slane %v3318_v62, %v14698_v20  ;;  %v16364_v30 = vrot.slane %v3319_v61, %v14698_v20  ;;  %v13096_v47 = vpack.c.bf16 %v2326_v59, %v2326_v59  ;;  %v2328_v62 = vcombine.low %v16322_v54, %v16330_v57 }
 0x48e   : > { %v2007_v48 = vpop.permute.xlu0 %2006  ;;  %v16376_v56 = vrot.slane %v4053_v55, %v14698_v20  ;;  %v16379_v61 = vrot.slane %v4054_v25, %v14698_v20  ;;  %v16384_v59 = vrot.slane %v3732_v0, %v14698_v20  ;;  %v4070_v54 = vcombine.high %v16241_v40, %v2009_v9 }
 0x48f   : > { %v3748_v43 = vcombine.low %v16243_v24, %v2007_v48  ;;  %v3749_v55 = vcombine.high %v16243_v24, %v2007_v48  ;;  %v5427_v25 = vunpack.c.l.b16 %v13096_v47  ;;  %v2013_v57 = vpop.permute.xlu1 %2012  ;;  %v13099_v21 = vpack.c.bf16 %v2328_v62, %v2328_v62 }
 0x490   : > { %v16395_v10 = vrot.slane %v3733_v26, %v14698_v20  ;;  %v4483_v0 = vcombine.low %v16225_v5, %v16263_v29  ;;  %v16400_v12 = vrot.slane %v4069_v49, %v14698_v20  ;;  %v16403_v40 = vrot.slane %v4070_v54, %v14698_v20 }
 0x491   : > { %v4484_v9 = vcombine.high %v16225_v5, %v16263_v29  ;;  %v16408_v24 = vrot.slane %v3748_v43, %v14698_v20  ;;  %v16411_v48 = vrot.slane %v3749_v55, %v14698_v20  ;;  %7798 = vperm.xlu0 %13550, %v5427_v25   ;;  %5538 = vperm.xlu1 %13548, %v5427_v25   ;;  %v5430_v49 = vunpack.c.l.b16 %v13099_v21 }
 0x492   : > { %v16390_v16 = vpop.permute.xlu0 %2010  ;;  %22424 = vst [vmem:[#allocation54_spill] sm:$0xff] %v16400_v12  ;;  %22425 = vst [vmem:[#allocation165_spill] sm:$0xff] %v16403_v40  ;;  %v4499_v54 = vcombine.low %v16245_v41, %v2013_v57  ;;  %v4500_v62 = vcombine.high %v16245_v41, %v2013_v57  ;;  %v13101_v43 = vpack.c.bf16 %v2194_v38, %v2194_v38 }
 0x493   : > { %22423 = vst [vmem:[#allocation56_spill] sm:$0xff] %v16390_v16  ;;  %v16424_v25 = vrot.slane %v4483_v0, %v14698_v20  ;;  %v4804_v26 = vcombine.low %v16231_v27, %v16273_v58  ;;  %v16429_v47 = vrot.slane %v4484_v9, %v14698_v20  ;;  %v4805_v41 = vcombine.high %v16231_v27, %v16273_v58  ;;  %v16480_v29 = vpop.permute.xlu1 %2016 }
 0x494   : > { %v16434_v57 = vrot.slane %v4499_v54, %v14698_v20  ;;  %v16437_v21 = vrot.slane %v4500_v62, %v14698_v20  ;;  %v5432_v5 = vunpack.c.l.b16 %v13101_v43  ;;  %v2311_v9 = vcombine.high %v16295_v19, %v16299_v53 }
 0x495   : > { %7807 = vperm.xlu0 %13550, %v5430_v49   ;;  %v16446_v51 = vrot.slane %v4804_v26, %v14698_v20  ;;  %v16455_v54 = vrot.slane %v4805_v41, %v14698_v20 }
 0x496   : > { %v2015_v55 = vpop.permute.xlu0 %2014 }
 0x497   : > { %v4820_v38 = vcombine.low %v16251_v45, %v2015_v55  ;;  %v4821_v0 = vcombine.high %v16251_v45, %v2015_v55  ;;  %22426 = vst [vmem:[#allocation166_spill] sm:$0xff] %v16446_v51  ;;  %22428 = vst [vmem:[#allocation168_spill] sm:$0xff] %v16455_v54  ;;  %v21746_v55 = vmov 0.0   ;;  %v2033_v16 = vpop.permute.xlu1 %2032  ;;  %v22443_v54 = vld [vmem:[#allocation99_spill] sm:$0xff]  ;;  %v22446_v51 = vld [vmem:[#allocation58_spill] sm:$0xff] }
 0x499   : > { %v16449_v27 = vrot.slane %v4820_v38, %v14698_v20  ;;  %v16452_v58 = vrot.slane %v4821_v0, %v14698_v20  ;;  %7813 = vperm.xlu0 %13550, %v5432_v5  }
 0x49a   : > { %v2031_v43 = vpop.permute.xlu0 %2030 }
 0x49b   : > { %22427 = vst [vmem:[#allocation167_spill] sm:$0xff] %v16452_v58  ;;  %v2334_v26 = vcombine.high %v2031_v43, %v21746_v55  ;;  %v16463_v38 = vrot.slane %v2031_v43, %v14698_v20  ;;  %v2279_v55 = vcombine.high %v16034_v60, %v16037_v36  ;;  %v16500_v36 = vrot.slane %v2033_v16, %v14698_v20  ;;  %v22444_v58 = vld [vmem:[#allocation95_spill] sm:$0xff] }
 0x49d   : > { %22429 = vst [vmem:[#allocation169_spill] sm:$0xff] %v16463_v38  ;;  %v16466_v0 = vrot.slane %v2334_v26, %v14698_v20  ;;  %v16470_v41 = vrot.slane %v16463_v38, %v15126_v42  ;;  %v16490_v38 = vrot.slane %v2311_v9, %v15126_v42  ;;  %22434 = vst [vmem:[#allocation174_spill] sm:$0xff] %v16500_v36 }
 0x49e   : > { %v2584_v9 = vcombine.high %v16020_v23, %v16026_v52  ;;  %v22440_v52 = vld [vmem:[#allocation88_spill] sm:$0xff] }
 0x49f   : > { %22430 = vst [vmem:[#allocation170_spill] sm:$0xff] %v16466_v0  ;;  %22431 = vst [vmem:[#allocation171_spill] sm:$0xff] %v16470_v41  ;;  %v16474_v45 = vrot.slane %v16466_v0, %v15126_v42  ;;  %v13097_v62 = vpack.c.bf16 %v16470_v41, %v16470_v41  ;;  %v16493_v41 = vrot.slane %v2279_v55, %v15126_v42 }
 0x4a1   : > { %22432 = vst [vmem:[#allocation172_spill] sm:$0xff] %v16474_v45  ;;  %v16482_v43 = vunpack.c.l.b16 %v13097_v62  ;;  %v13103_v26 = vpack.c.bf16 %v16474_v45, %v16474_v45  ;;  %v2332_v62 = vcombine.low %v16493_v41, %v16490_v38  ;;  %v2616_v45 = vcombine.high %v16282_v22, %v16288_v63 }
 0x4a2   : > { %v16514_v22 = vrot.slane %v2584_v9, %v15126_v42 }
 0x4a3   : > { %22433 = vst [vmem:[#allocation173_spill] sm:$0xff] %v16482_v43  ;;  %5541 = vperm.xlu1 %13548, %v16482_v43   ;;  %v5434_v0 = vunpack.c.l.b16 %v13103_v26  ;;  %v22435_v43 = vld [vmem:[#allocation18_spill] sm:$0xff]  ;;  %v13105_v55 = vpack.c.bf16 %v2332_v62, %v2332_v62  ;;  %v16507_v53 = vrot.slane %v2616_v45, %v15126_v42 }
 0x4a4   : > { %v22436_v26 = vld [vmem:[#allocation86_spill] sm:$0xff] }
 0x4a5   : > { %7819 = vperm.xlu0 %13550, %v5434_v0   ;;  %v2511_v60 = vcombine.low %v22436_v26, %v22435_v43  ;;  %v5436_v19 = vunpack.c.l.b16 %v13105_v55  ;;  %v22438_v43 = vmov 0.0   ;;  %v2649_v45 = vcombine.low %v16514_v22, %v16507_v53 }
 0x4a7   : > { %5547 = vperm.xlu1 %13548, %v5430_v49   ;;  %v16511_v49 = vrot.slane %v16500_v36, %v15126_v42  ;;  %v13107_v63 = vpack.c.bf16 %v2511_v60, %v2511_v60  ;;  %v22439_v36 = vld [vmem:[#allocation41_spill] sm:$0xff]  ;;  %v2632_v60 = vcombine.high %v16285_v7, %v16291_v31 }
 0x4a8   : > { %v2515_v55 = vcombine.low %v22440_v52, %v22439_v36  ;;  %v2752_v52 = vcombine.low %v22444_v58, %v22443_v54  ;;  %v22445_v36 = vld [vmem:[#allocation23_spill] sm:$0xff] }
 0x4a9   : > { %22437 = vst [vmem:[#allocation18_spill] sm:$0xff] %v16511_v49  ;;  %7825 = vperm.xlu0 %13550, %v5436_v19   ;;  %v13109_v26 = vpack.c.bf16 %v16511_v49, %v16511_v49  ;;  %v5438_v62 = vunpack.c.l.b16 %v13107_v63  ;;  %v2600_v63 = vcombine.high %v16023_v18, %v16029_v13  ;;  %v22442_v49 = vld [vmem:[#allocation67_spill] sm:$0xff]  ;;  %v2943_v31 = vcombine.low %v22446_v51, %v22445_v36  ;;  %v22449_v36 = vld [vmem:[#allocation77_spill] sm:$0xff] }
 0x4aa   : > { %v3513_v23 = vcombine.low %v22442_v49, %v16057_v8  ;;  %v13119_v58 = vpack.c.bf16 %v2752_v52, %v2752_v52  ;;  %v3045_v52 = vcombine.low %v16325_v17, %v16342_v44 }
 0x4ab   : > { %5553 = vperm.xlu1 %13548, %v5432_v5   ;;  %v2655_v5 = vcombine.high %v2033_v16, %v22438_v43  ;;  %v5440_v9 = vunpack.c.l.b16 %v13109_v26  ;;  %v13111_v16 = vpack.c.bf16 %v2649_v45, %v2649_v45  ;;  %v16539_v26 = vrot.slane %v2632_v60, %v15126_v42 }
 0x4ac   : > { %v2614_v8 = vrot.slane %v2600_v63, %v15126_v42  ;;  %v3520_v49 = vrot.slane %v3513_v23, %v14698_v20  ;;  %v13125_v54 = vpack.c.bf16 %v2943_v31, %v2943_v31  ;;  %v3029_v23 = vcombine.low %v16069_v4, %v16077_v6  ;;  %v22461_v6 = vld [vmem:[#allocation133_spill] sm:$0xff] }
 0x4ad   : > { %7831 = vperm.xlu0 %13550, %v5438_v62   ;;  %v5442_v45 = vunpack.c.l.b16 %v13111_v16  ;;  %v3529_v31 = vcombine.low %v16237_v37, %v16319_v3  ;;  %v16561_v63 = vunpack.c.l.b16 %v13119_v58  ;;  %v3521_v37 = vcombine.low %v16217_v11, %v16255_v28  ;;  %v2035_v3 = vpop.permute.xlu0 %2034  ;;  %v22457_v28 = vld [vmem:[#allocation45_spill] sm:$0xff] }
 0x4ae   : > { %v2653_v60 = vcombine.low %v2614_v8, %v16539_v26 }
 0x4af   : > { %5559 = vperm.xlu1 %13548, %v5434_v0   ;;  %v16526_v0 = vrot.slane %v2655_v5, %v14698_v20  ;;  %v22447_v5 = vld [vmem:[#allocation19_spill] sm:$0xff] }
 0x4b0   : > { %v3505_v7 = vcombine.low %v22447_v5, %v15943_v2  ;;  %v5007_v5 = vcombine.low %v22449_v36, %v15999_v46  ;;  %v3350_v46 = vcombine.low %v16103_v34, %v16096_v35  ;;  %v22454_v35 = vld [vmem:[#allocation163_spill] sm:$0xff]  ;;  %v22455_v34 = vld [vmem:[#allocation162_spill] sm:$0xff] }
 0x4b1   : > { %22441 = vst [vmem:[#allocation86_spill] sm:$0xff] %v16526_v0  ;;  %7837 = vperm.xlu0 %13550, %v5440_v9  }
 0x4b2   : > { %v3512_v51 = vrot.slane %v3505_v7, %v14698_v20  ;;  %v3334_v7 = vcombine.low %v16082_v50, %v16087_v1  ;;  %v22456_v1 = vld [vmem:[#allocation132_spill] sm:$0xff] }
 0x4b3   : > { %5565 = vperm.xlu1 %13548, %v5436_v19   ;;  %v13113_v19 = vpack.c.bf16 %v2515_v55, %v2515_v55  ;;  %v3765_v11 = vcombine.high %v22457_v28, %v22456_v1  ;;  %v2037_v1 = vpop.permute.xlu1 %2036 }
 0x4b4   : > { %v3537_v16 = vcombine.low %v3512_v51, %v3520_v49  ;;  %v16570_v49 = vrot.slane %v5007_v5, %v14698_v20 }
 0x4b5   : > { %7843 = vperm.xlu0 %13550, %v5442_v45   ;;  %v5444_v55 = vunpack.c.l.b16 %v13113_v19  ;;  %v16563_v19 = vunpack.c.l.b16 %v13125_v54  ;;  %v22451_v54 = vld [vmem:[#allocation130_spill] sm:$0xff] }
 0x4b6   : > { %v16579_v58 = vrot.slane %v3537_v16, %v15126_v42  ;;  %v22458_v16 = vld [vmem:[#allocation164_spill] sm:$0xff] }
 0x4b7   : > { %5571 = vperm.xlu1 %13548, %v5438_v62   ;;  %v16543_v62 = vrot.slane %v16526_v0, %v15126_v42  ;;  %v16574_v0 = vrot.slane %v3029_v23, %v15126_v42  ;;  %v16588_v23 = vrot.slane %v3334_v7, %v15126_v42  ;;  %v3366_v50 = vcombine.low %v22458_v16, %v16355_v39  ;;  %v22462_v7 = vld [vmem:[#allocation131_spill] sm:$0xff] }
 0x4b8   : > { %22450 = vst [vmem:[#allocation88_spill] sm:$0xff] %v16579_v58  ;;  %v3781_v4 = vcombine.high %v22462_v7, %v22461_v6  ;;  %v22473_v7 = vld [vmem:[#allocation138_spill] sm:$0xff] }
 0x4b9   : > { %22448 = vst [vmem:[#allocation41_spill] sm:$0xff] %v16543_v62  ;;  %v13115_v2 = vpack.c.bf16 %v16543_v62, %v16543_v62  ;;  %7849 = vperm.xlu0 %13550, %v5444_v55   ;;  %v22453_v62 = vld [vmem:[#allocation60_spill] sm:$0xff] }
 0x4bb   : > { %5577 = vperm.xlu1 %13548, %v5440_v9   ;;  %v3013_v9 = vcombine.low %v16062_v15, %v16074_v14  ;;  %v5446_v36 = vunpack.c.l.b16 %v13115_v2  ;;  %v4086_v2 = vcombine.high %v22451_v54, %v16134_v33  ;;  %v16596_v33 = vrot.slane %v3350_v46, %v15126_v42 }
 0x4bc   : > { %v16609_v46 = vcombine.high %v16493_v41, %v16490_v38  ;;  %v16628_v38 = vrot.slane %v3366_v50, %v15126_v42  ;;  %v3797_v41 = vcombine.high %v16384_v59, %v16408_v24  ;;  %v3813_v50 = vcombine.high %v16395_v10, %v16411_v48 }
 0x4bd   : > { %v3021_v51 = vrot.slane %v3013_v9, %v15126_v42  ;;  %v3061_v9 = vcombine.low %v22455_v34, %v22454_v35  ;;  %7855 = vperm.xlu0 %13550, %v5446_v36   ;;  %22459 = vst [vmem:[#allocation67_spill] sm:$0xff] %v16596_v33  ;;  %v3528_v35 = vrot.slane %v3521_v37, %v14698_v20 }
 0x4be   : > { %22463 = vst [vmem:[#allocation95_spill] sm:$0xff] %v16609_v46  ;;  %v16622_v37 = vcombine.high %v16514_v22, %v16507_v53  ;;  %v16638_v22 = vcombine.high %v2614_v8, %v16539_v26  ;;  %v16641_v53 = vrot.slane %v3781_v4, %v15126_v42  ;;  %v4118_v26 = vcombine.high %v16376_v56, %v16400_v12 }
 0x4bf   : > { %5583 = vperm.xlu1 %13548, %v5442_v45   ;;  %v13117_v45 = vpack.c.bf16 %v2653_v60, %v2653_v60  ;;  %v22452_v60 = vld [vmem:[#allocation50_spill] sm:$0xff] }
 0x4c0   : > { %v4102_v5 = vcombine.high %v22453_v62, %v22452_v60  ;;  %v3053_v60 = vrot.slane %v3045_v52, %v15126_v42  ;;  %v16600_v62 = vrot.slane %v2035_v3, %v15126_v42  ;;  %v16612_v52 = vrot.slane %v4086_v2, %v15126_v42  ;;  %22464 = vst [vmem:[#allocation23_spill] sm:$0xff] %v16622_v37  ;;  %v22471_v37 = vld [vmem:[#allocation137_spill] sm:$0xff] }
 0x4c1   : > { %v5448_v54 = vunpack.c.l.b16 %v13117_v45  ;;  %v16618_v45 = vrot.slane %v3061_v9, %v15126_v42  ;;  %v16633_v2 = vrot.slane %v2037_v1, %v14698_v20  ;;  %22467 = vst [vmem:[#allocation77_spill] sm:$0xff] %v16638_v22  ;;  %22468 = vst [vmem:[#allocation162_spill] sm:$0xff] %v16641_v53 }
 0x4c2   : > { %22460 = vst [vmem:[#allocation99_spill] sm:$0xff] %v16600_v62  ;;  %v16615_v3 = vrot.slane %v4102_v5, %v15126_v42  ;;  %v13121_v5 = vpack.c.bf16 %v16600_v62, %v16600_v62  ;;  %v3077_v9 = vcombine.low %v3021_v51, %v3053_v60  ;;  %v22472_v62 = vld [vmem:[#allocation136_spill] sm:$0xff] }
 0x4c3   : > { %5589 = vperm.xlu1 %13548, %v5444_v55   ;;  %v3536_v55 = vrot.slane %v3529_v31, %v14698_v20  ;;  %v3382_v31 = vcombine.low %v16371_v32, %v16364_v30  ;;  %7861 = vperm.xlu0 %13550, %v5448_v54   ;;  %22466 = vst [vmem:[#allocation19_spill] sm:$0xff] %v16633_v2 }
 0x4c4   : > { %v4531_v28 = vcombine.low %v22473_v7, %v22472_v62  ;;  %v16659_v4 = vcombine.high %v16574_v0, %v16618_v45  ;;  %v3100_v22 = vcombine.high %v16633_v2, %v22438_v43  ;;  %v13123_v62 = vpack.c.bf16 %v3077_v9, %v3077_v9  ;;  %v22480_v7 = vld [vmem:[#allocation144_spill] sm:$0xff]  ;;  %v22484_v9 = vld [vmem:[#allocation134_spill] sm:$0xff] }
 0x4c5   : > { %v3545_v6 = vcombine.low %v3528_v35, %v3536_v55  ;;  %v16644_v35 = vrot.slane %v3382_v31, %v15126_v42  ;;  %v22470_v55 = vld [vmem:[#allocation135_spill] sm:$0xff]  ;;  %v16670_v31 = vcombine.high %v16588_v23, %v16628_v38  ;;  %v16701_v2 = vrot.slane %v4118_v26, %v15126_v42 }
 0x4c6   : > { %v4515_v46 = vcombine.low %v22471_v37, %v22470_v55  ;;  %22474 = vst [vmem:[#allocation135_spill] sm:$0xff] %v16659_v4  ;;  %v5452_v4 = vunpack.c.l.b16 %v13121_v5  ;;  %v22483_v5 = vcombine.high %v22471_v37, %v22470_v55  ;;  %v3085_v55 = vcombine.high %v2037_v1, %v22438_v43 }
 0x4c7   : > { %5595 = vperm.xlu1 %13548, %v5446_v36   ;;  %v16625_v36 = vrot.slane %v3765_v11, %v15126_v42  ;;  %v16648_v11 = vcombine.high %v3021_v51, %v3053_v60  ;;  %7867 = vperm.xlu0 %13550, %v16561_v63   ;;  %v16662_v8 = vrot.slane %v3545_v6, %v15126_v42  ;;  %v22479_v6 = vld [vmem:[#allocation150_spill] sm:$0xff]  ;;  %v5454_v26 = vunpack.c.l.b16 %v13123_v62  ;;  %v22491_v62 = vld [vmem:[#allocation139_spill] sm:$0xff] }
 0x4c8   : > { %v4134_v51 = vcombine.high %v16379_v61, %v16403_v40  ;;  %v5023_v12 = vcombine.low %v22480_v7, %v22479_v6  ;;  %v16680_v40 = vrot.slane %v3813_v50, %v15126_v42  ;;  %v16696_v7 = vrot.slane %v22483_v5, %v15126_v42  ;;  %v22485_v50 = vld [vmem:[#allocation36_spill] sm:$0xff] }
 0x4c9   : > { %22465 = vst [vmem:[#allocation58_spill] sm:$0xff] %v16625_v36  ;;  %22469 = vst [vmem:[#allocation164_spill] sm:$0xff] %v16648_v11  ;;  %v16673_v11 = vrot.slane %v3797_v41, %v15126_v42  ;;  %v16687_v41 = vcombine.high %v16596_v33, %v16644_v35  ;;  %v5015_v6 = vcombine.low %v22485_v50, %v22484_v9 }
 0x4ca   : > { %22475 = vst [vmem:[#allocation137_spill] sm:$0xff] %v16662_v8  ;;  %22481 = vst [vmem:[#allocation150_spill] sm:$0xff] %v16680_v40  ;;  %v16711_v37 = vcombine.high %v16579_v58, %v16662_v8  ;;  %v16715_v5 = vrot.slane %v3100_v22, %v15126_v42  ;;  %v16729_v1 = vcombine.high %v16641_v53, %v16680_v40  ;;  %v22497_v8 = vld [vmem:[#allocation141_spill] sm:$0xff] }
 0x4cb   : > { %5601 = vperm.xlu1 %13548, %v5448_v54   ;;  %v22476_v54 = vld [vmem:[#allocation147_spill] sm:$0xff]  ;;  %22478 = vst [vmem:[#allocation175_spill] sm:$0xff] %v16673_v11  ;;  %22482 = vst [vmem:[#allocation144_spill] sm:$0xff] %v16687_v41  ;;  %7873 = vperm.xlu0 %13550, %v5452_v4   ;;  %v16719_v9 = vcombine.high %v16625_v36, %v16673_v11  ;;  %v5022_v22 = vrot.slane %v5015_v6, %v14698_v20  ;;  %v22495_v36 = vld [vmem:[#allocation168_spill] sm:$0xff] }
 0x4cc   : > { %v5031_v60 = vcombine.low %v22476_v54, %v16480_v29  ;;  %22477 = vst [vmem:[#allocation147_spill] sm:$0xff] %v16670_v31  ;;  %v4547_v29 = vcombine.low %v16424_v25, %v16434_v57  ;;  %v16690_v54 = vrot.slane %v4515_v46, %v15126_v42  ;;  %v4563_v46 = vcombine.low %v16429_v47, %v16437_v21 }
 0x4cd   : > { %22486 = vst [vmem:[#allocation134_spill] sm:$0xff] %v16711_v37  ;;  %22487 = vst [vmem:[#allocation36_spill] sm:$0xff] %v16715_v5  ;;  %v22492_v37 = vld [vmem:[#allocation43_spill] sm:$0xff]  ;;  %v16749_v53 = vcombine.high %v16612_v52, %v16701_v2  ;;  %v16752_v40 = vrot.slane %v3085_v55, %v14698_v20 }
 0x4ce   : > { %v5038_v41 = vrot.slane %v5031_v60, %v14698_v20  ;;  %22488 = vst [vmem:[#allocation176_spill] sm:$0xff] %v16719_v9  ;;  %v16723_v50 = vrot.slane %v4547_v29, %v15126_v42  ;;  %v22489_v60 = vld [vmem:[#allocation166_spill] sm:$0xff]  ;;  %v4836_v58 = vcombine.low %v22492_v37, %v22491_v62  ;;  %v22494_v29 = vld [vmem:[#allocation167_spill] sm:$0xff] }
 0x4cf   : > { %5607 = vperm.xlu1 %13548, %v16561_v63   ;;  %v16704_v63 = vrot.slane %v4134_v51, %v15126_v42  ;;  %v5030_v51 = vrot.slane %v5023_v12, %v14698_v20  ;;  %v4868_v31 = vcombine.low %v22489_v60, %v16449_v27  ;;  %22490 = vst [vmem:[#allocation166_spill] sm:$0xff] %v16729_v1  ;;  %22499 = vst [vmem:[#allocation43_spill] sm:$0xff] %v16749_v53 }
 0x4d0   : > { %v22493_v12 = vcombine.high %v16424_v25, %v16434_v57  ;;  %v4884_v11 = vcombine.low %v22495_v36, %v22494_v29  ;;  %7879 = vperm.xlu0 %13550, %v5454_v26   ;;  %v16745_v1 = vrot.slane %v4563_v46, %v15126_v42  ;;  %22500 = vst [vmem:[#allocation167_spill] sm:$0xff] %v16752_v40 }
 0x4d1   : > { %v5047_v6 = vcombine.low %v5030_v51, %v5038_v41  ;;  %v13127_v25 = vpack.c.bf16 %v16715_v5, %v16715_v5  ;;  %v3081_v57 = vcombine.low %v16574_v0, %v16618_v45  ;;  %v16763_v46 = vrot.slane %v4531_v28, %v15126_v42  ;;  %v22506_v0 = vld [vmem:[#allocation98_spill] sm:$0xff] }
 0x4d2   : > { %v16738_v9 = vrot.slane %v22493_v12, %v15126_v42  ;;  %22498 = vst [vmem:[#allocation139_spill] sm:$0xff] %v16745_v1  ;;  %v16760_v12 = vcombine.high %v16615_v3, %v16704_v63  ;;  %v16766_v41 = vrot.slane %v4868_v31, %v15126_v42  ;;  %v16770_v55 = vcombine.high %v16690_v54, %v16723_v50  ;;  %v22507_v45 = vld [vmem:[#allocation42_spill] sm:$0xff] }
 0x4d3   : > { %5613 = vperm.xlu1 %13548, %v5452_v4   ;;  %v22496_v4 = vld [vmem:[#allocation140_spill] sm:$0xff]  ;;  %v5039_v51 = vcombine.low %v16570_v49, %v5022_v22  ;;  %v16774_v53 = vrot.slane %v4884_v11, %v15126_v42  ;;  %v16784_v31 = vrot.slane %v4836_v58, %v15126_v42  ;;  %v16791_v49 = vcombine.high %v16763_v46, %v16745_v1 }
 0x4d4   : > { %v4852_v33 = vcombine.low %v22497_v8, %v22496_v4  ;;  %22501 = vst [vmem:[#allocation168_spill] sm:$0xff] %v16760_v12  ;;  %22502 = vst [vmem:[#allocation140_spill] sm:$0xff] %v16763_v46  ;;  %7885 = vperm.xlu0 %13550, %v16563_v19   ;;  %v2947_v12 = vcombine.low %v22507_v45, %v22506_v0  ;;  %v16781_v28 = vcombine.high %v16696_v7, %v16738_v9 }
 0x4d5   : > { %22503 = vst [vmem:[#allocation141_spill] sm:$0xff] %v16766_v41  ;;  %22504 = vst [vmem:[#allocation177_spill] sm:$0xff] %v16770_v55  ;;  %v16794_v11 = vrot.slane %v5047_v6, %v15126_v42  ;;  %v3115_v22 = vcombine.high %v16752_v40, %v22438_v43  ;;  %v5458_v0 = vunpack.c.l.b16 %v13127_v25  ;;  %v13129_v45 = vpack.c.bf16 %v3081_v57, %v3081_v57  ;;  %v22514_v55 = vld [vmem:[#allocation156_spill] sm:$0xff]  ;;  %v22519_v57 = vld [vmem:[#allocation83_spill] sm:$0xff] }
 0x4d6   : > { %22505 = vst [vmem:[#allocation178_spill] sm:$0xff] %v16774_v53  ;;  %22508 = vst [vmem:[#allocation98_spill] sm:$0xff] %v16781_v28  ;;  %v22513_v28 = vld [vmem:[#allocation155_spill] sm:$0xff]  ;;  %v16810_v6 = vrot.slane %v5039_v51, %v15126_v42  ;;  %v22523_v40 = vld [vmem:[#allocation153_spill] sm:$0xff] }
 0x4d7   : > { %5619 = vperm.xlu1 %13548, %v5454_v26   ;;  %22509 = vst [vmem:[#allocation42_spill] sm:$0xff] %v16784_v31  ;;  %v16787_v26 = vrot.slane %v4852_v33, %v15126_v42  ;;  %22511 = vst [vmem:[#allocation180_spill] sm:$0xff] %v16791_v49  ;;  %v22515_v58 = vcombine.low %v22513_v28, %v22514_v55  ;;  %v16807_v33 = vcombine.high %v16784_v31, %v16766_v41  ;;  %v22520_v55 = vld [vmem:[#allocation84_spill] sm:$0xff]  ;;  %v22526_v41 = vld [vmem:[#allocation154_spill] sm:$0xff] }
 0x4d8   : > { %22512 = vst [vmem:[#allocation181_spill] sm:$0xff] %v16794_v11  ;;  %22517 = vst [vmem:[#allocation156_spill] sm:$0xff] %v16810_v6  ;;  %7891 = vperm.xlu0 %13550, %v5458_v0   ;;  %v13131_v49 = vpack.c.bf16 %v2947_v12, %v2947_v12  ;;  %v22521_v28 = vcombine.low %v22519_v57, %v22520_v55  ;;  %v22525_v51 = vld [vmem:[#allocation152_spill] sm:$0xff]  ;;  %v16839_v57 = vcombine.high %v16810_v6, %v16794_v11  ;;  %v22530_v55 = vld [vmem:[#allocation15_spill] sm:$0xff] }
 0x4d9   : > { %22510 = vst [vmem:[#allocation179_spill] sm:$0xff] %v16787_v26  ;;  %v16802_v5 = vrot.slane %v22515_v58, %v15126_v42  ;;  %22516 = vst [vmem:[#allocation155_spill] sm:$0xff] %v16807_v33  ;;  %v16814_v25 = vcombine.high %v16787_v26, %v16774_v53  ;;  %v22527_v12 = vcombine.low %v22525_v51, %v22526_v41  ;;  %v5460_v26 = vunpack.c.l.b16 %v13129_v45  ;;  %v22571_v6 = vld [vmem:[#allocation145_spill] sm:$0xff] }
 0x4da   : > { %v16820_v58 = vrot.slane %v22521_v28, %v15126_v42  ;;  %22529 = vst [vmem:[#allocation84_spill] sm:$0xff] %v16839_v57  ;;  %v22531_v28 = vld [vmem:[#allocation9_spill] sm:$0xff]  ;;  %v22535_v51 = vcombine.high %v16325_v17, %v16342_v44  ;;  %v22539_v44 = vcombine.high %v22458_v16, %v16355_v39  ;;  %v22543_v39 = vld [vmem:[#allocation90_spill] sm:$0xff] }
 0x4db   : > { %5625 = vperm.xlu1 %13548, %v16563_v19   ;;  %22518 = vst [vmem:[#allocation182_spill] sm:$0xff] %v16814_v25  ;;  %v22522_v19 = vld [vmem:[#allocation151_spill] sm:$0xff]  ;;  %v16832_v46 = vrot.slane %v22527_v12, %v15126_v42  ;;  %v16835_v25 = vrot.slane %v3115_v22, %v15126_v42  ;;  %v22534_v22 = vcombine.low %v16023_v18, %v16029_v13  ;;  %v22544_v16 = vld [vmem:[#allocation49_spill] sm:$0xff] }
 0x4dc   : > { %v22524_v31 = vcombine.low %v22522_v19, %v22523_v40  ;;  %v22532_v40 = vcombine.low %v22530_v55, %v22531_v28  ;;  %v2039_v19 = vpop.permute.xlu0 %2038  ;;  %v16849_v41 = vcombine.low %v16820_v58, %v16802_v5  ;;  %v16861_v12 = vrot.slane %v22535_v51, %v15126_v42  ;;  %7897 = vperm.xlu0 %13550, %v5460_v26  }
 0x4dd   : > { %22528 = vst [vmem:[#allocation83_spill] sm:$0xff] %v16835_v25  ;;  %v16855_v45 = vrot.slane %v22534_v22, %v15126_v42  ;;  %v5462_v55 = vunpack.c.l.b16 %v13131_v49  ;;  %v16879_v17 = vrot.slane %v22539_v44, %v15126_v42  ;;  %v22545_v51 = vcombine.high %v22543_v39, %v22544_v16 }
 0x4de   : > { %v16826_v33 = vrot.slane %v22524_v31, %v15126_v42  ;;  %v16845_v31 = vrot.slane %v22532_v40, %v15126_v42  ;;  %22533 = vst [vmem:[#allocation151_spill] sm:$0xff] %v16849_v41  ;;  %v22537_v40 = vld [vmem:[#allocation163_spill] sm:$0xff]  ;;  %v22549_v41 = vld [vmem:[#allocation65_spill] sm:$0xff]  ;;  %v22552_v39 = vcombine.low %v16384_v59, %v16408_v24  ;;  %v22560_v59 = vcombine.low %v16395_v10, %v16411_v48 }
 0x4df   : > { %5631 = vperm.xlu1 %13548, %v5458_v0   ;;  %v22536_v0 = vcombine.high %v16062_v15, %v16074_v14  ;;  %v22538_v13 = vcombine.high %v22455_v34, %v22537_v40  ;;  %v16886_v14 = vrot.slane %v2039_v19, %v14698_v20  ;;  %v13133_v15 = vpack.c.bf16 %v16835_v25, %v16835_v25  ;;  %v22546_v40 = vld [vmem:[#allocation100_spill] sm:$0xff]  ;;  %v22565_v10 = vld [vmem:[#allocation131_spill] sm:$0xff]  ;;  %v22566_v48 = vld [vmem:[#allocation133_spill] sm:$0xff] }
 0x4e0   : > { %v16883_v49 = vcombine.low %v16845_v31, %v16826_v33  ;;  %v3398_v34 = vcombine.low %v16588_v23, %v16628_v38  ;;  %v16894_v22 = vcombine.low %v16855_v45, %v16832_v46  ;;  %v22551_v23 = vcombine.high %v16371_v32, %v16364_v30  ;;  %7903 = vperm.xlu0 %13550, %v5462_v55   ;;  %v22557_v32 = vld [vmem:[#allocation45_spill] sm:$0xff]  ;;  %v22558_v30 = vld [vmem:[#allocation132_spill] sm:$0xff] }
 0x4e1   : > { %v16867_v28 = vrot.slane %v22536_v0, %v15126_v42  ;;  %v16873_v18 = vrot.slane %v22538_v13, %v15126_v42  ;;  %22541 = vst [vmem:[#allocation152_spill] sm:$0xff] %v16886_v14  ;;  %v16900_v0 = vrot.slane %v22545_v51, %v15126_v42  ;;  %v22547_v13 = vld [vmem:[#allocation96_spill] sm:$0xff]  ;;  %v16942_v24 = vrot.slane %v22560_v59, %v15126_v42 }
 0x4e2   : > { %22540 = vst [vmem:[#allocation153_spill] sm:$0xff] %v16883_v49  ;;  %22542 = vst [vmem:[#allocation154_spill] sm:$0xff] %v16894_v22  ;;  %v3264_v44 = vcombine.low %v22547_v13, %v22546_v40  ;;  %v22548_v49 = vld [vmem:[#allocation11_spill] sm:$0xff]  ;;  %v16914_v38 = vrot.slane %v22551_v23, %v15126_v42  ;;  %v22559_v40 = vcombine.low %v22557_v32, %v22558_v30  ;;  %v22564_v30 = vld [vmem:[#allocation82_spill] sm:$0xff] }
 0x4e3   : > { %5637 = vperm.xlu1 %13548, %v5460_v26   ;;  %v22550_v57 = vcombine.high %v22548_v49, %v22549_v41  ;;  %v16920_v26 = vrot.slane %v22552_v39, %v15126_v42  ;;  %v16924_v16 = vcombine.low %v16867_v28, %v16861_v12  ;;  %v22555_v41 = vld [vmem:[#allocation17_spill] sm:$0xff]  ;;  %v16946_v23 = vcombine.low %v16900_v0, %v16873_v18  ;;  %v22563_v32 = vld [vmem:[#allocation119_spill] sm:$0xff] }
 0x4e4   : > { %v16936_v13 = vrot.slane %v22559_v40, %v15126_v42  ;;  %v3421_v39 = vcombine.high %v16886_v14, %v22438_v43  ;;  %v2762_v40 = vcombine.low %v22564_v30, %v22563_v32  ;;  %v22567_v59 = vcombine.low %v22565_v10, %v22566_v48  ;;  %v22572_v32 = vld [vmem:[#allocation165_spill] sm:$0xff]  ;;  %v22580_v48 = vld [vmem:[#allocation142_spill] sm:$0xff] }
 0x4e5   : > { %v16908_v25 = vrot.slane %v22550_v57, %v15126_v42  ;;  %22553 = vst [vmem:[#allocation15_spill] sm:$0xff] %v16924_v16  ;;  %v22554_v57 = vld [vmem:[#allocation129_spill] sm:$0xff]  ;;  %22561 = vst [vmem:[#allocation9_spill] sm:$0xff] %v16946_v23  ;;  %v22568_v23 = vld [vmem:[#allocation54_spill] sm:$0xff]  ;;  %v22573_v30 = vcombine.low %v16379_v61, %v22572_v32 }
 0x4e6   : > { %v22556_v49 = vcombine.high %v22554_v57, %v22555_v41  ;;  %v5464_v57 = vunpack.c.l.b16 %v13133_v15  ;;  %v13135_v41 = vpack.c.bf16 %v3398_v34, %v3398_v34  ;;  %v16960_v16 = vrot.slane %v22567_v59, %v15126_v42  ;;  %v22570_v34 = vld [vmem:[#allocation157_spill] sm:$0xff]  ;;  %v22582_v32 = vld [vmem:[#allocation50_spill] sm:$0xff] }
 0x4e7   : > { %v22569_v22 = vcombine.low %v16376_v56, %v22568_v23  ;;  %5643 = vperm.xlu1 %13548, %v5462_v55   ;;  %v13137_v15 = vpack.c.bf16 %v3264_v44, %v3264_v44  ;;  %v16974_v11 = vrot.slane %v22573_v30, %v15126_v42  ;;  %v16982_v56 = vcombine.low %v16936_v13, %v16920_v26  ;;  %v22576_v55 = vld [vmem:[#allocation130_spill] sm:$0xff]  ;;  %v22579_v23 = vld [vmem:[#allocation148_spill] sm:$0xff] }
 0x4e8   : > { %v16930_v51 = vrot.slane %v22556_v49, %v15126_v42  ;;  %v16952_v49 = vcombine.low %v16908_v25, %v16879_v17  ;;  %7909 = vperm.xlu0 %13550, %v5464_v57   ;;  %v2770_v61 = vcombine.low %v22580_v48, %v22579_v23  ;;  %v16994_v59 = vcombine.low %v16960_v16, %v16942_v24 }
 0x4e9   : > { %v16966_v14 = vrot.slane %v22569_v22, %v15126_v42  ;;  %22575 = vst [vmem:[#allocation49_spill] sm:$0xff] %v16982_v56  ;;  %v22577_v22 = vld [vmem:[#allocation10_spill] sm:$0xff]  ;;  %v3406_v56 = vcombine.high %v2039_v19, %v22438_v43  ;;  %v17004_v53 = vrot.slane %v3421_v39, %v15126_v42  ;;  %v22586_v23 = vcombine.high %v16429_v47, %v16437_v21  ;;  %v22588_v47 = vld [vmem:[#allocation136_spill] sm:$0xff] }
 0x4ea   : > { %22562 = vst [vmem:[#allocation163_spill] sm:$0xff] %v16952_v49  ;;  %v2778_v49 = vcombine.low %v22571_v6, %v22570_v34  ;;  %v16978_v10 = vcombine.low %v16930_v51, %v16914_v38  ;;  %v22578_v44 = vcombine.low %v22576_v55, %v22577_v22  ;;  %v22581_v34 = vld [vmem:[#allocation60_spill] sm:$0xff]  ;;  %v5466_v55 = vunpack.c.l.b16 %v13135_v41  ;;  %v22584_v22 = vld [vmem:[#allocation31_spill] sm:$0xff] }
 0x4eb   : > { %v22583_v30 = vcombine.low %v22581_v34, %v22582_v32  ;;  %v17012_v48 = vrot.slane %v22586_v23, %v15126_v42  ;;  %5649 = vperm.xlu1 %13548, %v5464_v57   ;;  %v2769_v19 = vrot.slane %v2762_v40, %v14698_v20  ;;  %v5468_v41 = vunpack.c.l.b16 %v13137_v15 }
 0x4ec   : > { %22574 = vst [vmem:[#allocation90_spill] sm:$0xff] %v16978_v10  ;;  %v16988_v6 = vrot.slane %v22578_v44, %v15126_v42  ;;  %v22585_v44 = vld [vmem:[#allocation93_spill] sm:$0xff]  ;;  %v2785_v39 = vrot.slane %v2778_v49, %v14698_v20  ;;  %7915 = vperm.xlu0 %13550, %v5466_v55   ;;  %v2777_v57 = vrot.slane %v2770_v61, %v14698_v20  ;;  %v22592_v61 = vld [vmem:[#allocation67_spill] sm:$0xff] }
 0x4ed   : > { %v17000_v10 = vrot.slane %v22583_v30, %v15126_v42  ;;  %v2754_v1 = vcombine.low %v22585_v44, %v22584_v22  ;;  %v22587_v30 = vld [vmem:[#allocation138_spill] sm:$0xff]  ;;  %v22590_v40 = vcombine.high %v22489_v60, %v16449_v27  ;;  %v22591_v49 = vcombine.high %v22495_v36, %v22494_v29 }
 0x4ee   : > { %v17016_v34 = vcombine.low %v16988_v6, %v16966_v14  ;;  %v22589_v21 = vcombine.high %v22587_v30, %v22588_v47  ;;  %v17044_v23 = vrot.slane %v3406_v56, %v14698_v20  ;;  %v13139_v30 = vpack.c.bf16 %v17004_v53, %v17004_v53 }
 0x4ef   : > { %v17022_v32 = vcombine.low %v17000_v10, %v16974_v11  ;;  %v17035_v44 = vrot.slane %v22590_v40, %v15126_v42  ;;  %v17041_v15 = vrot.slane %v22591_v49, %v15126_v42  ;;  %v3402_v47 = vcombine.low %v22592_v61, %v16644_v35  ;;  %5655 = vperm.xlu1 %13548, %v5466_v55   ;;  %v22596_v40 = vld [vmem:[#allocation97_spill] sm:$0xff] }
 0x4f0   : > { %v17028_v22 = vrot.slane %v22589_v21, %v15126_v42  ;;  %v17052_v27 = vcombine.low %v16696_v7, %v16738_v9  ;;  %v2761_v60 = vrot.slane %v2754_v1, %v14698_v20  ;;  %v22593_v36 = vcombine.high %v22492_v37, %v22491_v62  ;;  %7921 = vperm.xlu0 %13550, %v5468_v41   ;;  %v22595_v1 = vld [vmem:[#allocation101_spill] sm:$0xff] }
 0x4f1   : > { %v22594_v35 = vcombine.high %v22497_v8, %v22496_v4  ;;  %v2794_v7 = vcombine.low %v2777_v57, %v2785_v39  ;;  %v3268_v49 = vcombine.low %v22596_v40, %v22595_v1  ;;  %v3436_v62 = vcombine.high %v17044_v23, %v22438_v43  ;;  %v22600_v39 = vld [vmem:[#allocation146_spill] sm:$0xff]  ;;  %v22606_v40 = vld [vmem:[#allocation143_spill] sm:$0xff] }
 0x4f2   : > { %v17059_v29 = vrot.slane %v22593_v36, %v15126_v42  ;;  %v17063_v56 = vcombine.low %v17028_v22, %v17012_v48  ;;  %v2786_v9 = vcombine.low %v2761_v60, %v2769_v19  ;;  %v5470_v55 = vunpack.c.l.b16 %v13139_v30  ;;  %v22599_v19 = vld [vmem:[#allocation56_spill] sm:$0xff] }
 0x4f3   : > { %v17069_v21 = vrot.slane %v22594_v35, %v15126_v42  ;;  %v13141_v61 = vpack.c.bf16 %v3402_v47, %v3402_v47  ;;  %5661 = vperm.xlu1 %13548, %v5468_v41   ;;  %v17084_v4 = vrot.slane %v2794_v7, %v15126_v42  ;;  %v4280_v57 = vcombine.low %v22600_v39, %v22599_v19  ;;  %v22602_v36 = vld [vmem:[#allocation16_spill] sm:$0xff]  ;;  %v22603_v35 = vld [vmem:[#allocation53_spill] sm:$0xff] }
 0x4f4   : > { %v17075_v37 = vcombine.low %v17059_v29, %v17035_v44  ;;  %7927 = vperm.xlu0 %13550, %v5470_v55   ;;  %v17090_v60 = vcombine.high %v16820_v58, %v16802_v5  ;;  %v4264_v30 = vcombine.low %v22603_v35, %v22602_v36  ;;  %v13143_v47 = vpack.c.bf16 %v3268_v49, %v3268_v49  ;;  %v22605_v7 = vld [vmem:[#allocation149_spill] sm:$0xff]  ;;  %v22608_v58 = vld [vmem:[#allocation63_spill] sm:$0xff]  ;;  %v2043_v36 = vpop.permute.xlu0 %2042 }
 0x4f5   : > { %v17081_v8 = vcombine.low %v17069_v21, %v17041_v15  ;;  %v17096_v1 = vcombine.high %v16845_v31, %v16826_v33  ;;  %v17099_v41 = vrot.slane %v2786_v9, %v15126_v42  ;;  %v17104_v19 = vrot.slane %v3436_v62, %v15126_v42  ;;  %v22607_v5 = vld [vmem:[#allocation33_spill] sm:$0xff] }
 0x4f6   : > { %22597 = vst [vmem:[#allocation100_spill] sm:$0xff] %v17075_v37  ;;  %22601 = vst [vmem:[#allocation11_spill] sm:$0xff] %v17090_v60  ;;  %v5472_v39 = vunpack.c.l.b16 %v13141_v61  ;;  %v4256_v60 = vcombine.low %v22608_v58, %v22607_v5  ;;  %v17110_v49 = vcombine.high %v16855_v45, %v16832_v46  ;;  %v4287_v33 = vrot.slane %v4280_v57, %v14698_v20  ;;  %v22611_v35 = vld [vmem:[#allocation137_spill] sm:$0xff]  ;;  %v22615_v5 = vld [vmem:[#allocation102_spill] sm:$0xff] }
 0x4f7   : > { %22598 = vst [vmem:[#allocation96_spill] sm:$0xff] %v17081_v8  ;;  %22604 = vst [vmem:[#allocation65_spill] sm:$0xff] %v17096_v1  ;;  %v4272_v8 = vcombine.low %v22606_v40, %v22605_v7  ;;  %5667 = vperm.xlu1 %13548, %v5470_v55   ;;  %v17115_v31 = vcombine.high %v17099_v41, %v17084_v4  ;;  %v4271_v9 = vrot.slane %v4264_v30, %v14698_v20  ;;  %v22612_v7 = vld [vmem:[#allocation88_spill] sm:$0xff] }
 0x4f8   : > { %22609 = vst [vmem:[#allocation129_spill] sm:$0xff] %v17110_v49  ;;  %7933 = vperm.xlu0 %13550, %v5472_v39   ;;  %v5474_v62 = vunpack.c.l.b16 %v13143_v47  ;;  %v13145_v55 = vpack.c.bf16 %v17104_v19, %v17104_v19  ;;  %v3553_v46 = vcombine.low %v22612_v7, %v22611_v35  ;;  %v17125_v45 = vcombine.high %v16867_v28, %v16861_v12  ;;  %v22616_v58 = vld [vmem:[#allocation24_spill] sm:$0xff]  ;;  %v22650_v49 = vld [vmem:[#allocation121_spill] sm:$0xff] }
 0x4f9   : > { %22610 = vst [vmem:[#allocation17_spill] sm:$0xff] %v17115_v31  ;;  %v4279_v61 = vrot.slane %v4272_v8, %v14698_v20  ;;  %v4263_v57 = vrot.slane %v4256_v60, %v14698_v20  ;;  %v17130_v30 = vcombine.high %v16900_v0, %v16873_v18  ;;  %v17133_v40 = vrot.slane %v2043_v36, %v14698_v20 }
 0x4fa   : > { %22613 = vst [vmem:[#allocation45_spill] sm:$0xff] %v17125_v45  ;;  %v3692_v35 = vcombine.low %v22616_v58, %v22615_v5  ;;  %v17139_v12 = vcombine.high %v16908_v25, %v16879_v17  ;;  %v5476_v28 = vunpack.c.l.b16 %v13145_v55  ;;  %v13147_v60 = vpack.c.bf16 %v3553_v46, %v3553_v46  ;;  %v2047_v58 = vpop.permute.xlu0 %2046 }
 0x4fb   : > { %5673 = vperm.xlu1 %13548, %v5472_v39   ;;  %22614 = vst [vmem:[#allocation132_spill] sm:$0xff] %v17130_v30  ;;  %v4296_v47 = vcombine.low %v4279_v61, %v4287_v33  ;;  %v4288_v8 = vcombine.low %v4263_v57, %v4271_v9  ;;  %v17143_v39 = vcombine.high %v16930_v51, %v16914_v38  ;;  %v22624_v9 = vld [vmem:[#allocation175_spill] sm:$0xff] }
 0x4fc   : > { %7939 = vperm.xlu0 %13550, %v5474_v62   ;;  %22617 = vst [vmem:[#allocation119_spill] sm:$0xff] %v17139_v12  ;;  %v17147_v18 = vcombine.high %v16936_v13, %v16920_v26  ;;  %v17154_v33 = vcombine.high %v16960_v16, %v16942_v24  ;;  %v13149_v25 = vpack.c.bf16 %v3692_v35, %v3692_v35  ;;  %v5478_v51 = vunpack.c.l.b16 %v13147_v60  ;;  %v22631_v35 = vld [vmem:[#allocation150_spill] sm:$0xff] }
 0x4fd   : > { %22618 = vst [vmem:[#allocation82_spill] sm:$0xff] %v17143_v39  ;;  %v17150_v0 = vrot.slane %v4296_v47, %v15126_v42  ;;  %v17158_v17 = vcombine.high %v16988_v6, %v16966_v14  ;;  %v17161_v38 = vrot.slane %v4288_v8, %v15126_v42  ;;  %v17165_v26 = vrot.slane %v17133_v40, %v15126_v42  ;;  %v22629_v47 = vld [vmem:[#allocation103_spill] sm:$0xff] }
 0x4fe   : > { %22619 = vst [vmem:[#allocation131_spill] sm:$0xff] %v17147_v18  ;;  %22620 = vst [vmem:[#allocation133_spill] sm:$0xff] %v17154_v33  ;;  %v17169_v13 = vcombine.high %v17000_v10, %v16974_v11  ;;  %v5480_v14 = vunpack.c.l.b16 %v13149_v25  ;;  %v3836_v24 = vcombine.high %v2043_v36, %v22438_v43  ;;  %v17182_v55 = vcombine.high %v17028_v22, %v17012_v48  ;;  %v17184_v11 = vpop.permute.xlu1 %2040  ;;  %v22630_v48 = vld [vmem:[#allocation27_spill] sm:$0xff]  ;;  %v22642_v18 = vld [vmem:[#allocation64_spill] sm:$0xff] }
 0x4ff   : > { %5679 = vperm.xlu1 %13548, %v5474_v62   ;;  %22621 = vst [vmem:[#allocation54_spill] sm:$0xff] %v17158_v17  ;;  %v17173_v16 = vcombine.high %v17161_v38, %v17150_v0  ;;  %v13151_v6 = vpack.c.bf16 %v17165_v26, %v17165_v26  ;;  %v22625_v62 = vld [vmem:[#allocation58_spill] sm:$0xff]  ;;  %v17188_v10 = vcombine.high %v17059_v29, %v17035_v44 }
 0x500   : > { %7945 = vperm.xlu0 %13550, %v5476_v28   ;;  %22622 = vst [vmem:[#allocation157_spill] sm:$0xff] %v17169_v13  ;;  %v3830_v61 = vcombine.low %v22625_v62, %v22624_v9  ;;  %22626 = vst [vmem:[#allocation165_spill] sm:$0xff] %v17182_v55  ;;  %v17192_v36 = vcombine.high %v17069_v21, %v17041_v15  ;;  %v17195_v7 = vrot.slane %v3836_v24, %v14698_v20  ;;  %v22633_v9 = vld [vmem:[#allocation111_spill] sm:$0xff] }
 0x501   : > { %22623 = vst [vmem:[#allocation145_spill] sm:$0xff] %v17173_v16  ;;  %22627 = vst [vmem:[#allocation130_spill] sm:$0xff] %v17188_v10  ;;  %v5482_v46 = vunpack.c.l.b16 %v13151_v6  ;;  %v3696_v22 = vcombine.low %v22630_v48, %v22629_v47  ;;  %v22634_v62 = vld [vmem:[#allocation115_spill] sm:$0xff]  ;;  %v22638_v10 = vld [vmem:[#allocation114_spill] sm:$0xff] }
 0x502   : > { %22628 = vst [vmem:[#allocation10_spill] sm:$0xff] %v17192_v36  ;;  %v13153_v57 = vpack.c.bf16 %v3830_v61, %v3830_v61  ;;  %v2045_v8 = vpop.permute.xlu1 %2044  ;;  %v17201_v5 = vrot.slane %v17195_v7, %v15126_v42  ;;  %v4013_v61 = vcombine.low %v22634_v62, %v22633_v9  ;;  %v22637_v62 = vld [vmem:[#allocation120_spill] sm:$0xff] }
 0x503   : > { %5685 = vperm.xlu1 %13548, %v5476_v28   ;;  %v13155_v29 = vpack.c.bf16 %v3696_v22, %v3696_v22  ;;  %v22632_v28 = vld [vmem:[#allocation162_spill] sm:$0xff] }
 0x504   : > { %7951 = vperm.xlu0 %13550, %v5478_v51   ;;  %v5484_v44 = vunpack.c.l.b16 %v13153_v57  ;;  %v13157_v21 = vpack.c.bf16 %v17201_v5, %v17201_v5  ;;  %v3834_v60 = vcombine.low %v22632_v28, %v22631_v35  ;;  %v13161_v22 = vpack.c.bf16 %v4013_v61, %v4013_v61 }
 0x505   : > { %v5486_v15 = vunpack.c.l.b16 %v13155_v29  ;;  %v4151_v35 = vcombine.low %v16612_v52, %v16701_v2 }
 0x506   : > { %v17207_v25 = vpop.permute.xlu1 %2048  ;;  %v5488_v24 = vunpack.c.l.b16 %v13157_v21  ;;  %v13159_v6 = vpack.c.bf16 %v3834_v60, %v3834_v60 }
 0x507   : > { %5691 = vperm.xlu1 %13548, %v5478_v51   ;;  %v17209_v51 = vpop.permute.xlu0 %2050 }
 0x508   : > { %7957 = vperm.xlu0 %13550, %v5480_v14   ;;  %v5490_v48 = vunpack.c.l.b16 %v13159_v6  ;;  %v13165_v6 = vpack.c.bf16 %v4151_v35, %v4151_v35 }
 0x50a   : > { %v17222_v47 = vpop.permute.xlu1 %2052  ;;  %v5496_v2 = vunpack.c.l.b16 %v13165_v6 }
 0x50b   : > { %5697 = vperm.xlu1 %13548, %v5480_v14   ;;  %v17212_v14 = vrot.slane %v2045_v8, %v14698_v20  ;;  %22635 = vst [vmem:[#allocation148_spill] sm:$0xff] %v17222_v47 }
 0x50c   : > { %7963 = vperm.xlu0 %13550, %v5482_v46  }
 0x50d   : > { %v17220_v57 = vrot.slane %v17212_v14, %v15126_v42 }
 0x50f   : > { %5703 = vperm.xlu1 %13548, %v5482_v46   ;;  %v13163_v29 = vpack.c.bf16 %v17220_v57, %v17220_v57 }
 0x510   : > { %7969 = vperm.xlu0 %13550, %v5484_v44   ;;  %v17216_v46 = vpop.permute.xlu0 %7798  ;;  %v17227_v21 = vpop.permute.xlu1 %5538 }
 0x513   : > { %5709 = vperm.xlu1 %13548, %v5484_v44   ;;  %v4157_v44 = vcombine.high %v2045_v8, %v22438_v43  ;;  %v22636_v8 = vld [vmem:[#allocation112_spill] sm:$0xff] }
 0x514   : > { %7975 = vperm.xlu0 %13550, %v5486_v15   ;;  %v17231_v28 = vpop.permute.xlu0 %7807  ;;  %v4017_v61 = vcombine.low %v22637_v62, %v22636_v8  ;;  %v4155_v8 = vcombine.low %v16615_v3, %v16704_v63  ;;  %v17271_v63 = vrot.slane %v17207_v25, %v14698_v20 }
 0x515   : > { %v17234_v60 = vrot.slane %v4157_v44, %v14698_v20 }
 0x516   : > { %v13171_v6 = vpack.c.bf16 %v4155_v8, %v4155_v8 }
 0x517   : > { %5715 = vperm.xlu1 %13548, %v5486_v15   ;;  %v5492_v15 = vunpack.c.l.b16 %v13161_v22  ;;  %v17244_v52 = vrot.slane %v17234_v60, %v15126_v42 }
 0x518   : > { %7981 = vperm.xlu0 %13550, %v5488_v24   ;;  %v17240_v22 = vpop.permute.xlu0 %7813  ;;  %v5502_v13 = vunpack.c.l.b16 %v13171_v6 }
 0x519   : > { %v13169_v35 = vpack.c.bf16 %v17244_v52, %v17244_v52 }
 0x51b   : > { %5721 = vperm.xlu1 %13548, %v5488_v24   ;;  %v5494_v24 = vunpack.c.l.b16 %v13163_v29  ;;  %v5500_v62 = vunpack.c.l.b16 %v13169_v35  ;;  %v4602_v35 = vcombine.high %v17271_v63, %v22438_v43 }
 0x51c   : > { %7987 = vperm.xlu0 %13550, %v5490_v48  }
 0x51f   : > { %5727 = vperm.xlu1 %13548, %v5490_v48   ;;  %v13167_v48 = vpack.c.bf16 %v4017_v61, %v4017_v61 }
 0x520   : > { %7993 = vperm.xlu0 %13550, %v5492_v15  }
 0x521   : > { %v5498_v29 = vunpack.c.l.b16 %v13167_v48  ;;  %v17263_v48 = vrot.slane %v2047_v58, %v15126_v42  ;;  %v4579_v58 = vcombine.low %v16690_v54, %v16723_v50  ;;  %v4587_v54 = vcombine.high %v17207_v25, %v22438_v43  ;;  %v22645_v25 = vld [vmem:[#allocation139_spill] sm:$0xff] }
 0x522   : > { %v17236_v9 = vpop.permute.xlu1 %5541  ;;  %v17292_v50 = vrot.slane %v4602_v35, %v15126_v42  ;;  %v22646_v35 = vld [vmem:[#allocation140_spill] sm:$0xff] }
 0x523   : > { %5733 = vperm.xlu1 %13548, %v5492_v15   ;;  %v4583_v45 = vcombine.low %v22646_v35, %v22645_v25 }
 0x524   : > { %7999 = vperm.xlu0 %13550, %v5494_v24   ;;  %v17248_v44 = vpop.permute.xlu0 %7819 }
 0x525   : > { %v13183_v31 = vpack.c.bf16 %v4583_v45, %v4583_v45  ;;  %v17326_v45 = vrot.slane %v17209_v51, %v14698_v20 }
 0x526   : > { %v17246_v36 = vpop.permute.xlu1 %5547 }
 0x527   : > { %5739 = vperm.xlu1 %13548, %v5494_v24   ;;  %v22639_v24 = vld [vmem:[#allocation122_spill] sm:$0xff]  ;;  %v5514_v35 = vunpack.c.l.b16 %v13183_v31 }
 0x528   : > { %8005 = vperm.xlu0 %13550, %v5496_v2   ;;  %v4254_v55 = vcombine.low %v22639_v24, %v22638_v10  ;;  %v17260_v16 = vpop.permute.xlu0 %7825  ;;  %v13175_v10 = vpack.c.bf16 %v17263_v48, %v17263_v48  ;;  %v22641_v24 = vld [vmem:[#allocation116_spill] sm:$0xff] }
 0x529   : > { %v4445_v39 = vcombine.low %v22642_v18, %v22641_v24  ;;  %v17299_v18 = vrot.slane %v4587_v54, %v14698_v20 }
 0x52a   : > { %v17252_v15 = vpop.permute.xlu1 %5553  ;;  %v13173_v17 = vpack.c.bf16 %v4254_v55, %v4254_v55  ;;  %v5506_v8 = vunpack.c.l.b16 %v13175_v10 }
 0x52b   : > { %5745 = vperm.xlu1 %13548, %v5496_v2   ;;  %v13179_v12 = vpack.c.bf16 %v4445_v39, %v4445_v39  ;;  %v4617_v39 = vcombine.high %v17299_v18, %v22438_v43 }
 0x52c   : > { %8011 = vperm.xlu0 %13550, %v5498_v29   ;;  %v17267_v3 = vpop.permute.xlu0 %7831  ;;  %v5504_v2 = vunpack.c.l.b16 %v13173_v17 }
 0x52d   : > { %v17318_v25 = vrot.slane %v4617_v39, %v15126_v42  ;;  %v22655_v39 = vld [vmem:[#allocation141_spill] sm:$0xff] }
 0x52e   : > { %v17256_v61 = vpop.permute.xlu1 %5559 }
 0x52f   : > { %5751 = vperm.xlu1 %13548, %v5498_v29  }
 0x530   : > { %8017 = vperm.xlu0 %13550, %v5500_v62   ;;  %v17279_v55 = vpop.permute.xlu0 %7837 }
 0x532   : > { %v17265_v33 = vpop.permute.xlu1 %5565 }
 0x533   : > { %5757 = vperm.xlu1 %13548, %v5500_v62   ;;  %v13177_v62 = vpack.c.bf16 %v4579_v58, %v4579_v58  ;;  %v5510_v58 = vunpack.c.l.b16 %v13179_v12  ;;  %v22649_v12 = vld [vmem:[#allocation113_spill] sm:$0xff] }
 0x534   : > { %8023 = vperm.xlu0 %13550, %v5502_v13   ;;  %v17287_v17 = vpop.permute.xlu0 %7843  ;;  %v4449_v1 = vcombine.low %v22650_v49, %v22649_v12  ;;  %v22656_v12 = vld [vmem:[#allocation42_spill] sm:$0xff] }
 0x535   : > { %v4900_v31 = vcombine.low %v22656_v12, %v22655_v39  ;;  %v4908_v39 = vcombine.high %v17209_v51, %v22438_v43  ;;  %v22666_v51 = vld [vmem:[#allocation178_spill] sm:$0xff] }
 0x536   : > { %v17275_v29 = vpop.permute.xlu1 %5571 }
 0x537   : > { %5763 = vperm.xlu1 %13548, %v5502_v13   ;;  %v5508_v13 = vunpack.c.l.b16 %v13177_v62 }
 0x538   : > { %8029 = vperm.xlu0 %13550, %v5504_v2   ;;  %v17296_v10 = vpop.permute.xlu0 %7849 }
 0x53a   : > { %v17283_v6 = vpop.permute.xlu1 %5577 }
 0x53b   : > { %22640 = vst [vmem:[#allocation142_spill] sm:$0xff] %v17283_v6  ;;  %5769 = vperm.xlu1 %13548, %v5504_v2   ;;  %v13181_v2 = vpack.c.bf16 %v17292_v50, %v17292_v50 }
 0x53c   : > { %8035 = vperm.xlu0 %13550, %v5506_v8   ;;  %v17307_v62 = vpop.permute.xlu0 %7855 }
 0x53d   : > { %22647 = vst [vmem:[#allocation31_spill] sm:$0xff] %v17307_v62 }
 0x53e   : > { %v17294_v30 = vpop.permute.xlu1 %5583 }
 0x53f   : > { %22643 = vst [vmem:[#allocation60_spill] sm:$0xff] %v17294_v30  ;;  %5775 = vperm.xlu1 %13548, %v5506_v8   ;;  %v5512_v8 = vunpack.c.l.b16 %v13181_v2 }
 0x540   : > { %8041 = vperm.xlu0 %13550, %v5508_v13  }
 0x542   : > { %v17303_v24 = vpop.permute.xlu1 %5589  ;;  %v17315_v47 = vpop.permute.xlu0 %7861 }
 0x543   : > { %22644 = vst [vmem:[#allocation50_spill] sm:$0xff] %v17303_v24  ;;  %5781 = vperm.xlu1 %13548, %v5508_v13   ;;  %22651 = vst [vmem:[#allocation138_spill] sm:$0xff] %v17315_v47  ;;  %v13185_v13 = vpack.c.bf16 %v4449_v1, %v4449_v1  ;;  %v13189_v47 = vpack.c.bf16 %v4900_v31, %v4900_v31 }
 0x544   : > { %8047 = vperm.xlu0 %13550, %v5510_v58  }
 0x545   : > { %v5516_v49 = vunpack.c.l.b16 %v13185_v13  ;;  %v22659_v13 = vld [vmem:[#allocation117_spill] sm:$0xff]  ;;  %v5520_v12 = vunpack.c.l.b16 %v13189_v47 }
 0x546   : > { %v17311_v54 = vpop.permute.xlu1 %5595  ;;  %v17322_v24 = vpop.permute.xlu0 %7867 }
 0x547   : > { %22648 = vst [vmem:[#allocation93_spill] sm:$0xff] %v17311_v54  ;;  %5787 = vperm.xlu1 %13548, %v5510_v58   ;;  %22653 = vst [vmem:[#allocation67_spill] sm:$0xff] %v17322_v24  ;;  %v13187_v58 = vpack.c.bf16 %v17318_v25, %v17318_v25  ;;  %v22660_v54 = vld [vmem:[#allocation66_spill] sm:$0xff] }
 0x548   : > { %8053 = vperm.xlu0 %13550, %v5512_v8   ;;  %v4766_v62 = vcombine.low %v22660_v54, %v22659_v13  ;;  %v17354_v54 = vrot.slane %v4908_v39, %v14698_v20  ;;  %v22671_v20 = vld [vmem:[#allocation25_spill] sm:$0xff] }
 0x549   : > { %v5518_v24 = vunpack.c.l.b16 %v13187_v58 }
 0x54a   : > { %v17320_v37 = vpop.permute.xlu1 %5601  ;;  %v17334_v1 = vpop.permute.xlu0 %7873  ;;  %22664 = vst [vmem:[#allocation149_spill] sm:$0xff] %v17354_v54 }
 0x54b   : > { %22652 = vst [vmem:[#allocation136_spill] sm:$0xff] %v17320_v37  ;;  %5793 = vperm.xlu1 %13548, %v5512_v8   ;;  %22657 = vst [vmem:[#allocation97_spill] sm:$0xff] %v17334_v1  ;;  %v4923_v8 = vcombine.high %v17326_v45, %v22438_v43  ;;  %v13191_v1 = vpack.c.bf16 %v4766_v62, %v4766_v62 }
 0x54c   : > { %8059 = vperm.xlu0 %13550, %v5514_v35  }
 0x54d   : > { %v5522_v31 = vunpack.c.l.b16 %v13191_v1  ;;  %v22670_v1 = vld [vmem:[#allocation118_spill] sm:$0xff] }
 0x54e   : > { %v17330_v2 = vpop.permute.xlu1 %5607 }
 0x54f   : > { %22654 = vst [vmem:[#allocation101_spill] sm:$0xff] %v17330_v2  ;;  %5799 = vperm.xlu1 %13548, %v5514_v35   ;;  %v17342_v30 = vpop.permute.xlu0 %7879  ;;  %v17347_v35 = vrot.slane %v4923_v8, %v15126_v42  ;;  %v22667_v8 = vld [vmem:[#allocation179_spill] sm:$0xff] }
 0x550   : > { %8065 = vperm.xlu0 %13550, %v5516_v49   ;;  %22661 = vst [vmem:[#allocation146_spill] sm:$0xff] %v17342_v30  ;;  %v4904_v30 = vcombine.low %v22667_v8, %v22666_v51 }
 0x552   : > { %v17338_v37 = vpop.permute.xlu1 %5613 }
 0x553   : > { %22658 = vst [vmem:[#allocation56_spill] sm:$0xff] %v17338_v37  ;;  %5805 = vperm.xlu1 %13548, %v5516_v49   ;;  %v17351_v58 = vpop.permute.xlu0 %7885  ;;  %v13193_v49 = vpack.c.bf16 %v17347_v35, %v17347_v35 }
 0x554   : > { %8071 = vperm.xlu0 %13550, %v5518_v24   ;;  %22663 = vst [vmem:[#allocation53_spill] sm:$0xff] %v17351_v58  ;;  %v13195_v58 = vpack.c.bf16 %v4904_v30, %v4904_v30 }
 0x555   : > { %v5524_v62 = vunpack.c.l.b16 %v13193_v49 }
 0x556   : > { %v17349_v2 = vpop.permute.xlu1 %5619  ;;  %v5526_v8 = vunpack.c.l.b16 %v13195_v58 }
 0x557   : > { %22662 = vst [vmem:[#allocation16_spill] sm:$0xff] %v17349_v2  ;;  %5811 = vperm.xlu1 %13548, %v5518_v24   ;;  %v17362_v47 = vpop.permute.xlu0 %7891  ;;  %v4938_v24 = vcombine.high %v17354_v54, %v22438_v43  ;;  %v4770_v2 = vcombine.low %v22671_v20, %v22670_v1  ;;  %v22676_v1 = vld [vmem:[#allocation181_spill] sm:$0xff] }
 0x558   : > { %8077 = vperm.xlu0 %13550, %v5520_v12   ;;  %22668 = vst [vmem:[#allocation33_spill] sm:$0xff] %v17362_v47 }
 0x559   : > { %v17373_v51 = vrot.slane %v4938_v24, %v15126_v42 }
 0x55a   : > { %v17358_v13 = vpop.permute.xlu1 %5625 }
 0x55b   : > { %22665 = vst [vmem:[#allocation143_spill] sm:$0xff] %v17358_v13  ;;  %5817 = vperm.xlu1 %13548, %v5520_v12   ;;  %v17370_v37 = vpop.permute.xlu0 %7897  ;;  %v13197_v12 = vpack.c.bf16 %v4770_v2, %v4770_v2  ;;  %v13199_v49 = vpack.c.bf16 %v17373_v51, %v17373_v51 }
 0x55c   : > { %8083 = vperm.xlu0 %13550, %v5522_v31   ;;  %22672 = vst [vmem:[#allocation137_spill] sm:$0xff] %v17370_v37 }
 0x55d   : > { %v5528_v30 = vunpack.c.l.b16 %v13197_v12  ;;  %v5530_v2 = vunpack.c.l.b16 %v13199_v49 }
 0x55e   : > { %v17366_v39 = vpop.permute.xlu1 %5631 }
 0x55f   : > { %22669 = vst [vmem:[#allocation63_spill] sm:$0xff] %v17366_v39  ;;  %5823 = vperm.xlu1 %13548, %v5522_v31   ;;  %v17377_v47 = vpop.permute.xlu0 %7903  ;;  %v22677_v31 = vld [vmem:[#allocation156_spill] sm:$0xff] }
 0x560   : > { %8089 = vperm.xlu0 %13550, %v5524_v62   ;;  %22674 = vst [vmem:[#allocation102_spill] sm:$0xff] %v17377_v47  ;;  %v5055_v37 = vcombine.low %v22677_v31, %v22676_v1 }
 0x562   : > { %v17375_v13 = vpop.permute.xlu1 %5637  ;;  %v13201_v58 = vpack.c.bf16 %v5055_v37, %v5055_v37 }
 0x563   : > { %22673 = vst [vmem:[#allocation88_spill] sm:$0xff] %v17375_v13  ;;  %5829 = vperm.xlu1 %13548, %v5524_v62   ;;  %v22680_v13 = vld [vmem:[#allocation128_spill] sm:$0xff]  ;;  %v22681_v62 = vld [vmem:[#allocation91_spill] sm:$0xff] }
 0x564   : > { %8095 = vperm.xlu0 %13550, %v5526_v8   ;;  %v2191_v47 = vcombine.high %v22681_v62, %v22680_v13  ;;  %v5532_v6 = vunpack.c.l.b16 %v13201_v58  ;;  %v22687_v13 = vld [vmem:[#allocation161_spill] sm:$0xff]  ;;  %v22688_v62 = vld [vmem:[#allocation160_spill] sm:$0xff] }
 0x566   : > { %v17381_v20 = vpop.permute.xlu1 %5643  ;;  %v13203_v1 = vpack.c.bf16 %v2191_v47, %v2191_v47 }
 0x567   : > { %22675 = vst [vmem:[#allocation24_spill] sm:$0xff] %v17381_v20  ;;  %v17385_v39 = vpop.permute.xlu0 %7909  ;;  %5835 = vperm.xlu1 %13548, %v5526_v8   ;;  %v22683_v20 = vld [vmem:[#allocation171_spill] sm:$0xff] }
 0x568   : > { %22678 = vst [vmem:[#allocation175_spill] sm:$0xff] %v17385_v39  ;;  %8101 = vperm.xlu0 %13550, %v5528_v30   ;;  %v2379_v54 = vcombine.high %v22683_v20, %v22438_v43  ;;  %v6797_v37 = vunpack.c.l.b16 %v13203_v1  ;;  %v22692_v1 = vld [vmem:[#allocation62_spill] sm:$0xff] }
 0x56a   : > { %v17387_v24 = vpop.permute.xlu1 %5649  ;;  %v13205_v49 = vpack.c.bf16 %v2379_v54, %v2379_v54  ;;  %v13209_v54 = vpack.c.bf16 %v22692_v1, %v22692_v1 }
 0x56b   : > { %22679 = vst [vmem:[#allocation58_spill] sm:$0xff] %v17387_v24  ;;  %v17391_v12 = vpop.permute.xlu0 %7915  ;;  %5841 = vperm.xlu1 %13548, %v5528_v30  }
 0x56c   : > { %22682 = vst [vmem:[#allocation103_spill] sm:$0xff] %v17391_v12  ;;  %8107 = vperm.xlu0 %13550, %v5530_v2   ;;  %v2329_v12 = vcombine.high %v22688_v62, %v22687_v13  ;;  %v6799_v20 = vunpack.c.l.b16 %v13205_v49  ;;  %v22694_v13 = vld [vmem:[#allocation172_spill] sm:$0xff] }
 0x56d   : > { %v2381_v62 = vcombine.high %v22694_v13, %v22438_v43 }
 0x56e   : > { %v17395_v31 = vpop.permute.xlu1 %5655  ;;  %v13207_v58 = vpack.c.bf16 %v2329_v12, %v2329_v12 }
 0x56f   : > { %22684 = vst [vmem:[#allocation27_spill] sm:$0xff] %v17395_v31  ;;  %v17397_v8 = vpop.permute.xlu0 %7921  ;;  %5847 = vperm.xlu1 %13548, %v5530_v2   ;;  %v13211_v12 = vpack.c.bf16 %v2381_v62, %v2381_v62  ;;  %v22702_v62 = vld [vmem:[#allocation30_spill] sm:$0xff] }
 0x570   : > { %22685 = vst [vmem:[#allocation150_spill] sm:$0xff] %v17397_v8  ;;  %8113 = vperm.xlu0 %13550, %v5532_v6   ;;  %v6801_v2 = vunpack.c.l.b16 %v13207_v58  ;;  %v22698_v58 = vld [vmem:[#allocation95_spill] sm:$0xff] }
 0x571   : > { %v13213_v1 = vpack.c.bf16 %v22698_v58, %v22698_v58 }
 0x572   : > { %v17399_v24 = vpop.permute.xlu1 %5661 }
 0x573   : > { %22686 = vst [vmem:[#allocation162_spill] sm:$0xff] %v17399_v24  ;;  %v17403_v30 = vpop.permute.xlu0 %7927  ;;  %5853 = vperm.xlu1 %13548, %v5532_v6   ;;  %v6803_v6 = vunpack.c.l.b16 %v13209_v54  ;;  %v6807_v13 = vunpack.c.l.b16 %v13213_v1 }
 0x574   : > { %22689 = vst [vmem:[#allocation111_spill] sm:$0xff] %v17403_v30  ;;  %8684 = vperm.xlu0 %13550, %v6797_v37  }
 0x576   : > { %v17405_v47 = vpop.permute.xlu1 %5667 }
 0x577   : > { %22690 = vst [vmem:[#allocation115_spill] sm:$0xff] %v17405_v47  ;;  %v17407_v31 = vpop.permute.xlu0 %7933  ;;  %6906 = vperm.xlu1 %13548, %v6797_v37   ;;  %v6805_v37 = vunpack.c.l.b16 %v13211_v12 }
 0x578   : > { %22691 = vst [vmem:[#allocation112_spill] sm:$0xff] %v17407_v31  ;;  %8690 = vperm.xlu0 %13550, %v6799_v20  }
 0x57a   : > { %v17411_v24 = vpop.permute.xlu1 %5673 }
 0x57b   : > { %22693 = vst [vmem:[#allocation120_spill] sm:$0xff] %v17411_v24  ;;  %v17415_v30 = vpop.permute.xlu0 %7939  ;;  %6912 = vperm.xlu1 %13548, %v6799_v20   ;;  %v22701_v20 = vld [vmem:[#allocation18_spill] sm:$0xff] }
 0x57c   : > { %22695 = vst [vmem:[#allocation114_spill] sm:$0xff] %v17415_v30  ;;  %8696 = vperm.xlu0 %13550, %v6801_v2   ;;  %v2700_v54 = vcombine.high %v22701_v20, %v22438_v43  ;;  %v13215_v30 = vpack.c.bf16 %v22702_v62, %v22702_v62  ;;  %v22707_v20 = vld [vmem:[#allocation23_spill] sm:$0xff] }
 0x57d   : > { %v13219_v1 = vpack.c.bf16 %v22707_v20, %v22707_v20 }
 0x57e   : > { %v17417_v49 = vpop.permute.xlu1 %5679  ;;  %v6809_v12 = vunpack.c.l.b16 %v13215_v30  ;;  %v13217_v58 = vpack.c.bf16 %v2700_v54, %v2700_v54 }
 0x57f   : > { %22696 = vst [vmem:[#allocation122_spill] sm:$0xff] %v17417_v49  ;;  %v17419_v47 = vpop.permute.xlu0 %7945  ;;  %6918 = vperm.xlu1 %13548, %v6801_v2  }
 0x580   : > { %22697 = vst [vmem:[#allocation116_spill] sm:$0xff] %v17419_v47  ;;  %8702 = vperm.xlu0 %13550, %v6803_v6  }
 0x582   : > { %v17423_v24 = vpop.permute.xlu1 %5685 }
 0x583   : > { %22699 = vst [vmem:[#allocation64_spill] sm:$0xff] %v17423_v24  ;;  %v17425_v31 = vpop.permute.xlu0 %7951  ;;  %6924 = vperm.xlu1 %13548, %v6803_v6   ;;  %v6811_v6 = vunpack.c.l.b16 %v13217_v58 }
 0x584   : > { %22700 = vst [vmem:[#allocation139_spill] sm:$0xff] %v17425_v31  ;;  %8708 = vperm.xlu0 %13550, %v6805_v37  }
 0x586   : > { %v17431_v47 = vpop.permute.xlu1 %5691 }
 0x587   : > { %22703 = vst [vmem:[#allocation140_spill] sm:$0xff] %v17431_v47  ;;  %v17433_v2 = vpop.permute.xlu0 %7957  ;;  %6930 = vperm.xlu1 %13548, %v6805_v37   ;;  %v6813_v37 = vunpack.c.l.b16 %v13219_v1  ;;  %v22716_v1 = vld [vmem:[#allocation77_spill] sm:$0xff] }
 0x588   : > { %22704 = vst [vmem:[#allocation113_spill] sm:$0xff] %v17433_v2  ;;  %8714 = vperm.xlu0 %13550, %v6807_v13   ;;  %v22710_v2 = vld [vmem:[#allocation104_spill] sm:$0xff] }
 0x589   : > { %v13221_v30 = vpack.c.bf16 %v22710_v2, %v22710_v2  ;;  %v13225_v2 = vpack.c.bf16 %v22716_v1, %v22716_v1 }
 0x58a   : > { %v17435_v24 = vpop.permute.xlu1 %5697 }
 0x58b   : > { %22705 = vst [vmem:[#allocation121_spill] sm:$0xff] %v17435_v24  ;;  %v17437_v31 = vpop.permute.xlu0 %7963  ;;  %6936 = vperm.xlu1 %13548, %v6807_v13   ;;  %v22712_v24 = vld [vmem:[#allocation41_spill] sm:$0xff]  ;;  %v6815_v58 = vunpack.c.l.b16 %v13221_v30  ;;  %v6819_v30 = vunpack.c.l.b16 %v13225_v2 }
 0x58c   : > { %22706 = vst [vmem:[#allocation141_spill] sm:$0xff] %v17437_v31  ;;  %8720 = vperm.xlu0 %13550, %v6809_v12   ;;  %v2702_v13 = vcombine.high %v22712_v24, %v22438_v43  ;;  %v22719_v24 = vld [vmem:[#allocation99_spill] sm:$0xff] }
 0x58e   : > { %v17441_v49 = vpop.permute.xlu1 %5703  ;;  %v13223_v20 = vpack.c.bf16 %v2702_v13, %v2702_v13  ;;  %v22720_v13 = vld [vmem:[#allocation105_spill] sm:$0xff] }
 0x58f   : > { %22708 = vst [vmem:[#allocation42_spill] sm:$0xff] %v17441_v49  ;;  %v17443_v62 = vpop.permute.xlu0 %7969  ;;  %6942 = vperm.xlu1 %13548, %v6809_v12  }
 0x590   : > { %22709 = vst [vmem:[#allocation117_spill] sm:$0xff] %v17443_v62  ;;  %8726 = vperm.xlu0 %13550, %v6811_v6   ;;  %v6817_v12 = vunpack.c.l.b16 %v13223_v20 }
 0x592   : > { %v17447_v54 = vpop.permute.xlu1 %5709 }
 0x593   : > { %22711 = vst [vmem:[#allocation66_spill] sm:$0xff] %v17447_v54  ;;  %v17451_v31 = vpop.permute.xlu0 %7975  ;;  %6948 = vperm.xlu1 %13548, %v6811_v6   ;;  %v2812_v6 = vcombine.high %v22719_v24, %v22438_v43  ;;  %v22725_v24 = vld [vmem:[#allocation164_spill] sm:$0xff] }
 0x594   : > { %22713 = vst [vmem:[#allocation178_spill] sm:$0xff] %v17451_v31  ;;  %8732 = vperm.xlu0 %13550, %v6813_v37   ;;  %v13231_v2 = vpack.c.bf16 %v22725_v24, %v22725_v24 }
 0x595   : > { %v13229_v20 = vpack.c.bf16 %v2812_v6, %v2812_v6 }
 0x596   : > { %v17453_v49 = vpop.permute.xlu1 %5715 }
 0x597   : > { %22714 = vst [vmem:[#allocation179_spill] sm:$0xff] %v17453_v49  ;;  %v17455_v62 = vpop.permute.xlu0 %7981  ;;  %6954 = vperm.xlu1 %13548, %v6813_v37   ;;  %v13227_v49 = vpack.c.bf16 %v22720_v13, %v22720_v13 }
 0x598   : > { %22715 = vst [vmem:[#allocation118_spill] sm:$0xff] %v17455_v62  ;;  %8738 = vperm.xlu0 %13550, %v6815_v58  }
 0x599   : > { %v6821_v1 = vunpack.c.l.b16 %v13227_v49 }
 0x59a   : > { %v17459_v54 = vpop.permute.xlu1 %5721 }
 0x59b   : > { %22717 = vst [vmem:[#allocation25_spill] sm:$0xff] %v17459_v54  ;;  %v17461_v47 = vpop.permute.xlu0 %7987  ;;  %6960 = vperm.xlu1 %13548, %v6815_v58   ;;  %v6823_v58 = vunpack.c.l.b16 %v13229_v20 }
 0x59c   : > { %22718 = vst [vmem:[#allocation181_spill] sm:$0xff] %v17461_v47  ;;  %8744 = vperm.xlu0 %13550, %v6817_v12  }
 0x59e   : > { %v17467_v62 = vpop.permute.xlu1 %5727 }
 0x59f   : > { %22721 = vst [vmem:[#allocation156_spill] sm:$0xff] %v17467_v62  ;;  %v17469_v37 = vpop.permute.xlu0 %7993  ;;  %6966 = vperm.xlu1 %13548, %v6817_v12   ;;  %v6825_v12 = vunpack.c.l.b16 %v13231_v2  ;;  %v22728_v62 = vld [vmem:[#allocation106_spill] sm:$0xff]  ;;  %v22734_v2 = vld [vmem:[#allocation135_spill] sm:$0xff] }
 0x5a0   : > { %22722 = vst [vmem:[#allocation128_spill] sm:$0xff] %v17469_v37  ;;  %8750 = vperm.xlu0 %13550, %v6819_v30   ;;  %v13233_v49 = vpack.c.bf16 %v22728_v62, %v22728_v62  ;;  %v13237_v62 = vpack.c.bf16 %v22734_v2, %v22734_v2 }
 0x5a2   : > { %v17471_v54 = vpop.permute.xlu1 %5733  ;;  %v6827_v20 = vunpack.c.l.b16 %v13233_v49 }
 0x5a3   : > { %22723 = vst [vmem:[#allocation91_spill] sm:$0xff] %v17471_v54  ;;  %v17473_v47 = vpop.permute.xlu0 %7999  ;;  %6972 = vperm.xlu1 %13548, %v6819_v30   ;;  %v22730_v54 = vld [vmem:[#allocation36_spill] sm:$0xff] }
 0x5a4   : > { %22724 = vst [vmem:[#allocation171_spill] sm:$0xff] %v17473_v47  ;;  %8756 = vperm.xlu0 %13550, %v6821_v1   ;;  %v3131_v30 = vcombine.high %v22730_v54, %v22438_v43  ;;  %v6831_v54 = vunpack.c.l.b16 %v13237_v62  ;;  %v22743_v62 = vld [vmem:[#allocation147_spill] sm:$0xff] }
 0x5a6   : > { %v17477_v31 = vpop.permute.xlu1 %5739  ;;  %v13235_v24 = vpack.c.bf16 %v3131_v30, %v3131_v30 }
 0x5a7   : > { %22726 = vst [vmem:[#allocation161_spill] sm:$0xff] %v17477_v31  ;;  %v17479_v13 = vpop.permute.xlu0 %8005  ;;  %6978 = vperm.xlu1 %13548, %v6821_v1  }
 0x5a8   : > { %22727 = vst [vmem:[#allocation160_spill] sm:$0xff] %v17479_v13  ;;  %8762 = vperm.xlu0 %13550, %v6823_v58   ;;  %v6829_v1 = vunpack.c.l.b16 %v13235_v24 }
 0x5aa   : > { %v17483_v6 = vpop.permute.xlu1 %5745 }
 0x5ab   : > { %22729 = vst [vmem:[#allocation62_spill] sm:$0xff] %v17483_v6  ;;  %v17487_v47 = vpop.permute.xlu0 %8011  ;;  %6984 = vperm.xlu1 %13548, %v6823_v58   ;;  %v22737_v58 = vld [vmem:[#allocation107_spill] sm:$0xff] }
 0x5ac   : > { %22731 = vst [vmem:[#allocation172_spill] sm:$0xff] %v17487_v47  ;;  %8768 = vperm.xlu0 %13550, %v6825_v12   ;;  %v13239_v49 = vpack.c.bf16 %v22737_v58, %v22737_v58  ;;  %v13243_v58 = vpack.c.bf16 %v22743_v62, %v22743_v62 }
 0x5ae   : > { %v17489_v31 = vpop.permute.xlu1 %5751  ;;  %v6833_v24 = vunpack.c.l.b16 %v13239_v49 }
 0x5af   : > { %22732 = vst [vmem:[#allocation95_spill] sm:$0xff] %v17489_v31  ;;  %v17491_v13 = vpop.permute.xlu0 %8017  ;;  %6990 = vperm.xlu1 %13548, %v6825_v12  }
 0x5b0   : > { %22733 = vst [vmem:[#allocation18_spill] sm:$0xff] %v17491_v13  ;;  %8774 = vperm.xlu0 %13550, %v6827_v20   ;;  %v22739_v13 = vld [vmem:[#allocation83_spill] sm:$0xff] }
 0x5b1   : > { %v3133_v12 = vcombine.high %v22739_v13, %v22438_v43  ;;  %v6837_v13 = vunpack.c.l.b16 %v13243_v58  ;;  %v22751_v58 = vld [vmem:[#allocation144_spill] sm:$0xff] }
 0x5b2   : > { %v17495_v6 = vpop.permute.xlu1 %5757 }
 0x5b3   : > { %22735 = vst [vmem:[#allocation30_spill] sm:$0xff] %v17495_v6  ;;  %v17497_v37 = vpop.permute.xlu0 %8023  ;;  %6996 = vperm.xlu1 %13548, %v6827_v20   ;;  %v13241_v2 = vpack.c.bf16 %v3133_v12, %v3133_v12 }
 0x5b4   : > { %22736 = vst [vmem:[#allocation23_spill] sm:$0xff] %v17497_v37  ;;  %8780 = vperm.xlu0 %13550, %v6829_v1  }
 0x5b5   : > { %v6835_v20 = vunpack.c.l.b16 %v13241_v2 }
 0x5b6   : > { %v17501_v30 = vpop.permute.xlu1 %5763 }
 0x5b7   : > { %22738 = vst [vmem:[#allocation104_spill] sm:$0xff] %v17501_v30  ;;  %v17505_v31 = vpop.permute.xlu0 %8029  ;;  %7002 = vperm.xlu1 %13548, %v6829_v1   ;;  %v22746_v1 = vld [vmem:[#allocation47_spill] sm:$0xff] }
 0x5b8   : > { %22740 = vst [vmem:[#allocation41_spill] sm:$0xff] %v17505_v31  ;;  %8786 = vperm.xlu0 %13550, %v6831_v54   ;;  %v13245_v49 = vpack.c.bf16 %v22746_v1, %v22746_v1  ;;  %v13249_v1 = vpack.c.bf16 %v22751_v58, %v22751_v58 }
 0x5ba   : > { %v17507_v6 = vpop.permute.xlu1 %5769  ;;  %v6839_v2 = vunpack.c.l.b16 %v13245_v49 }
 0x5bb   : > { %22741 = vst [vmem:[#allocation77_spill] sm:$0xff] %v17507_v6  ;;  %v17509_v37 = vpop.permute.xlu0 %8035  ;;  %7008 = vperm.xlu1 %13548, %v6831_v54   ;;  %v3452_v54 = vcombine.high %v17004_v53, %v22438_v43  ;;  %v6843_v53 = vunpack.c.l.b16 %v13249_v1  ;;  %v22759_v1 = vld [vmem:[#allocation134_spill] sm:$0xff] }
 0x5bc   : > { %22742 = vst [vmem:[#allocation99_spill] sm:$0xff] %v17509_v37  ;;  %8792 = vperm.xlu0 %13550, %v6833_v24  }
 0x5bd   : > { %v13247_v62 = vpack.c.bf16 %v3452_v54, %v3452_v54 }
 0x5be   : > { %v17513_v30 = vpop.permute.xlu1 %5775 }
 0x5bf   : > { %22744 = vst [vmem:[#allocation105_spill] sm:$0xff] %v17513_v30  ;;  %v17515_v47 = vpop.permute.xlu0 %8041  ;;  %7014 = vperm.xlu1 %13548, %v6833_v24   ;;  %v6841_v24 = vunpack.c.l.b16 %v13247_v62 }
 0x5c0   : > { %22745 = vst [vmem:[#allocation164_spill] sm:$0xff] %v17515_v47  ;;  %8798 = vperm.xlu0 %13550, %v6835_v20  }
 0x5c2   : > { %v17519_v12 = vpop.permute.xlu1 %5781 }
 0x5c3   : > { %22747 = vst [vmem:[#allocation106_spill] sm:$0xff] %v17519_v12  ;;  %v17523_v37 = vpop.permute.xlu0 %8047  ;;  %7020 = vperm.xlu1 %13548, %v6835_v20   ;;  %v22754_v20 = vld [vmem:[#allocation108_spill] sm:$0xff] }
 0x5c4   : > { %22748 = vst [vmem:[#allocation36_spill] sm:$0xff] %v17523_v37  ;;  %8804 = vperm.xlu0 %13550, %v6837_v13   ;;  %v13251_v49 = vpack.c.bf16 %v22754_v20, %v22754_v20  ;;  %v13255_v20 = vpack.c.bf16 %v22759_v1, %v22759_v1 }
 0x5c6   : > { %v17525_v31 = vpop.permute.xlu1 %5787  ;;  %v6845_v62 = vunpack.c.l.b16 %v13251_v49  ;;  %v22762_v49 = vld [vmem:[#allocation109_spill] sm:$0xff] }
 0x5c7   : > { %22749 = vst [vmem:[#allocation135_spill] sm:$0xff] %v17525_v31  ;;  %v17527_v47 = vpop.permute.xlu0 %8053  ;;  %7026 = vperm.xlu1 %13548, %v6837_v13   ;;  %v3454_v13 = vcombine.high %v17104_v19, %v22438_v43  ;;  %v3881_v19 = vcombine.high %v17165_v26, %v22438_v43  ;;  %v22767_v26 = vld [vmem:[#allocation176_spill] sm:$0xff] }
 0x5c8   : > { %22750 = vst [vmem:[#allocation107_spill] sm:$0xff] %v17527_v47  ;;  %8810 = vperm.xlu0 %13550, %v6839_v2  }
 0x5c9   : > { %v13253_v58 = vpack.c.bf16 %v3454_v13, %v3454_v13  ;;  %v13257_v13 = vpack.c.bf16 %v22762_v49, %v22762_v49  ;;  %v13259_v1 = vpack.c.bf16 %v3881_v19, %v3881_v19 }
 0x5ca   : > { %v17531_v12 = vpop.permute.xlu1 %5793 }
 0x5cb   : > { %22752 = vst [vmem:[#allocation83_spill] sm:$0xff] %v17531_v12  ;;  %v17533_v30 = vpop.permute.xlu0 %8059  ;;  %7032 = vperm.xlu1 %13548, %v6839_v2   ;;  %v6847_v2 = vunpack.c.l.b16 %v13253_v58  ;;  %v6851_v58 = vunpack.c.l.b16 %v13257_v13 }
 0x5cc   : > { %22753 = vst [vmem:[#allocation147_spill] sm:$0xff] %v17533_v30  ;;  %8816 = vperm.xlu0 %13550, %v6841_v24  }
 0x5ce   : > { %v17537_v54 = vpop.permute.xlu1 %5799 }
 0x5cf   : > { %22755 = vst [vmem:[#allocation47_spill] sm:$0xff] %v17537_v54  ;;  %v17541_v31 = vpop.permute.xlu0 %8065  ;;  %7038 = vperm.xlu1 %13548, %v6841_v24   ;;  %v6849_v24 = vunpack.c.l.b16 %v13255_v20  ;;  %v13261_v20 = vpack.c.bf16 %v22767_v26, %v22767_v26 }
 0x5d0   : > { %22756 = vst [vmem:[#allocation144_spill] sm:$0xff] %v17541_v31  ;;  %8822 = vperm.xlu0 %13550, %v6843_v53   ;;  %v22956_v31 = vld [vmem:[#allocation92_spill] sm:$0xff] }
 0x5d1   : > { %v13182_v37 = vpack.c.bf16 %v22956_v31, %v22956_v31 }
 0x5d2   : > { %v17543_v12 = vpop.permute.xlu1 %5805 }
 0x5d3   : > { %22757 = vst [vmem:[#allocation108_spill] sm:$0xff] %v17543_v12  ;;  %v17545_v30 = vpop.permute.xlu0 %8071  ;;  %7044 = vperm.xlu1 %13548, %v6843_v53  }
 0x5d4   : > { %22758 = vst [vmem:[#allocation183_spill] sm:$0xff] %v17545_v30  ;;  %8828 = vperm.xlu0 %13550, %v6845_v62  }
 0x5d6   : > { %v17549_v54 = vpop.permute.xlu1 %5811 }
 0x5d7   : > { %22760 = vst [vmem:[#allocation134_spill] sm:$0xff] %v17549_v54  ;;  %v17551_v47 = vpop.permute.xlu0 %8077  ;;  %7050 = vperm.xlu1 %13548, %v6845_v62   ;;  %v6853_v62 = vunpack.c.l.b16 %v13259_v1 }
 0x5d8   : > { %22761 = vst [vmem:[#allocation184_spill] sm:$0xff] %v17551_v47  ;;  %8834 = vperm.xlu0 %13550, %v6847_v2  }
 0x5da   : > { %v17557_v30 = vpop.permute.xlu1 %5817 }
 0x5db   : > { %22763 = vst [vmem:[#allocation109_spill] sm:$0xff] %v17557_v30  ;;  %v17559_v53 = vpop.permute.xlu0 %8083  ;;  %7056 = vperm.xlu1 %13548, %v6847_v2   ;;  %v6855_v2 = vunpack.c.l.b16 %v13261_v20  ;;  %v22770_v30 = vld [vmem:[#allocation110_spill] sm:$0xff] }
 0x5dc   : > { %22764 = vst [vmem:[#allocation185_spill] sm:$0xff] %v17559_v53  ;;  %8840 = vperm.xlu0 %13550, %v6849_v24   ;;  %v13263_v19 = vpack.c.bf16 %v22770_v30, %v22770_v30  ;;  %v22775_v20 = vld [vmem:[#allocation166_spill] sm:$0xff]  ;;  %v22955_v53 = vld [vmem:[#allocation37_spill] sm:$0xff] }
 0x5dd   : > { %v13267_v30 = vpack.c.bf16 %v22775_v20, %v22775_v20 }
 0x5de   : > { %v17561_v54 = vpop.permute.xlu1 %5823  ;;  %v6857_v1 = vunpack.c.l.b16 %v13263_v19  ;;  %v22778_v19 = vld [vmem:[#allocation34_spill] sm:$0xff] }
 0x5df   : > { %22765 = vst [vmem:[#allocation186_spill] sm:$0xff] %v17561_v54  ;;  %v17563_v47 = vpop.permute.xlu0 %8089  ;;  %7062 = vperm.xlu1 %13548, %v6849_v24   ;;  %v3883_v24 = vcombine.high %v17201_v5, %v22438_v43  ;;  %v4202_v5 = vcombine.high %v17220_v57, %v22438_v43  ;;  %v22783_v57 = vld [vmem:[#allocation43_spill] sm:$0xff] }
 0x5e0   : > { %22766 = vst [vmem:[#allocation187_spill] sm:$0xff] %v17563_v47  ;;  %8846 = vperm.xlu0 %13550, %v6851_v58  }
 0x5e1   : > { %v13265_v26 = vpack.c.bf16 %v3883_v24, %v3883_v24  ;;  %v13269_v24 = vpack.c.bf16 %v22778_v19, %v22778_v19  ;;  %v13271_v20 = vpack.c.bf16 %v4202_v5, %v4202_v5 }
 0x5e2   : > { %v17567_v12 = vpop.permute.xlu1 %5829 }
 0x5e3   : > { %22768 = vst [vmem:[#allocation176_spill] sm:$0xff] %v17567_v12  ;;  %v17569_v49 = vpop.permute.xlu0 %8095  ;;  %7068 = vperm.xlu1 %13548, %v6851_v58   ;;  %v6859_v58 = vunpack.c.l.b16 %v13265_v26  ;;  %v6863_v26 = vunpack.c.l.b16 %v13269_v24 }
 0x5e4   : > { %22769 = vst [vmem:[#allocation188_spill] sm:$0xff] %v17569_v49  ;;  %8852 = vperm.xlu0 %13550, %v6853_v62  }
 0x5e6   : > { %v17573_v13 = vpop.permute.xlu1 %5835 }
 0x5e7   : > { %22771 = vst [vmem:[#allocation110_spill] sm:$0xff] %v17573_v13  ;;  %v17577_v47 = vpop.permute.xlu0 %8101  ;;  %7074 = vperm.xlu1 %13548, %v6853_v62   ;;  %v6861_v62 = vunpack.c.l.b16 %v13267_v30  ;;  %v13273_v30 = vpack.c.bf16 %v22783_v57, %v22783_v57 }
 0x5e8   : > { %22772 = vst [vmem:[#allocation189_spill] sm:$0xff] %v17577_v47  ;;  %8858 = vperm.xlu0 %13550, %v6855_v2  }
 0x5ea   : > { %v17579_v12 = vpop.permute.xlu1 %5841 }
 0x5eb   : > { %22773 = vst [vmem:[#allocation190_spill] sm:$0xff] %v17579_v12  ;;  %v17581_v49 = vpop.permute.xlu0 %8107  ;;  %7080 = vperm.xlu1 %13548, %v6855_v2  }
 0x5ec   : > { %22774 = vst [vmem:[#allocation191_spill] sm:$0xff] %v17581_v49  ;;  %8864 = vperm.xlu0 %13550, %v6857_v1  }
 0x5ee   : > { %v17585_v13 = vpop.permute.xlu1 %5847 }
 0x5ef   : > { %22776 = vst [vmem:[#allocation166_spill] sm:$0xff] %v17585_v13  ;;  %v17587_v54 = vpop.permute.xlu0 %8113  ;;  %7086 = vperm.xlu1 %13548, %v6857_v1   ;;  %v6865_v1 = vunpack.c.l.b16 %v13271_v20 }
 0x5f0   : > { %22777 = vst [vmem:[#allocation192_spill] sm:$0xff] %v17587_v54  ;;  %8870 = vperm.xlu0 %13550, %v6859_v58  }
 0x5f2   : > { %v17593_v49 = vpop.permute.xlu1 %5853 }
 0x5f3   : > { %22779 = vst [vmem:[#allocation34_spill] sm:$0xff] %v17593_v49  ;;  %v17595_v2 = vpop.permute.xlu0 %8684  ;;  %7092 = vperm.xlu1 %13548, %v6859_v58   ;;  %v6867_v58 = vunpack.c.l.b16 %v13273_v30  ;;  %v22791_v30 = vld [vmem:[#allocation168_spill] sm:$0xff] }
 0x5f4   : > { %22780 = vst [vmem:[#allocation193_spill] sm:$0xff] %v17595_v2  ;;  %8876 = vperm.xlu0 %13550, %v6861_v62   ;;  %v22786_v2 = vld [vmem:[#allocation123_spill] sm:$0xff] }
 0x5f5   : > { %v13275_v5 = vpack.c.bf16 %v22786_v2, %v22786_v2  ;;  %v13279_v2 = vpack.c.bf16 %v22791_v30, %v22791_v30  ;;  %v22797_v30 = vld [vmem:[#allocation177_spill] sm:$0xff] }
 0x5f6   : > { %v17597_v47 = vpop.permute.xlu1 %6906 }
 0x5f7   : > { %22781 = vst [vmem:[#allocation194_spill] sm:$0xff] %v17597_v47  ;;  %v17599_v54 = vpop.permute.xlu0 %8690  ;;  %7098 = vperm.xlu1 %13548, %v6861_v62   ;;  %v4204_v62 = vcombine.high %v17244_v52, %v22438_v43  ;;  %v6869_v20 = vunpack.c.l.b16 %v13275_v5  ;;  %v6873_v52 = vunpack.c.l.b16 %v13279_v2 }
 0x5f8   : > { %22782 = vst [vmem:[#allocation195_spill] sm:$0xff] %v17599_v54  ;;  %8882 = vperm.xlu0 %13550, %v6863_v26  }
 0x5f9   : > { %v13277_v57 = vpack.c.bf16 %v4204_v62, %v4204_v62 }
 0x5fa   : > { %v17603_v13 = vpop.permute.xlu1 %6912 }
 0x5fb   : > { %22784 = vst [vmem:[#allocation43_spill] sm:$0xff] %v17603_v13  ;;  %v17605_v19 = vpop.permute.xlu0 %8696  ;;  %7104 = vperm.xlu1 %13548, %v6863_v26   ;;  %v6871_v26 = vunpack.c.l.b16 %v13277_v57 }
 0x5fc   : > { %22785 = vst [vmem:[#allocation196_spill] sm:$0xff] %v17605_v19  ;;  %8888 = vperm.xlu0 %13550, %v6865_v1  }
 0x5fe   : > { %v17609_v24 = vpop.permute.xlu1 %6918 }
 0x5ff   : > { %22787 = vst [vmem:[#allocation123_spill] sm:$0xff] %v17609_v24  ;;  %v17613_v47 = vpop.permute.xlu0 %8702  ;;  %7110 = vperm.xlu1 %13548, %v6865_v1   ;;  %v22794_v1 = vld [vmem:[#allocation124_spill] sm:$0xff] }
 0x600   : > { %22788 = vst [vmem:[#allocation197_spill] sm:$0xff] %v17613_v47  ;;  %8894 = vperm.xlu0 %13550, %v6867_v58   ;;  %v13281_v5 = vpack.c.bf16 %v22794_v1, %v22794_v1 }
 0x602   : > { %v17615_v13 = vpop.permute.xlu1 %6924  ;;  %v6875_v57 = vunpack.c.l.b16 %v13281_v5 }
 0x603   : > { %22789 = vst [vmem:[#allocation198_spill] sm:$0xff] %v17615_v13  ;;  %v17617_v19 = vpop.permute.xlu0 %8708  ;;  %7116 = vperm.xlu1 %13548, %v6867_v58   ;;  %v4314_v58 = vcombine.high %v17263_v48, %v22438_v43  ;;  %v4633_v48 = vcombine.high %v17292_v50, %v22438_v43 }
 0x604   : > { %22790 = vst [vmem:[#allocation199_spill] sm:$0xff] %v17617_v19  ;;  %8900 = vperm.xlu0 %13550, %v6869_v20   ;;  %v22924_v19 = vld [vmem:[#allocation85_spill] sm:$0xff] }
 0x605   : > { %v13283_v2 = vpack.c.bf16 %v4314_v58, %v4314_v58 }
 0x606   : > { %v17621_v24 = vpop.permute.xlu1 %6930 }
 0x607   : > { %22792 = vst [vmem:[#allocation168_spill] sm:$0xff] %v17621_v24  ;;  %v17623_v54 = vpop.permute.xlu0 %8714  ;;  %7122 = vperm.xlu1 %13548, %v6869_v20   ;;  %v13285_v24 = vpack.c.bf16 %v22797_v30, %v22797_v30  ;;  %v17647_v30 = vunpack.c.l.b16 %v13283_v2 }
 0x608   : > { %22793 = vst [vmem:[#allocation200_spill] sm:$0xff] %v17623_v54  ;;  %8906 = vperm.xlu0 %13550, %v6871_v26  }
 0x609   : > { %v6879_v1 = vunpack.c.l.b16 %v13285_v24 }
 0x60a   : > { %v17627_v62 = vpop.permute.xlu1 %6936 }
 0x60b   : > { %22795 = vst [vmem:[#allocation124_spill] sm:$0xff] %v17627_v62  ;;  %v17629_v13 = vpop.permute.xlu0 %8720  ;;  %7128 = vperm.xlu1 %13548, %v6871_v26   ;;  %v22800_v62 = vld [vmem:[#allocation98_spill] sm:$0xff] }
 0x60c   : > { %22796 = vst [vmem:[#allocation201_spill] sm:$0xff] %v17629_v13  ;;  %8912 = vperm.xlu0 %13550, %v6873_v52   ;;  %v13288_v13 = vpack.c.bf16 %v22800_v62, %v22800_v62  ;;  %v22806_v62 = vld [vmem:[#allocation57_spill] sm:$0xff] }
 0x60d   : > { %v13287_v50 = vpack.c.bf16 %v22806_v62, %v22806_v62 }
 0x60e   : > { %v17635_v54 = vpop.permute.xlu1 %6942 }
 0x60f   : > { %22798 = vst [vmem:[#allocation177_spill] sm:$0xff] %v17635_v54  ;;  %v17637_v20 = vpop.permute.xlu0 %8726  ;;  %7134 = vperm.xlu1 %13548, %v6873_v52   ;;  %v17649_v54 = vunpack.c.l.b16 %v13288_v13  ;;  %v13289_v52 = vpack.c.bf16 %v4633_v48, %v4633_v48  ;;  %v17665_v48 = vunpack.c.l.b16 %v13287_v50 }
 0x610   : > { %22799 = vst [vmem:[#allocation202_spill] sm:$0xff] %v17637_v20  ;;  %8918 = vperm.xlu0 %13550, %v6875_v57  }
 0x611   : > { %22803 = vst [vmem:[#allocation204_spill] sm:$0xff] %v17649_v54  ;;  %v6883_v58 = vunpack.c.l.b16 %v13289_v52  ;;  %22810 = vst [vmem:[#allocation207_spill] sm:$0xff] %v17665_v48  ;;  %v4635_v52 = vcombine.high %v17318_v25, %v22438_v43 }
 0x612   : > { %v17641_v26 = vpop.permute.xlu1 %6948 }
 0x613   : > { %22801 = vst [vmem:[#allocation98_spill] sm:$0xff] %v17641_v26  ;;  %v17645_v5 = vpop.permute.xlu0 %8732  ;;  %7140 = vperm.xlu1 %13548, %v6875_v57  }
 0x614   : > { %22802 = vst [vmem:[#allocation203_spill] sm:$0xff] %v17645_v5  ;;  %8930 = vperm.xlu0 %13550, %v6879_v1   ;;  %v22807_v5 = vld [vmem:[#allocation180_spill] sm:$0xff] }
 0x615   : > { %v13291_v57 = vpack.c.bf16 %v22807_v5, %v22807_v5 }
 0x616   : > { %v17651_v20 = vpop.permute.xlu1 %6954 }
 0x617   : > { %22804 = vst [vmem:[#allocation205_spill] sm:$0xff] %v17651_v20  ;;  %v17653_v24 = vpop.permute.xlu0 %8738  ;;  %7146 = vperm.xlu1 %13548, %v17647_v30   ;;  %v6885_v20 = vunpack.c.l.b16 %v13291_v57 }
 0x618   : > { %22805 = vst [vmem:[#allocation206_spill] sm:$0xff] %v17653_v24  ;;  %8939 = vperm.xlu0 %13550, %v17649_v54   ;;  %v22811_v24 = vld [vmem:[#allocation125_spill] sm:$0xff] }
 0x619   : > { %v13293_v26 = vpack.c.bf16 %v22811_v24, %v22811_v24  ;;  %v22816_v24 = vld [vmem:[#allocation155_spill] sm:$0xff] }
 0x61a   : > { %v17661_v2 = vpop.permute.xlu1 %6960 }
 0x61b   : > { %22808 = vst [vmem:[#allocation57_spill] sm:$0xff] %v17661_v2  ;;  %v17663_v13 = vpop.permute.xlu0 %8744  ;;  %7152 = vperm.xlu1 %13548, %v6879_v1   ;;  %v6887_v5 = vunpack.c.l.b16 %v13293_v26 }
 0x61c   : > { %22809 = vst [vmem:[#allocation180_spill] sm:$0xff] %v17663_v13  ;;  %8942 = vperm.xlu0 %13550, %v6883_v58   ;;  %v13295_v13 = vpack.c.bf16 %v4635_v52, %v4635_v52 }
 0x61e   : > { %v17669_v54 = vpop.permute.xlu1 %6966  ;;  %v6889_v57 = vunpack.c.l.b16 %v13295_v13 }
 0x61f   : > { %22812 = vst [vmem:[#allocation125_spill] sm:$0xff] %v17669_v54  ;;  %v17673_v62 = vpop.permute.xlu0 %8750  ;;  %7158 = vperm.xlu1 %13548, %v17665_v48   ;;  %v13297_v54 = vpack.c.bf16 %v22816_v24, %v22816_v24  ;;  %v22819_v48 = vld [vmem:[#allocation126_spill] sm:$0xff] }
 0x620   : > { %22813 = vst [vmem:[#allocation208_spill] sm:$0xff] %v17673_v62  ;;  %8948 = vperm.xlu0 %13550, %v6885_v20   ;;  %v13299_v26 = vpack.c.bf16 %v22819_v48, %v22819_v48 }
 0x621   : > { %v6891_v62 = vunpack.c.l.b16 %v13297_v54 }
 0x622   : > { %v17676_v1 = vpop.permute.xlu1 %6972  ;;  %v6893_v13 = vunpack.c.l.b16 %v13299_v26 }
 0x623   : > { %22814 = vst [vmem:[#allocation209_spill] sm:$0xff] %v17676_v1  ;;  %v17678_v50 = vpop.permute.xlu0 %8756  ;;  %7164 = vperm.xlu1 %13548, %v6883_v58   ;;  %v4954_v58 = vcombine.high %v17347_v35, %v22438_v43 }
 0x624   : > { %22815 = vst [vmem:[#allocation210_spill] sm:$0xff] %v17678_v50  ;;  %8954 = vperm.xlu0 %13550, %v6887_v5  }
 0x625   : > { %v13301_v24 = vpack.c.bf16 %v4954_v58, %v4954_v58 }
 0x626   : > { %v17682_v2 = vpop.permute.xlu1 %6978 }
 0x627   : > { %22817 = vst [vmem:[#allocation155_spill] sm:$0xff] %v17682_v2  ;;  %v17684_v25 = vpop.permute.xlu0 %8762  ;;  %7170 = vperm.xlu1 %13548, %v6885_v20   ;;  %v6895_v54 = vunpack.c.l.b16 %v13301_v24  ;;  %v22824_v20 = vld [vmem:[#allocation182_spill] sm:$0xff] }
 0x628   : > { %22818 = vst [vmem:[#allocation211_spill] sm:$0xff] %v17684_v25  ;;  %8960 = vperm.xlu0 %13550, %v6889_v57   ;;  %v13303_v48 = vpack.c.bf16 %v22824_v20, %v22824_v20 }
 0x62a   : > { %v17688_v52 = vpop.permute.xlu1 %6984  ;;  %v6897_v35 = vunpack.c.l.b16 %v13303_v48 }
 0x62b   : > { %22820 = vst [vmem:[#allocation126_spill] sm:$0xff] %v17688_v52  ;;  %v17692_v50 = vpop.permute.xlu0 %8768  ;;  %7176 = vperm.xlu1 %13548, %v6887_v5   ;;  %v22827_v5 = vld [vmem:[#allocation127_spill] sm:$0xff] }
 0x62c   : > { %22821 = vst [vmem:[#allocation212_spill] sm:$0xff] %v17692_v50  ;;  %8966 = vperm.xlu0 %13550, %v6891_v62   ;;  %v13305_v26 = vpack.c.bf16 %v22827_v5, %v22827_v5 }
 0x62e   : > { %v17694_v2 = vpop.permute.xlu1 %6990  ;;  %v6899_v24 = vunpack.c.l.b16 %v13305_v26 }
 0x62f   : > { %22822 = vst [vmem:[#allocation213_spill] sm:$0xff] %v17694_v2  ;;  %v17696_v25 = vpop.permute.xlu0 %8774  ;;  %7182 = vperm.xlu1 %13548, %v6889_v57   ;;  %v4956_v57 = vcombine.high %v17373_v51, %v22438_v43 }
 0x630   : > { %22823 = vst [vmem:[#allocation214_spill] sm:$0xff] %v17696_v25  ;;  %8972 = vperm.xlu0 %13550, %v6893_v13  }
 0x631   : > { %v13307_v20 = vpack.c.bf16 %v4956_v57, %v4956_v57 }
 0x632   : > { %v17700_v52 = vpop.permute.xlu1 %6996 }
 0x633   : > { %22825 = vst [vmem:[#allocation182_spill] sm:$0xff] %v17700_v52  ;;  %v17702_v1 = vpop.permute.xlu0 %8780  ;;  %7188 = vperm.xlu1 %13548, %v6891_v62   ;;  %v22832_v62 = vld [vmem:[#allocation87_spill] sm:$0xff]  ;;  %v6901_v5 = vunpack.c.l.b16 %v13307_v20 }
 0x634   : > { %22826 = vst [vmem:[#allocation215_spill] sm:$0xff] %v17702_v1  ;;  %8978 = vperm.xlu0 %13550, %v6895_v54   ;;  %v22831_v1 = vld [vmem:[#allocation94_spill] sm:$0xff] }
 0x635   : > { %v5006_v25 = vcombine.high %v22832_v62, %v22831_v1  ;;  %v22839_v1 = vld [vmem:[#allocation84_spill] sm:$0xff] }
 0x636   : > { %v17706_v58 = vpop.permute.xlu1 %7002 }
 0x637   : > { %22828 = vst [vmem:[#allocation127_spill] sm:$0xff] %v17706_v58  ;;  %v17710_v2 = vpop.permute.xlu0 %8786  ;;  %7194 = vperm.xlu1 %13548, %v6893_v13   ;;  %v13308_v58 = vpack.c.bf16 %v5006_v25, %v5006_v25  ;;  %v22841_v25 = vld [vmem:[#allocation169_spill] sm:$0xff] }
 0x638   : > { %22829 = vst [vmem:[#allocation216_spill] sm:$0xff] %v17710_v2  ;;  %8984 = vperm.xlu0 %13550, %v6897_v35   ;;  %v2349_v62 = vcombine.high %v22841_v25, %v22438_v43 }
 0x639   : > { %v17722_v13 = vunpack.c.l.b16 %v13308_v58 }
 0x63a   : > { %v17712_v52 = vpop.permute.xlu1 %7008 }
 0x63b   : > { %22830 = vst [vmem:[#allocation217_spill] sm:$0xff] %v17712_v52  ;;  %v17716_v48 = vpop.permute.xlu0 %8792  ;;  %7200 = vperm.xlu1 %13548, %v6895_v54   ;;  %22836 = vst [vmem:[#allocation219_spill] sm:$0xff] %v17722_v13  ;;  %v13309_v54 = vpack.c.bf16 %v22839_v1, %v22839_v1  ;;  %v22859_v52 = vld [vmem:[#allocation69_spill] sm:$0xff] }
 0x63c   : > { %22833 = vst [vmem:[#allocation94_spill] sm:$0xff] %v17716_v48  ;;  %8990 = vperm.xlu0 %13550, %v6899_v24  }
 0x63e   : > { %v17718_v50 = vpop.permute.xlu1 %7014 }
 0x63f   : > { %22834 = vst [vmem:[#allocation87_spill] sm:$0xff] %v17718_v50  ;;  %v17720_v51 = vpop.permute.xlu0 %8798  ;;  %7206 = vperm.xlu1 %13548, %v6897_v35   ;;  %v22843_v35 = vld [vmem:[#allocation21_spill] sm:$0xff]  ;;  %v22847_v50 = vld [vmem:[#allocation70_spill] sm:$0xff] }
 0x640   : > { %22835 = vst [vmem:[#allocation218_spill] sm:$0xff] %v17720_v51  ;;  %8996 = vperm.xlu0 %13550, %v6901_v5   ;;  %v13095_v58 = vpack.c.bf16 %v22843_v35, %v22843_v35  ;;  %v13098_v25 = vpack.c.bf16 %v22847_v50, %v22847_v50  ;;  %v22851_v35 = vmov 1   ;;  %v22853_v50 = vld [vmem:[#allocation170_spill] sm:$0xff] }
 0x642   : > { %v17724_v26 = vpop.permute.xlu1 %7020 }
 0x643   : > { %22837 = vst [vmem:[#allocation220_spill] sm:$0xff] %v17724_v26  ;;  %v17726_v57 = vpop.permute.xlu0 %8804  ;;  %7212 = vperm.xlu1 %13548, %v6899_v24   ;;  %v17740_v26 = vunpack.c.l.b16 %v13309_v54  ;;  %v5429_v54 = vunpack.c.l.b16 %v13098_v25 }
 0x644   : > { %22838 = vst [vmem:[#allocation221_spill] sm:$0xff] %v17726_v57  ;;  %8999 = vperm.xlu0 %13550, %v17722_v13   ;;  %v17745_v57 = vrot.slane %v2349_v62, %v15126_v42 }
 0x645   : > { %22844 = vst [vmem:[#allocation21_spill] sm:$0xff] %v17740_v26 }
 0x646   : > { %v17731_v20 = vpop.permute.xlu1 %7026  ;;  %v13100_v62 = vpack.c.bf16 %v17745_v57, %v17745_v57 }
 0x647   : > { %22840 = vst [vmem:[#allocation84_spill] sm:$0xff] %v17731_v20  ;;  %v17735_v51 = vpop.permute.xlu0 %8810  ;;  %7218 = vperm.xlu1 %13548, %v6901_v5   ;;  %v5426_v20 = vunpack.c.l.b16 %v13095_v58 }
 0x648   : > { %22842 = vst [vmem:[#allocation169_spill] sm:$0xff] %v17735_v51  ;;  %8924 = vperm.xlu0 %13550, %v17647_v30   ;;  %v22848_v51 = vmov 0  }
 0x64a   : > { %v17742_v24 = vpop.permute.xlu1 %7032 }
 0x64b   : > { %22845 = vst [vmem:[#allocation222_spill] sm:$0xff] %v17742_v24  ;;  %v17747_v1 = vpop.permute.xlu0 %8816  ;;  %7224 = vperm.xlu1 %13548, %v17740_v26   ;;  %v2364_v26 = vcombine.high %v22853_v50, %v22438_v43  ;;  %v22855_v24 = vld [vmem:[#allocation151_spill] sm:$0xff]  ;;  %v13104_v50 = vpack.c.bf16 %v22859_v52, %v22859_v52 }
 0x64c   : > { %22846 = vst [vmem:[#allocation223_spill] sm:$0xff] %v17747_v1  ;;  %13551 = vset.pattern.permute.xlu0 %v22848_v51  ;;  %v5431_v51 = vunpack.c.l.b16 %v13100_v62 }
 0x64d   : > { %5535 = vperm.xlu0 %13551, %v5426_v20  }
 0x64e   : > { %v17753_v5 = vpop.permute.xlu1 %7038 }
 0x64f   : > { %22849 = vst [vmem:[#allocation70_spill] sm:$0xff] %v17753_v5  ;;  %v17755_v30 = vpop.permute.xlu0 %8822  ;;  %13549 = vset.pattern.permute.xlu1 %v22851_v35  ;;  %v13102_v5 = vpack.c.bf16 %v22855_v24, %v22855_v24  ;;  %v17772_v35 = vrot.slane %v2364_v26, %v15126_v42  ;;  %v5435_v24 = vunpack.c.l.b16 %v13104_v50 }
 0x650   : > { %22850 = vst [vmem:[#allocation224_spill] sm:$0xff] %v17755_v30  ;;  %7795 = vperm.xlu1 %13549, %v5426_v20   ;;  %v22856_v30 = vld [vmem:[#allocation173_spill] sm:$0xff] }
 0x651   : > { %5544 = vperm.xlu0 %13551, %v5429_v54  }
 0x652   : > { %v17760_v58 = vpop.permute.xlu1 %7044 }
 0x653   : > { %22852 = vst [vmem:[#allocation225_spill] sm:$0xff] %v17760_v58  ;;  %v17764_v1 = vpop.permute.xlu0 %8828  ;;  %v5433_v58 = vunpack.c.l.b16 %v13102_v5 }
 0x654   : > { %22854 = vst [vmem:[#allocation170_spill] sm:$0xff] %v17764_v1  ;;  %7801 = vperm.xlu1 %13549, %v22856_v30   ;;  %v13106_v30 = vpack.c.bf16 %v17772_v35, %v17772_v35 }
 0x655   : > { %5550 = vperm.xlu0 %13551, %v5431_v51  }
 0x656   : > { %v17769_v25 = vpop.permute.xlu1 %7050  ;;  %v5437_v52 = vunpack.c.l.b16 %v13106_v30 }
 0x657   : > { %22857 = vst [vmem:[#allocation151_spill] sm:$0xff] %v17769_v25  ;;  %v17774_v20 = vpop.permute.xlu0 %8834 }
 0x658   : > { %22858 = vst [vmem:[#allocation173_spill] sm:$0xff] %v17774_v20  ;;  %7804 = vperm.xlu1 %13549, %v5429_v54   ;;  %v22863_v20 = vld [vmem:[#allocation174_spill] sm:$0xff]  ;;  %v22865_v54 = vld [vmem:[#allocation153_spill] sm:$0xff] }
 0x659   : > { %5556 = vperm.xlu0 %13551, %v5433_v58   ;;  %v2670_v5 = vcombine.high %v22863_v20, %v22438_v43  ;;  %v13108_v48 = vpack.c.bf16 %v22865_v54, %v22865_v54 }
 0x65a   : > { %v17778_v62 = vpop.permute.xlu1 %7056 }
 0x65b   : > { %22860 = vst [vmem:[#allocation69_spill] sm:$0xff] %v17778_v62  ;;  %v17780_v1 = vpop.permute.xlu0 %8840  ;;  %v17795_v50 = vrot.slane %v2670_v5, %v15126_v42  ;;  %v5439_v62 = vunpack.c.l.b16 %v13108_v48 }
 0x65c   : > { %22861 = vst [vmem:[#allocation226_spill] sm:$0xff] %v17780_v1  ;;  %7810 = vperm.xlu1 %13549, %v5431_v51  }
 0x65d   : > { %5562 = vperm.xlu0 %13551, %v5435_v24   ;;  %22867 = vst [vmem:[#allocation228_spill] sm:$0xff] %v17795_v50 }
 0x65e   : > { %v17784_v26 = vpop.permute.xlu1 %7062 }
 0x65f   : > { %22862 = vst [vmem:[#allocation227_spill] sm:$0xff] %v17784_v26  ;;  %v17788_v25 = vpop.permute.xlu0 %8846  ;;  %v22869_v26 = vld [vmem:[#allocation71_spill] sm:$0xff] }
 0x660   : > { %22864 = vst [vmem:[#allocation174_spill] sm:$0xff] %v17788_v25  ;;  %7816 = vperm.xlu1 %13549, %v5433_v58   ;;  %v13110_v2 = vpack.c.bf16 %v22869_v26, %v22869_v26  ;;  %v13112_v58 = vpack.c.bf16 %v17795_v50, %v17795_v50 }
 0x661   : > { %5568 = vperm.xlu0 %13551, %v5437_v52  }
 0x662   : > { %v17792_v1 = vpop.permute.xlu1 %7068  ;;  %v5441_v54 = vunpack.c.l.b16 %v13110_v2  ;;  %v5443_v26 = vunpack.c.l.b16 %v13112_v58 }
 0x663   : > { %22866 = vst [vmem:[#allocation153_spill] sm:$0xff] %v17792_v1  ;;  %v17797_v51 = vpop.permute.xlu0 %8852  ;;  %v22873_v1 = vld [vmem:[#allocation86_spill] sm:$0xff] }
 0x664   : > { %22868 = vst [vmem:[#allocation229_spill] sm:$0xff] %v17797_v51  ;;  %7822 = vperm.xlu1 %13549, %v5435_v24   ;;  %v2685_v48 = vcombine.high %v22873_v1, %v22438_v43  ;;  %v22875_v24 = vld [vmem:[#allocation154_spill] sm:$0xff] }
 0x665   : > { %5574 = vperm.xlu0 %13551, %v5439_v62   ;;  %v13114_v25 = vpack.c.bf16 %v22875_v24, %v22875_v24 }
 0x666   : > { %v17801_v20 = vpop.permute.xlu1 %7074  ;;  %v17818_v2 = vrot.slane %v2685_v48, %v15126_v42  ;;  %v2802_v48 = vcombine.low %v17099_v41, %v17084_v4  ;;  %v22888_v4 = vld [vmem:[#allocation73_spill] sm:$0xff] }
 0x667   : > { %22870 = vst [vmem:[#allocation71_spill] sm:$0xff] %v17801_v20  ;;  %v17803_v30 = vpop.permute.xlu0 %8858  ;;  %v13122_v41 = vpack.c.bf16 %v22888_v4, %v22888_v4 }
 0x668   : > { %22871 = vst [vmem:[#allocation230_spill] sm:$0xff] %v17803_v30  ;;  %7828 = vperm.xlu1 %13549, %v5437_v52   ;;  %22877 = vst [vmem:[#allocation232_spill] sm:$0xff] %v17818_v2  ;;  %v5445_v30 = vunpack.c.l.b16 %v13114_v25 }
 0x669   : > { %5580 = vperm.xlu0 %13551, %v5441_v54  }
 0x66a   : > { %v17807_v5 = vpop.permute.xlu1 %7080 }
 0x66b   : > { %22872 = vst [vmem:[#allocation231_spill] sm:$0xff] %v17807_v5  ;;  %v17811_v51 = vpop.permute.xlu0 %8864  ;;  %v22879_v5 = vld [vmem:[#allocation72_spill] sm:$0xff] }
 0x66c   : > { %22874 = vst [vmem:[#allocation86_spill] sm:$0xff] %v17811_v51  ;;  %7834 = vperm.xlu1 %13549, %v5439_v62   ;;  %v13116_v13 = vpack.c.bf16 %v22879_v5, %v22879_v5  ;;  %v13118_v62 = vpack.c.bf16 %v17818_v2, %v17818_v2  ;;  %v22964_v2 = vld [vmem:[#allocation136_spill] sm:$0xff] }
 0x66d   : > { %5586 = vperm.xlu0 %13551, %v5443_v26  }
 0x66e   : > { %v17815_v20 = vpop.permute.xlu1 %7086  ;;  %v5447_v24 = vunpack.c.l.b16 %v13116_v13  ;;  %v5449_v5 = vunpack.c.l.b16 %v13118_v62  ;;  %v22885_v13 = vld [vmem:[#allocation19_spill] sm:$0xff] }
 0x66f   : > { %22876 = vst [vmem:[#allocation154_spill] sm:$0xff] %v17815_v20  ;;  %v17820_v52 = vpop.permute.xlu0 %8870 }
 0x670   : > { %22878 = vst [vmem:[#allocation233_spill] sm:$0xff] %v17820_v52  ;;  %7840 = vperm.xlu1 %13549, %v5441_v54   ;;  %v13120_v54 = vpack.c.bf16 %v2802_v48, %v2802_v48  ;;  %v5453_v48 = vunpack.c.l.b16 %v13122_v41  ;;  %v22898_v41 = vld [vmem:[#allocation20_spill] sm:$0xff] }
 0x671   : > { %5592 = vperm.xlu0 %13551, %v5445_v30  }
 0x672   : > { %v17824_v1 = vpop.permute.xlu1 %7092  ;;  %v5451_v51 = vunpack.c.l.b16 %v13120_v54 }
 0x673   : > { %22880 = vst [vmem:[#allocation72_spill] sm:$0xff] %v17824_v1  ;;  %v17826_v58 = vpop.permute.xlu0 %8876 }
 0x674   : > { %22881 = vst [vmem:[#allocation234_spill] sm:$0xff] %v17826_v58  ;;  %7846 = vperm.xlu1 %13549, %v5443_v26   ;;  %v17840_v58 = vrot.slane %v22885_v13, %v15126_v42 }
 0x675   : > { %5598 = vperm.xlu0 %13551, %v5447_v24  }
 0x676   : > { %v17832_v20 = vpop.permute.xlu1 %7098  ;;  %22886 = vst [vmem:[#allocation19_spill] sm:$0xff] %v17840_v58 }
 0x677   : > { %22882 = vst [vmem:[#allocation235_spill] sm:$0xff] %v17832_v20  ;;  %v17834_v25 = vpop.permute.xlu0 %8882 }
 0x678   : > { %22883 = vst [vmem:[#allocation236_spill] sm:$0xff] %v17834_v25  ;;  %7852 = vperm.xlu1 %13549, %v5445_v30   ;;  %v13124_v30 = vpack.c.bf16 %v17840_v58, %v17840_v58  ;;  %v22908_v25 = vld [vmem:[#allocation48_spill] sm:$0xff] }
 0x679   : > { %5604 = vperm.xlu0 %13551, %v5449_v5  }
 0x67a   : > { %v17836_v1 = vpop.permute.xlu1 %7104  ;;  %v5455_v54 = vunpack.c.l.b16 %v13124_v30 }
 0x67b   : > { %22884 = vst [vmem:[#allocation237_spill] sm:$0xff] %v17836_v1  ;;  %v17842_v52 = vpop.permute.xlu0 %8888 }
 0x67c   : > { %22887 = vst [vmem:[#allocation238_spill] sm:$0xff] %v17842_v52  ;;  %7858 = vperm.xlu1 %13549, %v5447_v24   ;;  %v22893_v52 = vld [vmem:[#allocation15_spill] sm:$0xff] }
 0x67d   : > { %5610 = vperm.xlu0 %13551, %v5451_v51   ;;  %v13126_v4 = vpack.c.bf16 %v22893_v52, %v22893_v52 }
 0x67e   : > { %v17846_v26 = vpop.permute.xlu1 %7110 }
 0x67f   : > { %22889 = vst [vmem:[#allocation73_spill] sm:$0xff] %v17846_v26  ;;  %v17850_v62 = vpop.permute.xlu0 %8894  ;;  %v22895_v26 = vld [vmem:[#allocation167_spill] sm:$0xff] }
 0x680   : > { %22890 = vst [vmem:[#allocation239_spill] sm:$0xff] %v17850_v62  ;;  %7864 = vperm.xlu1 %13549, %v5449_v5   ;;  %v17862_v20 = vrot.slane %v22895_v26, %v15126_v42  ;;  %v5457_v5 = vunpack.c.l.b16 %v13126_v4 }
 0x681   : > { %5616 = vperm.xlu0 %13551, %v5453_v48  }
 0x682   : > { %v17852_v13 = vpop.permute.xlu1 %7116  ;;  %22896 = vst [vmem:[#allocation167_spill] sm:$0xff] %v17862_v20  ;;  %v13130_v52 = vpack.c.bf16 %v17862_v20, %v17862_v20 }
 0x683   : > { %22891 = vst [vmem:[#allocation240_spill] sm:$0xff] %v17852_v13  ;;  %v17854_v1 = vpop.permute.xlu0 %8900  ;;  %v13128_v13 = vpack.c.bf16 %v22898_v41, %v22898_v41 }
 0x684   : > { %22892 = vst [vmem:[#allocation241_spill] sm:$0xff] %v17854_v1  ;;  %7870 = vperm.xlu1 %13549, %v5451_v51   ;;  %v5461_v4 = vunpack.c.l.b16 %v13130_v52 }
 0x685   : > { %5622 = vperm.xlu0 %13551, %v5455_v54   ;;  %v5459_v51 = vunpack.c.l.b16 %v13128_v13 }
 0x686   : > { %v17858_v24 = vpop.permute.xlu1 %7122 }
 0x687   : > { %22894 = vst [vmem:[#allocation15_spill] sm:$0xff] %v17858_v24  ;;  %v17864_v62 = vpop.permute.xlu0 %8906 }
 0x688   : > { %22897 = vst [vmem:[#allocation242_spill] sm:$0xff] %v17864_v62  ;;  %7876 = vperm.xlu1 %13549, %v5453_v48   ;;  %v22903_v62 = vld [vmem:[#allocation9_spill] sm:$0xff] }
 0x689   : > { %5628 = vperm.xlu0 %13551, %v5457_v5   ;;  %v13132_v41 = vpack.c.bf16 %v22903_v62, %v22903_v62 }
 0x68a   : > { %v17868_v30 = vpop.permute.xlu1 %7128 }
 0x68b   : > { %22899 = vst [vmem:[#allocation20_spill] sm:$0xff] %v17868_v30  ;;  %v17870_v1 = vpop.permute.xlu0 %8912 }
 0x68c   : > { %22900 = vst [vmem:[#allocation243_spill] sm:$0xff] %v17870_v1  ;;  %7882 = vperm.xlu1 %13549, %v5455_v54   ;;  %v22905_v1 = vld [vmem:[#allocation152_spill] sm:$0xff]  ;;  %v5463_v54 = vunpack.c.l.b16 %v13132_v41 }
 0x68d   : > { %5634 = vperm.xlu0 %13551, %v5459_v51   ;;  %v17884_v13 = vrot.slane %v22905_v1, %v15126_v42 }
 0x68e   : > { %v17874_v26 = vpop.permute.xlu1 %7134 }
 0x68f   : > { %22901 = vst [vmem:[#allocation244_spill] sm:$0xff] %v17874_v26  ;;  %v17876_v24 = vpop.permute.xlu0 %8918  ;;  %22906 = vst [vmem:[#allocation152_spill] sm:$0xff] %v17884_v13  ;;  %v13134_v26 = vpack.c.bf16 %v22908_v25, %v22908_v25  ;;  %v13136_v62 = vpack.c.bf16 %v17884_v13, %v17884_v13 }
 0x690   : > { %22902 = vst [vmem:[#allocation245_spill] sm:$0xff] %v17876_v24  ;;  %7888 = vperm.xlu1 %13549, %v5457_v5  }
 0x691   : > { %5640 = vperm.xlu0 %13551, %v5461_v4   ;;  %v5465_v24 = vunpack.c.l.b16 %v13134_v26  ;;  %v5467_v41 = vunpack.c.l.b16 %v13136_v62 }
 0x692   : > { %v17880_v48 = vpop.permute.xlu1 %7140 }
 0x693   : > { %22904 = vst [vmem:[#allocation9_spill] sm:$0xff] %v17880_v48  ;;  %v17886_v30 = vpop.permute.xlu0 %8930 }
 0x694   : > { %22907 = vst [vmem:[#allocation246_spill] sm:$0xff] %v17886_v30  ;;  %7894 = vperm.xlu1 %13549, %v5459_v51   ;;  %v22913_v30 = vld [vmem:[#allocation163_spill] sm:$0xff] }
 0x695   : > { %5646 = vperm.xlu0 %13551, %v5463_v54   ;;  %v13138_v25 = vpack.c.bf16 %v22913_v30, %v22913_v30 }
 0x696   : > { %v17890_v52 = vpop.permute.xlu1 %7146 }
 0x697   : > { %22909 = vst [vmem:[#allocation48_spill] sm:$0xff] %v17890_v52  ;;  %v17894_v5 = vpop.permute.xlu0 %8939  ;;  %v17906_v52 = vrot.slane %v17044_v23, %v15126_v42  ;;  %v5469_v26 = vunpack.c.l.b16 %v13138_v25 }
 0x698   : > { %22910 = vst [vmem:[#allocation247_spill] sm:$0xff] %v17894_v5  ;;  %7900 = vperm.xlu1 %13549, %v5461_v4   ;;  %v22917_v4 = vld [vmem:[#allocation12_spill] sm:$0xff] }
 0x699   : > { %5652 = vperm.xlu0 %13551, %v5465_v24   ;;  %22915 = vst [vmem:[#allocation250_spill] sm:$0xff] %v17906_v52 }
 0x69a   : > { %v17896_v1 = vpop.permute.xlu1 %7152 }
 0x69b   : > { %22911 = vst [vmem:[#allocation248_spill] sm:$0xff] %v17896_v1  ;;  %v17898_v48 = vpop.permute.xlu0 %8942  ;;  %v13140_v1 = vpack.c.bf16 %v22917_v4, %v22917_v4 }
 0x69c   : > { %22912 = vst [vmem:[#allocation249_spill] sm:$0xff] %v17898_v48  ;;  %7906 = vperm.xlu1 %13549, %v5463_v54   ;;  %v13142_v54 = vpack.c.bf16 %v17906_v52, %v17906_v52 }
 0x69d   : > { %5658 = vperm.xlu0 %13551, %v5467_v41   ;;  %v5471_v30 = vunpack.c.l.b16 %v13140_v1  ;;  %v17930_v1 = vrot.slane %v17184_v11, %v15126_v42 }
 0x69e   : > { %v17902_v51 = vpop.permute.xlu1 %7158  ;;  %v5473_v25 = vunpack.c.l.b16 %v13142_v54 }
 0x69f   : > { %22914 = vst [vmem:[#allocation163_spill] sm:$0xff] %v17902_v51  ;;  %v17908_v5 = vpop.permute.xlu0 %8948 }
 0x6a0   : > { %22916 = vst [vmem:[#allocation251_spill] sm:$0xff] %v17908_v5  ;;  %7912 = vperm.xlu1 %13549, %v5465_v24   ;;  %v22922_v5 = vld [vmem:[#allocation90_spill] sm:$0xff] }
 0x6a1   : > { %5664 = vperm.xlu0 %13551, %v5469_v26   ;;  %v13144_v4 = vpack.c.bf16 %v22922_v5, %v22922_v5  ;;  %v22923_v24 = vld [vmem:[#allocation22_spill] sm:$0xff]  ;;  %v13148_v5 = vpack.c.bf16 %v17930_v1, %v17930_v1 }
 0x6a2   : > { %v17912_v62 = vpop.permute.xlu1 %7164  ;;  %v3503_v47 = vcombine.low %v22924_v19, %v22923_v24  ;;  %22926 = vst [vmem:[#allocation22_spill] sm:$0xff] %v17930_v1 }
 0x6a3   : > { %22918 = vst [vmem:[#allocation12_spill] sm:$0xff] %v17912_v62  ;;  %v17914_v48 = vpop.permute.xlu0 %8954  ;;  %v5479_v11 = vunpack.c.l.b16 %v13148_v5 }
 0x6a4   : > { %22919 = vst [vmem:[#allocation252_spill] sm:$0xff] %v17914_v48  ;;  %7918 = vperm.xlu1 %13549, %v5467_v41   ;;  %v13146_v48 = vpack.c.bf16 %v3503_v47, %v3503_v47  ;;  %v22932_v47 = vld [vmem:[#allocation49_spill] sm:$0xff] }
 0x6a5   : > { %5670 = vperm.xlu0 %13551, %v5471_v30  }
 0x6a6   : > { %v17918_v23 = vpop.permute.xlu1 %7170 }
 0x6a7   : > { %22920 = vst [vmem:[#allocation253_spill] sm:$0xff] %v17918_v23  ;;  %v17920_v51 = vpop.permute.xlu0 %8960  ;;  %v5475_v23 = vunpack.c.l.b16 %v13144_v4 }
 0x6a8   : > { %22921 = vst [vmem:[#allocation254_spill] sm:$0xff] %v17920_v51  ;;  %7924 = vperm.xlu1 %13549, %v5469_v26   ;;  %v5477_v26 = vunpack.c.l.b16 %v13146_v48  ;;  %v22951_v51 = vld [vmem:[#allocation51_spill] sm:$0xff] }
 0x6a9   : > { %5676 = vperm.xlu0 %13551, %v5473_v25  }
 0x6aa   : > { %v17926_v62 = vpop.permute.xlu1 %7176 }
 0x6ab   : > { %22925 = vst [vmem:[#allocation90_spill] sm:$0xff] %v17926_v62  ;;  %v17932_v41 = vpop.permute.xlu0 %8966 }
 0x6ac   : > { %22927 = vst [vmem:[#allocation85_spill] sm:$0xff] %v17932_v41  ;;  %7930 = vperm.xlu1 %13549, %v5471_v30   ;;  %v3851_v41 = vcombine.high %v17133_v40, %v22438_v43  ;;  %v13150_v30 = vpack.c.bf16 %v22932_v47, %v22932_v47 }
 0x6ad   : > { %5682 = vperm.xlu0 %13551, %v5475_v23  }
 0x6ae   : > { %v17934_v54 = vpop.permute.xlu1 %7182 }
 0x6af   : > { %22928 = vst [vmem:[#allocation255_spill] sm:$0xff] %v17934_v54  ;;  %v17938_v19 = vpop.permute.xlu0 %8972 }
 0x6b0   : > { %22929 = vst [vmem:[#allocation256_spill] sm:$0xff] %v17938_v19  ;;  %7936 = vperm.xlu1 %13549, %v5473_v25   ;;  %v17951_v19 = vrot.slane %v3851_v41, %v15126_v42  ;;  %v5481_v25 = vunpack.c.l.b16 %v13150_v30  ;;  %v3866_v30 = vcombine.high %v17195_v7, %v22438_v43 }
 0x6b1   : > { %5688 = vperm.xlu0 %13551, %v5477_v26  }
 0x6b2   : > { %v17940_v24 = vpop.permute.xlu1 %7188  ;;  %22934 = vst [vmem:[#allocation259_spill] sm:$0xff] %v17951_v19 }
 0x6b3   : > { %22930 = vst [vmem:[#allocation257_spill] sm:$0xff] %v17940_v24  ;;  %v17944_v4 = vpop.permute.xlu0 %8978  ;;  %v22936_v24 = vld [vmem:[#allocation35_spill] sm:$0xff] }
 0x6b4   : > { %22931 = vst [vmem:[#allocation258_spill] sm:$0xff] %v17944_v4  ;;  %7942 = vperm.xlu1 %13549, %v5475_v23   ;;  %v13152_v5 = vpack.c.bf16 %v22936_v24, %v22936_v24  ;;  %v13154_v23 = vpack.c.bf16 %v17951_v19, %v17951_v19 }
 0x6b5   : > { %5694 = vperm.xlu0 %13551, %v5479_v11  }
 0x6b6   : > { %v17948_v54 = vpop.permute.xlu1 %7194  ;;  %v5483_v47 = vunpack.c.l.b16 %v13152_v5  ;;  %v5485_v24 = vunpack.c.l.b16 %v13154_v23  ;;  %v17974_v5 = vrot.slane %v3866_v30, %v15126_v42 }
 0x6b7   : > { %22933 = vst [vmem:[#allocation49_spill] sm:$0xff] %v17948_v54  ;;  %v17953_v48 = vpop.permute.xlu0 %8984 }
 0x6b8   : > { %22935 = vst [vmem:[#allocation260_spill] sm:$0xff] %v17953_v48  ;;  %7948 = vperm.xlu1 %13549, %v5477_v26   ;;  %v13156_v26 = vpack.c.bf16 %v16994_v59, %v16994_v59  ;;  %22942 = vst [vmem:[#allocation265_spill] sm:$0xff] %v17974_v5 }
 0x6b9   : > { %5700 = vperm.xlu0 %13551, %v5481_v25  }
 0x6ba   : > { %v17957_v40 = vpop.permute.xlu1 %7200 }
 0x6bb   : > { %22937 = vst [vmem:[#allocation35_spill] sm:$0xff] %v17957_v40  ;;  %v17959_v4 = vpop.permute.xlu0 %8990 }
 0x6bc   : > { %22938 = vst [vmem:[#allocation261_spill] sm:$0xff] %v17959_v4  ;;  %7954 = vperm.xlu1 %13549, %v5479_v11   ;;  %v5487_v4 = vunpack.c.l.b16 %v13156_v26  ;;  %v4172_v26 = vcombine.high %v17212_v14, %v22438_v43 }
 0x6bd   : > { %5706 = vperm.xlu0 %13551, %v5483_v47  }
 0x6be   : > { %v17963_v41 = vpop.permute.xlu1 %7206 }
 0x6bf   : > { %22939 = vst [vmem:[#allocation262_spill] sm:$0xff] %v17963_v41  ;;  %v17967_v48 = vpop.permute.xlu0 %8996  ;;  %v22944_v41 = vld [vmem:[#allocation61_spill] sm:$0xff] }
 0x6c0   : > { %22940 = vst [vmem:[#allocation263_spill] sm:$0xff] %v17967_v48  ;;  %7960 = vperm.xlu1 %13549, %v5481_v25   ;;  %v13158_v54 = vpack.c.bf16 %v22944_v41, %v22944_v41  ;;  %v13160_v25 = vpack.c.bf16 %v17974_v5, %v17974_v5  ;;  %v22949_v48 = vld [vmem:[#allocation13_spill] sm:$0xff] }
 0x6c1   : > { %5712 = vperm.xlu0 %13551, %v5485_v24  }
 0x6c2   : > { %v17971_v40 = vpop.permute.xlu1 %7212  ;;  %v5489_v59 = vunpack.c.l.b16 %v13158_v54  ;;  %v17995_v54 = vrot.slane %v4172_v26, %v15126_v42  ;;  %v4187_v26 = vcombine.high %v17234_v60, %v22438_v43 }
 0x6c3   : > { %22941 = vst [vmem:[#allocation264_spill] sm:$0xff] %v17971_v40  ;;  %v17976_v11 = vpop.permute.xlu0 %8999 }
 0x6c4   : > { %22943 = vst [vmem:[#allocation266_spill] sm:$0xff] %v17976_v11  ;;  %7966 = vperm.xlu1 %13549, %v5483_v47   ;;  %v5491_v11 = vunpack.c.l.b16 %v13160_v25  ;;  %v13162_v47 = vpack.c.bf16 %v17016_v34, %v17016_v34  ;;  %22948 = vst [vmem:[#allocation269_spill] sm:$0xff] %v17995_v54  ;;  %v13166_v34 = vpack.c.bf16 %v17995_v54, %v17995_v54 }
 0x6c5   : > { %5718 = vperm.xlu0 %13551, %v5487_v4  }
 0x6c6   : > { %v17980_v7 = vpop.permute.xlu1 %7218 }
 0x6c7   : > { %22945 = vst [vmem:[#allocation61_spill] sm:$0xff] %v17980_v7  ;;  %v17982_v23 = vpop.permute.xlu0 %8924 }
 0x6c8   : > { %22946 = vst [vmem:[#allocation267_spill] sm:$0xff] %v17982_v23  ;;  %7972 = vperm.xlu1 %13549, %v5485_v24   ;;  %v5493_v23 = vunpack.c.l.b16 %v13162_v47  ;;  %v13164_v24 = vpack.c.bf16 %v22949_v48, %v22949_v48  ;;  %v5497_v48 = vunpack.c.l.b16 %v13166_v34  ;;  %v13168_v47 = vpack.c.bf16 %v17022_v32, %v17022_v32  ;;  %v22954_v34 = vld [vmem:[#allocation52_spill] sm:$0xff] }
 0x6c9   : > { %5724 = vperm.xlu0 %13551, %v5489_v59   ;;  %v18028_v32 = vrot.slane %v17271_v63, %v15126_v42 }
 0x6ca   : > { %v17986_v30 = vpop.permute.xlu1 %7224  ;;  %v5495_v14 = vunpack.c.l.b16 %v13164_v24  ;;  %v18018_v24 = vrot.slane %v4187_v26, %v15126_v42  ;;  %v5499_v62 = vunpack.c.l.b16 %v13168_v47  ;;  %v5862_v26 = vadd.s32 4294967288, %v22954_v34 }
 0x6cb   : > { %22947 = vst [vmem:[#allocation268_spill] sm:$0xff] %v17986_v30  ;;  %22952 = vst [vmem:[#allocation51_spill] sm:$0xff] %v18028_v32  ;;  %v4304_v47 = vcombine.low %v17161_v38, %v17150_v0  ;;  %v13178_v0 = vpack.c.bf16 %v18028_v32, %v18028_v32 }
 0x6cc   : > { %v17992_v41 = vpop.permute.xlu0 %5535  ;;  %7978 = vperm.xlu1 %13549, %v5487_v4   ;;  %22950 = vst [vmem:[#allocation13_spill] sm:$0xff] %v18018_v24 }
 0x6cd   : > { %5730 = vperm.xlu0 %13551, %v5491_v11   ;;  %v13174_v5 = vpack.c.bf16 %v4304_v47, %v4304_v47  ;;  %v22958_v47 = vld [vmem:[#allocation89_spill] sm:$0xff] }
 0x6cf   : > { %v17999_v7 = vpop.permute.xlu1 %7795 }
 0x6d0   : > { %v18001_v30 = vpop.permute.xlu0 %5544  ;;  %7984 = vperm.xlu1 %13549, %v5489_v59  }
 0x6d1   : > { %5736 = vperm.xlu0 %13551, %v5493_v23  }
 0x6d3   : > { %v18005_v25 = vpop.permute.xlu1 %7801 }
 0x6d4   : > { %v18007_v4 = vpop.permute.xlu0 %5550  ;;  %7990 = vperm.xlu1 %13549, %v5491_v11   ;;  %v13170_v11 = vpack.c.bf16 %v22951_v51, %v22951_v51  ;;  %v5869_v51 = vadd.s32 4294967280, %v22954_v34 }
 0x6d5   : > { %5742 = vperm.xlu0 %13551, %v5495_v14  }
 0x6d6   : > { %v5501_v49 = vunpack.c.l.b16 %v13170_v11  ;;  %v22957_v11 = vld [vmem:[#allocation7_spill] sm:$0xff] }
 0x6d7   : > { %v18013_v40 = vpop.permute.xlu1 %7804  ;;  %v18062_v31 = vsub.s32 %v5869_v51, %v22957_v11  ;;  %v18078_v51 = vunpack.c.l.b16 %v13178_v0 }
 0x6d8   : > { %v18015_v59 = vpop.permute.xlu0 %5556  ;;  %7996 = vperm.xlu1 %13549, %v5493_v23   ;;  %v18032_v23 = vrot.slane %v17299_v18, %v15126_v42  ;;  %v13176_v18 = vpack.c.bf16 %v22955_v53, %v22955_v53  ;;  %v18059_v53 = vsub.s32 %v22954_v34, %v22957_v11  ;;  %v18076_v34 = vrot.slane %v17326_v45, %v15126_v42 }
 0x6d9   : > { %5748 = vperm.xlu0 %13551, %v5497_v48   ;;  %v8130_v8 = vrot.slane %v18005_v25, %v18062_v31 }
 0x6da   : > { %22953 = vst [vmem:[#allocation270_spill] sm:$0xff] %v18032_v23  ;;  %v13184_v38 = vpack.c.bf16 %v18032_v23, %v18032_v23  ;;  %v18068_v23 = vunpack.c.l.b16 %v13176_v18  ;;  %v5505_v18 = vunpack.c.l.b16 %v13174_v5  ;;  %v5893_v5 = vrot.slane %v17252_v15, %v18059_v53 }
 0x6db   : > { %v18022_v54 = vpop.permute.xlu1 %7810  ;;  %v5879_v13 = vrot.slane %v18001_v30, %v18059_v53  ;;  %v8121_v45 = vrot.slane %v17999_v7, %v18059_v53 }
 0x6dc   : > { %v18024_v60 = vpop.permute.xlu0 %5562  ;;  %8002 = vperm.xlu1 %13549, %v5495_v14   ;;  %v13172_v14 = vpack.c.bf16 %v18018_v24, %v18018_v24  ;;  %v18053_v24 = vsub.s32 %v5862_v26, %v22957_v11  ;;  %v18070_v26 = vunpack.c.l.b16 %v13182_v37  ;;  %v22961_v11 = vld [vmem:[#allocation31_spill] sm:$0xff] }
 0x6dd   : > { %5754 = vperm.xlu0 %13551, %v5499_v62   ;;  %v5907_v7 = vrot.slane %v18024_v60, %v18059_v53 }
 0x6de   : > { %v5503_v19 = vunpack.c.l.b16 %v13172_v14  ;;  %v18080_v14 = vunpack.c.l.b16 %v13184_v38  ;;  %v8125_v37 = vrot.slane %v17216_v46, %v18053_v24  ;;  %v5873_v38 = vrot.slane %v17236_v9, %v18062_v31  ;;  %v22960_v9 = vld [vmem:[#allocation60_spill] sm:$0xff] }
 0x6df   : > { %v18040_v12 = vpop.permute.xlu1 %7816  ;;  %v5883_v46 = vrot.slane %v17246_v36, %v18053_v24  ;;  %v5911_v36 = vrot.slane %v17265_v33, %v18053_v24  ;;  %v22962_v33 = vld [vmem:[#allocation50_spill] sm:$0xff]  ;;  %v5897_v15 = vrot.slane %v18015_v59, %v18053_v24  ;;  %v5888_v59 = vrot.slane %v18007_v4, %v18062_v31 }
 0x6e0   : > { %v18042_v63 = vpop.permute.xlu0 %5568  ;;  %8008 = vperm.xlu1 %13549, %v5497_v48   ;;  %v13180_v48 = vpack.c.bf16 %v17052_v27, %v17052_v27  ;;  %v5949_v20 = vrot.slane %v22962_v33, %v18059_v53  ;;  %v22965_v33 = vld [vmem:[#allocation101_spill] sm:$0xff]  ;;  %v8126_v25 = vsel %vm5867_vm0, %v8125_v37, %v8121_v45 }
 0x6e1   : > { %5760 = vperm.xlu0 %13551, %v5501_v49   ;;  %v5884_v4 = vsel %vm5867_vm0, %v5883_v46, %v5879_v13  ;;  %v8131_v37 = vsel %vm5874_vm1, %v8130_v8, %v8126_v25  ;;  %v5912_v45 = vsel %vm5867_vm0, %v5911_v36, %v5907_v7  ;;  %v22968_v36 = vrot.slane %v22960_v9, %v18053_v24 }
 0x6e2   : > { %v18088_v27 = vunpack.c.l.b16 %v13180_v48  ;;  %v5902_v48 = vrot.slane %v17256_v61, %v18062_v31  ;;  %v22963_v61 = vld [vmem:[#allocation93_spill] sm:$0xff] }
 0x6e3   : > { %v18064_v32 = vpop.permute.xlu1 %7822 }
 0x6e4   : > { %v18066_v1 = vpop.permute.xlu0 %5574  ;;  %8014 = vperm.xlu1 %13549, %v5499_v62   ;;  %v5866_v62 = vrot.slane %v17227_v21, %v18053_v24  ;;  %v5921_v21 = vrot.slane %v17275_v29, %v18059_v53  ;;  %v5861_v29 = vrot.slane %v17992_v41, %v18059_v53 }
 0x6e5   : > { %5766 = vperm.xlu0 %13551, %v5503_v19   ;;  %v5925_v41 = vrot.slane %v18066_v1, %v18053_v24  ;;  %v5916_v1 = vrot.slane %v18042_v63, %v18062_v31 }
 0x6e6   : > { %v5868_v30 = vsel %vm5867_vm0, %v5866_v62, %v5861_v29  ;;  %v5889_v62 = vsel %vm5874_vm1, %v5888_v59, %v5884_v4  ;;  %v22969_v59 = vrot.slane %v17240_v22, %v18059_v53 }
 0x6e7   : > { %v18098_v52 = vpop.permute.xlu1 %7828  ;;  %v5875_v13 = vsel %vm5874_vm1, %v5873_v38, %v5868_v30  ;;  %v5926_v46 = vsel %vm5867_vm0, %v5925_v41, %v5921_v21 }
 0x6e8   : > { %v18108_v0 = vpop.permute.xlu0 %5580  ;;  %8020 = vperm.xlu1 %13549, %v5501_v49   ;;  %v22959_v49 = vld [vmem:[#allocation142_spill] sm:$0xff]  ;;  %v6367_v38 = vsel %vm6366_vm5, %v5889_v62, %v5875_v13  ;;  %v8172_v9 = vrot.slane %v18098_v52, %v18062_v31  ;;  %v22970_v62 = vrot.slane %v22963_v61, %v18062_v31 }
 0x6e9   : > { %5772 = vperm.xlu0 %13551, %v5505_v18  }
 0x6eb   : > { %v18134_v58 = vpop.permute.xlu1 %7834 }
 0x6ec   : > { %v5587_v50 = vpop.permute.xlu0 %5586  ;;  %8026 = vperm.xlu1 %13549, %v5503_v19   ;;  %v5898_v19 = vsel %vm5867_vm0, %v5897_v15, %v5893_v5  ;;  %v8135_v5 = vrot.slane %v18013_v40, %v18059_v53  ;;  %v8144_v40 = vrot.slane %v18022_v54, %v18062_v31  ;;  %v22966_v54 = vrot.slane %v17231_v28, %v18053_v24 }
 0x6ed   : > { %5778 = vperm.xlu0 %13551, %v18068_v23   ;;  %v5903_v60 = vsel %vm5874_vm1, %v5902_v48, %v5898_v19  ;;  %v5944_v63 = vrot.slane %v5587_v50, %v18062_v31  ;;  %v8181_v21 = vrot.slane %v18134_v58, %v18053_v24  ;;  %v8163_v19 = vrot.slane %v18064_v32, %v18059_v53 }
 0x6ee   : > { %v6369_v8 = vsel %vm6368_vm6, %v5903_v60, %v6367_v38 }
 0x6ef   : > { %v18153_v6 = vpop.permute.xlu1 %7840 }
 0x6f0   : > { %v5593_v39 = vpop.permute.xlu0 %5592  ;;  %8032 = vperm.xlu1 %13549, %v5505_v18   ;;  %v5935_v18 = vrot.slane %v18108_v0, %v18059_v53  ;;  %v8140_v0 = vsel %vm5867_vm0, %v22966_v54, %v8135_v5  ;;  %v8191_v52 = vrot.slane %v18153_v6, %v18059_v53 }
 0x6f1   : > { %v5953_v15 = vrot.slane %v5593_v39, %v18053_v24  ;;  %5784 = vperm.xlu0 %13551, %v18078_v51   ;;  %v8153_v39 = vrot.slane %v18040_v12, %v18053_v24  ;;  %v5917_v12 = vsel %vm5874_vm1, %v5916_v1, %v5912_v45  ;;  %v8145_v58 = vsel %vm5874_vm1, %v8144_v40, %v8140_v0 }
 0x6f2   : > { %v5940_v41 = vsel %vm5867_vm0, %v22968_v36, %v5935_v18  ;;  %v6371_v7 = vsel %vm6370_vm7, %v5917_v12, %v6369_v8  ;;  %v8622_v61 = vsel %vm6366_vm5, %v8145_v58, %v8131_v37  ;;  %v22973_v40 = vrot.slane %v17248_v44, %v18062_v31  ;;  %v22978_v8 = vld [vmem:[#allocation56_spill] sm:$0xff]  ;;  %v22980_v36 = vld [vmem:[#allocation138_spill] sm:$0xff] }
 0x6f3   : > { %v7847_v29 = vpop.permute.xlu1 %7846  ;;  %v5954_v50 = vsel %vm5867_vm0, %v5953_v15, %v5949_v20  ;;  %v8154_v30 = vsel %vm5867_vm0, %v8153_v39, %v22969_v59  ;;  %v22971_v15 = vrot.slane %v17267_v3, %v18059_v53  ;;  %v22977_v0 = vrot.slane %v17287_v17, %v18053_v24 }
 0x6f4   : > { %v5599_v48 = vpop.permute.xlu0 %5598  ;;  %8038 = vperm.xlu1 %13549, %v18068_v23   ;;  %v22967_v23 = vrot.slane %v22959_v49, %v18062_v31  ;;  %v5945_v49 = vsel %vm5874_vm1, %v5944_v63, %v5940_v41  ;;  %v5959_v5 = vsel %vm5874_vm1, %v22970_v62, %v5954_v50  ;;  %v8200_v3 = vrot.slane %v7847_v29, %v18062_v31 }
 0x6f5   : > { %5790 = vperm.xlu0 %13551, %v18088_v27   ;;  %v5963_v20 = vrot.slane %v5599_v48, %v18059_v53  ;;  %v8182_v13 = vsel %vm5867_vm0, %v8181_v21, %v22971_v15  ;;  %v8159_v6 = vsel %vm5874_vm1, %v22973_v40, %v8154_v30  ;;  %v22975_v29 = vrot.slane %v17279_v55, %v18062_v31 }
 0x6f6   : > { %v5931_v28 = vsel %vm5874_vm1, %v22967_v23, %v5926_v46  ;;  %v22974_v46 = vrot.slane %v17260_v16, %v18053_v24  ;;  %v22976_v16 = vrot.slane %v17296_v10, %v18059_v53  ;;  %v8196_v12 = vsel %vm5867_vm0, %v22977_v0, %v8191_v52  ;;  %v22990_v0 = vld [vmem:[#allocation76_spill] sm:$0xff] }
 0x6f7   : > { %v7853_v4 = vpop.permute.xlu1 %7852  ;;  %v6373_v32 = vsel %vm6372_vm8, %v5931_v28, %v6371_v7  ;;  %v8187_v45 = vsel %vm5874_vm1, %v22975_v29, %v8182_v13  ;;  %v5986_v23 = vrot.slane %v22978_v8, %v18062_v31  ;;  %v8623_v10 = vsel %vm6368_vm6, %v8159_v6, %v8622_v61  ;;  %v6422_v7 = vld [vmem:[#allocation2 + $0x4] sm:$0x1]  ;;  %v22987_v6 = vld [vmem:[#allocation97_spill] sm:$0xff] }
 0x6f8   : > { %v5605_v1 = vpop.permute.xlu0 %5604  ;;  %v8209_v22 = vrot.slane %v7853_v4, %v18053_v24  ;;  %8044 = vperm.xlu1 %13549, %v18078_v51   ;;  %v6375_v60 = vsel %vm6374_vm9, %v5945_v49, %v6373_v32  ;;  %v22972_v51 = vrot.slane %v22964_v2, %v18053_v24  ;;  %v8168_v39 = vsel %vm5867_vm0, %v22974_v46, %v8163_v19 }
 0x6f9   : > { %v5972_v25 = vrot.slane %v5605_v1, %v18062_v31  ;;  %5796 = vperm.xlu0 %13551, %v18070_v26   ;;  %v6377_v63 = vsel %vm6376_vm10, %v5959_v5, %v6375_v60  ;;  %v8173_v2 = vsel %vm5874_vm1, %v8172_v9, %v8168_v39  ;;  %v8201_v28 = vsel %vm5874_vm1, %v8200_v3, %v8196_v12  ;;  %v22986_v60 = vld [vmem:[#allocation67_spill] sm:$0xff] }
 0x6fa   : > { %v5968_v18 = vsel %vm5867_vm0, %v22972_v51, %v5963_v20  ;;  %v8210_v54 = vsel %vm5867_vm0, %v8209_v22, %v22976_v16  ;;  %v8223_v41 = vrot.slane %v22980_v36, %v18053_v24  ;;  %v8624_v20 = vsel %vm6370_vm7, %v8173_v2, %v8623_v10 }
 0x6fb   : > { %v5973_v38 = vsel %vm5874_vm1, %v5972_v25, %v5968_v18  ;;  %v7859_v37 = vpop.permute.xlu1 %7858  ;;  %v22981_v58 = vrot.slane %v22965_v33, %v18059_v53  ;;  %v22982_v30 = vrot.slane %v22961_v11, %v18062_v31  ;;  %v13190_v15 = vpack.c.bf16 %v18076_v34, %v18076_v34 }
 0x6fc   : > { %v6379_v44 = vsel %vm6378_vm11, %v5973_v38, %v6377_v63  ;;  %v5611_v48 = vpop.permute.xlu0 %5610  ;;  %8050 = vperm.xlu1 %13549, %v18088_v27   ;;  %v8219_v21 = vrot.slane %v7859_v37, %v18059_v53  ;;  %v22979_v27 = vpack.c.bf16 %v17063_v56, %v17063_v56  ;;  %v8625_v56 = vsel %vm6372_vm8, %v8187_v45, %v8624_v20  ;;  %v8668_v63 = vld [vmem:[#allocation2 + $0x24] sm:$0x1]  ;;  %v22988_v37 = vld [vmem:[#allocation100_spill] sm:$0xff] }
 0x6fd   : > { %v6401_v50 = vpack.c.b16 %v6379_v44, %v6379_v44  ;;  %v5981_v55 = vrot.slane %v5611_v48, %v18053_v24  ;;  %5802 = vperm.xlu0 %13551, %v18080_v14   ;;  %v8215_v19 = vsel %vm5874_vm1, %v22982_v30, %v8210_v54  ;;  %v8626_v11 = vsel %vm6374_vm9, %v8201_v28, %v8625_v56  ;;  %v22989_v48 = vld [vmem:[#allocation149_spill] sm:$0xff]  ;;  %v22992_v20 = vld [vmem:[#allocation148_spill] sm:$0xff]  ;;  %v22994_v30 = vld [vmem:[#allocation158_spill] sm:$0xff] }
 0x6fe   : > { %v5517_v17 = vunpack.c.l.b16 %v22979_v27  ;;  %v8224_v1 = vsel %vm5867_vm0, %v8223_v41, %v8219_v21  ;;  %v8627_v32 = vsel %vm6376_vm10, %v8215_v19, %v8626_v11  ;;  %v22985_v52 = vpack.c.bf16 %v22958_v47, %v22958_v47  ;;  %v22991_v27 = vld [vmem:[#allocation96_spill] sm:$0xff] }
 0x6ff   : > { %6418 = vst.msk [vmem:[#allocation2] sm:$0xf] %vm6417_vm12, %v6401_v50  ;;  %v5982_v59 = vsel %vm5867_vm0, %v5981_v55, %v22981_v58  ;;  %v7865_v49 = vpop.permute.xlu1 %7864  ;;  %v8233_v51 = vrot.slane %v22986_v60, %v18059_v53  ;;  %v8242_v46 = vrot.slane %v22987_v6, %v18062_v31  ;;  %v5521_v39 = vunpack.c.l.b16 %v13190_v15  ;;  %v22997_v15 = vld [vmem:[#allocation80_spill] sm:$0xff] }
 0x700   : > { %v5987_v9 = vsel %vm5874_vm1, %v5986_v23, %v5982_v59  ;;  %v18289_v33 = vpop.permute.xlu0 %5616  ;;  %v8228_v62 = vrot.slane %v7865_v49, %v18062_v31  ;;  %8056 = vperm.xlu1 %13549, %v18070_v26   ;;  %v5519_v26 = vunpack.c.l.b16 %v22985_v52  ;;  %v13192_v2 = vpack.c.bf16 %v22988_v37, %v22988_v37  ;;  %v22993_v59 = vld [vmem:[#allocation159_spill] sm:$0xff] }
 0x701   : > { %v6402_v5 = vpack.c.b16 %v5987_v9, %v5987_v9  ;;  %5808 = vperm.xlu0 %13551, %v5517_v17   ;;  %v18326_v16 = vrot.slane %v22989_v48, %v15126_v42  ;;  %v13194_v12 = vpack.c.bf16 %v22990_v0, %v22990_v0  ;;  %v18348_v58 = vrot.slane %v22992_v20, %v15126_v42  ;;  %v23002_v48 = vld [vmem:[#allocation33_spill] sm:$0xff]  ;;  %v23003_v0 = vld [vmem:[#allocation143_spill] sm:$0xff]  ;;  %v23006_v20 = vld [vmem:[#allocation102_spill] sm:$0xff] }
 0x702   : > { %v8229_v22 = vsel %vm5874_vm1, %v8228_v62, %v8224_v1  ;;  %v5523_v54 = vunpack.c.l.b16 %v13192_v2  ;;  %v2327_v19 = vcombine.high %v22994_v30, %v22993_v59  ;;  %v2380_v49 = vcombine.high %v17745_v57, %v22438_v43  ;;  %v23007_v30 = vld [vmem:[#allocation88_spill] sm:$0xff] }
 0x703   : > { %v6423_v13 = vsel %vm18284_vm15, %v6402_v5, %v6422_v7  ;;  %v8628_v25 = vsel %vm6378_vm11, %v8229_v22, %v8627_v32  ;;  %v7871_v61 = vpop.permute.xlu1 %7870  ;;  %v5525_v21 = vunpack.c.l.b16 %v13194_v12  ;;  %v13196_v8 = vpack.c.bf16 %v18326_v16, %v18326_v16  ;;  %v22995_v7 = vld [vmem:[#allocation74_spill] sm:$0xff]  ;;  %v23020_v59 = vld [vmem:[#allocation64_spill] sm:$0xff] }
 0x704   : > { %6424 = vst [vmem:[#allocation2 + $0x4] sm:$0x1] %v6423_v13  ;;  %v18307_v18 = vpop.permute.xlu0 %5622  ;;  %v8650_v3 = vpack.c.b16 %v8628_v25, %v8628_v25  ;;  %v8237_v40 = vrot.slane %v7871_v61, %v18053_v24  ;;  %8062 = vperm.xlu1 %13549, %v18080_v14   ;;  %v13200_v9 = vpack.c.bf16 %v22995_v7, %v22995_v7  ;;  %v22996_v5 = vld [vmem:[#allocation78_spill] sm:$0xff] }
 0x705   : > { %5814 = vperm.xlu0 %13551, %v5519_v26   ;;  %v5527_v28 = vunpack.c.l.b16 %v13196_v8  ;;  %v13206_v1 = vpack.c.bf16 %v22996_v5, %v22996_v5  ;;  %v13202_v22 = vpack.c.bf16 %v18348_v58, %v18348_v58  ;;  %v13204_v32 = vpack.c.bf16 %v2327_v19, %v2327_v19  ;;  %v23009_v5 = vld [vmem:[#allocation175_spill] sm:$0xff] }
 0x706   : > { %8667 = vst.msk [vmem:[#allocation2 + $0x20] sm:$0xf] %vm6417_vm12, %v8650_v3  ;;  %v8238_v47 = vsel %vm5867_vm0, %v8237_v40, %v8233_v51  ;;  %v13212_v57 = vpack.c.bf16 %v22997_v15, %v22997_v15  ;;  %v18368_v13 = vcombine.high %v17772_v35, %v22438_v43  ;;  %v13208_v52 = vpack.c.bf16 %v2380_v49, %v2380_v49  ;;  %v23008_v49 = vld [vmem:[#allocation24_spill] sm:$0xff]  ;;  %v23011_v15 = vld [vmem:[#allocation58_spill] sm:$0xff]  ;;  %v23017_v35 = vld [vmem:[#allocation115_spill] sm:$0xff] }
 0x707   : > { %v8243_v38 = vsel %vm5874_vm1, %v8242_v46, %v8238_v47  ;;  %v18318_v29 = vpop.permute.xlu1 %7876  ;;  %v5531_v61 = vunpack.c.l.b16 %v13200_v9  ;;  %v18376_v3 = vunpack.c.l.b16 %v13206_v1  ;;  %v5533_v40 = vunpack.c.l.b16 %v13202_v22  ;;  %v22999_v47 = vld [vmem:[#allocation146_spill] sm:$0xff]  ;;  %v23010_v22 = vld [vmem:[#allocation103_spill] sm:$0xff] }
 0x708   : > { %v18320_v45 = vpop.permute.xlu0 %5628  ;;  %v8651_v14 = vpack.c.b16 %v8243_v38, %v8243_v38  ;;  %8068 = vperm.xlu1 %13549, %v5517_v17   ;;  %v13198_v17 = vpack.c.bf16 %v22991_v27, %v22991_v27  ;;  %v18378_v6 = vunpack.c.l.b16 %v13204_v32  ;;  %v18380_v46 = vunpack.c.l.b16 %v13212_v57  ;;  %v23005_v27 = vld [vmem:[#allocation137_spill] sm:$0xff] }
 0x709   : > { %5820 = vperm.xlu0 %13551, %v5521_v39   ;;  %v18388_v37 = vunpack.c.l.b16 %v13208_v52  ;;  %v6005_v12 = vrot.slane %v23003_v0, %v18059_v53  ;;  %v6023_v19 = vrot.slane %v23007_v30, %v18053_v24  ;;  %v6033_v7 = vrot.slane %v23008_v49, %v18059_v53  ;;  %v23015_v0 = vld [vmem:[#allocation111_spill] sm:$0xff] }
 0x70a   : > { %v8669_v44 = vsel %vm18284_vm15, %v8651_v14, %v8668_v63  ;;  %v5529_v56 = vunpack.c.l.b16 %v13198_v17  ;;  %v23000_v63 = vld [vmem:[#allocation16_spill] sm:$0xff]  ;;  %v23001_v14 = vld [vmem:[#allocation53_spill] sm:$0xff]  ;;  %v6042_v57 = vrot.slane %v23011_v15, %v18062_v31  ;;  %v6009_v52 = vrot.slane %v18320_v45, %v18053_v24 }
 0x70b   : > { %8670 = vst [vmem:[#allocation2 + $0x24] sm:$0x1] %v8669_v44  ;;  %v18330_v50 = vpop.permute.xlu1 %7882  ;;  %v5995_v38 = vrot.slane %v23000_v63, %v18053_v24  ;;  %v8261_v44 = vrot.slane %v23001_v14, %v18059_v53  ;;  %v6000_v30 = vrot.slane %v18307_v18, %v18062_v31  ;;  %v8247_v45 = vrot.slane %v18318_v29, %v18059_v53  ;;  %v23018_v29 = vld [vmem:[#allocation120_spill] sm:$0xff] }
 0x70c   : > { %v18332_v55 = vpop.permute.xlu0 %5634  ;;  %8074 = vperm.xlu1 %13549, %v5519_v26   ;;  %v22998_v26 = vld [vmem:[#allocation11_spill] sm:$0xff]  ;;  %v6079_v1 = vrot.slane %v23018_v29, %v18053_v24 }
 0x70d   : > { %5826 = vperm.xlu0 %13551, %v5523_v54   ;;  %v13210_v25 = vpack.c.bf16 %v22998_v26, %v22998_v26  ;;  %v23012_v26 = vld [vmem:[#allocation150_spill] sm:$0xff] }
 0x70f   : > { %v18336_v23 = vpop.permute.xlu1 %7888  ;;  %v18390_v2 = vunpack.c.l.b16 %v13210_v25 }
 0x710   : > { %v18338_v10 = vpop.permute.xlu0 %5640  ;;  %8080 = vperm.xlu1 %13549, %v5521_v39   ;;  %v8251_v39 = vrot.slane %v22999_v47, %v18053_v24  ;;  %v23013_v47 = vld [vmem:[#allocation27_spill] sm:$0xff]  ;;  %v8265_v18 = vrot.slane %v18336_v23, %v18053_v24  ;;  %v6098_v23 = vrot.slane %v23020_v59, %v18062_v31 }
 0x711   : > { %5832 = vperm.xlu0 %13551, %v5525_v21   ;;  %v6051_v63 = vrot.slane %v23013_v47, %v18053_v24  ;;  %v23016_v47 = vld [vmem:[#allocation112_spill] sm:$0xff]  ;;  %v6028_v25 = vrot.slane %v18338_v10, %v18062_v31 }
 0x712   : > { %v8266_v59 = vsel %vm5867_vm0, %v8265_v18, %v8261_v44 }
 0x713   : > { %v18342_v36 = vpop.permute.xlu1 %7894 }
 0x714   : > { %v18344_v41 = vpop.permute.xlu0 %5646  ;;  %8086 = vperm.xlu1 %13549, %v5523_v54   ;;  %v8270_v54 = vrot.slane %v23002_v48, %v18062_v31  ;;  %v5991_v48 = vrot.slane %v18289_v33, %v18059_v53  ;;  %v6070_v33 = vrot.slane %v23017_v35, %v18062_v31  ;;  %v23019_v35 = vld [vmem:[#allocation122_spill] sm:$0xff]  ;;  %v8275_v44 = vrot.slane %v18342_v36, %v18059_v53 }
 0x715   : > { %5838 = vperm.xlu0 %13551, %v5527_v28   ;;  %v6037_v49 = vrot.slane %v18344_v41, %v18053_v24  ;;  %v6010_v41 = vsel %vm5867_vm0, %v6009_v52, %v6005_v12  ;;  %v8252_v52 = vsel %vm5867_vm0, %v8251_v39, %v8247_v45  ;;  %v8256_v39 = vrot.slane %v18330_v50, %v18062_v31 }
 0x716   : > { %v8271_v50 = vsel %vm5874_vm1, %v8270_v54, %v8266_v59 }
 0x717   : > { %v18356_v62 = vpop.permute.xlu1 %7900  ;;  %v6038_v10 = vsel %vm5867_vm0, %v6037_v49, %v6033_v7  ;;  %v23021_v49 = vrot.slane %v23005_v27, %v18053_v24 }
 0x718   : > { %v18358_v11 = vpop.permute.xlu0 %5652  ;;  %8092 = vperm.xlu1 %13549, %v5525_v21   ;;  %v23004_v21 = vld [vmem:[#allocation63_spill] sm:$0xff] }
 0x719   : > { %5844 = vperm.xlu0 %13551, %v5529_v56   ;;  %v6014_v8 = vrot.slane %v23004_v21, %v18062_v31  ;;  %v6019_v21 = vrot.slane %v18332_v55, %v18059_v53  ;;  %v6089_v55 = vrot.slane %v23019_v35, %v18059_v53  ;;  %v6047_v29 = vrot.slane %v18358_v11, %v18059_v53 }
 0x71b   : > { %v18372_v60 = vpop.permute.xlu1 %7906  ;;  %v6015_v35 = vsel %vm5874_vm1, %v6014_v8, %v6010_v41  ;;  %v6024_v42 = vsel %vm5867_vm0, %v6023_v19, %v6019_v21  ;;  %v6043_v8 = vsel %vm5874_vm1, %v6042_v57, %v6038_v10  ;;  %v6052_v19 = vsel %vm5867_vm0, %v6051_v63, %v6047_v29 }
 0x71c   : > { %v18374_v51 = vpop.permute.xlu0 %5658  ;;  %8098 = vperm.xlu1 %13549, %v5527_v28   ;;  %v6029_v11 = vsel %vm5874_vm1, %v6028_v25, %v6024_v42  ;;  %v8284_v25 = vrot.slane %v18356_v62, %v18062_v31 }
 0x71d   : > { %5850 = vperm.xlu0 %13551, %v5531_v61  }
 0x71f   : > { %v18400_v28 = vpop.permute.xlu1 %7912 }
 0x720   : > { %v5665_v9 = vpop.permute.xlu0 %5664  ;;  %8104 = vperm.xlu1 %13549, %v5529_v56   ;;  %v23014_v56 = vld [vmem:[#allocation162_spill] sm:$0xff]  ;;  %v8303_v54 = vrot.slane %v18400_v28, %v18059_v53 }
 0x721   : > { %5856 = vperm.xlu0 %13551, %v5533_v40   ;;  %v6061_v14 = vrot.slane %v23014_v56, %v18059_v53  ;;  %v6065_v56 = vrot.slane %v5665_v9, %v18053_v24  ;;  %v6056_v9 = vrot.slane %v18374_v51, %v18062_v31 }
 0x723   : > { %v18434_v15 = vpop.permute.xlu1 %7918  ;;  %v6066_v7 = vsel %vm5867_vm0, %v6065_v56, %v6061_v14 }
 0x724   : > { %v5671_v32 = vpop.permute.xlu0 %5670  ;;  %8110 = vperm.xlu1 %13549, %v5531_v61   ;;  %v5996_v61 = vsel %vm5867_vm0, %v5995_v38, %v5991_v48  ;;  %v6071_v63 = vsel %vm5874_vm1, %v6070_v33, %v6066_v7  ;;  %v8312_v28 = vrot.slane %v18434_v15, %v18062_v31 }
 0x725   : > { %6909 = vperm.xlu0 %13551, %v18378_v6   ;;  %v6001_v12 = vsel %vm5874_vm1, %v6000_v30, %v5996_v61  ;;  %v6075_v38 = vrot.slane %v5671_v32, %v18059_v53  ;;  %v6057_v32 = vsel %vm5874_vm1, %v6056_v9, %v6052_v19 }
 0x726   : > { %v6380_v42 = vsel %vm6366_vm5, %v6015_v35, %v6001_v12  ;;  %v8257_v35 = vsel %vm5874_vm1, %v8256_v39, %v8252_v52 }
 0x727   : > { %v7925_v17 = vpop.permute.xlu1 %7924  ;;  %v6381_v57 = vsel %vm6368_vm6, %v6029_v11, %v6380_v42  ;;  %v6080_v21 = vsel %vm5867_vm0, %v6079_v1, %v6075_v38  ;;  %v8280_v1 = vsel %vm5867_vm0, %v23021_v49, %v8275_v44  ;;  %v23032_v49 = vpack.c.bf16 %v18368_v13, %v18368_v13  ;;  %v23033_v13 = vld [vmem:[#allocation139_spill] sm:$0xff] }
 0x728   : > { %v5677_v48 = vpop.permute.xlu0 %5676  ;;  %8116 = vperm.xlu1 %13549, %v5533_v40   ;;  %v8293_v40 = vrot.slane %v18372_v60, %v18053_v24  ;;  %v8321_v30 = vrot.slane %v7925_v17, %v18053_v24  ;;  %v6382_v60 = vsel %vm6370_vm7, %v6043_v8, %v6381_v57  ;;  %v8285_v33 = vsel %vm5874_vm1, %v8284_v25, %v8280_v1 }
 0x729   : > { %v6084_v51 = vrot.slane %v5677_v48, %v18062_v31  ;;  %6915 = vperm.xlu0 %13551, %v18376_v3   ;;  %v6383_v17 = vsel %vm6372_vm8, %v6057_v32, %v6382_v60  ;;  %v8629_v48 = vsel %vm6366_vm5, %v8271_v50, %v8257_v35  ;;  %v23028_v8 = vrot.slane %v23016_v47, %v18053_v24  ;;  %v23031_v60 = vld [vmem:[#allocation65_spill] sm:$0xff] }
 0x72a   : > { %v6384_v18 = vsel %vm6374_vm9, %v6071_v63, %v6383_v17  ;;  %v8630_v7 = vsel %vm6368_vm6, %v8285_v33, %v8629_v48  ;;  %v6808_v1 = vunpack.c.l.b16 %v23032_v49  ;;  %v23043_v49 = vld [vmem:[#allocation29_spill] sm:$0xff] }
 0x72b   : > { %v7931_v14 = vpop.permute.xlu1 %7930  ;;  %v6085_v45 = vsel %vm5874_vm1, %v6084_v51, %v6080_v21 }
 0x72c   : > { %v5683_v36 = vpop.permute.xlu0 %5682  ;;  %8687 = vperm.xlu1 %13549, %v18378_v6   ;;  %v23022_v6 = vrot.slane %v23006_v20, %v18059_v53  ;;  %v8331_v27 = vrot.slane %v7931_v14, %v18059_v53  ;;  %v6385_v29 = vsel %vm6376_vm10, %v6085_v45, %v6384_v18  ;;  %v23023_v20 = vrot.slane %v23012_v26, %v18059_v53  ;;  %v23030_v14 = vld [vmem:[#allocation116_spill] sm:$0xff] }
 0x72d   : > { %v6093_v62 = vrot.slane %v5683_v36, %v18053_v24  ;;  %6921 = vperm.xlu0 %13551, %v18388_v37   ;;  %v8354_v47 = vrot.slane %v23030_v14, %v18062_v31  ;;  %v6426_v45 = vld [vmem:[#allocation2 + $0xc] sm:$0x1] }
 0x72e   : > { %v8294_v56 = vsel %vm5867_vm0, %v8293_v40, %v23022_v6  ;;  %v8322_v10 = vsel %vm5867_vm0, %v8321_v30, %v23023_v20  ;;  %v8336_v19 = vsel %vm5867_vm0, %v23028_v8, %v8331_v27  ;;  %v23029_v40 = vld [vmem:[#allocation140_spill] sm:$0xff]  ;;  %v23037_v8 = vld [vmem:[#allocation81_spill] sm:$0xff] }
 0x72f   : > { %v6094_v41 = vsel %vm5867_vm0, %v6093_v62, %v6089_v55  ;;  %v7937_v61 = vpop.permute.xlu1 %7936  ;;  %v23024_v55 = vrot.slane %v23009_v5, %v18062_v31  ;;  %v23026_v5 = vld [vmem:[#allocation114_spill] sm:$0xff]  ;;  %v6107_v42 = vrot.slane %v23029_v40, %v18053_v24  ;;  %v23038_v40 = vld [vmem:[#allocation232_spill] sm:$0xff] }
 0x730   : > { %v6099_v12 = vsel %vm5874_vm1, %v6098_v23, %v6094_v41  ;;  %v5689_v9 = vpop.permute.xlu0 %5688  ;;  %v8340_v15 = vrot.slane %v7937_v61, %v18062_v31  ;;  %8693 = vperm.xlu1 %13549, %v18376_v3   ;;  %v23025_v23 = vrot.slane %v23010_v22, %v18053_v24  ;;  %v8345_v39 = vrot.slane %v23026_v5, %v18059_v53  ;;  %v23036_v5 = vld [vmem:[#allocation129_spill] sm:$0xff] }
 0x731   : > { %v8299_v59 = vsel %vm5874_vm1, %v23024_v55, %v8294_v56  ;;  %v6386_v26 = vsel %vm6378_vm11, %v6099_v12, %v6385_v29  ;;  %6927 = vperm.xlu0 %13551, %v18390_v2   ;;  %v6103_v52 = vrot.slane %v5689_v9, %v18059_v53  ;;  %v23027_v22 = vrot.slane %v23015_v0, %v18062_v31  ;;  %v23034_v12 = vld [vmem:[#allocation79_spill] sm:$0xff] }
 0x732   : > { %v8308_v38 = vsel %vm5867_vm0, %v23025_v23, %v8303_v54  ;;  %v6403_v11 = vpack.c.b16 %v6386_v26, %v6386_v26  ;;  %v8631_v50 = vsel %vm6370_vm7, %v8299_v59, %v8630_v7  ;;  %v8341_v25 = vsel %vm5874_vm1, %v8340_v15, %v8336_v19  ;;  %v8672_v59 = vld [vmem:[#allocation2 + $0x2c] sm:$0x1] }
 0x733   : > { %v8313_v3 = vsel %vm5874_vm1, %v8312_v28, %v8308_v38  ;;  %v8327_v51 = vsel %vm5874_vm1, %v23027_v22, %v8322_v10  ;;  %v7943_v44 = vpop.permute.xlu1 %7942  ;;  %v6108_v21 = vsel %vm5867_vm0, %v6107_v42, %v6103_v52  ;;  %v13216_v54 = vpack.c.bf16 %v23031_v60, %v23031_v60 }
 0x734   : > { %6425 = vst.msk [vmem:[#allocation2 + $0x8] sm:$0xf] %vm6417_vm12, %v6403_v11  ;;  %v5695_v32 = vpop.permute.xlu0 %5694  ;;  %v8349_v0 = vrot.slane %v7943_v44, %v18053_v24  ;;  %8699 = vperm.xlu1 %13549, %v18388_v37   ;;  %v8632_v57 = vsel %vm6372_vm8, %v8313_v3, %v8631_v50  ;;  %v8363_v61 = vrot.slane %v23033_v13, %v18053_v24  ;;  %v23046_v13 = vld [vmem:[#allocation152_spill] sm:$0xff] }
 0x735   : > { %v6112_v63 = vrot.slane %v5695_v32, %v18062_v31  ;;  %6933 = vperm.xlu0 %13551, %v18380_v46   ;;  %v8633_v36 = vsel %vm6374_vm9, %v8327_v51, %v8632_v57  ;;  %v6810_v29 = vunpack.c.l.b16 %v13216_v54  ;;  %v13218_v20 = vpack.c.bf16 %v23034_v12, %v23034_v12  ;;  %v23039_v32 = vld [vmem:[#allocation19_spill] sm:$0xff]  ;;  %v23042_v54 = vld [vmem:[#allocation17_spill] sm:$0xff] }
 0x736   : > { %v8350_v30 = vsel %vm5867_vm0, %v8349_v0, %v8345_v39  ;;  %v8634_v62 = vsel %vm6376_vm10, %v8341_v25, %v8633_v36  ;;  %v13222_v39 = vpack.c.bf16 %v23036_v5, %v23036_v5  ;;  %v13224_v19 = vpack.c.bf16 %v23037_v8, %v23037_v8  ;;  %v23041_v36 = vld [vmem:[#allocation28_spill] sm:$0xff]  ;;  %v23051_v5 = vld [vmem:[#allocation121_spill] sm:$0xff] }
 0x737   : > { %v6113_v37 = vsel %vm5874_vm1, %v6112_v63, %v6108_v21  ;;  %v8355_v17 = vsel %vm5874_vm1, %v8354_v47, %v8350_v30  ;;  %v7949_v6 = vpop.permute.xlu1 %7948  ;;  %v6812_v38 = vunpack.c.l.b16 %v13218_v20  ;;  %v2703_v42 = vcombine.high %v23038_v40, %v22438_v43  ;;  %v23040_v63 = vld [vmem:[#allocation167_spill] sm:$0xff] }
 0x738   : > { %v6404_v56 = vpack.c.b16 %v6113_v37, %v6113_v37  ;;  %v18566_v28 = vpop.permute.xlu0 %5700  ;;  %v8635_v33 = vsel %vm6378_vm11, %v8355_v17, %v8634_v62  ;;  %8705 = vperm.xlu1 %13549, %v18390_v2   ;;  %v8359_v41 = vrot.slane %v7949_v6, %v18059_v53  ;;  %v23035_v2 = vld [vmem:[#allocation228_spill] sm:$0xff]  ;;  %v6816_v51 = vunpack.c.l.b16 %v13222_v39  ;;  %v23044_v6 = vld [vmem:[#allocation45_spill] sm:$0xff] }
 0x739   : > { %6939 = vperm.xlu0 %13551, %v6808_v1   ;;  %v8652_v18 = vpack.c.b16 %v8635_v33, %v8635_v33  ;;  %v2701_v9 = vcombine.high %v23035_v2, %v22438_v43  ;;  %v3130_v25 = vcombine.high %v23039_v32, %v22438_v43  ;;  %v6818_v0 = vunpack.c.l.b16 %v13224_v19  ;;  %v23047_v2 = vld [vmem:[#allocation113_spill] sm:$0xff]  ;;  %v23053_v19 = vld [vmem:[#allocation178_spill] sm:$0xff] }
 0x73a   : > { %v6427_v27 = vsel %vm18284_vm15, %v6404_v56, %v6426_v45  ;;  %v8364_v55 = vsel %vm5867_vm0, %v8363_v61, %v8359_v41  ;;  %v13226_v14 = vpack.c.bf16 %v2703_v42, %v2703_v42  ;;  %v3132_v21 = vcombine.high %v23040_v63, %v22438_v43  ;;  %v23045_v41 = vld [vmem:[#allocation8_spill] sm:$0xff]  ;;  %v23054_v42 = vld [vmem:[#allocation118_spill] sm:$0xff] }
 0x73b   : > { %6428 = vst [vmem:[#allocation2 + $0xc] sm:$0x1] %v6427_v27  ;;  %8671 = vst.msk [vmem:[#allocation2 + $0x28] sm:$0xf] %vm6417_vm12, %v8652_v18  ;;  %v7955_v10 = vpop.permute.xlu1 %7954  ;;  %v13220_v48 = vpack.c.bf16 %v2701_v9, %v2701_v9  ;;  %v13230_v30 = vpack.c.bf16 %v23041_v36, %v23041_v36  ;;  %v13228_v45 = vpack.c.bf16 %v23042_v54, %v23042_v54 }
 0x73c   : > { %v18580_v15 = vpop.permute.xlu0 %5706  ;;  %v8368_v35 = vrot.slane %v7955_v10, %v18062_v31  ;;  %8711 = vperm.xlu1 %13549, %v18380_v46   ;;  %v6820_v60 = vunpack.c.l.b16 %v13226_v14  ;;  %v13232_v62 = vpack.c.bf16 %v3130_v25, %v3130_v25  ;;  %v13234_v56 = vpack.c.bf16 %v23044_v6, %v23044_v6  ;;  %v23055_v25 = vld [vmem:[#allocation66_spill] sm:$0xff]  ;;  %v23056_v14 = vld [vmem:[#allocation179_spill] sm:$0xff] }
 0x73d   : > { %6945 = vperm.xlu0 %13551, %v6810_v29   ;;  %v6814_v46 = vunpack.c.l.b16 %v13220_v48  ;;  %v13238_v33 = vpack.c.bf16 %v3132_v21, %v3132_v21  ;;  %v18626_v18 = vunpack.c.l.b16 %v13230_v30  ;;  %v18632_v61 = vcombine.high %v23046_v13, %v22438_v43  ;;  %v23057_v21 = vld [vmem:[#allocation181_spill] sm:$0xff] }
 0x73e   : > { %v8369_v23 = vsel %vm5874_vm1, %v8368_v35, %v8364_v55  ;;  %v18636_v20 = vunpack.c.l.b16 %v13232_v62  ;;  %v8373_v9 = vrot.slane %v23047_v2, %v18059_v53  ;;  %v18644_v55 = vunpack.c.l.b16 %v13234_v56  ;;  %v23058_v30 = vld [vmem:[#allocation25_spill] sm:$0xff]  ;;  %v23060_v56 = vld [vmem:[#allocation156_spill] sm:$0xff] }
 0x73f   : > { %v8653_v26 = vpack.c.b16 %v8369_v23, %v8369_v23  ;;  %v18586_v3 = vpop.permute.xlu1 %7960  ;;  %v23048_v23 = vld [vmem:[#allocation132_spill] sm:$0xff]  ;;  %v6117_v39 = vrot.slane %v23051_v5, %v18059_v53  ;;  %v6145_v63 = vrot.slane %v23056_v14, %v18059_v53  ;;  %v6154_v54 = vrot.slane %v23058_v30, %v18062_v31 }
 0x740   : > { %v18588_v11 = vpop.permute.xlu0 %5712  ;;  %8717 = vperm.xlu1 %13549, %v6808_v1   ;;  %v13236_v1 = vpack.c.bf16 %v23043_v49, %v23043_v49  ;;  %v6131_v13 = vrot.slane %v18580_v15, %v18059_v53  ;;  %v8377_v2 = vrot.slane %v18586_v3, %v18053_v24  ;;  %v23064_v15 = vld [vmem:[#allocation160_spill] sm:$0xff] }
 0x741   : > { %6951 = vperm.xlu0 %13551, %v6812_v38   ;;  %v8673_v52 = vsel %vm18284_vm15, %v8653_v26, %v8672_v59  ;;  %v18646_v59 = vunpack.c.l.b16 %v13238_v33  ;;  %v23049_v26 = vld [vmem:[#allocation141_spill] sm:$0xff]  ;;  %v6163_v33 = vrot.slane %v23060_v56, %v18053_v24  ;;  %v6140_v14 = vrot.slane %v18588_v11, %v18062_v31  ;;  %v23065_v3 = vld [vmem:[#allocation172_spill] sm:$0xff]  ;;  %v23066_v56 = vld [vmem:[#allocation62_spill] sm:$0xff] }
 0x742   : > { %8674 = vst [vmem:[#allocation2 + $0x2c] sm:$0x1] %v8673_v52  ;;  %v18638_v10 = vunpack.c.l.b16 %v13236_v1  ;;  %v8382_v48 = vrot.slane %v23049_v26, %v18062_v31  ;;  %v23050_v52 = vld [vmem:[#allocation117_spill] sm:$0xff]  ;;  %v23059_v1 = vld [vmem:[#allocation128_spill] sm:$0xff]  ;;  %v6191_v27 = vrot.slane %v23066_v56, %v18053_v24  ;;  %v8378_v40 = vsel %vm5867_vm0, %v8377_v2, %v8373_v9 }
 0x743   : > { %v18594_v7 = vpop.permute.xlu1 %7966 }
 0x744   : > { %v18596_v22 = vpop.permute.xlu0 %5718  ;;  %8723 = vperm.xlu1 %13549, %v6810_v29   ;;  %v6822_v29 = vunpack.c.l.b16 %v13228_v45  ;;  %v6121_v45 = vrot.slane %v18566_v28, %v18053_v24  ;;  %v23061_v28 = vld [vmem:[#allocation171_spill] sm:$0xff] }
 0x745   : > { %6957 = vperm.xlu0 %13551, %v6814_v46   ;;  %v6149_v62 = vrot.slane %v18596_v22, %v18053_v24  ;;  %v23062_v22 = vld [vmem:[#allocation91_spill] sm:$0xff] }
 0x746   : > { %v6173_v5 = vrot.slane %v23062_v22, %v18059_v53  ;;  %v6122_v36 = vsel %vm5867_vm0, %v6121_v45, %v6117_v39 }
 0x747   : > { %v18600_v44 = vpop.permute.xlu1 %7972  ;;  %v6150_v11 = vsel %vm5867_vm0, %v6149_v62, %v6145_v63  ;;  %v8387_v63 = vrot.slane %v18594_v7, %v18059_v53 }
 0x748   : > { %v18604_v50 = vpop.permute.xlu0 %5724  ;;  %8729 = vperm.xlu1 %13549, %v6812_v38   ;;  %v23067_v38 = vld [vmem:[#allocation95_spill] sm:$0xff]  ;;  %v8396_v7 = vrot.slane %v18600_v44, %v18062_v31 }
 0x749   : > { %6963 = vperm.xlu0 %13551, %v6816_v51   ;;  %v6201_v22 = vrot.slane %v23067_v38, %v18059_v53  ;;  %v6159_v38 = vrot.slane %v18604_v50, %v18059_v53  ;;  %v6155_v50 = vsel %vm5874_vm1, %v6154_v54, %v6150_v11 }
 0x74b   : > { %v18608_v47 = vpop.permute.xlu1 %7978 }
 0x74c   : > { %v18610_v57 = vpop.permute.xlu0 %5730  ;;  %8735 = vperm.xlu1 %13549, %v6814_v46   ;;  %v8391_v46 = vrot.slane %v23050_v52, %v18053_v24  ;;  %v23068_v52 = vld [vmem:[#allocation18_spill] sm:$0xff] }
 0x74d   : > { %6969 = vperm.xlu0 %13551, %v6818_v0  }
 0x74e   : > { %v8392_v44 = vsel %vm5867_vm0, %v8391_v46, %v8387_v63  ;;  %v23072_v46 = vrot.slane %v23053_v19, %v18059_v53 }
 0x74f   : > { %v18618_v37 = vpop.permute.xlu1 %7984 }
 0x750   : > { %v18622_v17 = vpop.permute.xlu0 %5736  ;;  %8741 = vperm.xlu1 %13549, %v6816_v51   ;;  %v23052_v51 = vld [vmem:[#allocation42_spill] sm:$0xff] }
 0x751   : > { %6975 = vperm.xlu0 %13551, %v6820_v60   ;;  %v6126_v8 = vrot.slane %v23052_v51, %v18062_v31  ;;  %v23063_v51 = vld [vmem:[#allocation161_spill] sm:$0xff]  ;;  %v6177_v32 = vrot.slane %v18622_v17, %v18053_v24  ;;  %v6168_v17 = vrot.slane %v18610_v57, %v18062_v31  ;;  %v8405_v57 = vrot.slane %v18608_v47, %v18053_v24 }
 0x753   : > { %v18634_v12 = vpop.permute.xlu1 %7990  ;;  %v6127_v62 = vsel %vm5874_vm1, %v6126_v8, %v6122_v36  ;;  %v8383_v36 = vsel %vm5874_vm1, %v8382_v48, %v8378_v40 }
 0x754   : > { %v18642_v35 = vpop.permute.xlu0 %5742  ;;  %8747 = vperm.xlu1 %13549, %v6818_v0   ;;  %v6135_v0 = vrot.slane %v23055_v25, %v18053_v24  ;;  %v6182_v25 = vrot.slane %v23063_v51, %v18062_v31 }
 0x755   : > { %6981 = vperm.xlu0 %13551, %v6822_v29  }
 0x756   : > { %v6136_v56 = vsel %vm5867_vm0, %v6135_v0, %v6131_v13  ;;  %v23070_v0 = vld [vmem:[#allocation104_spill] sm:$0xff]  ;;  %v6178_v13 = vsel %vm5867_vm0, %v6177_v32, %v6173_v5 }
 0x757   : > { %v18674_v49 = vpop.permute.xlu1 %7996  ;;  %v6141_v39 = vsel %vm5874_vm1, %v6140_v14, %v6136_v56  ;;  %v6219_v9 = vrot.slane %v23070_v0, %v18053_v24  ;;  %v6183_v48 = vsel %vm5874_vm1, %v6182_v25, %v6178_v13 }
 0x758   : > { %v5749_v26 = vpop.permute.xlu0 %5748  ;;  %8753 = vperm.xlu1 %13549, %v6820_v60   ;;  %v23069_v60 = vld [vmem:[#allocation30_spill] sm:$0xff]  ;;  %v6387_v8 = vsel %vm6366_vm5, %v6141_v39, %v6127_v62 }
 0x759   : > { %6987 = vperm.xlu0 %13551, %v18626_v18   ;;  %v6210_v6 = vrot.slane %v23069_v60, %v18062_v31  ;;  %v6196_v2 = vrot.slane %v5749_v26, %v18062_v31  ;;  %v23071_v60 = vld [vmem:[#allocation77_spill] sm:$0xff]  ;;  %v8433_v26 = vrot.slane %v18674_v49, %v18053_v24  ;;  %v6388_v5 = vsel %vm6368_vm6, %v6155_v50, %v6387_v8 }
 0x75a   : > { %v8415_v49 = vrot.slane %v18618_v37, %v18059_v53  ;;  %v23073_v37 = vrot.slane %v23059_v1, %v18059_v53  ;;  %v23074_v1 = vrot.slane %v23054_v42, %v18062_v31 }
 0x75b   : > { %v18707_v30 = vpop.permute.xlu1 %8002 }
 0x75c   : > { %v5755_v51 = vpop.permute.xlu0 %5754  ;;  %8759 = vperm.xlu1 %13549, %v6822_v29   ;;  %v6187_v29 = vrot.slane %v18642_v35, %v18059_v53  ;;  %v6164_v35 = vsel %vm5867_vm0, %v6163_v33, %v6159_v38 }
 0x75d   : > { %v6205_v45 = vrot.slane %v5755_v51, %v18053_v24  ;;  %6993 = vperm.xlu0 %13551, %v18636_v20   ;;  %v6229_v51 = vrot.slane %v23071_v60, %v18059_v53  ;;  %v6169_v32 = vsel %vm5874_vm1, %v6168_v17, %v6164_v35  ;;  %v8434_v17 = vsel %vm5867_vm0, %v8433_v26, %v23073_v37 }
 0x75e   : > { %v6192_v40 = vsel %vm5867_vm0, %v6191_v27, %v6187_v29  ;;  %v6389_v38 = vsel %vm6370_vm7, %v6169_v32, %v6388_v5  ;;  %v8424_v27 = vrot.slane %v18634_v12, %v18062_v31  ;;  %v23079_v32 = vld [vmem:[#allocation105_spill] sm:$0xff]  ;;  %v23081_v5 = vld [vmem:[#allocation23_spill] sm:$0xff] }
 0x75f   : > { %v8009_v14 = vpop.permute.xlu1 %8008  ;;  %v6206_v47 = vsel %vm5867_vm0, %v6205_v45, %v6201_v22  ;;  %v8406_v22 = vsel %vm5867_vm0, %v8405_v57, %v23072_v46  ;;  %v6197_v11 = vsel %vm5874_vm1, %v6196_v2, %v6192_v40  ;;  %v6390_v19 = vsel %vm6372_vm8, %v6183_v48, %v6389_v38 }
 0x760   : > { %v5761_v54 = vpop.permute.xlu0 %5760  ;;  %8765 = vperm.xlu1 %13549, %v18626_v18   ;;  %v8397_v18 = vsel %vm5874_vm1, %v8396_v7, %v8392_v44  ;;  %v6211_v25 = vsel %vm5874_vm1, %v6210_v6, %v6206_v47  ;;  %v8443_v45 = vrot.slane %v18707_v30, %v18059_v53  ;;  %v6391_v6 = vsel %vm6374_vm9, %v6197_v11, %v6390_v19  ;;  %v6430_v11 = vld [vmem:[#allocation2 + $0x14] sm:$0x1] }
 0x761   : > { %6999 = vperm.xlu0 %13551, %v18644_v55   ;;  %v6215_v33 = vrot.slane %v5761_v54, %v18059_v53  ;;  %v8636_v12 = vsel %vm6366_vm5, %v8397_v18, %v8383_v36  ;;  %v8452_v62 = vrot.slane %v8009_v14, %v18062_v31  ;;  %v8411_v50 = vsel %vm5874_vm1, %v23074_v1, %v8406_v22 }
 0x762   : > { %v23075_v30 = vrot.slane %v23057_v21, %v18053_v24  ;;  %v6392_v7 = vsel %vm6376_vm10, %v6211_v25, %v6391_v6  ;;  %v23077_v21 = vrot.slane %v23065_v3, %v18059_v53  ;;  %v23078_v36 = vrot.slane %v23064_v15, %v18053_v24 }
 0x763   : > { %v8015_v56 = vpop.permute.xlu1 %8014  ;;  %v6238_v47 = vrot.slane %v23079_v32, %v18062_v31  ;;  %v8637_v3 = vsel %vm6368_vm6, %v8411_v50, %v8636_v12  ;;  %v8475_v48 = vrot.slane %v23081_v5, %v18053_v24  ;;  %v23082_v18 = vrot.slane %v23068_v52, %v18062_v31  ;;  %v23090_v5 = vld [vmem:[#allocation22_spill] sm:$0xff] }
 0x764   : > { %v5767_v39 = vpop.permute.xlu0 %5766  ;;  %v8461_v63 = vrot.slane %v8015_v56, %v18053_v24  ;;  %8771 = vperm.xlu1 %13549, %v18636_v20   ;;  %v6220_v20 = vsel %vm5867_vm0, %v6219_v9, %v6215_v33  ;;  %v8420_v29 = vsel %vm5867_vm0, %v23075_v30, %v8415_v49  ;;  %v23076_v9 = vrot.slane %v23061_v28, %v18062_v31  ;;  %v8676_v30 = vld [vmem:[#allocation2 + $0x34] sm:$0x1] }
 0x765   : > { %v6224_v0 = vrot.slane %v5767_v39, %v18062_v31  ;;  %7005 = vperm.xlu0 %13551, %v18638_v10   ;;  %v8425_v2 = vsel %vm5874_vm1, %v8424_v27, %v8420_v29  ;;  %v8448_v35 = vsel %vm5867_vm0, %v23078_v36, %v8443_v45  ;;  %v23083_v19 = vpack.c.bf16 %v23045_v41, %v23045_v41  ;;  %v23085_v41 = vld [vmem:[#allocation99_spill] sm:$0xff] }
 0x766   : > { %v8439_v14 = vsel %vm5874_vm1, %v23076_v9, %v8434_v17  ;;  %v8462_v8 = vsel %vm5867_vm0, %v8461_v63, %v23077_v21  ;;  %v8453_v26 = vsel %vm5874_vm1, %v8452_v62, %v8448_v35  ;;  %v8638_v40 = vsel %vm6370_vm7, %v8425_v2, %v8637_v3  ;;  %v23089_v3 = vld [vmem:[#allocation82_spill] sm:$0xff] }
 0x767   : > { %v6225_v13 = vsel %vm5874_vm1, %v6224_v0, %v6220_v20  ;;  %v8021_v57 = vpop.permute.xlu1 %8020  ;;  %v8467_v46 = vsel %vm5874_vm1, %v23082_v18, %v8462_v8  ;;  %v8639_v49 = vsel %vm6372_vm8, %v8439_v14, %v8638_v40  ;;  %v6836_v37 = vunpack.c.l.b16 %v23083_v19  ;;  %v23084_v0 = vld [vmem:[#allocation41_spill] sm:$0xff]  ;;  %v23088_v8 = vld [vmem:[#allocation250_spill] sm:$0xff]  ;;  %v23091_v40 = vld [vmem:[#allocation259_spill] sm:$0xff] }
 0x768   : > { %v6393_v42 = vsel %vm6378_vm11, %v6225_v13, %v6392_v7  ;;  %v5773_v60 = vpop.permute.xlu0 %5772  ;;  %8777 = vperm.xlu1 %13549, %v18644_v55   ;;  %v8471_v44 = vrot.slane %v8021_v57, %v18059_v53  ;;  %v23080_v55 = vpack.c.bf16 %v23048_v23, %v23048_v23  ;;  %v8640_v27 = vsel %vm6374_vm9, %v8453_v26, %v8639_v49  ;;  %v23086_v7 = vld [vmem:[#allocation119_spill] sm:$0xff] }
 0x769   : > { %v6405_v54 = vpack.c.b16 %v6393_v42, %v6393_v42  ;;  %v6233_v28 = vrot.slane %v5773_v60, %v18053_v24  ;;  %7011 = vperm.xlu0 %13551, %v18646_v59   ;;  %v8641_v39 = vsel %vm6376_vm10, %v8467_v46, %v8640_v27  ;;  %v8485_v12 = vrot.slane %v23084_v0, %v18059_v53  ;;  %v23087_v42 = vld [vmem:[#allocation40_spill] sm:$0xff]  ;;  %v23092_v46 = vld [vmem:[#allocation59_spill] sm:$0xff] }
 0x76a   : > { %v6834_v15 = vunpack.c.l.b16 %v23080_v55  ;;  %v8476_v52 = vsel %vm5867_vm0, %v8475_v48, %v8471_v44  ;;  %v8494_v1 = vrot.slane %v23085_v41, %v18062_v31  ;;  %v13246_v13 = vpack.c.bf16 %v23086_v7, %v23086_v7 }
 0x76b   : > { %6429 = vst.msk [vmem:[#allocation2 + $0x10] sm:$0xf] %vm6417_vm12, %v6405_v54  ;;  %v6234_v33 = vsel %vm5867_vm0, %v6233_v28, %v6229_v51  ;;  %v8027_v22 = vpop.permute.xlu1 %8026  ;;  %v13248_v60 = vpack.c.bf16 %v23087_v42, %v23087_v42  ;;  %v3453_v36 = vcombine.high %v23088_v8, %v22438_v43  ;;  %v13252_v26 = vpack.c.bf16 %v23089_v3, %v23089_v3  ;;  %v23101_v42 = vld [vmem:[#allocation107_spill] sm:$0xff] }
 0x76c   : > { %v6239_v23 = vsel %vm5874_vm1, %v6238_v47, %v6234_v33  ;;  %v18823_v56 = vpop.permute.xlu0 %5778  ;;  %v8480_v38 = vrot.slane %v8027_v22, %v18062_v31  ;;  %8783 = vperm.xlu1 %13549, %v18638_v10   ;;  %v13244_v10 = vpack.c.bf16 %v18632_v61, %v18632_v61  ;;  %v6840_v14 = vunpack.c.l.b16 %v13246_v13  ;;  %v23102_v8 = vld [vmem:[#allocation135_spill] sm:$0xff] }
 0x76d   : > { %v6406_v51 = vpack.c.b16 %v6239_v23, %v6239_v23  ;;  %7017 = vperm.xlu0 %13551, %v6834_v15   ;;  %v6842_v54 = vunpack.c.l.b16 %v13248_v60  ;;  %v13250_v28 = vpack.c.bf16 %v3453_v36, %v3453_v36  ;;  %v3563_v48 = vcombine.high %v23090_v5, %v22438_v43  ;;  %v23093_v23 = vld [vmem:[#allocation44_spill] sm:$0xff]  ;;  %v23104_v3 = vld [vmem:[#allocation147_spill] sm:$0xff] }
 0x76e   : > { %v8481_v25 = vsel %vm5874_vm1, %v8480_v38, %v8476_v52  ;;  %v6838_v50 = vunpack.c.l.b16 %v13244_v10  ;;  %v3882_v33 = vcombine.high %v23091_v40, %v22438_v43  ;;  %v6846_v18 = vunpack.c.l.b16 %v13252_v26  ;;  %v23105_v5 = vld [vmem:[#allocation144_spill] sm:$0xff]  ;;  %v23106_v40 = vld [vmem:[#allocation47_spill] sm:$0xff] }
 0x76f   : > { %v6431_v63 = vsel %vm18284_vm15, %v6406_v51, %v6430_v11  ;;  %v8642_v17 = vsel %vm6378_vm11, %v8481_v25, %v8641_v39  ;;  %v8033_v45 = vpop.permute.xlu1 %8032  ;;  %v6844_v47 = vunpack.c.l.b16 %v13250_v28  ;;  %v13254_v22 = vpack.c.bf16 %v23092_v46, %v23092_v46  ;;  %v23094_v51 = vld [vmem:[#allocation131_spill] sm:$0xff]  ;;  %v23095_v25 = vld [vmem:[#allocation46_spill] sm:$0xff]  ;;  %v23107_v46 = vld [vmem:[#allocation108_spill] sm:$0xff] }
 0x770   : > { %6432 = vst [vmem:[#allocation2 + $0x14] sm:$0x1] %v6431_v63  ;;  %v18841_v6 = vpop.permute.xlu0 %5784  ;;  %v8654_v20 = vpack.c.b16 %v8642_v17, %v8642_v17  ;;  %v8489_v62 = vrot.slane %v8033_v45, %v18053_v24  ;;  %8789 = vperm.xlu1 %13549, %v18646_v59   ;;  %v13260_v38 = vpack.c.bf16 %v23093_v23, %v23093_v23  ;;  %v23096_v63 = vld [vmem:[#allocation265_spill] sm:$0xff] }
 0x771   : > { %7023 = vperm.xlu0 %13551, %v6836_v37   ;;  %v13256_v27 = vpack.c.bf16 %v3563_v48, %v3563_v48  ;;  %v13258_v52 = vpack.c.bf16 %v23094_v51, %v23094_v51  ;;  %v13266_v39 = vpack.c.bf16 %v23095_v25, %v23095_v25  ;;  %v18894_v19 = vcombine.high %v23096_v63, %v22438_v43  ;;  %v23097_v17 = vld [vmem:[#allocation133_spill] sm:$0xff]  ;;  %v23109_v51 = vld [vmem:[#allocation184_spill] sm:$0xff]  ;;  %v23110_v25 = vld [vmem:[#allocation134_spill] sm:$0xff] }
 0x772   : > { %8675 = vst.msk [vmem:[#allocation2 + $0x30] sm:$0xf] %vm6417_vm12, %v8654_v20  ;;  %v8490_v61 = vsel %vm5867_vm0, %v8489_v62, %v8485_v12  ;;  %v13264_v10 = vpack.c.bf16 %v23097_v17, %v23097_v17  ;;  %v6848_v45 = vunpack.c.l.b16 %v13254_v22  ;;  %v18902_v20 = vunpack.c.l.b16 %v13260_v38  ;;  %v23108_v38 = vld [vmem:[#allocation183_spill] sm:$0xff]  ;;  %v23119_v17 = vld [vmem:[#allocation166_spill] sm:$0xff] }
 0x773   : > { %v8495_v29 = vsel %vm5874_vm1, %v8494_v1, %v8490_v61  ;;  %v18852_v57 = vpop.permute.xlu1 %8038  ;;  %v6850_v62 = vunpack.c.l.b16 %v13256_v27  ;;  %v18904_v41 = vunpack.c.l.b16 %v13258_v52  ;;  %v18906_v1 = vunpack.c.l.b16 %v13266_v39 }
 0x774   : > { %v18854_v2 = vpop.permute.xlu0 %5790  ;;  %v8655_v59 = vpack.c.b16 %v8495_v29, %v8495_v29  ;;  %8795 = vperm.xlu1 %13549, %v6834_v15   ;;  %v23099_v29 = vld [vmem:[#allocation106_spill] sm:$0xff]  ;;  %v8522_v60 = vrot.slane %v23101_v42, %v18062_v31  ;;  %v6257_v36 = vrot.slane %v23102_v8, %v18059_v53  ;;  %v6285_v22 = vrot.slane %v23107_v46, %v18059_v53  ;;  %v23114_v42 = vld [vmem:[#allocation187_spill] sm:$0xff] }
 0x775   : > { %7029 = vperm.xlu0 %13551, %v6838_v50   ;;  %v6247_v7 = vrot.slane %v23099_v29, %v18053_v24  ;;  %v6294_v39 = vrot.slane %v23110_v25, %v18062_v31  ;;  %v6261_v63 = vrot.slane %v18854_v2, %v18053_v24  ;;  %v8499_v2 = vrot.slane %v18852_v57, %v18059_v53  ;;  %v23115_v25 = vld [vmem:[#allocation188_spill] sm:$0xff]  ;;  %v23117_v57 = vld [vmem:[#allocation110_spill] sm:$0xff] }
 0x776   : > { %v8677_v9 = vsel %vm18284_vm15, %v8655_v59, %v8676_v30  ;;  %v18916_v59 = vunpack.c.l.b16 %v13264_v10  ;;  %v23112_v10 = vld [vmem:[#allocation109_spill] sm:$0xff]  ;;  %v6331_v52 = vrot.slane %v23117_v57, %v18053_v24 }
 0x777   : > { %8678 = vst [vmem:[#allocation2 + $0x34] sm:$0x1] %v8677_v9  ;;  %v18860_v21 = vpop.permute.xlu1 %8044  ;;  %v23100_v9 = vld [vmem:[#allocation36_spill] sm:$0xff] }
 0x778   : > { %v18864_v35 = vpop.permute.xlu0 %5796  ;;  %8801 = vperm.xlu1 %13549, %v6836_v37   ;;  %v13262_v37 = vpack.c.bf16 %v3882_v33, %v3882_v33  ;;  %v6275_v33 = vrot.slane %v23106_v40, %v18053_v24 }
 0x779   : > { %7035 = vperm.xlu0 %13551, %v6840_v14   ;;  %v6271_v61 = vrot.slane %v18864_v35, %v18059_v53 }
 0x77a   : > { %v18914_v13 = vunpack.c.l.b16 %v13262_v37  ;;  %v23111_v37 = vld [vmem:[#allocation185_spill] sm:$0xff] }
 0x77b   : > { %v18866_v44 = vpop.permute.xlu1 %8050  ;;  %v6276_v26 = vsel %vm5867_vm0, %v6275_v33, %v6271_v61 }
 0x77c   : > { %v18868_v32 = vpop.permute.xlu0 %5802  ;;  %8807 = vperm.xlu1 %13549, %v6838_v50   ;;  %v23098_v50 = vld [vmem:[#allocation164_spill] sm:$0xff] }
 0x77d   : > { %7041 = vperm.xlu0 %13551, %v6842_v54   ;;  %v8503_v30 = vrot.slane %v23098_v50, %v18053_v24  ;;  %v6303_v50 = vrot.slane %v23112_v10, %v18053_v24  ;;  %v6280_v27 = vrot.slane %v18868_v32, %v18062_v31 }
 0x77f   : > { %v18872_v55 = vpop.permute.xlu1 %8056 }
 0x780   : > { %v18874_v15 = vpop.permute.xlu0 %5808  ;;  %8813 = vperm.xlu1 %13549, %v6840_v14   ;;  %v8513_v14 = vrot.slane %v23100_v9, %v18059_v53  ;;  %v6243_v9 = vrot.slane %v18823_v56, %v18059_v53 }
 0x781   : > { %7047 = vperm.xlu0 %13551, %v6844_v47   ;;  %v6289_v40 = vrot.slane %v18874_v15, %v18053_v24  ;;  %v6262_v15 = vsel %vm5867_vm0, %v6261_v63, %v6257_v36  ;;  %v8504_v63 = vsel %vm5867_vm0, %v8503_v30, %v8499_v2  ;;  %v8508_v30 = vrot.slane %v18860_v21, %v18062_v31 }
 0x783   : > { %v18882_v49 = vpop.permute.xlu1 %8062  ;;  %v6290_v32 = vsel %vm5867_vm0, %v6289_v40, %v6285_v22  ;;  %v23120_v40 = vrot.slane %v23104_v3, %v18053_v24 }
 0x784   : > { %v18884_v11 = vpop.permute.xlu0 %5814  ;;  %8819 = vperm.xlu1 %13549, %v6842_v54   ;;  %v23103_v54 = vld [vmem:[#allocation83_spill] sm:$0xff] }
 0x785   : > { %7053 = vperm.xlu0 %13551, %v6846_v18   ;;  %v6266_v28 = vrot.slane %v23103_v54, %v18062_v31  ;;  %v6252_v54 = vrot.slane %v18841_v6, %v18062_v31  ;;  %v8517_v6 = vrot.slane %v18866_v44, %v18053_v24  ;;  %v6350_v44 = vrot.slane %v23119_v17, %v18062_v31 }
 0x786   : > { %v6299_v57 = vrot.slane %v18884_v11, %v18059_v53  ;;  %v6281_v11 = vsel %vm5874_vm1, %v6280_v27, %v6276_v26  ;;  %v8536_v27 = vrot.slane %v18882_v49, %v18062_v31 }
 0x787   : > { %v18898_v0 = vpop.permute.xlu1 %8068  ;;  %v8518_v17 = vsel %vm5867_vm0, %v8517_v6, %v8513_v14  ;;  %v8527_v14 = vrot.slane %v18872_v55, %v18059_v53 }
 0x788   : > { %v18900_v12 = vpop.permute.xlu0 %5820  ;;  %8825 = vperm.xlu1 %13549, %v6844_v47   ;;  %v6304_v61 = vsel %vm5867_vm0, %v6303_v50, %v6299_v57  ;;  %v8523_v21 = vsel %vm5874_vm1, %v8522_v60, %v8518_v17 }
 0x789   : > { %7059 = vperm.xlu0 %13551, %v6848_v45  }
 0x78b   : > { %v18926_v47 = vpop.permute.xlu1 %8074 }
 0x78c   : > { %v5827_v23 = vpop.permute.xlu0 %5826  ;;  %8831 = vperm.xlu1 %13549, %v6846_v18   ;;  %v23113_v18 = vld [vmem:[#allocation186_spill] sm:$0xff]  ;;  %v8555_v60 = vrot.slane %v18926_v47, %v18059_v53 }
 0x78d   : > { %7065 = vperm.xlu0 %13551, %v6850_v62   ;;  %v6313_v29 = vrot.slane %v23113_v18, %v18059_v53  ;;  %v23116_v18 = vld [vmem:[#allocation176_spill] sm:$0xff]  ;;  %v6317_v10 = vrot.slane %v5827_v23, %v18053_v24  ;;  %v6308_v23 = vrot.slane %v18900_v12, %v18062_v31 }
 0x78e   : > { %v6322_v56 = vrot.slane %v23116_v18, %v18062_v31  ;;  %v23118_v18 = vld [vmem:[#allocation190_spill] sm:$0xff] }
 0x78f   : > { %v18960_v46 = vpop.permute.xlu1 %8080  ;;  %v6341_v35 = vrot.slane %v23118_v18, %v18059_v53  ;;  %v6267_v18 = vsel %vm5874_vm1, %v6266_v28, %v6262_v15  ;;  %v6318_v22 = vsel %vm5867_vm0, %v6317_v10, %v6313_v29  ;;  %v6295_v28 = vsel %vm5874_vm1, %v6294_v39, %v6290_v32 }
 0x790   : > { %v5833_v8 = vpop.permute.xlu0 %5832  ;;  %8837 = vperm.xlu1 %13549, %v6848_v45   ;;  %v6248_v45 = vsel %vm5867_vm0, %v6247_v7, %v6243_v9  ;;  %v6309_v33 = vsel %vm5874_vm1, %v6308_v23, %v6304_v61  ;;  %v6323_v50 = vsel %vm5874_vm1, %v6322_v56, %v6318_v22  ;;  %v8564_v47 = vrot.slane %v18960_v46, %v18062_v31 }
 0x791   : > { %7071 = vperm.xlu0 %13551, %v18904_v41   ;;  %v6253_v36 = vsel %vm5874_vm1, %v6252_v54, %v6248_v45  ;;  %v6327_v7 = vrot.slane %v5833_v8, %v18059_v53 }
 0x792   : > { %v6394_v26 = vsel %vm6366_vm5, %v6267_v18, %v6253_v36  ;;  %v8509_v18 = vsel %vm5874_vm1, %v8508_v30, %v8504_v63 }
 0x793   : > { %v8087_v48 = vpop.permute.xlu1 %8086  ;;  %v6395_v39 = vsel %vm6368_vm6, %v6281_v11, %v6394_v26  ;;  %v6332_v8 = vsel %vm5867_vm0, %v6331_v52, %v6327_v7  ;;  %v8532_v52 = vsel %vm5867_vm0, %v23120_v40, %v8527_v14  ;;  %v23131_v40 = vpack.c.bf16 %v18894_v19, %v18894_v19  ;;  %v23132_v19 = vld [vmem:[#allocation192_spill] sm:$0xff] }
 0x794   : > { %v5839_v9 = vpop.permute.xlu0 %5838  ;;  %8843 = vperm.xlu1 %13549, %v6850_v62   ;;  %v8545_v62 = vrot.slane %v18898_v0, %v18053_v24  ;;  %v8573_v54 = vrot.slane %v8087_v48, %v18053_v24  ;;  %v6396_v0 = vsel %vm6370_vm7, %v6295_v28, %v6395_v39  ;;  %v8537_v56 = vsel %vm5874_vm1, %v8536_v27, %v8532_v52 }
 0x795   : > { %v6336_v12 = vrot.slane %v5839_v9, %v18062_v31  ;;  %7077 = vperm.xlu0 %13551, %v18902_v20   ;;  %v6397_v48 = vsel %vm6372_vm8, %v6309_v33, %v6396_v0  ;;  %v8643_v9 = vsel %vm6366_vm5, %v8523_v21, %v8509_v18  ;;  %v23127_v28 = vrot.slane %v23115_v25, %v18053_v24  ;;  %v23130_v0 = vld [vmem:[#allocation54_spill] sm:$0xff]  ;;  %v9572_v18 = vld [vmem:[#allocation2] sm:$0xf] }
 0x796   : > { %v6398_v6 = vsel %vm6374_vm9, %v6323_v50, %v6397_v48  ;;  %v8644_v22 = vsel %vm6368_vm6, %v8537_v56, %v8643_v9  ;;  %v6862_v52 = vunpack.c.l.b16 %v23131_v40 }
 0x797   : > { %v8093_v29 = vpop.permute.xlu1 %8092  ;;  %v6337_v2 = vsel %vm5874_vm1, %v6336_v12, %v6332_v8 }
 0x798   : > { %v5845_v55 = vpop.permute.xlu0 %5844  ;;  %8849 = vperm.xlu1 %13549, %v18904_v41   ;;  %v23121_v41 = vrot.slane %v23105_v5, %v18059_v53  ;;  %v8583_v3 = vrot.slane %v8093_v29, %v18059_v53  ;;  %v6399_v57 = vsel %vm6376_vm10, %v6337_v2, %v6398_v6  ;;  %v23122_v5 = vrot.slane %v23111_v37, %v18059_v53  ;;  %v23129_v29 = vld [vmem:[#allocation191_spill] sm:$0xff]  ;;  %v6434_v2 = vld [vmem:[#allocation2 + $0x1c] sm:$0x1] }
 0x799   : > { %v6345_v49 = vrot.slane %v5845_v55, %v18053_v24  ;;  %7083 = vperm.xlu0 %13551, %v18914_v13   ;;  %v8606_v25 = vrot.slane %v23129_v29, %v18062_v31 }
 0x79a   : > { %v8546_v10 = vsel %vm5867_vm0, %v8545_v62, %v23121_v41  ;;  %v8574_v32 = vsel %vm5867_vm0, %v8573_v54, %v23122_v5  ;;  %v8588_v61 = vsel %vm5867_vm0, %v23127_v28, %v8583_v3  ;;  %v23128_v62 = vld [vmem:[#allocation34_spill] sm:$0xff]  ;;  %v9573_v3 = vld [vmem:[#allocation2 + $0x8] sm:$0xf] }
 0x79b   : > { %v6346_v15 = vsel %vm5867_vm0, %v6345_v49, %v6341_v35  ;;  %v8099_v45 = vpop.permute.xlu1 %8098  ;;  %v23123_v35 = vrot.slane %v23108_v38, %v18062_v31  ;;  %v23125_v38 = vld [vmem:[#allocation189_spill] sm:$0xff]  ;;  %v6359_v26 = vrot.slane %v23128_v62, %v18053_v24  ;;  %v23133_v5 = vld [vmem:[#allocation68_spill] sm:$0xff]  ;;  %v23164_v62 = vld [vmem:[#allocation98_spill] sm:$0xff] }
 0x79c   : > { %v6351_v36 = vsel %vm5874_vm1, %v6350_v44, %v6346_v15  ;;  %v5851_v23 = vpop.permute.xlu0 %5850  ;;  %v8592_v46 = vrot.slane %v8099_v45, %v18062_v31  ;;  %8855 = vperm.xlu1 %13549, %v18902_v20   ;;  %v23124_v44 = vrot.slane %v23109_v51, %v18053_v24  ;;  %v8597_v30 = vrot.slane %v23125_v38, %v18059_v53 }
 0x79d   : > { %v8551_v17 = vsel %vm5874_vm1, %v23123_v35, %v8546_v10  ;;  %v6400_v37 = vsel %vm6378_vm11, %v6351_v36, %v6399_v57  ;;  %7089 = vperm.xlu0 %13551, %v18916_v59   ;;  %v6355_v63 = vrot.slane %v5851_v23, %v18059_v53  ;;  %v23126_v51 = vrot.slane %v23114_v42, %v18062_v31 }
 0x79e   : > { %v8560_v7 = vsel %vm5867_vm0, %v23124_v44, %v8555_v60  ;;  %v6407_v11 = vpack.c.b16 %v6400_v37, %v6400_v37  ;;  %v8645_v21 = vsel %vm6370_vm7, %v8551_v17, %v8644_v22  ;;  %v8593_v27 = vsel %vm5874_vm1, %v8592_v46, %v8588_v61 }
 0x79f   : > { %v8565_v20 = vsel %vm5874_vm1, %v8564_v47, %v8560_v7  ;;  %v8579_v12 = vsel %vm5874_vm1, %v23126_v51, %v8574_v32  ;;  %v8105_v14 = vpop.permute.xlu1 %8104  ;;  %v6360_v8 = vsel %vm5867_vm0, %v6359_v26, %v6355_v63  ;;  %v13270_v60 = vpack.c.bf16 %v23130_v0, %v23130_v0  ;;  %v9574_v7 = vld [vmem:[#allocation2 + $0x10] sm:$0xf] }
 0x7a0   : > { %6433 = vst.msk [vmem:[#allocation2 + $0x18] sm:$0xf] %vm6417_vm12, %v6407_v11  ;;  %v5857_v33 = vpop.permute.xlu0 %5856  ;;  %v8601_v42 = vrot.slane %v8105_v14, %v18053_v24  ;;  %8861 = vperm.xlu1 %13549, %v18914_v13   ;;  %v8646_v39 = vsel %vm6372_vm8, %v8565_v20, %v8645_v21  ;;  %v8615_v57 = vrot.slane %v23132_v19, %v18053_v24  ;;  %v8680_v11 = vld [vmem:[#allocation2 + $0x3c] sm:$0x1]  ;;  %v23138_v21 = vld [vmem:[#allocation157_spill] sm:$0xff] }
 0x7a1   : > { %v6364_v50 = vrot.slane %v5857_v33, %v18062_v31  ;;  %7095 = vperm.xlu0 %13551, %v18906_v1   ;;  %v8647_v55 = vsel %vm6374_vm9, %v8579_v12, %v8646_v39  ;;  %v6864_v36 = vunpack.c.l.b16 %v13270_v60  ;;  %v13272_v32 = vpack.c.bf16 %v23133_v5, %v23133_v5  ;;  %v23135_v12 = vld [vmem:[#allocation14_spill] sm:$0xff]  ;;  %v23139_v39 = vld [vmem:[#allocation55_spill] sm:$0xff]  ;;  %v23144_v5 = vld [vmem:[#allocation145_spill] sm:$0xff] }
 0x7a2   : > { %v8602_v54 = vsel %vm5867_vm0, %v8601_v42, %v8597_v30  ;;  %v8648_v49 = vsel %vm6376_vm10, %v8593_v27, %v8647_v55  ;;  %v9578_v37 = vpack.i.b16 %v9573_v3, %v9572_v18  ;;  %v13276_v33 = vpack.c.bf16 %v23138_v21, %v23138_v21  ;;  %v23140_v55 = vld [vmem:[#allocation13_spill] sm:$0xff] }
 0x7a3   : > { %v6365_v13 = vsel %vm5874_vm1, %v6364_v50, %v6360_v8  ;;  %v8607_v48 = vsel %vm5874_vm1, %v8606_v25, %v8602_v54  ;;  %v8111_v41 = vpop.permute.xlu1 %8110  ;;  %v6866_v38 = vunpack.c.l.b16 %v13272_v32  ;;  %v13278_v50 = vpack.c.bf16 %v23139_v39, %v23139_v39  ;;  %v23150_v39 = vld [vmem:[#allocation195_spill] sm:$0xff] }
 0x7a4   : > { %v6408_v10 = vpack.c.b16 %v6365_v13, %v6365_v13  ;;  %v19092_v47 = vpop.permute.xlu0 %6909  ;;  %v8649_v56 = vsel %vm6378_vm11, %v8607_v48, %v8648_v49  ;;  %8867 = vperm.xlu1 %13549, %v18916_v59   ;;  %v8611_v15 = vrot.slane %v8111_v41, %v18059_v53  ;;  %v23134_v59 = vld [vmem:[#allocation269_spill] sm:$0xff]  ;;  %v6870_v25 = vunpack.c.l.b16 %v13276_v33  ;;  %v23141_v41 = vld [vmem:[#allocation51_spill] sm:$0xff] }
 0x7a5   : > { %7101 = vperm.xlu0 %13551, %v6862_v52   ;;  %v8656_v6 = vpack.c.b16 %v8649_v56, %v8649_v56  ;;  %v4203_v46 = vcombine.high %v23134_v59, %v22438_v43  ;;  %v4205_v54 = vcombine.high %v23140_v55, %v22438_v43  ;;  %v9580_v60 = vshrl.u32 %v9573_v3, 16  ;;  %v23143_v3 = vld [vmem:[#allocation26_spill] sm:$0xff]  ;;  %v23145_v59 = vld [vmem:[#allocation32_spill] sm:$0xff] }
 0x7a6   : > { %v6435_v45 = vsel %vm18284_vm15, %v6408_v10, %v6434_v2  ;;  %v8616_v9 = vsel %vm5867_vm0, %v8615_v57, %v8611_v15  ;;  %v9585_v2 = vshrl.u32 %v9574_v7, 16  ;;  %v9579_v13 = vshrl.u32 %v9572_v18, 16  ;;  %v23151_v55 = vld [vmem:[#allocation196_spill] sm:$0xff] }
 0x7a7   : > { %6436 = vst [vmem:[#allocation2 + $0x1c] sm:$0x1] %v6435_v45  ;;  %8679 = vst.msk [vmem:[#allocation2 + $0x38] sm:$0xf] %vm6417_vm12, %v8656_v6  ;;  %v8117_v23 = vpop.permute.xlu1 %8116  ;;  %v9575_v35 = vld [vmem:[#allocation2 + $0x18] sm:$0xf]  ;;  %v13274_v22 = vpack.c.bf16 %v4203_v46, %v4203_v46  ;;  %v6872_v40 = vunpack.c.l.b16 %v13278_v50  ;;  %v4632_v10 = vcombine.high %v23141_v41, %v22438_v43  ;;  %v13284_v19 = vpack.c.bf16 %v23143_v3, %v23143_v3 }
 0x7a8   : > { %v19106_v17 = vpop.permute.xlu0 %6915  ;;  %v8620_v44 = vrot.slane %v8117_v23, %v18062_v31  ;;  %8873 = vperm.xlu1 %13549, %v18906_v1   ;;  %v9584_v20 = vpack.i.b16 %v9575_v35, %v9574_v7  ;;  %v19120_v1 = vrot.slane %v9578_v37, %v23135_v12  ;;  %v9586_v29 = vshrl.u32 %v9575_v35, 16  ;;  %v23142_v6 = vld [vmem:[#allocation270_spill] sm:$0xff]  ;;  %v23155_v41 = vld [vmem:[#allocation199_spill] sm:$0xff] }
 0x7a9   : > { %7107 = vperm.xlu0 %13551, %v6864_v36   ;;  %v6868_v26 = vunpack.c.l.b16 %v13274_v22  ;;  %v4634_v15 = vcombine.high %v23142_v6, %v22438_v43  ;;  %v9581_v45 = vpack.i.b16 %v9580_v60, %v9579_v13  ;;  %v13282_v32 = vpack.c.bf16 %v23144_v5, %v23144_v5  ;;  %v23152_v60 = vld [vmem:[#allocation194_spill] sm:$0xff]  ;;  %v23153_v13 = vld [vmem:[#allocation43_spill] sm:$0xff]  ;;  %v23170_v5 = vld [vmem:[#allocation125_spill] sm:$0xff] }
 0x7aa   : > { %v8621_v63 = vsel %vm5874_vm1, %v8620_v44, %v8616_v9  ;;  %v19115_v28 = vrot.slane %v9584_v20, %v23135_v12  ;;  %23137 = vst [vmem:[#allocation37_spill] sm:$0xff] %v19120_v1  ;;  %v9587_v49 = vpack.i.b16 %v9586_v29, %v9585_v2  ;;  %v13290_v46 = vpack.c.bf16 %v23145_v59, %v23145_v59  ;;  %v23156_v6 = vld [vmem:[#allocation123_spill] sm:$0xff] }
 0x7ab   : > { %v8657_v30 = vpack.c.b16 %v8621_v63, %v8621_v63  ;;  %v19112_v51 = vpop.permute.xlu1 %8687  ;;  %v13286_v35 = vpack.c.bf16 %v4632_v10, %v4632_v10  ;;  %v13292_v44 = vpack.c.bf16 %v4634_v15, %v4634_v15  ;;  %v19162_v7 = vrot.slane %v9581_v45, %v23135_v12  ;;  %v23157_v45 = vld [vmem:[#allocation198_spill] sm:$0xff] }
 0x7ac   : > { %23136 = vst [vmem:[#allocation52_spill] sm:$0xff] %v19115_v28  ;;  %v19117_v61 = vpop.permute.xlu0 %6921  ;;  %8879 = vperm.xlu1 %13549, %v6862_v52   ;;  %v13280_v52 = vpack.c.bf16 %v4205_v54, %v4205_v54  ;;  %v19151_v57 = vrot.slane %v9587_v49, %v23135_v12  ;;  %v6878_v37 = vunpack.c.l.b16 %v13284_v19  ;;  %v19168_v20 = vcombine.high %v18076_v34, %v22438_v43  ;;  %v23149_v34 = vld [vmem:[#allocation165_spill] sm:$0xff]  ;;  %v23158_v19 = vld [vmem:[#allocation200_spill] sm:$0xff] }
 0x7ad   : > { %7113 = vperm.xlu0 %13551, %v6866_v38   ;;  %v8681_v14 = vsel %vm18284_vm15, %v8657_v30, %v8680_v11  ;;  %23146 = vst [vmem:[#allocation92_spill] sm:$0xff] %v19162_v7  ;;  %v19170_v11 = vunpack.c.l.b16 %v13282_v32  ;;  %v23147_v30 = vld [vmem:[#allocation39_spill] sm:$0xff]  ;;  %v19182_v33 = vunpack.c.l.b16 %v13286_v35  ;;  %v19184_v29 = vunpack.c.l.b16 %v13292_v44  ;;  %v23159_v32 = vld [vmem:[#allocation168_spill] sm:$0xff] }
 0x7ae   : > { %8682 = vst [vmem:[#allocation2 + $0x3c] sm:$0x1] %v8681_v14  ;;  %v23148_v14 = vld [vmem:[#allocation193_spill] sm:$0xff]  ;;  %v9019_v50 = vrot.slane %v23150_v39, %v18062_v31  ;;  %v9028_v54 = vrot.slane %v23151_v55, %v18053_v24  ;;  %v7232_v2 = vrot.slane %v23152_v60, %v18059_v53  ;;  %v7241_v49 = vrot.slane %v23153_v13, %v18062_v31  ;;  %v23161_v55 = vld [vmem:[#allocation124_spill] sm:$0xff] }
 0x7af   : > { %v19128_v27 = vpop.permute.xlu1 %8693  ;;  %v7250_v15 = vrot.slane %v23156_v6, %v18053_v24  ;;  %v7260_v3 = vrot.slane %v23157_v45, %v18059_v53  ;;  %v7269_v59 = vrot.slane %v23159_v32, %v18062_v31  ;;  %v7278_v60 = vrot.slane %v23161_v55, %v18053_v24  ;;  %v23168_v32 = vld [vmem:[#allocation57_spill] sm:$0xff] }
 0x7b0   : > { %v19130_v42 = vpop.permute.xlu0 %6927  ;;  %8885 = vperm.xlu1 %13549, %v6864_v36   ;;  %v6874_v36 = vunpack.c.l.b16 %v13280_v52  ;;  %v7246_v13 = vrot.slane %v19106_v17, %v18059_v53  ;;  %v9014_v6 = vrot.slane %v19112_v51, %v18053_v24  ;;  %v7297_v22 = vrot.slane %v23164_v62, %v18062_v31  ;;  %v23165_v17 = vld [vmem:[#allocation203_spill] sm:$0xff]  ;;  %v23166_v51 = vld [vmem:[#allocation206_spill] sm:$0xff] }
 0x7b1   : > { %7119 = vperm.xlu0 %13551, %v6868_v26   ;;  %v7264_v35 = vrot.slane %v19130_v42, %v18053_v24  ;;  %v23163_v42 = vld [vmem:[#allocation177_spill] sm:$0xff]  ;;  %v7255_v55 = vrot.slane %v19117_v61, %v18062_v31  ;;  %v7316_v39 = vrot.slane %v23168_v32, %v18059_v53  ;;  %v7325_v28 = vrot.slane %v23170_v5, %v18062_v31 }
 0x7b2   : > { %v7288_v9 = vrot.slane %v23163_v42, %v18059_v53  ;;  %v23169_v42 = vld [vmem:[#allocation180_spill] sm:$0xff] }
 0x7b3   : > { %v19134_v8 = vpop.permute.xlu1 %8699  ;;  %v7265_v61 = vsel %vm5867_vm0, %v7264_v35, %v7260_v3  ;;  %v9024_v3 = vrot.slane %v19128_v27, %v18059_v53 }
 0x7b4   : > { %v19138_v0 = vpop.permute.xlu0 %6933  ;;  %8891 = vperm.xlu1 %13549, %v6866_v38   ;;  %v19174_v38 = vunpack.c.l.b16 %v13290_v46  ;;  %v7236_v46 = vrot.slane %v19092_v47, %v18053_v24  ;;  %v23162_v47 = vld [vmem:[#allocation202_spill] sm:$0xff]  ;;  %v9033_v27 = vrot.slane %v19134_v8, %v18062_v31 }
 0x7b5   : > { %7125 = vperm.xlu0 %13551, %v6870_v25   ;;  %v7274_v32 = vrot.slane %v19138_v0, %v18059_v53  ;;  %v7270_v0 = vsel %vm5874_vm1, %v7269_v59, %v7265_v61  ;;  %v23173_v61 = vld [vmem:[#allocation207_spill] sm:$0xff] }
 0x7b6   : > { %v7237_v62 = vsel %vm5867_vm0, %v7236_v46, %v7232_v2 }
 0x7b7   : > { %v19140_v48 = vpop.permute.xlu1 %8705  ;;  %v7242_v5 = vsel %vm5874_vm1, %v7241_v49, %v7237_v62 }
 0x7b8   : > { %v19144_v56 = vpop.permute.xlu0 %6939  ;;  %8897 = vperm.xlu1 %13549, %v6868_v26   ;;  %v9010_v26 = vrot.slane %v23148_v14, %v18059_v53  ;;  %v23160_v14 = vld [vmem:[#allocation201_spill] sm:$0xff] }
 0x7b9   : > { %7131 = vperm.xlu0 %13551, %v6872_v40  }
 0x7ba   : > { %v9015_v7 = vsel %vm5867_vm0, %v9014_v6, %v9010_v26  ;;  %v23172_v6 = vld [vmem:[#allocation155_spill] sm:$0xff] }
 0x7bb   : > { %v19155_v23 = vpop.permute.xlu1 %8711  ;;  %v9020_v59 = vsel %vm5874_vm1, %v9019_v50, %v9015_v7 }
 0x7bc   : > { %v19159_v18 = vpop.permute.xlu0 %6945  ;;  %8903 = vperm.xlu1 %13549, %v6870_v25  }
 0x7bd   : > { %7137 = vperm.xlu0 %13551, %v6874_v36   ;;  %v7292_v1 = vrot.slane %v19159_v18, %v18053_v24  ;;  %v7283_v18 = vrot.slane %v19144_v56, %v18062_v31  ;;  %v9042_v56 = vrot.slane %v19140_v48, %v18053_v24 }
 0x7bf   : > { %v19172_v63 = vpop.permute.xlu1 %8717  ;;  %v7293_v35 = vsel %vm5867_vm0, %v7292_v1, %v7288_v9  ;;  %v9029_v1 = vsel %vm5867_vm0, %v9028_v54, %v9024_v3 }
 0x7c0   : > { %v19180_v21 = vpop.permute.xlu0 %6951  ;;  %8909 = vperm.xlu1 %13549, %v6872_v40   ;;  %v23154_v40 = vld [vmem:[#allocation197_spill] sm:$0xff]  ;;  %v7298_v7 = vsel %vm5874_vm1, %v7297_v22, %v7293_v35  ;;  %v9061_v22 = vrot.slane %v19172_v63, %v18062_v31 }
 0x7c1   : > { %7143 = vperm.xlu0 %13551, %v19170_v11   ;;  %v23175_v54 = vrot.slane %v23154_v40, %v18059_v53 }
 0x7c3   : > { %v19213_v44 = vpop.permute.xlu1 %8723 }
 0x7c4   : > { %v6958_v45 = vpop.permute.xlu0 %6957  ;;  %8915 = vperm.xlu1 %13549, %v6874_v36   ;;  %v23167_v36 = vld [vmem:[#allocation205_spill] sm:$0xff]  ;;  %v9070_v9 = vrot.slane %v19213_v44, %v18053_v24  ;;  %v9052_v44 = vrot.slane %v19155_v23, %v18059_v53  ;;  %v23176_v23 = vrot.slane %v23160_v14, %v18059_v53  ;;  %v23177_v14 = vrot.slane %v23155_v41, %v18062_v31 }
 0x7c5   : > { %7149 = vperm.xlu0 %13551, %v6878_v37   ;;  %v7306_v10 = vrot.slane %v23167_v36, %v18053_v24  ;;  %v7251_v36 = vsel %vm5867_vm0, %v7250_v15, %v7246_v13  ;;  %v23171_v15 = vld [vmem:[#allocation209_spill] sm:$0xff] }
 0x7c6   : > { %v7256_v2 = vsel %vm5874_vm1, %v7255_v55, %v7251_v36  ;;  %v7334_v26 = vrot.slane %v23171_v15, %v18053_v24  ;;  %v7344_v55 = vrot.slane %v23172_v6, %v18059_v53 }
 0x7c7   : > { %v19245_v25 = vpop.permute.xlu1 %8729  ;;  %v7733_v49 = vsel %vm6366_vm5, %v7256_v2, %v7242_v5  ;;  %v9071_v5 = vsel %vm5867_vm0, %v9070_v9, %v23176_v23  ;;  %v23182_v9 = vld [vmem:[#allocation126_spill] sm:$0xff]  ;;  %v23186_v23 = vpack.c.bf16 %v23147_v30, %v23147_v30 }
 0x7c8   : > { %v6964_v52 = vpop.permute.xlu0 %6963  ;;  %8927 = vperm.xlu1 %13549, %v6878_v37   ;;  %v7302_v37 = vrot.slane %v19180_v21, %v18059_v53  ;;  %v7279_v21 = vsel %vm5867_vm0, %v7278_v60, %v7274_v32  ;;  %v7734_v36 = vsel %vm6368_vm6, %v7270_v0, %v7733_v49  ;;  %v9034_v32 = vsel %vm5874_vm1, %v9033_v27, %v9029_v1 }
 0x7c9   : > { %v7320_v46 = vrot.slane %v6964_v52, %v18053_v24  ;;  %7155 = vperm.xlu0 %13551, %v19182_v33   ;;  %v7311_v52 = vrot.slane %v6958_v45, %v18062_v31  ;;  %v7284_v8 = vsel %vm5874_vm1, %v7283_v18, %v7279_v21  ;;  %v23174_v45 = vld [vmem:[#allocation204_spill] sm:$0xff]  ;;  %v9080_v0 = vrot.slane %v19245_v25, %v18059_v53 }
 0x7ca   : > { %v7307_v50 = vsel %vm5867_vm0, %v7306_v10, %v7302_v37  ;;  %v7735_v18 = vsel %vm6370_vm7, %v7284_v8, %v7734_v36  ;;  %v23178_v25 = vrot.slane %v23158_v19, %v18053_v24  ;;  %v23180_v19 = vrot.slane %v23166_v51, %v18059_v53 }
 0x7cb   : > { %v8736_v13 = vpop.permute.xlu1 %8735  ;;  %v7321_v48 = vsel %vm5867_vm0, %v7320_v46, %v7316_v39  ;;  %v9043_v39 = vsel %vm5867_vm0, %v9042_v56, %v23175_v54  ;;  %v7312_v2 = vsel %vm5874_vm1, %v7311_v52, %v7307_v50  ;;  %v7736_v40 = vsel %vm6372_vm8, %v7298_v7, %v7735_v18  ;;  %v23184_v7 = vld [vmem:[#allocation208_spill] sm:$0xff] }
 0x7cc   : > { %v6970_v62 = vpop.permute.xlu0 %6969  ;;  %8936 = vperm.xlu1 %13549, %v23173_v61   ;;  %v7326_v10 = vsel %vm5874_vm1, %v7325_v28, %v7321_v48  ;;  %v9511_v28 = vsel %vm6366_vm5, %v9034_v32, %v9020_v59  ;;  %v7737_v63 = vsel %vm6374_vm9, %v7312_v2, %v7736_v40  ;;  %v9089_v27 = vrot.slane %v8736_v13, %v18062_v31 }
 0x7cd   : > { %7161 = vperm.xlu0 %13551, %v23174_v45   ;;  %v7330_v60 = vrot.slane %v6970_v62, %v18059_v53  ;;  %v9048_v35 = vsel %vm5874_vm1, %v23177_v14, %v9043_v39  ;;  %v9057_v56 = vsel %vm5867_vm0, %v23178_v25, %v9052_v44  ;;  %v7738_v52 = vsel %vm6376_vm10, %v7326_v10, %v7737_v63 }
 0x7ce   : > { %v9062_v59 = vsel %vm5874_vm1, %v9061_v22, %v9057_v56  ;;  %v23181_v61 = vrot.slane %v23165_v17, %v18053_v24  ;;  %v7353_v45 = vrot.slane %v23182_v9, %v18062_v31  ;;  %v9512_v51 = vsel %vm6368_vm6, %v9048_v35, %v9511_v28  ;;  %v23187_v28 = vld [vmem:[#allocation210_spill] sm:$0xff]  ;;  %v23188_v35 = vld [vmem:[#allocation211_spill] sm:$0xff] }
 0x7cf   : > { %v8742_v3 = vpop.permute.xlu1 %8741  ;;  %v9112_v50 = vrot.slane %v23184_v7, %v18053_v24  ;;  %v23185_v54 = vrot.slane %v23169_v42, %v18062_v31  ;;  %v9122_v63 = vrot.slane %v23187_v28, %v18059_v53  ;;  %v9131_v30 = vrot.slane %v23188_v35, %v18062_v31  ;;  %v9557_v56 = vld [vmem:[#allocation2 + $0x64] sm:$0x1]  ;;  %v23200_v28 = vld [vmem:[#allocation94_spill] sm:$0xff] }
 0x7d0   : > { %v6976_v46 = vpop.permute.xlu0 %6975  ;;  %v9098_v15 = vrot.slane %v8742_v3, %v18053_v24  ;;  %8933 = vperm.xlu1 %13549, %v19182_v33   ;;  %v7335_v33 = vsel %vm5867_vm0, %v7334_v26, %v7330_v60  ;;  %v23179_v26 = vrot.slane %v23162_v47, %v18062_v31  ;;  %v9085_v1 = vsel %vm5867_vm0, %v23181_v61, %v9080_v0  ;;  %v7779_v3 = vld [vmem:[#allocation2 + $0x44] sm:$0x1] }
 0x7d1   : > { %v7339_v37 = vrot.slane %v6976_v46, %v18062_v31  ;;  %7167 = vperm.xlu0 %13551, %v19174_v38   ;;  %v9090_v36 = vsel %vm5874_vm1, %v9089_v27, %v9085_v1  ;;  %v9513_v60 = vsel %vm6370_vm7, %v9062_v59, %v9512_v51  ;;  %v4955_v1 = vcombine.high %v18326_v16, %v22438_v43  ;;  %v23202_v35 = vld [vmem:[#allocation87_spill] sm:$0xff] }
 0x7d2   : > { %v9076_v13 = vsel %vm5874_vm1, %v23179_v26, %v9071_v5  ;;  %v9099_v62 = vsel %vm5867_vm0, %v9098_v15, %v23180_v19  ;;  %v6890_v5 = vunpack.c.l.b16 %v23186_v23  ;;  %v23190_v19 = vld [vmem:[#allocation38_spill] sm:$0xff]  ;;  %v5065_v16 = vcombine.high %v18348_v58, %v22438_v43 }
 0x7d3   : > { %v7340_v6 = vsel %vm5874_vm1, %v7339_v37, %v7335_v33  ;;  %v8748_v49 = vpop.permute.xlu1 %8747  ;;  %v9104_v39 = vsel %vm5874_vm1, %v23185_v54, %v9099_v62  ;;  %v9514_v2 = vsel %vm6372_vm8, %v9076_v13, %v9513_v60  ;;  %v13302_v62 = vpack.c.bf16 %v23190_v19, %v23190_v19  ;;  %v23194_v43 = vld [vmem:[#allocation214_spill] sm:$0xff] }
 0x7d4   : > { %v7739_v41 = vsel %vm6378_vm11, %v7340_v6, %v7738_v52  ;;  %v6982_v21 = vpop.permute.xlu0 %6981  ;;  %8945 = vperm.xlu1 %13549, %v19174_v38   ;;  %v9108_v48 = vrot.slane %v8748_v49, %v18059_v53  ;;  %v23183_v38 = vpack.c.bf16 %v23149_v34, %v23149_v34  ;;  %v9515_v10 = vsel %vm6374_vm9, %v9090_v36, %v9514_v2  ;;  %v23189_v6 = vld [vmem:[#allocation130_spill] sm:$0xff]  ;;  %v23192_v2 = vld [vmem:[#allocation219_spill] sm:$0xff] }
 0x7d5   : > { %v7761_v8 = vpack.c.b16 %v7739_v41, %v7739_v41  ;;  %v7348_v47 = vrot.slane %v6982_v21, %v18053_v24  ;;  %7173 = vperm.xlu0 %13551, %v19184_v29   ;;  %v9516_v15 = vsel %vm6376_vm10, %v9104_v39, %v9515_v10  ;;  %v13300_v49 = vpack.c.bf16 %v23189_v6, %v23189_v6  ;;  %v23191_v36 = vld [vmem:[#allocation10_spill] sm:$0xff]  ;;  %v23195_v10 = vld [vmem:[#allocation213_spill] sm:$0xff] }
 0x7d6   : > { %v6888_v17 = vunpack.c.l.b16 %v23183_v38  ;;  %v9113_v42 = vsel %vm5867_vm0, %v9112_v50, %v9108_v48  ;;  %v13304_v48 = vpack.c.bf16 %v4955_v1, %v4955_v1  ;;  %v13306_v38 = vpack.c.bf16 %v23191_v36, %v23191_v36  ;;  %v23198_v23 = vld [vmem:[#allocation182_spill] sm:$0xff]  ;;  %v23204_v6 = vld [vmem:[#allocation221_spill] sm:$0xff] }
 0x7d7   : > { %7778 = vst.msk [vmem:[#allocation2 + $0x40] sm:$0xf] %vm6417_vm12, %v7761_v8  ;;  %v7349_v32 = vsel %vm5867_vm0, %v7348_v47, %v7344_v55  ;;  %v8754_v44 = vpop.permute.xlu1 %8753  ;;  %v6894_v21 = vunpack.c.l.b16 %v13300_v49  ;;  %v6896_v47 = vunpack.c.l.b16 %v13302_v62  ;;  %v13310_v54 = vpack.c.bf16 %v5065_v16, %v5065_v16  ;;  %v23207_v62 = vld [vmem:[#allocation169_spill] sm:$0xff] }
 0x7d8   : > { %v7354_v34 = vsel %vm5874_vm1, %v7353_v45, %v7349_v32  ;;  %v19361_v18 = vpop.permute.xlu0 %6987  ;;  %v9117_v22 = vrot.slane %v8754_v44, %v18062_v31  ;;  %8951 = vperm.xlu1 %13549, %v19184_v29   ;;  %v13298_v29 = vpack.c.bf16 %v19168_v20, %v19168_v20  ;;  %v6898_v51 = vunpack.c.l.b16 %v13304_v48 }
 0x7d9   : > { %v7762_v55 = vpack.c.b16 %v7354_v34, %v7354_v34  ;;  %7179 = vperm.xlu0 %13551, %v6888_v17   ;;  %v6900_v50 = vunpack.c.l.b16 %v13306_v38  ;;  %v23193_v34 = vld [vmem:[#allocation212_spill] sm:$0xff]  ;;  %v9150_v58 = vrot.slane %v23194_v43, %v18059_v53  ;;  %v9196_v49 = vrot.slane %v23204_v6, %v18053_v24  ;;  %v23210_v38 = vld [vmem:[#allocation70_spill] sm:$0xff] }
 0x7da   : > { %v9118_v46 = vsel %vm5874_vm1, %v9117_v22, %v9113_v42  ;;  %v6892_v20 = vunpack.c.l.b16 %v13298_v29  ;;  %v9140_v22 = vrot.slane %v23193_v34, %v18053_v24  ;;  %v23196_v42 = vld [vmem:[#allocation215_spill] sm:$0xff]  ;;  %v9206_v1 = vrot.slane %v23207_v62, %v18059_v53 }
 0x7db   : > { %v7780_v40 = vsel %vm18284_vm15, %v7762_v55, %v7779_v3  ;;  %v9517_v0 = vsel %vm6378_vm11, %v9118_v46, %v9516_v15  ;;  %v8760_v37 = vpop.permute.xlu1 %8759  ;;  %v6904_v3 = vunpack.c.l.b16 %v13310_v54  ;;  %v7362_v55 = vrot.slane %v23195_v10, %v18053_v24  ;;  %v23197_v15 = vld [vmem:[#allocation216_spill] sm:$0xff] }
 0x7dc   : > { %7781 = vst [vmem:[#allocation2 + $0x44] sm:$0x1] %v7780_v40  ;;  %v19379_v33 = vpop.permute.xlu0 %6993  ;;  %v9539_v27 = vpack.c.b16 %v9517_v0, %v9517_v0  ;;  %v9126_v14 = vrot.slane %v8760_v37, %v18053_v24  ;;  %8957 = vperm.xlu1 %13549, %v6888_v17   ;;  %v9159_v46 = vrot.slane %v23196_v42, %v18062_v31  ;;  %v23199_v0 = vld [vmem:[#allocation127_spill] sm:$0xff] }
 0x7dd   : > { %7185 = vperm.xlu0 %13551, %v6890_v5   ;;  %v9168_v40 = vrot.slane %v23197_v15, %v18053_v24  ;;  %v7381_v29 = vrot.slane %v23199_v0, %v18062_v31  ;;  %v7437_v16 = vrot.slane %v23210_v38, %v18062_v31  ;;  %v23211_v0 = vld [vmem:[#allocation21_spill] sm:$0xff] }
 0x7de   : > { %9556 = vst.msk [vmem:[#allocation2 + $0x60] sm:$0xf] %vm6417_vm12, %v9539_v27  ;;  %v9127_v25 = vsel %vm5867_vm0, %v9126_v14, %v9122_v63  ;;  %v9178_v63 = vrot.slane %v23200_v28, %v18059_v53  ;;  %v23201_v27 = vld [vmem:[#allocation217_spill] sm:$0xff] }
 0x7df   : > { %v9132_v52 = vsel %vm5874_vm1, %v9131_v30, %v9127_v25  ;;  %v19389_v59 = vpop.permute.xlu1 %8765  ;;  %v7390_v14 = vrot.slane %v23201_v27, %v18053_v24  ;;  %v7400_v30 = vrot.slane %v23202_v35, %v18059_v53  ;;  %v23213_v27 = vld [vmem:[#allocation225_spill] sm:$0xff] }
 0x7e0   : > { %v19391_v26 = vpop.permute.xlu0 %6999  ;;  %v9540_v13 = vpack.c.b16 %v9132_v52, %v9132_v52  ;;  %8963 = vperm.xlu1 %13549, %v6890_v5   ;;  %v7372_v5 = vrot.slane %v23198_v23, %v18059_v53  ;;  %v9853_v23 = vld [vmem:[#allocation2] sm:$0xf]  ;;  %v7446_v35 = vrot.slane %v23213_v27, %v18053_v24 }
 0x7e1   : > { %7191 = vperm.xlu0 %13551, %v6892_v20   ;;  %v7376_v25 = vrot.slane %v19391_v26, %v18053_v24  ;;  %v23208_v26 = vld [vmem:[#allocation222_spill] sm:$0xff] }
 0x7e2   : > { %v9558_v41 = vsel %vm18284_vm15, %v9540_v13, %v9557_v56  ;;  %v23203_v56 = vld [vmem:[#allocation218_spill] sm:$0xff]  ;;  %v23205_v13 = vld [vmem:[#allocation220_spill] sm:$0xff] }
 0x7e3   : > { %9559 = vst [vmem:[#allocation2 + $0x64] sm:$0x1] %v9558_v41  ;;  %v19397_v61 = vpop.permute.xlu1 %8771  ;;  %v9187_v52 = vrot.slane %v23203_v56, %v18062_v31  ;;  %v7409_v41 = vrot.slane %v23205_v13, %v18062_v31  ;;  %v7377_v34 = vsel %vm5867_vm0, %v7376_v25, %v7372_v5  ;;  %v23214_v5 = vld [vmem:[#allocation151_spill] sm:$0xff]  ;;  %v23217_v56 = vld [vmem:[#allocation170_spill] sm:$0xff] }
 0x7e4   : > { %v19401_v8 = vpop.permute.xlu0 %7005  ;;  %8969 = vperm.xlu1 %13549, %v6892_v20   ;;  %v7456_v25 = vrot.slane %v23214_v5, %v18059_v53 }
 0x7e5   : > { %7197 = vperm.xlu0 %13551, %v6894_v21   ;;  %v7386_v54 = vrot.slane %v19401_v8, %v18059_v53 }
 0x7e7   : > { %v19403_v9 = vpop.permute.xlu1 %8777  ;;  %v7391_v27 = vsel %vm5867_vm0, %v7390_v14, %v7386_v54 }
 0x7e8   : > { %v19405_v45 = vpop.permute.xlu0 %7011  ;;  %8975 = vperm.xlu1 %13549, %v6894_v21   ;;  %v23206_v21 = vld [vmem:[#allocation84_spill] sm:$0xff]  ;;  %v9154_v43 = vrot.slane %v19403_v9, %v18053_v24 }
 0x7e9   : > { %7203 = vperm.xlu0 %13551, %v6896_v47   ;;  %v7418_v19 = vrot.slane %v23206_v21, %v18053_v24 }
 0x7eb   : > { %v19409_v17 = vpop.permute.xlu1 %8783 }
 0x7ec   : > { %v7018_v7 = vpop.permute.xlu0 %7017  ;;  %8981 = vperm.xlu1 %13549, %v6896_v47   ;;  %v7428_v47 = vrot.slane %v23208_v26, %v18059_v53 }
 0x7ed   : > { %7209 = vperm.xlu0 %13551, %v6898_v51   ;;  %v7404_v48 = vrot.slane %v7018_v7, %v18053_v24  ;;  %v7395_v7 = vrot.slane %v19405_v45, %v18062_v31  ;;  %v23215_v45 = vld [vmem:[#allocation69_spill] sm:$0xff] }
 0x7ee   : > { %v7465_v9 = vrot.slane %v23215_v45, %v18062_v31 }
 0x7ef   : > { %v19413_v60 = vpop.permute.xlu1 %8789  ;;  %v7405_v21 = vsel %vm5867_vm0, %v7404_v48, %v7400_v30  ;;  %v7396_v45 = vsel %vm5874_vm1, %v7395_v7, %v7391_v27 }
 0x7f0   : > { %v19415_v32 = vpop.permute.xlu0 %7023  ;;  %8987 = vperm.xlu1 %13549, %v6898_v51   ;;  %v23209_v51 = vld [vmem:[#allocation223_spill] sm:$0xff]  ;;  %v7410_v14 = vsel %vm5874_vm1, %v7409_v41, %v7405_v21  ;;  %v9173_v54 = vrot.slane %v19413_v60, %v18062_v31 }
 0x7f1   : > { %7215 = vperm.xlu0 %13551, %v6900_v50   ;;  %v9215_v36 = vrot.slane %v23209_v51, %v18062_v31  ;;  %v7414_v26 = vrot.slane %v19415_v32, %v18059_v53  ;;  %v9855_v32 = vld [vmem:[#allocation2 + $0x10] sm:$0xf] }
 0x7f3   : > { %v19417_v39 = vpop.permute.xlu1 %8795 }
 0x7f4   : > { %v19419_v44 = vpop.permute.xlu0 %7029  ;;  %8993 = vperm.xlu1 %13549, %v6900_v50   ;;  %v7367_v50 = vrot.slane %v19379_v33, %v18062_v31  ;;  %v23212_v33 = vld [vmem:[#allocation224_spill] sm:$0xff] }
 0x7f5   : > { %7221 = vperm.xlu0 %13551, %v23192_v2   ;;  %v9224_v8 = vrot.slane %v23212_v33, %v18053_v24  ;;  %v23219_v33 = vld [vmem:[#allocation173_spill] sm:$0xff] }
 0x7f7   : > { %v19436_v37 = vpop.permute.xlu1 %8801 }
 0x7f8   : > { %v7036_v20 = vpop.permute.xlu0 %7035  ;;  %8921 = vperm.xlu1 %13549, %v19170_v11   ;;  %v7358_v11 = vrot.slane %v19361_v18, %v18059_v53  ;;  %v9136_v18 = vrot.slane %v19389_v59, %v18059_v53  ;;  %v9192_v42 = vrot.slane %v19436_v37, %v18059_v53 }
 0x7f9   : > { %7227 = vperm.xlu0 %13551, %v6904_v3   ;;  %v7432_v59 = vrot.slane %v7036_v20, %v18053_v24  ;;  %v7423_v20 = vrot.slane %v19419_v44, %v18062_v31 }
 0x7fa   : > { %v7363_v13 = vsel %vm5867_vm0, %v7362_v55, %v7358_v11  ;;  %v9141_v5 = vsel %vm5867_vm0, %v9140_v22, %v9136_v18  ;;  %v9155_v55 = vsel %vm5867_vm0, %v9154_v43, %v9150_v58  ;;  %v7419_v58 = vsel %vm5867_vm0, %v7418_v19, %v7414_v26  ;;  %v9854_v19 = vld [vmem:[#allocation2 + $0x8] sm:$0xf]  ;;  %v10003_v43 = vld [vmem:[#allocation2 + $0x20] sm:$0xf] }
 0x7fb   : > { %v19470_v2 = vpop.permute.xlu1 %8807  ;;  %v7368_v38 = vsel %vm5874_vm1, %v7367_v50, %v7363_v13  ;;  %v7433_v48 = vsel %vm5867_vm0, %v7432_v59, %v7428_v47  ;;  %v9164_v50 = vrot.slane %v19409_v17, %v18059_v53  ;;  %v9160_v41 = vsel %vm5874_vm1, %v9159_v46, %v9155_v55 }
 0x7fc   : > { %v7042_v10 = vpop.permute.xlu0 %7041  ;;  %9002 = vperm.xlu1 %13549, %v23211_v0   ;;  %v7382_v0 = vsel %vm5874_vm1, %v7381_v29, %v7377_v34  ;;  %v9145_v29 = vrot.slane %v19397_v61, %v18062_v31  ;;  %v7424_v47 = vsel %vm5874_vm1, %v7423_v20, %v7419_v58  ;;  %v7438_v17 = vsel %vm5874_vm1, %v7437_v16, %v7433_v48  ;;  %v10427_v58 = vld [vmem:[#allocation2 + $0x40] sm:$0xf] }
 0x7fd   : > { %9861 = vrot.lane.b32.xlu0 %v9853_v23, %s13665_s27  ;;  %v7442_v30 = vrot.slane %v7042_v10, %v18059_v53  ;;  %v7740_v22 = vsel %vm6366_vm5, %v7382_v0, %v7368_v38  ;;  %v23216_v59 = vmov 0   ;;  %v9169_v16 = vsel %vm5867_vm0, %v9168_v40, %v9164_v50  ;;  %v9856_v40 = vld [vmem:[#allocation2 + $0x18] sm:$0xf] }
 0x7fe   : > { %v7741_v61 = vsel %vm6368_vm6, %v7396_v45, %v7740_v22  ;;  %v9201_v13 = vrot.slane %v19470_v2, %v18062_v31  ;;  %v9174_v21 = vsel %vm5874_vm1, %v9173_v54, %v9169_v16  ;;  %v10005_v2 = vld [vmem:[#allocation2 + $0x30] sm:$0xf]  ;;  %v9197_v62 = vsel %vm5867_vm0, %v9196_v49, %v9192_v42  ;;  %v7783_v54 = vld [vmem:[#allocation2 + $0x4c] sm:$0x1] }
 0x7ff   : > { %v8814_v23 = vpop.permute.xlu1 %8813  ;;  %v7742_v18 = vsel %vm6370_vm7, %v7410_v14, %v7741_v61  ;;  %v23218_v14 = vld [vmem:[#allocation227_spill] sm:$0xff] }
 0x800   : > { %v7048_v11 = vpop.permute.xlu0 %7047  ;;  %9005 = vperm.xlu1 %13549, %v6904_v3   ;;  %v9182_v3 = vrot.slane %v19417_v39, %v18053_v24  ;;  %v7447_v39 = vsel %vm5867_vm0, %v7446_v35, %v7442_v30  ;;  %v9210_v10 = vrot.slane %v8814_v23, %v18053_v24  ;;  %v7743_v35 = vsel %vm6372_vm8, %v7424_v47, %v7742_v18 }
 0x801   : > { %v7451_v44 = vrot.slane %v7048_v11, %v18062_v31  ;;  %9865 = vrot.lane.b32.xlu0 %v9855_v32, %s13665_s27  ;;  %v7744_v26 = vsel %vm6374_vm9, %v7438_v17, %v7743_v35  ;;  %v9202_v55 = vsel %vm5874_vm1, %v9201_v13, %v9197_v62  ;;  %v9234_v11 = vrot.slane %v23217_v56, %v18059_v53  ;;  %v23221_v56 = vld [vmem:[#allocation174_spill] sm:$0xff] }
 0x802   : > { %v9183_v37 = vsel %vm5867_vm0, %v9182_v3, %v9178_v63  ;;  %v9211_v28 = vsel %vm5867_vm0, %v9210_v10, %v9206_v1  ;;  %v7474_v48 = vrot.slane %v23218_v14, %v18053_v24  ;;  %v23224_v14 = vld [vmem:[#allocation153_spill] sm:$0xff] }
 0x803   : > { %v8820_v34 = vpop.permute.xlu1 %8819  ;;  %v7452_v46 = vsel %vm5874_vm1, %v7451_v44, %v7447_v39  ;;  %v9188_v45 = vsel %vm5874_vm1, %v9187_v52, %v9183_v37  ;;  %v9216_v6 = vsel %vm5874_vm1, %v9215_v36, %v9211_v28  ;;  %v10006_v39 = vld [vmem:[#allocation2 + $0x38] sm:$0xf] }
 0x804   : > { %v7054_v7 = vpop.permute.xlu0 %7053  ;;  %9863 = vrot.lane.b32.xlu1 %v9854_v19, %s13665_s27  ;;  %v9220_v15 = vrot.slane %v8820_v34, %v18059_v53  ;;  %v7745_v27 = vsel %vm6376_vm10, %v7452_v46, %v7744_v26 }
 0x805   : > { %v7460_v60 = vrot.slane %v7054_v7, %v18053_v24  ;;  %10011 = vrot.lane.b32.xlu0 %v10003_v43, %s13665_s27  ;;  %13552 = vset.pattern.permute.xlu1 %v23216_v59  ;;  %v23220_v59 = vld [vmem:[#allocation226_spill] sm:$0xff] }
 0x806   : > { %v9225_v49 = vsel %vm5867_vm0, %v9224_v8, %v9220_v15  ;;  %v9243_v8 = vrot.slane %v23219_v33, %v18062_v31  ;;  %v9252_v16 = vrot.slane %v23220_v59, %v18053_v24 }
 0x807   : > { %v7461_v38 = vsel %vm5867_vm0, %v7460_v60, %v7456_v25  ;;  %v8826_v0 = vpop.permute.xlu1 %8825  ;;  %v9146_v25 = vsel %vm5874_vm1, %v9145_v29, %v9141_v5  ;;  %v10004_v29 = vld [vmem:[#allocation2 + $0x28] sm:$0xf] }
 0x808   : > { %v7466_v20 = vsel %vm5874_vm1, %v7465_v9, %v7461_v38  ;;  %v7060_v63 = vpop.permute.xlu0 %7059  ;;  %v9229_v23 = vrot.slane %v8826_v0, %v18062_v31  ;;  %9867 = vrot.lane.b32.xlu1 %v9856_v40, %s13665_s27  ;;  %v9518_v9 = vsel %vm6366_vm5, %v9160_v41, %v9146_v25  ;;  %v9561_v38 = vld [vmem:[#allocation2 + $0x6c] sm:$0x1] }
 0x809   : > { %v7746_v1 = vsel %vm6378_vm11, %v7466_v20, %v7745_v27  ;;  %10015 = vrot.lane.b32.xlu0 %v10005_v2, %s13665_s27  ;;  %v7470_v5 = vrot.slane %v7060_v63, %v18059_v53  ;;  %v9519_v52 = vsel %vm6368_vm6, %v9174_v21, %v9518_v9 }
 0x80a   : > { %v7763_v30 = vpack.c.b16 %v7746_v1, %v7746_v1  ;;  %v9520_v44 = vsel %vm6370_vm7, %v9188_v45, %v9519_v52  ;;  %v9230_v51 = vsel %vm5874_vm1, %v9229_v23, %v9225_v49  ;;  %v19620_v23 = vld [vmem:[#allocation2 + $0x60] sm:$0xf] }
 0x80b   : > { %v8832_v32 = vpop.permute.xlu1 %8831  ;;  %v9521_v50 = vsel %vm6372_vm8, %v9202_v55, %v9520_v44  ;;  %v7475_v61 = vsel %vm5867_vm0, %v7474_v48, %v7470_v5  ;;  %v7484_v48 = vrot.slane %v23224_v14, %v18059_v53  ;;  %v23225_v44 = vld [vmem:[#allocation71_spill] sm:$0xff] }
 0x80c   : > { %7782 = vst.msk [vmem:[#allocation2 + $0x48] sm:$0xf] %vm6417_vm12, %v7763_v30  ;;  %v7066_v22 = vpop.permute.xlu0 %7065  ;;  %v9238_v36 = vrot.slane %v8832_v32, %v18053_v24  ;;  %10013 = vrot.lane.b32.xlu1 %v10004_v29, %s13665_s27  ;;  %v9522_v41 = vsel %vm6374_vm9, %v9216_v6, %v9521_v50  ;;  %v23222_v6 = vld [vmem:[#allocation229_spill] sm:$0xff]  ;;  %v23223_v32 = vld [vmem:[#allocation230_spill] sm:$0xff] }
 0x80d   : > { %v7479_v3 = vrot.slane %v7066_v22, %v18062_v31  ;;  %10435 = vrot.lane.b32.xlu0 %v10427_v58, %s13665_s27  ;;  %v9523_v19 = vsel %vm6376_vm10, %v9230_v51, %v9522_v41  ;;  %v9271_v49 = vrot.slane %v23222_v6, %v18062_v31  ;;  %v9280_v29 = vrot.slane %v23223_v32, %v18053_v24  ;;  %v23226_v58 = vld [vmem:[#allocation86_spill] sm:$0xff] }
 0x80e   : > { %v9239_v47 = vsel %vm5867_vm0, %v9238_v36, %v9234_v11  ;;  %v9262_v11 = vrot.slane %v23221_v56, %v18059_v53  ;;  %v7493_v22 = vrot.slane %v23225_v44, %v18062_v31  ;;  %v9290_v51 = vrot.slane %v23226_v58, %v18059_v53  ;;  %v23227_v36 = vld [vmem:[#allocation233_spill] sm:$0xff]  ;;  %v23230_v41 = vld [vmem:[#allocation234_spill] sm:$0xff]  ;;  %v23240_v56 = vld [vmem:[#allocation15_spill] sm:$0xff] }
 0x80f   : > { %v7480_v34 = vsel %vm5874_vm1, %v7479_v3, %v7475_v61  ;;  %v9244_v18 = vsel %vm5874_vm1, %v9243_v8, %v9239_v47  ;;  %v8838_v17 = vpop.permute.xlu1 %8837  ;;  %v9299_v33 = vrot.slane %v23227_v36, %v18062_v31  ;;  %v23228_v8 = vld [vmem:[#allocation231_spill] sm:$0xff]  ;;  %v23229_v3 = vld [vmem:[#allocation154_spill] sm:$0xff]  ;;  %v9308_v47 = vrot.slane %v23230_v41, %v18053_v24 }
 0x810   : > { %v7764_v7 = vpack.c.b16 %v7480_v34, %v7480_v34  ;;  %v19600_v43 = vpop.permute.xlu0 %7071  ;;  %v9524_v10 = vsel %vm6378_vm11, %v9244_v18, %v9523_v19  ;;  %10017 = vrot.lane.b32.xlu1 %v10006_v39, %s13665_s27  ;;  %v9248_v46 = vrot.slane %v8838_v17, %v18059_v53  ;;  %v7502_v50 = vrot.slane %v23228_v8, %v18053_v24  ;;  %v23232_v39 = vld [vmem:[#allocation236_spill] sm:$0xff]  ;;  %v23241_v32 = vld [vmem:[#allocation242_spill] sm:$0xff] }
 0x811   : > { %v9541_v42 = vpack.c.b16 %v9524_v10, %v9524_v10  ;;  %v7512_v61 = vrot.slane %v23229_v3, %v18059_v53  ;;  %v7488_v19 = vrot.slane %v19600_v43, %v18053_v24  ;;  %v23233_v10 = vld [vmem:[#allocation235_spill] sm:$0xff]  ;;  %v23235_v43 = vld [vmem:[#allocation237_spill] sm:$0xff]  ;;  %v7568_v6 = vrot.slane %v23240_v56, %v18059_v53  ;;  %v23242_v3 = vld [vmem:[#allocation20_spill] sm:$0xff] }
 0x812   : > { %v7784_v60 = vsel %vm18284_vm15, %v7764_v7, %v7783_v54  ;;  %v9253_v26 = vsel %vm5867_vm0, %v9252_v16, %v9248_v46  ;;  %v23231_v54 = vld [vmem:[#allocation72_spill] sm:$0xff]  ;;  %v9318_v7 = vrot.slane %v23232_v39, %v18059_v53  ;;  %v23234_v16 = vld [vmem:[#allocation238_spill] sm:$0xff]  ;;  %v9355_v14 = vrot.slane %v23241_v32, %v18062_v31  ;;  %v23244_v56 = vld [vmem:[#allocation9_spill] sm:$0xff] }
 0x813   : > { %7785 = vst [vmem:[#allocation2 + $0x4c] sm:$0x1] %v7784_v60  ;;  %9560 = vst.msk [vmem:[#allocation2 + $0x68] sm:$0xf] %vm6417_vm12, %v9541_v42  ;;  %v8844_v35 = vpop.permute.xlu1 %8843  ;;  %v10428_v37 = vld [vmem:[#allocation2 + $0x48] sm:$0xf]  ;;  %v7521_v34 = vrot.slane %v23231_v54, %v18062_v31  ;;  %v7530_v42 = vrot.slane %v23233_v10, %v18053_v24  ;;  %v7489_v44 = vsel %vm5867_vm0, %v7488_v19, %v7484_v48 }
 0x814   : > { %v7078_v13 = vpop.permute.xlu0 %7077  ;;  %v9257_v21 = vrot.slane %v8844_v35, %v18062_v31  ;;  %10437 = vrot.lane.b32.xlu1 %v10428_v37, %s13665_s27  ;;  %v9327_v35 = vrot.slane %v23234_v16, %v18062_v31  ;;  %v7540_v37 = vrot.slane %v23235_v43, %v18059_v53  ;;  %v7577_v54 = vrot.slane %v23242_v3, %v18062_v31  ;;  %v23243_v19 = vld [vmem:[#allocation244_spill] sm:$0xff] }
 0x815   : > { %v7498_v46 = vrot.slane %v7078_v13, %v18059_v53  ;;  %v7596_v3 = vrot.slane %v23244_v56, %v18059_v53 }
 0x816   : > { %v9258_v15 = vsel %vm5874_vm1, %v9257_v21, %v9253_v26  ;;  %v23236_v21 = vld [vmem:[#allocation73_spill] sm:$0xff] }
 0x817   : > { %v9542_v0 = vpack.c.b16 %v9258_v15, %v9258_v15  ;;  %v8850_v40 = vpop.permute.xlu1 %8849  ;;  %v7549_v26 = vrot.slane %v23236_v21, %v18062_v31  ;;  %v23237_v15 = vld [vmem:[#allocation239_spill] sm:$0xff]  ;;  %v7503_v39 = vsel %vm5867_vm0, %v7502_v50, %v7498_v46  ;;  %v7494_v50 = vsel %vm5874_vm1, %v7493_v22, %v7489_v44 }
 0x818   : > { %v7084_v27 = vpop.permute.xlu0 %7083  ;;  %v9266_v60 = vrot.slane %v8850_v40, %v18053_v24  ;;  %v23239_v40 = vld [vmem:[#allocation240_spill] sm:$0xff] }
 0x819   : > { %v9562_v20 = vsel %vm18284_vm15, %v9542_v0, %v9561_v38  ;;  %v7507_v38 = vrot.slane %v7084_v27, %v18062_v31  ;;  %v9336_v0 = vrot.slane %v23237_v15, %v18053_v24 }
 0x81a   : > { %9563 = vst [vmem:[#allocation2 + $0x6c] sm:$0x1] %v9562_v20  ;;  %v19618_v63 = vld [vmem:[#allocation2 + $0x68] sm:$0xf]  ;;  %v23238_v20 = vld [vmem:[#allocation241_spill] sm:$0xff]  ;;  %v9267_v10 = vsel %vm5867_vm0, %v9266_v60, %v9262_v11 }
 0x81b   : > { %v19616_v28 = vpop.permute.xlu1 %8855  ;;  %v9346_v13 = vrot.slane %v23238_v20, %v18059_v53 }
 0x81c   : > { %v7090_v2 = vpop.permute.xlu0 %7089  ;;  %v9276_v48 = vrot.slane %v19616_v28, %v18059_v53 }
 0x81d   : > { %v7516_v18 = vrot.slane %v7090_v2, %v18053_v24  ;;  %v7558_v2 = vrot.slane %v23239_v40, %v18053_v24  ;;  %v7508_v40 = vsel %vm5874_vm1, %v7507_v38, %v7503_v39 }
 0x81e   : > { %v7747_v22 = vsel %vm6366_vm5, %v7508_v40, %v7494_v50 }
 0x81f   : > { %v19624_v45 = vpop.permute.xlu1 %8861  ;;  %v7517_v58 = vsel %vm5867_vm0, %v7516_v18, %v7512_v61  ;;  %v7586_v18 = vrot.slane %v23243_v19, %v18053_v24 }
 0x820   : > { %v7096_v62 = vpop.permute.xlu0 %7095  ;;  %v7522_v11 = vsel %vm5874_vm1, %v7521_v34, %v7517_v58  ;;  %v9285_v46 = vrot.slane %v19624_v45, %v18062_v31  ;;  %v9272_v34 = vsel %vm5874_vm1, %v9271_v49, %v9267_v10  ;;  %v9281_v45 = vsel %vm5867_vm0, %v9280_v29, %v9276_v48 }
 0x821   : > { %v7526_v43 = vrot.slane %v7096_v62, %v18059_v53 }
 0x823   : > { %v19626_v1 = vpop.permute.xlu1 %8867 }
 0x824   : > { %v19628_v9 = vpop.permute.xlu0 %7101 }
 0x825   : > { %v7535_v61 = vrot.slane %v19628_v9, %v18062_v31  ;;  %v9294_v9 = vrot.slane %v19626_v1, %v18053_v24 }
 0x827   : > { %v19630_v55 = vpop.permute.xlu1 %8873  ;;  %v9295_v10 = vsel %vm5867_vm0, %v9294_v9, %v9290_v51 }
 0x828   : > { %v7108_v30 = vpop.permute.xlu0 %7107  ;;  %v9304_v29 = vrot.slane %v19630_v55, %v18059_v53 }
 0x829   : > { %v7544_v27 = vrot.slane %v7108_v30, %v18053_v24 }
 0x82b   : > { %v19632_v5 = vpop.permute.xlu1 %8879  ;;  %v7545_v28 = vsel %vm5867_vm0, %v7544_v27, %v7540_v37 }
 0x82c   : > { %v19636_v52 = vpop.permute.xlu0 %7113  ;;  %v7550_v27 = vsel %vm5874_vm1, %v7549_v26, %v7545_v28 }
 0x82d   : > { %v7554_v62 = vrot.slane %v19636_v52, %v18059_v53  ;;  %v7531_v52 = vsel %vm5867_vm0, %v7530_v42, %v7526_v43  ;;  %v9286_v42 = vsel %vm5874_vm1, %v9285_v46, %v9281_v45  ;;  %v7787_v45 = vld [vmem:[#allocation2 + $0x54] sm:$0x1] }
 0x82e   : > { %v7536_v37 = vsel %vm5874_vm1, %v7535_v61, %v7531_v52 }
 0x82f   : > { %v19661_v17 = vpop.permute.xlu1 %8885  ;;  %v7559_v39 = vsel %vm5867_vm0, %v7558_v2, %v7554_v62 }
 0x830   : > { %v7120_v59 = vpop.permute.xlu0 %7119  ;;  %v9322_v1 = vrot.slane %v19661_v17, %v18053_v24 }
 0x831   : > { %v7563_v60 = vrot.slane %v7120_v59, %v18062_v31  ;;  %v7748_v59 = vsel %vm6368_vm6, %v7522_v11, %v7747_v22 }
 0x832   : > { %v7749_v17 = vsel %vm6370_vm7, %v7536_v37, %v7748_v59  ;;  %v9323_v51 = vsel %vm5867_vm0, %v9322_v1, %v9318_v7  ;;  %v9309_v7 = vsel %vm5867_vm0, %v9308_v47, %v9304_v29 }
 0x833   : > { %v8892_v8 = vpop.permute.xlu1 %8891  ;;  %v7750_v48 = vsel %vm6372_vm8, %v7550_v27, %v7749_v17 }
 0x834   : > { %v7126_v21 = vpop.permute.xlu0 %7125  ;;  %v9332_v61 = vrot.slane %v8892_v8, %v18059_v53 }
 0x835   : > { %v7572_v30 = vrot.slane %v7126_v21, %v18053_v24  ;;  %v9313_v21 = vrot.slane %v19632_v5, %v18062_v31 }
 0x836   : > { %v9337_v47 = vsel %vm5867_vm0, %v9336_v0, %v9332_v61 }
 0x837   : > { %v8898_v38 = vpop.permute.xlu1 %8897  ;;  %v7573_v58 = vsel %vm5867_vm0, %v7572_v30, %v7568_v6  ;;  %v7564_v6 = vsel %vm5874_vm1, %v7563_v60, %v7559_v39  ;;  %v9525_v30 = vsel %vm6366_vm5, %v9286_v42, %v9272_v34  ;;  %v9314_v46 = vsel %vm5874_vm1, %v9313_v21, %v9309_v7  ;;  %v11124_v60 = vld [vmem:[#allocation2] sm:$0xf] }
 0x838   : > { %v7132_v44 = vpop.permute.xlu0 %7131  ;;  %v7578_v26 = vsel %vm5874_vm1, %v7577_v54, %v7573_v58  ;;  %v7751_v19 = vsel %vm6374_vm9, %v7564_v6, %v7750_v48  ;;  %v9341_v5 = vrot.slane %v8898_v38, %v18062_v31  ;;  %v9300_v54 = vsel %vm5874_vm1, %v9299_v33, %v9295_v10  ;;  %v11128_v6 = vld [vmem:[#allocation2 + $0x10] sm:$0xf]  ;;  %v11125_v48 = vld [vmem:[#allocation2 + $0x4] sm:$0x1] }
 0x839   : > { %v7582_v49 = vrot.slane %v7132_v44, %v18059_v53  ;;  %v7752_v8 = vsel %vm6376_vm10, %v7578_v26, %v7751_v19  ;;  %v9526_v56 = vsel %vm6368_vm6, %v9300_v54, %v9525_v30  ;;  %v11133_v59 = vshrl.u32 %v11124_v60, 16  ;;  %v10577_v54 = vld [vmem:[#allocation2 + $0x60] sm:$0xf] }
 0x83a   : > { %v9342_v20 = vsel %vm5874_vm1, %v9341_v5, %v9337_v47  ;;  %v9527_v15 = vsel %vm6370_vm7, %v9314_v46, %v9526_v56  ;;  %v11164_v61 = vshll.u32 %v11128_v6, 16  ;;  %v11142_v5 = vshll.u32 %v11125_v48, 16 }
 0x83b   : > { %v8904_v43 = vpop.permute.xlu1 %8903  ;;  %v7587_v50 = vsel %vm5867_vm0, %v7586_v18, %v7582_v49  ;;  %v9328_v18 = vsel %vm5874_vm1, %v9327_v35, %v9323_v51  ;;  %v23245_v35 = vld [vmem:[#allocation48_spill] sm:$0xff]  ;;  %v11136_v49 = vshll.u32 %v11124_v60, 16  ;;  %v11135_v21 = vrot.slane %v11133_v59, 4 }
 0x83c   : > { %v7138_v2 = vpop.permute.xlu0 %7137  ;;  %v9350_v40 = vrot.slane %v8904_v43, %v18053_v24  ;;  %v7605_v38 = vrot.slane %v23245_v35, %v18062_v31  ;;  %v9528_v44 = vsel %vm6372_vm8, %v9328_v18, %v9527_v15  ;;  %v11161_v51 = vshrl.u32 %v11128_v6, 16  ;;  %v11129_v18 = vld [vmem:[#allocation2 + $0x14] sm:$0x1]  ;;  %v23252_v6 = vld [vmem:[#allocation248_spill] sm:$0xff] }
 0x83d   : > { %v7591_v55 = vrot.slane %v7138_v2, %v18062_v31  ;;  %v9529_v27 = vsel %vm6374_vm9, %v9342_v20, %v9528_v44  ;;  %v11138_v26 = vrot.slane %v11136_v49, 5  ;;  %v11330_v2 = vld [vmem:[#allocation2 + $0x20] sm:$0xf]  ;;  %v11144_v35 = vrot.slane %v11142_v5, 5 }
 0x83e   : > { %v9351_v41 = vsel %vm5867_vm0, %v9350_v40, %v9346_v13  ;;  %v23246_v13 = vld [vmem:[#allocation243_spill] sm:$0xff]  ;;  %v11339_v19 = vshrl.u32 %v11330_v2, 16  ;;  %v11170_v56 = vshll.u32 %v11129_v18, 16 }
 0x83f   : > { %v7592_v11 = vsel %vm5874_vm1, %v7591_v55, %v7587_v50  ;;  %v8910_v62 = vpop.permute.xlu1 %8909  ;;  %v9364_v22 = vrot.slane %v23246_v13, %v18053_v24  ;;  %v9356_v34 = vsel %vm5874_vm1, %v9355_v14, %v9351_v41  ;;  %v11342_v50 = vshll.u32 %v11330_v2, 16  ;;  %v11930_v20 = vld [vmem:[#allocation2 + $0x40] sm:$0xf]  ;;  %v11931_v18 = vld [vmem:[#allocation2 + $0x44] sm:$0x1] }
 0x840   : > { %v7753_v36 = vsel %vm6378_vm11, %v7592_v11, %v7752_v8  ;;  %v7144_v33 = vpop.permute.xlu0 %7143  ;;  %v9360_v16 = vrot.slane %v8910_v62, %v18059_v53  ;;  %v9530_v14 = vsel %vm6376_vm10, %v9356_v34, %v9529_v27  ;;  %v11139_v7 = vor.u32 %v11138_v26, %v11135_v21  ;;  %v11334_v62 = vld [vmem:[#allocation2 + $0x30] sm:$0xf]  ;;  %v11335_v26 = vld [vmem:[#allocation2 + $0x34] sm:$0x1] }
 0x841   : > { %v7765_v28 = vpack.c.b16 %v7753_v36, %v7753_v36  ;;  %v7600_v9 = vrot.slane %v7144_v33, %v18053_v24  ;;  %v11163_v8 = vrot.slane %v11161_v51, 4  ;;  %v11166_v11 = vrot.slane %v11164_v61, 5 }
 0x842   : > { %v11341_v33 = vrot.slane %v11339_v19, 4  ;;  %v11344_v41 = vrot.slane %v11342_v50, 5  ;;  %v11140_v60 = vrot.slane %v11139_v7, 4 }
 0x843   : > { %7786 = vst.msk [vmem:[#allocation2 + $0x50] sm:$0xf] %vm6417_vm12, %v7765_v28  ;;  %v7601_v0 = vsel %vm5867_vm0, %v7600_v9, %v7596_v3  ;;  %v8916_v52 = vpop.permute.xlu1 %8915  ;;  %v9365_v3 = vsel %vm5867_vm0, %v9364_v22, %v9360_v16  ;;  %v11331_v28 = vld [vmem:[#allocation2 + $0x24] sm:$0x1]  ;;  %v11367_v9 = vshrl.u32 %v11334_v62, 16  ;;  %v11370_v16 = vshll.u32 %v11334_v62, 16 }
 0x844   : > { %v7606_v37 = vsel %vm5874_vm1, %v7605_v38, %v7601_v0  ;;  %v19785_v58 = vpop.permute.xlu0 %7149  ;;  %v9369_v1 = vrot.slane %v8916_v52, %v18062_v31  ;;  %v11167_v38 = vor.u32 %v11166_v11, %v11163_v8  ;;  %v11345_v0 = vor.u32 %v11344_v41, %v11341_v33 }
 0x845   : > { %v7766_v39 = vpack.c.b16 %v7606_v37, %v7606_v37  ;;  %v11348_v34 = vshll.u32 %v11331_v28, 16  ;;  %v11369_v52 = vrot.slane %v11367_v9, 4  ;;  %v11372_v44 = vrot.slane %v11370_v16, 5  ;;  %v23255_v9 = vld [vmem:[#allocation252_spill] sm:$0xff] }
 0x846   : > { %v9370_v32 = vsel %vm5874_vm1, %v9369_v1, %v9365_v3  ;;  %v11942_v37 = vshll.u32 %v11930_v20, 16  ;;  %v12136_v1 = vld [vmem:[#allocation2 + $0x60] sm:$0xf]  ;;  %v11145_v59 = vsel %vm19814_vm4, %v11140_v60, %v11144_v35  ;;  %v11168_v27 = vrot.slane %v11167_v38, 4  ;;  %v23249_v3 = vld [vmem:[#allocation246_spill] sm:$0xff]  ;;  %v23256_v60 = vld [vmem:[#allocation12_spill] sm:$0xff] }
 0x847   : > { %v7788_v42 = vsel %vm18284_vm15, %v7766_v39, %v7787_v45  ;;  %v9531_v10 = vsel %vm6378_vm11, %v9370_v32, %v9530_v14  ;;  %v19795_v29 = vpop.permute.xlu1 %8927  ;;  %v11939_v45 = vshrl.u32 %v11930_v20, 16  ;;  %v11172_v39 = vrot.slane %v11170_v56, 5  ;;  %v23250_v32 = vld [vmem:[#allocation247_spill] sm:$0xff]  ;;  %v23257_v38 = vld [vmem:[#allocation253_spill] sm:$0xff]  ;;  %v23261_v28 = vld [vmem:[#allocation256_spill] sm:$0xff] }
 0x848   : > { %7789 = vst [vmem:[#allocation2 + $0x54] sm:$0x1] %v7788_v42  ;;  %v19797_v43 = vpop.permute.xlu0 %7155  ;;  %v9543_v17 = vpack.c.b16 %v9531_v10, %v9531_v10  ;;  %v23251_v42 = vld [vmem:[#allocation249_spill] sm:$0xff]  ;;  %v11346_v61 = vrot.slane %v11345_v0, 4  ;;  %v12145_v19 = vshrl.u32 %v12136_v1, 16  ;;  %v12148_v50 = vshll.u32 %v12136_v1, 16 }
 0x849   : > { %v11350_v5 = vrot.slane %v11348_v34, 5  ;;  %v11941_v7 = vrot.slane %v11939_v45, 4  ;;  %v11944_v8 = vrot.slane %v11942_v37, 5  ;;  %v11173_v11 = vsel %vm19814_vm4, %v11168_v27, %v11172_v39  ;;  %v23258_v0 = vld [vmem:[#allocation254_spill] sm:$0xff]  ;;  %v23260_v34 = vld [vmem:[#allocation85_spill] sm:$0xff] }
 0x84a   : > { %9564 = vst.msk [vmem:[#allocation2 + $0x70] sm:$0xf] %vm6417_vm12, %v9543_v17  ;;  %v10429_v40 = vld [vmem:[#allocation2 + $0x50] sm:$0xf]  ;;  %v11376_v62 = vshll.u32 %v11335_v26, 16  ;;  %v7633_v35 = vrot.slane %v23256_v60, %v18062_v31  ;;  %v12147_v37 = vrot.slane %v12145_v19, 4 }
 0x84b   : > { %10439 = vrot.lane.b32.xlu0 %v10429_v40, %s13665_s27  ;;  %v19801_v55 = vpop.permute.xlu1 %8936  ;;  %v11934_v2 = vld [vmem:[#allocation2 + $0x50] sm:$0xf]  ;;  %v23253_v40 = vld [vmem:[#allocation163_spill] sm:$0xff]  ;;  %v12150_v1 = vrot.slane %v12148_v50, 5  ;;  %v11945_v39 = vor.u32 %v11944_v8, %v11941_v7  ;;  %v11948_v26 = vshll.u32 %v11931_v18, 16  ;;  %v23264_v7 = vld [vmem:[#allocation258_spill] sm:$0xff] }
 0x84c   : > { %v19803_v30 = vpop.permute.xlu0 %7161  ;;  %v7624_v48 = vrot.slane %v23253_v40, %v18059_v53  ;;  %v11967_v33 = vshrl.u32 %v11934_v2, 16  ;;  %v11970_v41 = vshll.u32 %v11934_v2, 16  ;;  %v12137_v2 = vld [vmem:[#allocation2 + $0x64] sm:$0x1]  ;;  %v23266_v19 = vld [vmem:[#allocation260_spill] sm:$0xff]  ;;  %v23267_v18 = vld [vmem:[#allocation261_spill] sm:$0xff] }
 0x84d   : > { %v7628_v40 = vrot.slane %v19803_v30, %v18053_v24  ;;  %v23262_v50 = vld [vmem:[#allocation255_spill] sm:$0xff]  ;;  %v12154_v16 = vshll.u32 %v12137_v2, 16  ;;  %v11950_v56 = vrot.slane %v11948_v26, 5  ;;  %v23269_v2 = vld [vmem:[#allocation262_spill] sm:$0xff] }
 0x84e   : > { %v11969_v60 = vrot.slane %v11967_v33, 4  ;;  %v11972_v25 = vrot.slane %v11970_v41, 5  ;;  %v12151_v41 = vor.u32 %v12150_v1, %v12147_v37  ;;  %v23268_v37 = vld [vmem:[#allocation35_spill] sm:$0xff] }
 0x84f   : > { %10585 = vrot.lane.b32.xlu0 %v10577_v54, %s13665_s27  ;;  %v19806_v46 = vpop.permute.xlu1 %8933  ;;  %v11373_v54 = vor.u32 %v11372_v44, %v11369_v52  ;;  %v23259_v52 = vld [vmem:[#allocation90_spill] sm:$0xff]  ;;  %v11935_v30 = vld [vmem:[#allocation2 + $0x54] sm:$0x1]  ;;  %v7629_v10 = vsel %vm5867_vm0, %v7628_v40, %v7624_v48  ;;  %v7689_v1 = vrot.slane %v23268_v37, %v18062_v31  ;;  %v7698_v44 = vrot.slane %v23269_v2, %v18053_v24 }
 0x850   : > { %v19808_v36 = vpop.permute.xlu0 %7167  ;;  %v11973_v49 = vor.u32 %v11972_v25, %v11969_v60  ;;  %v11976_v17 = vshll.u32 %v11935_v30, 16  ;;  %v12152_v40 = vrot.slane %v12151_v41, 4  ;;  %v7634_v60 = vsel %vm5874_vm1, %v7633_v35, %v7629_v10 }
 0x851   : > { %v10579_v47 = vld [vmem:[#allocation2 + $0x70] sm:$0xf]  ;;  %v11374_v27 = vrot.slane %v11373_v54, 4  ;;  %v9388_v30 = vrot.slane %v19795_v29, %v18059_v53  ;;  %v7638_v25 = vrot.slane %v19808_v36, %v18059_v53  ;;  %v23272_v10 = vrot.slane %v23252_v6, %v18053_v24 }
 0x852   : > { %v11978_v41 = vrot.slane %v11976_v17, 5  ;;  %v23284_v37 = vrot.slane %v23260_v34, %v18053_v24  ;;  %v23286_v34 = vrot.slane %v23264_v7, %v18062_v31 }
 0x853   : > { %10589 = vrot.lane.b32.xlu0 %v10579_v47, %s13665_s27  ;;  %v19811_v13 = vpop.permute.xlu1 %8945  ;;  %v23254_v47 = vld [vmem:[#allocation251_spill] sm:$0xff] }
 0x854   : > { %v19818_v15 = vpop.permute.xlu0 %7173 }
 0x857   : > { %11188 = vrot.lane.b32.xlu0 %v11145_v59, %s13665_s27  ;;  %v19831_v21 = vpop.permute.xlu1 %8951  ;;  %v11351_v59 = vsel %vm19814_vm4, %v11346_v61, %v11350_v5  ;;  %v23263_v61 = vld [vmem:[#allocation257_spill] sm:$0xff]  ;;  %v9402_v5 = vrot.slane %v19801_v55, %v18059_v53  ;;  %v7610_v55 = vrot.slane %v19785_v58, %v18059_v53  ;;  %v23271_v58 = vrot.slane %v23250_v32, %v18053_v24 }
 0x858   : > { %v19835_v51 = vpop.permute.xlu0 %7179  ;;  %v7647_v32 = vrot.slane %v19818_v15, %v18062_v31 }
 0x859   : > { %v7615_v29 = vsel %vm5867_vm0, %v23272_v10, %v7610_v55  ;;  %v7656_v35 = vrot.slane %v19835_v51, %v18053_v24  ;;  %v23273_v51 = vrot.slane %v23249_v3, %v18053_v24 }
 0x85b   : > { %11192 = vrot.lane.b32.xlu0 %v11173_v11, %s13665_s27  ;;  %v19848_v20 = vpop.permute.xlu1 %8957  ;;  %v11378_v11 = vrot.slane %v11376_v62, 5  ;;  %v23265_v62 = vld [vmem:[#allocation49_spill] sm:$0xff] }
 0x85c   : > { %v19854_v45 = vpop.permute.xlu0 %7185  ;;  %v9434_v6 = vrot.slane %v19848_v20, %v18053_v24  ;;  %v23275_v20 = vrot.slane %v23257_v38, %v18053_v24  ;;  %v23277_v38 = vrot.slane %v23254_v47, %v18053_v24 }
 0x85d   : > { %v11379_v8 = vsel %vm19814_vm4, %v11374_v27, %v11378_v11  ;;  %v23270_v27 = vld [vmem:[#allocation264_spill] sm:$0xff]  ;;  %v12156_v11 = vrot.slane %v12154_v16, 5  ;;  %v11974_v16 = vrot.slane %v11973_v49, 4  ;;  %v9425_v49 = vrot.slane %v19831_v21, %v18062_v31 }
 0x85e   : > { %v7643_v55 = vsel %vm5867_vm0, %v23275_v20, %v7638_v25  ;;  %v7666_v3 = vrot.slane %v19854_v45, %v18059_v53 }
 0x85f   : > { %11394 = vrot.lane.b32.xlu0 %v11351_v59, %s13665_s27  ;;  %v19869_v54 = vpop.permute.xlu1 %8963  ;;  %v11946_v59 = vrot.slane %v11945_v39, 4  ;;  %v7619_v39 = vrot.slane %v19797_v43, %v18062_v31  ;;  %v9397_v43 = vrot.slane %v19806_v46, %v18062_v31  ;;  %v12157_v15 = vsel %vm19814_vm4, %v12152_v40, %v12156_v11 }
 0x860   : > { %v19875_v33 = vpop.permute.xlu0 %7191  ;;  %v11979_v40 = vsel %vm19814_vm4, %v11974_v16, %v11978_v41  ;;  %v23276_v11 = vrot.slane %v23259_v52, %v18059_v53  ;;  %v9444_v10 = vrot.slane %v19869_v54, %v18059_v53 }
 0x861   : > { %v11951_v14 = vsel %vm19814_vm4, %v11946_v59, %v11950_v56  ;;  %v9416_v56 = vrot.slane %v19811_v13, %v18059_v53  ;;  %v7620_v46 = vsel %vm5874_vm1, %v7619_v39, %v7615_v29  ;;  %v9393_v13 = vsel %vm5867_vm0, %v23273_v51, %v9388_v30 }
 0x862   : > { %v7754_v59 = vsel %vm6366_vm5, %v7634_v60, %v7620_v46  ;;  %v9398_v39 = vsel %vm5874_vm1, %v9397_v43, %v9393_v13  ;;  %v7675_v60 = vrot.slane %v19875_v33, %v18062_v31  ;;  %v23279_v33 = vrot.slane %v23265_v62, %v18059_v53 }
 0x863   : > { %11398 = vrot.lane.b32.xlu0 %v11379_v8, %s13665_s27  ;;  %v19893_v48 = vpop.permute.xlu1 %8969  ;;  %v9407_v8 = vsel %vm5867_vm0, %v23271_v58, %v9402_v5  ;;  %v9421_v25 = vsel %vm5867_vm0, %v23277_v38, %v9416_v56  ;;  %v23278_v58 = vrot.slane %v23255_v9, %v18059_v53  ;;  %v23281_v56 = vrot.slane %v23263_v61, %v18053_v24 }
 0x864   : > { %v7198_v26 = vpop.permute.xlu0 %7197  ;;  %v9426_v30 = vsel %vm5874_vm1, %v9425_v49, %v9421_v25  ;;  %v9453_v62 = vrot.slane %v19893_v48, %v18062_v31  ;;  %v23282_v49 = vrot.slane %v23258_v0, %v18062_v31  ;;  %v23283_v0 = vrot.slane %v23261_v28, %v18059_v53 }
 0x865   : > { %v7684_v21 = vrot.slane %v7198_v26, %v18053_v24  ;;  %v7657_v26 = vsel %vm5867_vm0, %v7656_v35, %v23276_v11  ;;  %v9435_v52 = vsel %vm5867_vm0, %v9434_v6, %v23278_v58  ;;  %v23290_v58 = vld [vmem:[#allocation263_spill] sm:$0xff] }
 0x866   : > { %v9440_v6 = vsel %vm5874_vm1, %v23282_v49, %v9435_v52  ;;  %v9495_v52 = vrot.slane %v23290_v58, %v18062_v31  ;;  %v20059_v49 = vld [vmem:[#allocation2 + $0x28] sm:$0xf] }
 0x867   : > { %11994 = vrot.lane.b32.xlu0 %v11951_v14, %s13665_s27  ;;  %v8976_v36 = vpop.permute.xlu1 %8975  ;;  %v23274_v14 = vrot.slane %v23251_v42, %v18062_v31  ;;  %v7648_v42 = vsel %vm5874_vm1, %v7647_v32, %v7643_v55  ;;  %v7685_v41 = vsel %vm5867_vm0, %v7684_v21, %v23279_v33  ;;  %v23280_v32 = vrot.slane %v23262_v50, %v18062_v31 }
 0x868   : > { %v7204_v17 = vpop.permute.xlu0 %7203  ;;  %v9462_v47 = vrot.slane %v8976_v36, %v18053_v24  ;;  %v7755_v9 = vsel %vm6368_vm6, %v7648_v42, %v7754_v59  ;;  %v7671_v36 = vsel %vm5867_vm0, %v23281_v56, %v7666_v3  ;;  %v7690_v61 = vsel %vm5874_vm1, %v7689_v1, %v7685_v41  ;;  %v23293_v56 = vld [vmem:[#allocation268_spill] sm:$0xff] }
 0x869   : > { %v9412_v5 = vsel %vm5874_vm1, %v23274_v14, %v9407_v8  ;;  %v7694_v8 = vrot.slane %v7204_v17, %v18059_v53  ;;  %v7662_v35 = vsel %vm5874_vm1, %v23280_v32, %v7657_v26  ;;  %v7676_v54 = vsel %vm5874_vm1, %v7675_v60, %v7671_v36  ;;  %v23292_v32 = vld [vmem:[#allocation267_spill] sm:$0xff] }
 0x86a   : > { %v9532_v16 = vsel %vm6366_vm5, %v9412_v5, %v9398_v39  ;;  %v9463_v51 = vsel %vm5867_vm0, %v9462_v47, %v23283_v0  ;;  %v9449_v1 = vsel %vm5867_vm0, %v23284_v37, %v9444_v10  ;;  %v23287_v3 = vrot.slane %v23270_v27, %v18059_v53  ;;  %v20043_v47 = vld [vmem:[#allocation2 + $0x20] sm:$0xf] }
 0x86b   : > { %11998 = vrot.lane.b32.xlu0 %v11979_v40, %s13665_s27  ;;  %v8982_v45 = vpop.permute.xlu1 %8981  ;;  %v9533_v46 = vsel %vm6368_vm6, %v9426_v30, %v9532_v16  ;;  %v7699_v48 = vsel %vm5867_vm0, %v7698_v44, %v7694_v8  ;;  %v23285_v44 = vld [vmem:[#allocation61_spill] sm:$0xff]  ;;  %v9454_v21 = vsel %vm5874_vm1, %v9453_v62, %v9449_v1  ;;  %v9468_v39 = vsel %vm5874_vm1, %v23286_v34, %v9463_v51  ;;  %v11130_v34 = vld [vmem:[#allocation2 + $0x18] sm:$0xf] }
 0x86c   : > { %v7210_v43 = vpop.permute.xlu0 %7209  ;;  %v9472_v50 = vrot.slane %v8982_v45, %v18059_v53  ;;  %v7717_v59 = vrot.slane %v23285_v44, %v18062_v31  ;;  %v9534_v20 = vsel %vm6370_vm7, %v9440_v6, %v9533_v46  ;;  %v23288_v42 = vrot.slane %v23266_v19, %v18053_v24  ;;  %v23289_v30 = vld [vmem:[#allocation245_spill] sm:$0xff] }
 0x86d   : > { %v7703_v29 = vrot.slane %v7210_v43, %v18062_v31  ;;  %v9374_v27 = vrot.slane %v23289_v30, %v18059_v53  ;;  %v9535_v19 = vsel %vm6372_vm8, %v9454_v21, %v9534_v20  ;;  %v11126_v43 = vld [vmem:[#allocation2 + $0x8] sm:$0xf]  ;;  %v23291_v10 = vrot.slane %v23267_v18, %v18059_v53  ;;  %v20061_v6 = vld [vmem:[#allocation2 + $0x30] sm:$0xf]  ;;  %v9565_v21 = vld [vmem:[#allocation2 + $0x74] sm:$0x1] }
 0x86e   : > { %v9477_v11 = vsel %vm5867_vm0, %v23288_v42, %v9472_v50  ;;  %v9536_v41 = vsel %vm6374_vm9, %v9468_v39, %v9535_v19  ;;  %v7726_v36 = vrot.slane %v23293_v56, %v18053_v24  ;;  %v9728_v44 = vshrl.u32 %v20061_v6, 16 }
 0x86f   : > { %12200 = vrot.lane.b32.xlu0 %v12157_v15, %s13665_s27  ;;  %v8988_v17 = vpop.permute.xlu1 %8987  ;;  %v7756_v15 = vsel %vm6370_vm7, %v7662_v35, %v7755_v9  ;;  %v7704_v5 = vsel %vm5874_vm1, %v7703_v29, %v7699_v48  ;;  %v20051_v9 = vld [vmem:[#allocation2 + $0x38] sm:$0xf]  ;;  %v9383_v35 = vrot.slane %v23292_v32, %v18062_v31  ;;  %v9722_v48 = vshrl.u32 %v20043_v47, 16 }
 0x870   : > { %v7216_v13 = vpop.permute.xlu0 %7215  ;;  %v9481_v14 = vrot.slane %v8988_v17, %v18062_v31  ;;  %v7757_v28 = vsel %vm6372_vm8, %v7676_v54, %v7756_v15  ;;  %v9729_v15 = vshrl.u32 %v20051_v9, 16  ;;  %v11178_v58 = vshll.u32 %v11130_v34, 16 }
 0x871   : > { %v7712_v2 = vrot.slane %v7216_v13, %v18053_v24  ;;  %v7758_v55 = vsel %vm6374_vm9, %v7690_v61, %v7757_v28  ;;  %v11147_v61 = vshrl.u32 %v11126_v43, 16  ;;  %v11150_v13 = vshll.u32 %v11126_v43, 16 }
 0x872   : > { %v7759_v38 = vsel %vm6376_vm10, %v7704_v5, %v7758_v55  ;;  %v9482_v7 = vsel %vm5874_vm1, %v9481_v14, %v9477_v11  ;;  %v11332_v14 = vld [vmem:[#allocation2 + $0x28] sm:$0xf]  ;;  %v12140_v5 = vld [vmem:[#allocation2 + $0x70] sm:$0xf]  ;;  %vm9698_vm5 = vcmask 392192   ;;  %vm9701_vm6 = vcmask 523264  }
 0x873   : > { %v7713_v40 = vsel %vm5867_vm0, %v7712_v2, %v23287_v3  ;;  %v8994_v26 = vpop.permute.xlu1 %8993  ;;  %v9537_v62 = vsel %vm6376_vm10, %v9482_v7, %v9536_v41  ;;  %v9723_v2 = vshrl.u32 %v20059_v49, 16  ;;  %v11353_v42 = vshrl.u32 %v11332_v14, 16  ;;  %v11336_v7 = vld [vmem:[#allocation2 + $0x38] sm:$0xf] }
 0x874   : > { %v7718_v25 = vsel %vm5874_vm1, %v7717_v59, %v7713_v40  ;;  %v7222_v60 = vpop.permute.xlu0 %7221  ;;  %v9490_v45 = vrot.slane %v8994_v26, %v18053_v24  ;;  %v7791_v59 = vld [vmem:[#allocation2 + $0x5c] sm:$0x1]  ;;  %v11356_v11 = vshll.u32 %v11332_v14, 16  ;;  %v11381_v32 = vshrl.u32 %v11336_v7, 16 }
 0x875   : > { %v7760_v8 = vsel %vm6378_vm11, %v7718_v25, %v7759_v38  ;;  %v7722_v33 = vrot.slane %v7222_v60, %v18059_v53  ;;  %v12173_v38 = vshrl.u32 %v12140_v5, 16  ;;  %v12176_v25 = vshll.u32 %v12140_v5, 16 }
 0x876   : > { %v7767_v16 = vpack.c.b16 %v7760_v8, %v7760_v8  ;;  %v9491_v29 = vsel %vm5867_vm0, %v9490_v45, %v23291_v10  ;;  %v9730_v60 = vpack.i.b16 %v9729_v15, %v9728_v44  ;;  %v11127_v10 = vld [vmem:[#allocation2 + $0xc] sm:$0x1]  ;;  %v11383_v44 = vrot.slane %v11381_v32, 4 }
 0x877   : > { %v9496_v46 = vsel %vm5874_vm1, %v9495_v52, %v9491_v29  ;;  %v8922_v54 = vpop.permute.xlu1 %8921  ;;  %v7727_v37 = vsel %vm5867_vm0, %v7726_v36, %v7722_v33  ;;  %v23294_v52 = vld [vmem:[#allocation266_spill] sm:$0xff]  ;;  %v9724_v33 = vpack.i.b16 %v9723_v2, %v9722_v48  ;;  %v11355_v29 = vrot.slane %v11353_v42, 4 }
 0x878   : > { %7790 = vst.msk [vmem:[#allocation2 + $0x58] sm:$0xf] %vm6417_vm12, %v7767_v16  ;;  %v7228_v18 = vpop.permute.xlu0 %7227  ;;  %v9538_v50 = vsel %vm6378_vm11, %v9496_v46, %v9537_v62  ;;  %v9378_v17 = vrot.slane %v8922_v54, %v18053_v24  ;;  %v9500_v19 = vrot.slane %v23294_v52, %v18059_v53  ;;  %v11152_v16 = vrot.slane %v11150_v13, 5  ;;  %v11131_v53 = vld [vmem:[#allocation2 + $0x1c] sm:$0x1] }
 0x879   : > { %v7731_v0 = vrot.slane %v7228_v18, %v18062_v31  ;;  %v9545_v51 = vpack.c.b16 %v9538_v50, %v9538_v50  ;;  %v12175_v62 = vrot.slane %v12173_v38, 4  ;;  %v12178_v46 = vrot.slane %v12176_v25, 5  ;;  %v11333_v54 = vld [vmem:[#allocation2 + $0x2c] sm:$0x1]  ;;  %v9569_v50 = vld [vmem:[#allocation2 + $0x7c] sm:$0x1] }
 0x87a   : > { %v9379_v1 = vsel %vm5867_vm0, %v9378_v17, %v9374_v27  ;;  %v11175_v27 = vshrl.u32 %v11130_v34, 16  ;;  %v20091_v18 = vrot.slane %v9730_v60, %v23135_v12  ;;  %v11358_v48 = vrot.slane %v11356_v11, 5  ;;  %v10291_v25 = vld [vmem:[#allocation2 + $0x70] sm:$0xf] }
 0x87b   : > { %v7732_v28 = vsel %vm5874_vm1, %v7731_v0, %v7727_v37  ;;  %9568 = vst.msk [vmem:[#allocation2 + $0x78] sm:$0xf] %vm6417_vm12, %v9545_v51  ;;  %v9384_v20 = vsel %vm5874_vm1, %v9383_v35, %v9379_v1  ;;  %v9003_v55 = vpop.permute.xlu1 %9002  ;;  %v11384_v35 = vshll.u32 %v11336_v7, 16  ;;  %v10578_v0 = vld [vmem:[#allocation2 + $0x68] sm:$0xf]  ;;  %v11156_v15 = vshll.u32 %v11127_v10, 16 }
 0x87c   : > { %v7768_v39 = vpack.c.b16 %v7732_v28, %v7732_v28  ;;  %v20076_v3 = vpop.permute.xlu0 %9861  ;;  %v9544_v40 = vpack.c.b16 %v9384_v20, %v9384_v20  ;;  %v9504_v26 = vrot.slane %v9003_v55, %v18053_v24  ;;  %v11149_v24 = vrot.slane %v11147_v61, 4  ;;  %v11932_v1 = vld [vmem:[#allocation2 + $0x48] sm:$0xf] }
 0x87d   : > { %v11177_v61 = vrot.slane %v11175_v27, 4  ;;  %v20097_v37 = vrot.slane %v9724_v33, %v23135_v12  ;;  %v11184_v5 = vshll.u32 %v11131_v53, 16  ;;  %v11362_v2 = vshll.u32 %v11333_v54, 16  ;;  %v11933_v54 = vld [vmem:[#allocation2 + $0x4c] sm:$0x1] }
 0x87e   : > { %v7792_v45 = vsel %vm18284_vm15, %v7768_v39, %v7791_v59  ;;  %v9566_v30 = vsel %vm18284_vm15, %v9544_v40, %v9565_v21  ;;  %v9505_v36 = vsel %vm5867_vm0, %v9504_v26, %v9500_v19  ;;  %v11153_v14 = vor.u32 %v11152_v16, %v11149_v24  ;;  %v11337_v39 = vld [vmem:[#allocation2 + $0x3c] sm:$0x1]  ;;  %v23295_v24 = vld [vmem:[#allocation75_spill] sm:$0xff] }
 0x87f   : > { %7793 = vst [vmem:[#allocation2 + $0x5c] sm:$0x1] %v7792_v45  ;;  %9567 = vst [vmem:[#allocation2 + $0x74] sm:$0x1] %v9566_v30  ;;  %v10430_v8 = vld [vmem:[#allocation2 + $0x58] sm:$0xf]  ;;  %v9006_v43 = vpop.permute.xlu1 %9005  ;;  %v12179_v55 = vor.u32 %v12178_v46, %v12175_v62  ;;  %v9781_v34 = vcombine.low %v20097_v37, %v20091_v18  ;;  %v11359_v11 = vor.u32 %v11358_v48, %v11355_v29 }
 0x880   : > { %10441 = vrot.lane.b32.xlu1 %v10430_v8, %s13665_s27  ;;  %v9509_v41 = vrot.slane %v9006_v43, %v18062_v31  ;;  %v20087_v56 = vpop.permute.xlu0 %9865  ;;  %v11180_v31 = vrot.slane %v11178_v58, 5  ;;  %v11386_v59 = vrot.slane %v11384_v35, 5  ;;  %v11953_v26 = vshrl.u32 %v11932_v1, 16 }
 0x881   : > { %v11956_v38 = vshll.u32 %v11932_v1, 16  ;;  %v11158_v45 = vrot.slane %v11156_v15, 5  ;;  %v11154_v27 = vrot.slane %v11153_v14, 4  ;;  %v11186_v58 = vrot.slane %v11184_v5, 5  ;;  %v11936_v5 = vld [vmem:[#allocation2 + $0x58] sm:$0xf] }
 0x882   : > { %v9510_v17 = vsel %vm5874_vm1, %v9509_v41, %v9505_v36  ;;  %v20100_v28 = vld [vmem:[#allocation2 + $0x78] sm:$0xf]  ;;  %v11181_v40 = vor.u32 %v11180_v31, %v11177_v61  ;;  %v11364_v52 = vrot.slane %v11362_v2, 5  ;;  %v11387_v19 = vor.u32 %v11386_v59, %v11383_v44 }
 0x883   : > { %v9546_v51 = vpack.c.b16 %v9510_v17, %v9510_v17  ;;  %v20094_v13 = vpop.permute.xlu1 %9863  ;;  %v10580_v20 = vld [vmem:[#allocation2 + $0x78] sm:$0xf]  ;;  %v10301_v30 = vpack.i.b16 %v20100_v28, %v10291_v25  ;;  %v12180_v8 = vrot.slane %v12179_v55, 4  ;;  %v20113_v16 = vrot.slane %v9781_v34, %v23295_v24 }
 0x884   : > { %10587 = vrot.lane.b32.xlu1 %v10578_v0, %s13665_s27  ;;  %v20106_v60 = vpop.permute.xlu0 %10011  ;;  %v11390_v33 = vshll.u32 %v11337_v39, 16  ;;  %v11182_v41 = vrot.slane %v11181_v40, 4  ;;  %v11360_v10 = vrot.slane %v11359_v11, 4  ;;  %v20115_v29 = vrot.slane %v11953_v26, 4 }
 0x885   : > { %v9570_v21 = vsel %vm18284_vm15, %v9546_v51, %v9569_v50  ;;  %v11958_v32 = vrot.slane %v11956_v38, 5  ;;  %v11159_v35 = vsel %vm19814_vm4, %v11154_v27, %v11158_v45  ;;  %v23296_v50 = vld [vmem:[#allocation92_spill] sm:$0xff]  ;;  %v12969_v48 = vcombine.low %v20113_v16, %v20113_v16 }
 0x886   : > { %9571 = vst [vmem:[#allocation2 + $0x7c] sm:$0x1] %v9570_v21  ;;  %v12141_v42 = vld [vmem:[#allocation2 + $0x74] sm:$0x1]  ;;  %v11187_v62 = vsel %vm19814_vm4, %v11182_v41, %v11186_v58  ;;  %v11365_v46 = vsel %vm19814_vm4, %v11360_v10, %v11364_v52  ;;  %v9638_v17 = vcombine.low %v23296_v50, %v19151_v57  ;;  %v11388_v0 = vrot.slane %v11387_v19, 4 }
 0x887   : > { %v20108_v7 = vpop.permute.xlu1 %9867  ;;  %v12182_v4 = vshll.u32 %v12141_v42, 16  ;;  %v11392_v51 = vrot.slane %v11390_v33, 5  ;;  %v10022_v14 = vshrl.u32 %v20106_v60, 16  ;;  %v11959_v1 = vor.u32 %v11958_v32, %v20115_v29  ;;  %v12138_v21 = vld [vmem:[#allocation2 + $0x68] sm:$0xf] }
 0x888   : > { %10591 = vrot.lane.b32.xlu1 %v10580_v20, %s13665_s27  ;;  %v20130_v61 = vpop.permute.xlu0 %10015  ;;  %v9877_v15 = vpack.i.b16 %v20108_v7, %v20087_v56  ;;  %v10296_v2 = vshrl.u32 %v19620_v23, 16  ;;  %v11962_v59 = vshll.u32 %v11933_v54, 16  ;;  %v10297_v20 = vshrl.u32 %v19618_v63, 16  ;;  %v11937_v41 = vld [vmem:[#allocation2 + $0x5c] sm:$0x1] }
 0x889   : > { %v12184_v43 = vrot.slane %v12182_v4, 5  ;;  %v10303_v55 = vshrl.u32 %v20100_v28, 16  ;;  %v20146_v34 = vrot.slane %v10301_v30, %v23135_v12  ;;  %v10028_v39 = vshrl.u32 %v20130_v61, 16  ;;  %v12142_v54 = vld [vmem:[#allocation2 + $0x78] sm:$0xf] }
 0x88a   : > { %v9871_v40 = vpack.i.b16 %v20094_v13, %v20076_v3  ;;  %v11981_v26 = vshrl.u32 %v11936_v5, 16  ;;  %v11984_v38 = vshll.u32 %v11936_v5, 16  ;;  %v10302_v45 = vshrl.u32 %v10291_v25, 16  ;;  %v12139_v5 = vld [vmem:[#allocation2 + $0x6c] sm:$0x1] }
 0x88b   : > { %v20119_v36 = vpop.permute.xlu1 %10013  ;;  %v12185_v53 = vsel %vm19814_vm4, %v12180_v8, %v12184_v43  ;;  %v23297_v28 = vpack.i.b16 %v19618_v63, %v19620_v23  ;;  %v9879_v30 = vshrl.u32 %v20108_v7, 16  ;;  %v20162_v27 = vrot.slane %v9877_v15, %v23135_v12 }
 0x88c   : > { %11190 = vrot.lane.b32.xlu1 %v11159_v35, %s13665_s27  ;;  %v10023_v31 = vshrl.u32 %v20119_v36, 16  ;;  %12204 = vrot.lane.b32.xlu0 %v12185_v53, %s13665_s27  ;;  %v12159_v52 = vshrl.u32 %v12138_v21, 16  ;;  %v9878_v19 = vshrl.u32 %v20087_v56, 16  ;;  %v12162_v8 = vshll.u32 %v12138_v21, 16 }
 0x88d   : > { %v20158_v4 = vrot.slane %v23297_v28, %v23135_v12  ;;  %v10304_v43 = vpack.i.b16 %v10303_v55, %v10302_v45  ;;  %v9873_v33 = vshrl.u32 %v20094_v13, 16  ;;  %v20169_v63 = vrot.slane %v9871_v40, %v23135_v12  ;;  %v12143_v28 = vld [vmem:[#allocation2 + $0x7c] sm:$0x1] }
 0x88e   : > { %v10024_v42 = vpack.i.b16 %v10023_v31, %v10022_v14  ;;  %v11964_v56 = vrot.slane %v11962_v59, 5  ;;  %v11983_v10 = vrot.slane %v11981_v26, 4  ;;  %v11986_v29 = vrot.slane %v11984_v38, 5 }
 0x88f   : > { %v20141_v44 = vpop.permute.xlu1 %10017  ;;  %v10321_v25 = vcombine.low %v20158_v4, %v20146_v34  ;;  %v10298_v32 = vpack.i.b16 %v10297_v20, %v10296_v2  ;;  %v9872_v35 = vshrl.u32 %v20076_v3, 16  ;;  %v9880_v53 = vpack.i.b16 %v9879_v30, %v9878_v19 }
 0x890   : > { %11194 = vrot.lane.b32.xlu1 %v11187_v62, %s13665_s27  ;;  %v10029_v11 = vshrl.u32 %v20141_v44, 16  ;;  %9802 = vrot.lane.b32.xlu0 %v12969_v48, %s13687_s12  ;;  %v20172_v23 = vrot.slane %v10024_v42, %v23135_v12  ;;  %v9897_v13 = vcombine.low %v20169_v63, %v20162_v27  ;;  %v11393_v31 = vsel %vm19814_vm4, %v11388_v0, %v11392_v51 }
 0x891   : > { %v11960_v48 = vrot.slane %v11959_v1, 4  ;;  %v20186_v14 = vrot.slane %v10304_v43, %v23135_v12  ;;  %v9874_v15 = vpack.i.b16 %v9873_v33, %v9872_v35  ;;  %v12161_v2 = vrot.slane %v12159_v52, 4 }
 0x892   : > { %v10030_v58 = vpack.i.b16 %v10029_v11, %v10028_v39  ;;  %v12164_v59 = vrot.slane %v12162_v8, 5  ;;  %v11987_v21 = vor.u32 %v11986_v29, %v11983_v10  ;;  %v12187_v20 = vshrl.u32 %v12142_v54, 16 }
 0x893   : > { %v12190_v55 = vshll.u32 %v12142_v54, 16  ;;  %v20193_v39 = vrot.slane %v10298_v32, %v23135_v12  ;;  %v20196_v0 = vrot.slane %v9880_v53, %v23135_v12  ;;  %v11965_v51 = vsel %vm19814_vm4, %v11960_v48, %v11964_v56 }
 0x894   : > { %v20175_v7 = vrot.slane %v10030_v58, %v23135_v12  ;;  %11396 = vrot.lane.b32.xlu1 %v11365_v46, %s13665_s27  ;;  %v11990_v46 = vshll.u32 %v11937_v41, 16  ;;  %v20203_v40 = vrot.slane %v9897_v13, %v23295_v24  ;;  %v12168_v11 = vshll.u32 %v12139_v5, 16  ;;  %v23299_v13 = vld [vmem:[#allocation52_spill] sm:$0xff] }
 0x895   : > { %v10322_v26 = vcombine.high %v20158_v4, %v20146_v34  ;;  %v10356_v38 = vcombine.high %v20193_v39, %v20186_v14  ;;  %v9922_v45 = vrot.slane %v9874_v15, %v23135_v12  ;;  %v11988_v30 = vrot.slane %v11987_v21, 4 }
 0x896   : > { %v10081_v62 = vcombine.low %v20172_v23, %v20175_v7  ;;  %23298 = vst [vmem:[#allocation7_spill] sm:$0xff] %v20203_v40  ;;  %v11992_v42 = vrot.slane %v11990_v46, 5  ;;  %v12165_v58 = vor.u32 %v12164_v59, %v12161_v2  ;;  %v12189_v52 = vrot.slane %v12187_v20, 4 }
 0x897   : > { %v12192_v19 = vrot.slane %v12190_v55, 5  ;;  %v9931_v8 = vcombine.low %v9922_v45, %v20196_v0  ;;  %v13319_v43 = vcombine.high %v20203_v40, %v20203_v40  ;;  %v9646_v33 = vrot.slane %v9638_v17, %v23295_v24  ;;  %v23300_v17 = vld [vmem:[#allocation37_spill] sm:$0xff] }
 0x898   : > { %11400 = vrot.lane.b32.xlu1 %v11393_v31, %s13665_s27  ;;  %v20190_v3 = vrot.slane %v10081_v62, %v23295_v24  ;;  %v9727_v41 = vpack.i.b16 %v20051_v9, %v20061_v6  ;;  %v11993_v56 = vsel %vm19814_vm4, %v11988_v30, %v11992_v42  ;;  %v12170_v10 = vrot.slane %v12168_v11, 5 }
 0x899   : > { %v12196_v29 = vshll.u32 %v12143_v28, 16  ;;  %v9721_v32 = vpack.i.b16 %v20059_v49, %v20043_v47  ;;  %v12166_v35 = vrot.slane %v12165_v58, 4  ;;  %v12193_v53 = vor.u32 %v12192_v19, %v12189_v52 }
 0x89a   : > { %v12983_v1 = vcombine.low %v20190_v3, %v20190_v3  ;;  %v9604_v62 = vcombine.low %v23300_v17, %v23299_v13  ;;  %v10027_v9 = vpack.i.b16 %v20141_v44, %v20130_v61  ;;  %v12962_v6 = vcombine.low %v9646_v33, %v9646_v33 }
 0x89b   : > { %v9939_v54 = vrot.slane %v9931_v8, %v23295_v24  ;;  %v9746_v31 = vrot.slane %v9727_v41, %v23135_v12  ;;  %v12171_v48 = vsel %vm19814_vm4, %v12166_v35, %v12170_v10  ;;  %v12198_v46 = vrot.slane %v12196_v29, 5 }
 0x89c   : > { %11996 = vrot.lane.b32.xlu1 %v11965_v51, %s13665_s27  ;;  %10102 = vrot.lane.b32.xlu0 %v12983_v1, %s13687_s12  ;;  %v10021_v47 = vpack.i.b16 %v20119_v36, %v20106_v60  ;;  %v9738_v49 = vrot.slane %v9721_v32, %v23135_v12  ;;  %v12194_v15 = vrot.slane %v12193_v53, 4  ;;  %v20241_v61 = vrot.slane %v9604_v62, %v23295_v24 }
 0x89d   : > { %v9898_v44 = vcombine.high %v20169_v63, %v20162_v27  ;;  %v10046_v5 = vrot.slane %v10027_v9, %v23135_v12  ;;  %v13320_v2 = vcombine.high %v9939_v54, %v9939_v54  ;;  %v12976_v55 = vcombine.low %v9939_v54, %v9939_v54 }
 0x89e   : > { %23301 = vst [vmem:[#allocation89_spill] sm:$0xff] %v20241_v61  ;;  %v9747_v59 = vcombine.low %v9738_v49, %v9746_v31  ;;  %v12199_v60 = vsel %vm19814_vm4, %v12194_v15, %v12198_v46  ;;  %v10038_v36 = vrot.slane %v10021_v47, %v23135_v12  ;;  %v13311_v21 = vcombine.high %v20241_v61, %v20241_v61  ;;  %v11735_v61 = vld [vmem:[#allocation2 + $0x6c] sm:$0x1] }
 0x89f   : > { %v20257_v63 = vrot.slane %v9898_v44, %v23295_v24  ;;  %v9932_v51 = vcombine.high %v9922_v45, %v20196_v0  ;;  %v13312_v30 = vcombine.high %v9646_v33, %v9646_v33  ;;  %v10355_v45 = vcombine.low %v20193_v39, %v20186_v14 }
 0x8a0   : > { %12000 = vrot.lane.b32.xlu1 %v11993_v56, %s13665_s27  ;;  %9957 = vrot.lane.b32.xlu0 %v13319_v43, %s13688_s13  ;;  %v10047_v20 = vcombine.low %v10038_v36, %v10046_v5  ;;  %v20254_v27 = vrot.slane %v9747_v59, %v23295_v24  ;;  %v13316_v58 = vcombine.high %v20113_v16, %v20113_v16  ;;  %vm9691_vm0 = vcmask 130048  }
 0x8a1   : > { %v12979_v11 = vcombine.low %v20257_v63, %v20257_v63  ;;  %v20274_v0 = vrot.slane %v9932_v51, %v23295_v24  ;;  %v9748_v19 = vcombine.high %v9738_v49, %v9746_v31  ;;  %v20285_v8 = vrot.slane %v10355_v45, %v23295_v24 }
 0x8a2   : > { %v13315_v1 = vcombine.high %v20254_v27, %v20254_v27  ;;  %v20265_v42 = vrot.slane %v10047_v20, %v23295_v24  ;;  %v10048_v43 = vcombine.high %v10038_v36, %v10046_v5  ;;  %v13324_v33 = vcombine.high %v20190_v3, %v20190_v3 }
 0x8a3   : > { %v12980_v52 = vcombine.low %v20274_v0, %v20274_v0  ;;  %v20292_v41 = vrot.slane %v9748_v19, %v23295_v24  ;;  %v12997_v16 = vcombine.low %v20285_v8, %v20285_v8  ;;  %v9782_v29 = vcombine.high %v20097_v37, %v20091_v18  ;;  %v10436_v37 = vpop.permute.xlu0 %10435 }
 0x8a4   : > { %12202 = vrot.lane.b32.xlu1 %v12171_v48, %s13665_s27  ;;  %9659 = vrot.lane.b32.xlu0 %v12962_v6, %s13687_s12  ;;  %23302 = vst [vmem:[#allocation142_spill] sm:$0xff] %v20265_v42  ;;  %v13323_v28 = vcombine.high %v20265_v42, %v20265_v42  ;;  %v20301_v10 = vrot.slane %v10048_v43, %v23295_v24  ;;  %v10446_v6 = vshrl.u32 %v10436_v37, 16  ;;  %vm9695_vm1 = vcmask 261120  }
 0x8a5   : > { %v12972_v56 = vcombine.low %v20292_v41, %v20292_v41  ;;  %v10082_v3 = vcombine.high %v20172_v23, %v20175_v7  ;;  %v20311_v35 = vrot.slane %v9782_v29, %v23295_v24  ;;  %v10438_v23 = vpop.permute.xlu1 %10437  ;;  %v23303_v45 = vcombine.high %v23300_v17, %v23299_v13 }
 0x8a6   : > { %v12986_v32 = vcombine.low %v20301_v10, %v20301_v10  ;;  %v10447_v9 = vshrl.u32 %v10438_v23, 16  ;;  %vm9704_vm7 = vcmask 654336   ;;  %vm9710_vm8 = vcmask 916480  }
 0x8a7   : > { %v12973_v53 = vcombine.low %v20311_v35, %v20311_v35  ;;  %v20317_v62 = vrot.slane %v10082_v3, %v23295_v24  ;;  %v10445_v3 = vpack.i.b16 %v10438_v23, %v10436_v37  ;;  %v10156_v37 = vld [vmem:[#allocation2 + $0x58] sm:$0xf]  ;;  %vm9707_vm9 = vcmask 785408  }
 0x8a8   : > { %12206 = vrot.lane.b32.xlu1 %v12199_v60, %s13665_s27  ;;  %9962 = vrot.lane.b32.xlu0 %v13320_v2, %s13689_s14  ;;  %s13690_s27 = smov 64   ;;  %v10448_v31 = vpack.i.b16 %v10447_v9, %v10446_v6 }
 0x8a9   : > { %v12987_v18 = vcombine.low %v20317_v62, %v20317_v62  ;;  %v20380_v23 = vrot.slane %v10445_v3, %v23135_v12 }
 0x8aa   : > { %v20324_v44 = vrot.slane %v10448_v31, %v23135_v12 }
 0x8ac   : > { %9952 = vrot.lane.b32.xlu1 %v12976_v55, %s13687_s12  ;;  %9664 = vrot.lane.b32.xlu0 %v13311_v21, %s13688_s13 }
 0x8b0   : > { %9807 = vrot.lane.b32.xlu1 %v13315_v1, %s13688_s13  ;;  %9967 = vrot.lane.b32.xlu0 %v12979_v11, %s13690_s27 }
 0x8b4   : > { %10107 = vrot.lane.b32.xlu1 %v13323_v28, %s13688_s13  ;;  %9669 = vrot.lane.b32.xlu0 %v13312_v30, %s13689_s14 }
 0x8b8   : > { %9812 = vrot.lane.b32.xlu1 %v13316_v58, %s13689_s14  ;;  %9972 = vrot.lane.b32.xlu0 %v12980_v52, %s13691_s24  ;;  %v20340_v58 = vrot.slane %v23303_v45, %v23295_v24  ;;  %v23307_v45 = vcombine.high %v23296_v50, %v19151_v57 }
 0x8ba   : > { %v12965_v13 = vcombine.low %v20340_v58, %v20340_v58 }
 0x8bc   : > { %10112 = vrot.lane.b32.xlu1 %v13324_v33, %s13689_s14  ;;  %10376 = vrot.lane.b32.xlu0 %v12997_v16, %s13687_s12 }
 0x8bd   : > { %v10440_v7 = vpop.permute.xlu0 %10439 }
 0x8be   : > { %v10452_v48 = vshrl.u32 %v10440_v7, 16 }
 0x8c0   : > { %9817 = vrot.lane.b32.xlu1 %v12972_v56, %s13690_s27 }
 0x8c1   : > { %v10586_v47 = vpop.permute.xlu0 %10585 }
 0x8c2   : > { %v10596_v60 = vshrl.u32 %v10586_v47, 16 }
 0x8c4   : > { %10117 = vrot.lane.b32.xlu1 %v12986_v32, %s13690_s27 }
 0x8c5   : > { %v10590_v2 = vpop.permute.xlu0 %10589 }
 0x8c6   : > { %v10602_v20 = vshrl.u32 %v10590_v2, 16 }
 0x8c8   : > { %9822 = vrot.lane.b32.xlu1 %v12973_v53, %s13691_s24  ;;  %v13321_v53 = vcombine.high %v20257_v63, %v20257_v63 }
 0x8cc   : > { %10122 = vrot.lane.b32.xlu1 %v12987_v18, %s13691_s24 }
 0x8f2   : > { %v10442_v54 = vpop.permute.xlu1 %10441 }
 0x8f3   : > { %v10453_v46 = vshrl.u32 %v10442_v54, 16  ;;  %v10451_v17 = vpack.i.b16 %v10442_v54, %v10440_v7  ;;  %v20373_v7 = vrot.slane %v10321_v25, %v23295_v24  ;;  %v10154_v54 = vld [vmem:[#allocation2 + $0x48] sm:$0xf]  ;;  %v10155_v25 = vld [vmem:[#allocation2 + $0x50] sm:$0xf] }
 0x8f5   : > { %v10454_v49 = vpack.i.b16 %v10453_v46, %v10452_v48  ;;  %23304 = vst [vmem:[#allocation60_spill] sm:$0xff] %v20373_v7  ;;  %v20376_v9 = vrot.slane %v10451_v17, %v23135_v12  ;;  %v13331_v63 = vcombine.high %v20373_v7, %v20373_v7  ;;  %v13317_v48 = vcombine.high %v20292_v41, %v20292_v41 }
 0x8f6   : > { %v10588_v15 = vpop.permute.xlu1 %10587  ;;  %v10167_v46 = vshrl.u32 %v10156_v37, 16 }
 0x8f7   : > { %v20327_v5 = vrot.slane %v10454_v49, %v23135_v12  ;;  %v10597_v59 = vshrl.u32 %v10588_v15, 16  ;;  %v10595_v52 = vpack.i.b16 %v10588_v15, %v10586_v47  ;;  %v10471_v31 = vcombine.low %v20380_v23, %v20376_v9  ;;  %v10153_v47 = vld [vmem:[#allocation2 + $0x40] sm:$0xf] }
 0x8f8   : > { %v10161_v49 = vshrl.u32 %v10154_v54, 16  ;;  %v10166_v15 = vshrl.u32 %v10155_v25, 16  ;;  %v10160_v41 = vshrl.u32 %v10153_v47, 16 }
 0x8f9   : > { %v10505_v36 = vcombine.low %v20324_v44, %v20327_v5  ;;  %v10598_v55 = vpack.i.b16 %v10597_v59, %v10596_v60  ;;  %v20357_v56 = vrot.slane %v10595_v52, %v23135_v12  ;;  %v13325_v60 = vcombine.high %v20301_v10, %v20301_v10 }
 0x8fa   : > { %v10592_v21 = vpop.permute.xlu1 %10591  ;;  %v20413_v52 = vrot.slane %v23307_v45, %v23295_v24 }
 0x8fb   : > { %v10603_v51 = vshrl.u32 %v10592_v21, 16  ;;  %v20332_v1 = vrot.slane %v10505_v36, %v23295_v24  ;;  %v10601_v11 = vpack.i.b16 %v10592_v21, %v10590_v2  ;;  %v20343_v19 = vrot.slane %v10598_v55, %v23135_v12  ;;  %v10926_v55 = vld [vmem:[#allocation2 + $0x20] sm:$0xf] }
 0x8fc   : > { %v20401_v36 = vrot.slane %v10471_v31, %v23295_v24  ;;  %v10168_v21 = vpack.i.b16 %v10167_v46, %v10166_v15  ;;  %v10935_v3 = vshrl.u32 %v10926_v55, 16  ;;  %v10933_v15 = vld [vmem:[#allocation2 + $0x3c] sm:$0x1] }
 0x8fd   : > { %v10604_v28 = vpack.i.b16 %v10603_v51, %v10602_v20  ;;  %v13004_v30 = vcombine.low %v20332_v1, %v20332_v1  ;;  %v20350_v33 = vrot.slane %v10601_v11, %v23135_v12  ;;  %v10162_v20 = vpack.i.b16 %v10161_v49, %v10160_v41  ;;  %v10930_v51 = vld [vmem:[#allocation2 + $0x30] sm:$0xf] }
 0x8fe   : > { %v20394_v2 = vpop.permute.xlu1 %11190  ;;  %23306 = vst [vmem:[#allocation50_spill] sm:$0xff] %v20401_v36  ;;  %v13318_v11 = vcombine.high %v20311_v35, %v20311_v35  ;;  %v13335_v10 = vcombine.high %v20401_v36, %v20401_v36  ;;  %v10159_v35 = vpack.i.b16 %v10154_v54, %v10153_v47  ;;  %v10966_v50 = vshll.u32 %v10930_v51, 16 }
 0x8ff   : > { %v20346_v43 = vrot.slane %v10604_v28, %v23135_v12  ;;  %10526 = vrot.lane.b32.xlu1 %v13004_v30, %s13687_s12  ;;  %v10621_v32 = vcombine.low %v20357_v56, %v20350_v33  ;;  %v10165_v28 = vpack.i.b16 %v10156_v37, %v10155_v25  ;;  %v10932_v30 = vld [vmem:[#allocation2 + $0x38] sm:$0xf]  ;;  %v20425_v57 = vrot.slane %v10162_v20, %v23135_v12 }
 0x900   : > { %v10977_v37 = vshrl.u32 %v10932_v30, 16  ;;  %v13326_v25 = vcombine.high %v20317_v62, %v20317_v62  ;;  %v20438_v49 = vrot.slane %v10159_v35, %v23135_v12  ;;  %v10927_v62 = vld [vmem:[#allocation2 + $0x24] sm:$0x1]  ;;  %v13322_v35 = vcombine.high %v20274_v0, %v20274_v0 }
 0x901   : > { %v10655_v16 = vcombine.low %v20343_v19, %v20346_v43  ;;  %v20386_v6 = vrot.slane %v10621_v32, %v23295_v24  ;;  %v10938_v32 = vshll.u32 %v10926_v55, 16  ;;  %v20430_v31 = vrot.slane %v10165_v28, %v23135_v12 }
 0x902   : > { %v20418_v17 = vpop.permute.xlu1 %11194  ;;  %v10979_v20 = vrot.slane %v10977_v37, 4  ;;  %v10656_v34 = vcombine.high %v20343_v19, %v20346_v43 }
 0x903   : > { %9674 = vrot.lane.b32.xlu1 %v12965_v13, %s13690_s27  ;;  %v20361_v29 = vrot.slane %v10655_v16, %v23295_v24  ;;  %23305 = vst [vmem:[#allocation31_spill] sm:$0xff] %v20386_v6  ;;  %v13339_v59 = vcombine.high %v20386_v6, %v20386_v6  ;;  %v20416_v16 = vrot.slane %v10168_v21, %v23135_v12  ;;  %v10928_v13 = vld [vmem:[#allocation2 + $0x28] sm:$0xf]  ;;  %v10968_v21 = vrot.slane %v10966_v50, 5 }
 0x904   : > { %v10949_v54 = vshrl.u32 %v10928_v13, 16  ;;  %v10952_v47 = vshll.u32 %v10928_v13, 16  ;;  %v10185_v28 = vcombine.low %v20438_v49, %v20430_v31 }
 0x905   : > { %v13011_v18 = vcombine.low %v20361_v29, %v20361_v29  ;;  %v10219_v46 = vcombine.low %v20425_v57, %v20416_v16  ;;  %v13340_v0 = vcombine.high %v20361_v29, %v20361_v29 }
 0x906   : > { %v10951_v45 = vrot.slane %v10949_v54, 4 }
 0x907   : > { %9977 = vrot.lane.b32.xlu1 %v13321_v53, %s13685_s11  ;;  %10676 = vrot.lane.b32.xlu0 %v13011_v18, %s13687_s12  ;;  %v10963_v53 = vshrl.u32 %v10930_v51, 16  ;;  %v20421_v18 = vpop.permute.xlu0 %11188  ;;  %v20441_v51 = vpop.permute.xlu1 %11396 }
 0x909   : > { %v10965_v41 = vrot.slane %v10963_v53, 4  ;;  %v10986_v53 = vshll.u32 %v10933_v15, 16 }
 0x90b   : > { %10381 = vrot.lane.b32.xlu1 %v13331_v63, %s13688_s13  ;;  %9827 = vrot.lane.b32.xlu0 %v13317_v48, %s13685_s11  ;;  %v10980_v63 = vshll.u32 %v10932_v30, 16  ;;  %v12966_v48 = vcombine.low %v20413_v52, %v20413_v52  ;;  %v10929_v30 = vld [vmem:[#allocation2 + $0x2c] sm:$0x1]  ;;  %v20447_v13 = vpop.permute.xlu0 %11192 }
 0x90c   : > { %v10958_v37 = vshll.u32 %v10929_v30, 16  ;;  %v13336_v30 = vcombine.high %v20332_v1, %v20332_v1 }
 0x90d   : > { %v10982_v55 = vrot.slane %v10980_v63, 5  ;;  %v10969_v63 = vor.u32 %v10968_v21, %v10965_v41 }
 0x90f   : > { %10681 = vrot.lane.b32.xlu1 %v13339_v59, %s13688_s13  ;;  %10127 = vrot.lane.b32.xlu0 %v13325_v60, %s13685_s11  ;;  %v10937_v59 = vrot.slane %v10935_v3, 4  ;;  %v10940_v60 = vrot.slane %v10938_v32, 5  ;;  %v20452_v3 = vrot.slane %v10219_v46, %v23295_v24  ;;  %v10954_v32 = vrot.slane %v10952_v47, 5  ;;  %v20468_v21 = vpop.permute.xlu0 %11394 }
 0x910   : > { %v10983_v54 = vor.u32 %v10982_v55, %v10979_v20  ;;  %v20461_v46 = vrot.slane %v10185_v28, %v23295_v24  ;;  %v10970_v29 = vrot.slane %v10969_v63, 4  ;;  %v11206_v55 = vshrl.u32 %v20418_v17, 16 }
 0x911   : > { %v10941_v50 = vor.u32 %v10940_v60, %v10937_v59  ;;  %v12990_v47 = vcombine.low %v20452_v3, %v20452_v3  ;;  %v10955_v15 = vor.u32 %v10954_v32, %v10951_v45  ;;  %v10988_v59 = vrot.slane %v10986_v53, 5  ;;  %v20465_v60 = vpop.permute.xlu1 %11400  ;;  %v10727_v53 = vld [vmem:[#allocation2] sm:$0xf] }
 0x912   : > { %23308 = vst [vmem:[#allocation93_spill] sm:$0xff] %v20461_v46  ;;  %v10984_v20 = vrot.slane %v10983_v54, 4  ;;  %v11200_v32 = vshrl.u32 %v20394_v2, 16 }
 0x913   : > { %9832 = vrot.lane.b32.xlu1 %v13318_v11, %s13676_s23  ;;  %10531 = vrot.lane.b32.xlu0 %v13335_v10, %s13688_s13  ;;  %v13332_v11 = vcombine.high %v20285_v8, %v20285_v8  ;;  %v10931_v10 = vld [vmem:[#allocation2 + $0x34] sm:$0x1]  ;;  %v10944_v8 = vshll.u32 %v10927_v62, 16  ;;  %v10942_v62 = vrot.slane %v10941_v50, 4 }
 0x914   : > { %v20481_v45 = vsel %vm19814_vm4, %v10984_v20, %v10988_v59  ;;  %v20515_v59 = vrot.slane %v10322_v26, %v23295_v24  ;;  %v20533_v26 = vrot.slane %v10356_v38, %v23295_v24  ;;  %v11412_v20 = vshrl.u32 %v20465_v60, 16 }
 0x915   : > { %v10946_v41 = vrot.slane %v10944_v8, 5 }
 0x917   : > { %10132 = vrot.lane.b32.xlu1 %v13326_v25, %s13676_s23  ;;  %9679 = vrot.lane.b32.xlu0 %v12966_v48, %s13691_s24  ;;  %v10972_v25 = vshll.u32 %v10931_v10, 16  ;;  %v10472_v48 = vcombine.high %v20380_v23, %v20376_v9  ;;  %v10960_v9 = vrot.slane %v10958_v37, 5  ;;  %v10956_v10 = vrot.slane %v10955_v15, 4 }
 0x918   : > { %v20489_v50 = vsel %vm19814_vm4, %v10942_v62, %v10946_v41  ;;  %v11199_v37 = vshrl.u32 %v20421_v18, 16  ;;  %v13313_v15 = vcombine.high %v20340_v58, %v20340_v58  ;;  %v10739_v62 = vshrl.u32 %v10727_v53, 16 }
 0x919   : > { %v10974_v23 = vrot.slane %v10972_v25, 5  ;;  %v20475_v28 = vrot.slane %v10472_v48, %v23295_v24  ;;  %v20493_v1 = vsel %vm19814_vm4, %v10956_v10, %v10960_v9  ;;  %v20500_v25 = vpop.permute.xlu1 %11996  ;;  %v11000_v48 = vshrl.u32 %v20481_v45, 16 }
 0x91a   : > { %v11201_v41 = vpack.i.b16 %v11200_v32, %v11199_v37  ;;  %v10994_v9 = vshrl.u32 %v20493_v1, 16  ;;  %v13314_v58 = vcombine.high %v20413_v52, %v20413_v52  ;;  %v13000_v52 = vcombine.low %v20515_v59, %v20515_v59  ;;  %v10731_v32 = vld [vmem:[#allocation2 + $0x10] sm:$0xf] }
 0x91b   : > { %10386 = vrot.lane.b32.xlu1 %v13332_v11, %s13689_s14  ;;  %9982 = vrot.lane.b32.xlu0 %v13322_v35, %s13676_s23  ;;  %v13327_v11 = vcombine.high %v20461_v46, %v20461_v46  ;;  %v11205_v35 = vshrl.u32 %v20447_v13, 16  ;;  %v20497_v8 = vsel %vm19814_vm4, %v10970_v29, %v10974_v23  ;;  %v13007_v54 = vcombine.low %v20475_v28, %v20475_v28 }
 0x91c   : > { %v10999_v29 = vshrl.u32 %v20497_v8, 16  ;;  %v10742_v23 = vshll.u32 %v10727_v53, 16  ;;  %v20542_v19 = vrot.slane %v11201_v41, %v23135_v12  ;;  %v20547_v14 = vrot.slane %v10739_v62, 4 }
 0x91d   : > { %v11207_v63 = vpack.i.b16 %v11206_v55, %v11205_v35  ;;  %v20544_v43 = vpop.permute.xlu1 %12000  ;;  %v11406_v10 = vshrl.u32 %v20441_v51, 16  ;;  %v10729_v35 = vld [vmem:[#allocation2 + $0x8] sm:$0xf]  ;;  %v13001_v37 = vcombine.low %v20533_v26, %v20533_v26 }
 0x91e   : > { %v20549_v39 = vrot.slane %v10742_v23, 5  ;;  %v10756_v23 = vshll.u32 %v10729_v35, 16 }
 0x91f   : > { %10686 = vrot.lane.b32.xlu1 %v13340_v0, %s13689_s14  ;;  %10240 = vrot.lane.b32.xlu0 %v12990_v47, %s13687_s12  ;;  %v20505_v0 = vpop.permute.xlu0 %11398  ;;  %v10622_v47 = vcombine.high %v20357_v56, %v20350_v33  ;;  %v10993_v33 = vshrl.u32 %v20489_v50, 16  ;;  %v20527_v4 = vrot.slane %v11207_v63, %v23135_v12  ;;  %v11001_v56 = vpack.i.b16 %v11000_v48, %v10999_v29  ;;  %v10733_v48 = vld [vmem:[#allocation2 + $0x18] sm:$0xf] }
 0x920   : > { %v11411_v38 = vshrl.u32 %v20505_v0, 16  ;;  %v20561_v63 = vrot.slane %v10656_v34, %v23295_v24  ;;  %v10753_v29 = vshrl.u32 %v10729_v35, 16  ;;  %v10770_v34 = vshll.u32 %v10731_v32, 16 }
 0x921   : > { %v20539_v55 = vrot.slane %v10622_v47, %v23295_v24  ;;  %v11258_v53 = vcombine.low %v20542_v19, %v20527_v4  ;;  %v11405_v47 = vshrl.u32 %v20468_v21, 16  ;;  %v20576_v46 = vpop.permute.xlu1 %12202  ;;  %v13328_v35 = vcombine.high %v20452_v3, %v20452_v3  ;;  %v10730_v3 = vld [vmem:[#allocation2 + $0xc] sm:$0x1] }
 0x922   : > { %v11413_v62 = vpack.i.b16 %v11412_v20, %v11411_v38  ;;  %v10186_v20 = vcombine.high %v20438_v49, %v20430_v31  ;;  %v10992_v31 = vpack.i.b16 %v20493_v1, %v20489_v50  ;;  %v10734_v49 = vld [vmem:[#allocation2 + $0x1c] sm:$0x1] }
 0x923   : > { %10245 = vrot.lane.b32.xlu1 %v13327_v11, %s13688_s13  ;;  %10536 = vrot.lane.b32.xlu0 %v13336_v30, %s13689_s14  ;;  %v10995_v11 = vpack.i.b16 %v10994_v9, %v10993_v33  ;;  %v20552_v30 = vpop.permute.xlu0 %11994  ;;  %v13014_v41 = vcombine.low %v20539_v55, %v20539_v55  ;;  %v11407_v33 = vpack.i.b16 %v11406_v10, %v11405_v47  ;;  %v10772_v47 = vrot.slane %v10770_v34, 5 }
 0x924   : > { %v20590_v10 = vrot.slane %v11413_v62, %v23135_v12  ;;  %v20611_v50 = vrot.slane %v10186_v20, %v23295_v24  ;;  %v10745_v20 = vor.u32 %v20549_v39, %v20547_v14  ;;  %v11204_v14 = vpack.i.b16 %v20418_v17, %v20447_v13 }
 0x925   : > { %v20573_v9 = vrot.slane %v10995_v11, %v23135_v12  ;;  %v10998_v11 = vpack.i.b16 %v20481_v45, %v20497_v8  ;;  %v10755_v45 = vrot.slane %v10753_v29, 4  ;;  %v10758_v8 = vrot.slane %v10756_v23, 5  ;;  %v10728_v29 = vld [vmem:[#allocation2 + $0x4] sm:$0x1]  ;;  %v10732_v23 = vld [vmem:[#allocation2 + $0x14] sm:$0x1] }
 0x926   : > { %v10776_v36 = vshll.u32 %v10732_v23, 16 }
 0x927   : > { %10541 = vrot.lane.b32.xlu1 %v13007_v54, %s13690_s27  ;;  %9684 = vrot.lane.b32.xlu0 %v13313_v15, %s13685_s11  ;;  %v20564_v54 = vrot.slane %v11001_v56, %v23135_v12  ;;  %v10506_v15 = vcombine.high %v20324_v44, %v20327_v5  ;;  %v10781_v56 = vshrl.u32 %v10733_v48, 16  ;;  %v13015_v44 = vcombine.low %v20561_v63, %v20561_v63  ;;  %v20587_v38 = vpop.permute.xlu0 %11998 }
 0x928   : > { %v20581_v5 = vrot.slane %v11258_v53, %v23295_v24  ;;  %v20614_v1 = vrot.slane %v10998_v11, %v23135_v12  ;;  %v10762_v11 = vshll.u32 %v10730_v3, 16  ;;  %v10778_v13 = vrot.slane %v10776_v36, 5 }
 0x929   : > { %v11052_v53 = vcombine.low %v20573_v9, %v20564_v54 }
 0x92b   : > { %9689 = vrot.lane.b32.xlu1 %v13314_v58, %s13676_s23  ;;  %10391 = vrot.lane.b32.xlu0 %v13000_v52, %s13690_s27  ;;  %v10767_v58 = vshrl.u32 %v10731_v32, 16  ;;  %v10784_v52 = vshll.u32 %v10733_v48, 16  ;;  %v20595_v32 = vrot.slane %v10506_v15, %v23295_v24  ;;  %v20603_v48 = vrot.slane %v11407_v33, %v23135_v12 }
 0x92c   : > { %v10783_v15 = vrot.slane %v10781_v56, 4  ;;  %v20621_v34 = vrot.slane %v11052_v53, %v23295_v24  ;;  %v20625_v56 = vpop.permute.xlu1 %12206  ;;  %v10748_v53 = vshll.u32 %v10728_v29, 16 }
 0x92d   : > { %v10786_v62 = vrot.slane %v10784_v52, 5  ;;  %v13008_v33 = vcombine.low %v20595_v32, %v20595_v32  ;;  %v20629_v52 = vrot.slane %v10992_v31, %v23135_v12 }
 0x92e   : > { %v13025_v39 = vcombine.low %v20621_v34, %v20621_v34  ;;  %v13348_v7 = vcombine.high %v20621_v34, %v20621_v34 }
 0x92f   : > { %10396 = vrot.lane.b32.xlu1 %v13001_v37, %s13691_s24  ;;  %10691 = vrot.lane.b32.xlu0 %v13014_v41, %s13690_s27  ;;  %v10769_v37 = vrot.slane %v10767_v58, 4  ;;  %v11410_v41 = vpack.i.b16 %v20465_v60, %v20505_v0  ;;  %v11464_v58 = vcombine.low %v20603_v48, %v20590_v10  ;;  %v10790_v60 = vshll.u32 %v10734_v49, 16 }
 0x930   : > { %v11404_v0 = vpack.i.b16 %v20441_v51, %v20468_v21  ;;  %v10787_v6 = vor.u32 %v10786_v62, %v10783_v15  ;;  %v12993_v21 = vcombine.low %v20611_v50, %v20611_v50  ;;  %v11018_v31 = vcombine.low %v20629_v52, %v20614_v1  ;;  %v20661_v23 = vpop.permute.xlu1 %9952 }
 0x931   : > { %v10773_v49 = vor.u32 %v10772_v47, %v10769_v37  ;;  %v20637_v51 = vrot.slane %v11410_v41, %v23135_v12  ;;  %v20648_v37 = vrot.slane %v11464_v58, %v23295_v24  ;;  %v10792_v3 = vrot.slane %v10790_v60, 5  ;;  %23309 = vst [vmem:[#allocation136_spill] sm:$0xff] %v20661_v23 }
 0x932   : > { %v20651_v47 = vrot.slane %v11404_v0, %v23135_v12  ;;  %v10746_v15 = vrot.slane %v10745_v20, 4  ;;  %v10764_v62 = vrot.slane %v10762_v11, 5  ;;  %v10788_v41 = vrot.slane %v10787_v6, 4 }
 0x933   : > { %10696 = vrot.lane.b32.xlu1 %v13015_v44, %s13691_s24  ;;  %10250 = vrot.lane.b32.xlu0 %v13328_v35, %s13689_s14  ;;  %v13032_v44 = vcombine.low %v20581_v5, %v20581_v5  ;;  %v20633_v35 = vpop.permute.xlu0 %12200  ;;  %v10774_v17 = vrot.slane %v10773_v49, 4  ;;  %v13337_v58 = vcombine.high %v20475_v28, %v20475_v28  ;;  %v10750_v60 = vrot.slane %v10748_v53, 5 }
 0x934   : > { %v11430_v29 = vcombine.low %v20651_v47, %v20637_v51  ;;  %v10793_v6 = vsel %vm19814_vm4, %v10788_v41, %v10792_v3 }
 0x935   : > { %v10779_v20 = vsel %vm19814_vm4, %v10774_v17, %v10778_v13  ;;  %v10804_v49 = vshrl.u32 %v10793_v6, 16 }
 0x936   : > { %v20687_v53 = vrot.slane %v11430_v29, %v23295_v24  ;;  %v10220_v29 = vcombine.high %v20425_v57, %v20416_v16 }
 0x937   : > { %11279 = vrot.lane.b32.xlu1 %v13032_v44, %s13687_s12  ;;  %10546 = vrot.lane.b32.xlu0 %v13008_v33, %s13691_s24  ;;  %v10759_v44 = vor.u32 %v10758_v8, %v10755_v45  ;;  %v11198_v45 = vpack.i.b16 %v20394_v2, %v20421_v18  ;;  %v20656_v8 = vpop.permute.xlu0 %12204  ;;  %v20666_v33 = vrot.slane %v11018_v31, %v23295_v24 }
 0x938   : > { %v20669_v2 = vrot.slane %v11204_v14, %v23135_v12  ;;  %v13039_v18 = vcombine.low %v20648_v37, %v20648_v37  ;;  %23311 = vst [vmem:[#allocation56_spill] sm:$0xff] %v20687_v53  ;;  %v10751_v14 = vsel %vm19814_vm4, %v10746_v15, %v10750_v60  ;;  %v20724_v57 = vrot.slane %v10220_v29, %v23295_v24 }
 0x939   : > { %23310 = vst [vmem:[#allocation101_spill] sm:$0xff] %v20666_v33  ;;  %v10760_v36 = vrot.slane %v10759_v44, 4  ;;  %v20677_v0 = vrot.slane %v11198_v45, %v23135_v12  ;;  %v13347_v11 = vcombine.high %v20666_v33, %v20666_v33  ;;  %v13333_v44 = vcombine.high %v20515_v59, %v20515_v59 }
 0x93a   : > { %v13355_v45 = vcombine.high %v20687_v53, %v20687_v53  ;;  %v10797_v17 = vshrl.u32 %v10751_v14, 16  ;;  %v13341_v59 = vcombine.high %v20539_v55, %v20539_v55 }
 0x93b   : > { %10255 = vrot.lane.b32.xlu1 %v12993_v21, %s13690_s27  ;;  %11073 = vrot.lane.b32.xlu0 %v13025_v39, %s13687_s12  ;;  %v10765_v28 = vsel %vm19814_vm4, %v10760_v36, %v10764_v62  ;;  %v11224_v21 = vcombine.low %v20677_v0, %v20669_v2  ;;  %v20691_v31 = vpop.permute.xlu0 %9802  ;;  %v20697_v39 = vpop.permute.xlu1 %9807  ;;  %v10803_v62 = vshrl.u32 %v10779_v20, 16 }
 0x93c   : > { %v10798_v3 = vshrl.u32 %v10765_v28, 16  ;;  %v10796_v60 = vpack.i.b16 %v10765_v28, %v10751_v14  ;;  %v11734_v28 = vld [vmem:[#allocation2 + $0x68] sm:$0xf] }
 0x93d   : > { %v10805_v13 = vpack.i.b16 %v10804_v49, %v10803_v62  ;;  %v20708_v15 = vrot.slane %v11224_v21, %v23295_v24  ;;  %v11732_v49 = vld [vmem:[#allocation2 + $0x60] sm:$0xf]  ;;  %v11738_v21 = vld [vmem:[#allocation2 + $0x78] sm:$0xf]  ;;  %v11755_v29 = vshrl.u32 %v11734_v28, 16 }
 0x93e   : > { %v11744_v62 = vshll.u32 %v11732_v49, 16 }
 0x93f   : > { %10551 = vrot.lane.b32.xlu1 %v13337_v58, %s13685_s11  ;;  %11485 = vrot.lane.b32.xlu0 %v13039_v18, %s13687_s12  ;;  %v20703_v41 = vpop.permute.xlu0 %10102  ;;  %23312 = vst [vmem:[#allocation138_spill] sm:$0xff] %v20708_v15  ;;  %v10799_v58 = vpack.i.b16 %v10798_v3, %v10797_v17  ;;  %v10802_v18 = vpack.i.b16 %v10793_v6, %v10779_v20  ;;  %v20714_v36 = vpop.permute.xlu1 %10107  ;;  %v11741_v3 = vshrl.u32 %v11732_v49, 16  ;;  %v11786_v17 = vshll.u32 %v11738_v21, 16 }
 0x940   : > { %23313 = vst [vmem:[#allocation67_spill] sm:$0xff] %v20714_v36  ;;  %v20719_v55 = vrot.slane %v10805_v13, %v23135_v12  ;;  %v13351_v16 = vcombine.high %v20708_v15, %v20708_v15  ;;  %v20731_v20 = vrot.slane %v10796_v60, %v23135_v12  ;;  %v13342_v13 = vcombine.high %v20561_v63, %v20561_v63  ;;  %v11733_v63 = vld [vmem:[#allocation2 + $0x64] sm:$0x1] }
 0x941   : > { %v20728_v6 = vrot.slane %v10799_v58, %v23135_v12  ;;  %v11758_v58 = vshll.u32 %v11734_v28, 16  ;;  %v12994_v60 = vcombine.low %v20724_v57, %v20724_v57  ;;  %v11746_v53 = vrot.slane %v11744_v62, 5 }
 0x942   : > { %v11788_v28 = vrot.slane %v11786_v17, 5  ;;  %v11764_v17 = vshll.u32 %v11735_v61, 16 }
 0x943   : > { %11078 = vrot.lane.b32.xlu1 %v13347_v11, %s13688_s13  ;;  %10401 = vrot.lane.b32.xlu0 %v13333_v44, %s13685_s11  ;;  %v13334_v11 = vcombine.high %v20533_v26, %v20533_v26  ;;  %v20734_v26 = vrot.slane %v10802_v18, %v23135_v12  ;;  %v11736_v44 = vld [vmem:[#allocation2 + $0x70] sm:$0xf]  ;;  %v20736_v14 = vpop.permute.xlu0 %9957  ;;  %v20745_v15 = vpop.permute.xlu1 %9812  ;;  %v11760_v36 = vrot.slane %v11758_v58, 5 }
 0x944   : > { %23314 = vst [vmem:[#allocation97_spill] sm:$0xff] %v20736_v14  ;;  %v11769_v18 = vshrl.u32 %v11736_v44, 16  ;;  %v11737_v14 = vld [vmem:[#allocation2 + $0x74] sm:$0x1] }
 0x945   : > { %v10822_v49 = vcombine.low %v20731_v20, %v20734_v26 }
 0x946   : > { %v11771_v23 = vrot.slane %v11769_v18, 4 }
 0x947   : > { %11490 = vrot.lane.b32.xlu1 %v13355_v45, %s13688_s13  ;;  %10701 = vrot.lane.b32.xlu0 %v13341_v59, %s13685_s11  ;;  %v11783_v45 = vshrl.u32 %v11738_v21, 16  ;;  %v10856_v59 = vcombine.low %v20728_v6, %v20719_v55  ;;  %v11739_v21 = vld [vmem:[#allocation2 + $0x7c] sm:$0x1]  ;;  %v20756_v40 = vpop.permute.xlu0 %9659  ;;  %v20764_v58 = vpop.permute.xlu1 %10112  ;;  %v20769_v18 = vrot.slane %v10822_v49, %v23295_v24  ;;  %v12012_v49 = vshrl.u32 %v20544_v43, 16 }
 0x948   : > { %v11792_v62 = vshll.u32 %v11739_v21, 16 }
 0x949   : > { %v11785_v33 = vrot.slane %v11783_v45, 4  ;;  %v11750_v45 = vshll.u32 %v11733_v63, 16  ;;  %23315 = vst [vmem:[#allocation100_spill] sm:$0xff] %v20769_v18  ;;  %v13343_v63 = vcombine.high %v20769_v18, %v20769_v18 }
 0x94b   : > { %10406 = vrot.lane.b32.xlu1 %v13334_v11, %s13676_s23  ;;  %11284 = vrot.lane.b32.xlu0 %v13351_v16, %s13688_s13  ;;  %v11772_v11 = vshll.u32 %v11736_v44, 16  ;;  %v11743_v16 = vrot.slane %v11741_v3, 4  ;;  %v20754_v44 = vrot.slane %v10856_v59, %v23295_v24  ;;  %v11778_v59 = vshll.u32 %v11737_v14, 16 }
 0x94c   : > { %v11789_v42 = vor.u32 %v11788_v28, %v11785_v33  ;;  %v11752_v61 = vrot.slane %v11750_v45, 5  ;;  %v20774_v33 = vpop.permute.xlu0 %9962 }
 0x94d   : > { %v11774_v3 = vrot.slane %v11772_v11, 5  ;;  %v11747_v34 = vor.u32 %v11746_v53, %v11743_v16  ;;  %v11794_v53 = vrot.slane %v11792_v62, 5  ;;  %v11780_v14 = vrot.slane %v11778_v59, 5  ;;  %v20793_v62 = vpop.permute.xlu1 %9817 }
 0x94e   : > { %v13352_v16 = vcombine.high %v20581_v5, %v20581_v5 }
 0x94f   : > { %10706 = vrot.lane.b32.xlu1 %v13342_v13, %s13676_s23  ;;  %10260 = vrot.lane.b32.xlu0 %v12994_v60, %s13691_s24  ;;  %v11757_v13 = vrot.slane %v11755_v29, 4  ;;  %v13338_v60 = vcombine.high %v20595_v32, %v20595_v32  ;;  %v11225_v29 = vcombine.high %v20677_v0, %v20669_v2  ;;  %v13356_v32 = vcombine.high %v20648_v37, %v20648_v37 }
 0x950   : > { %v11775_v21 = vor.u32 %v11774_v3, %v11771_v23  ;;  %v11748_v2 = vrot.slane %v11747_v34, 4  ;;  %v11766_v0 = vrot.slane %v11764_v17, 5  ;;  %v11790_v37 = vrot.slane %v11789_v42, 4 }
 0x951   : > { %v11761_v11 = vor.u32 %v11760_v36, %v11757_v13  ;;  %v20781_v36 = vrot.slane %v11225_v29, %v23295_v24  ;;  %v11019_v23 = vcombine.high %v20629_v52, %v20614_v1  ;;  %v12011_v42 = vshrl.u32 %v20587_v38, 16  ;;  %v20817_v29 = vpop.permute.xlu0 %9664 }
 0x952   : > { %v11776_v13 = vrot.slane %v11775_v21, 4  ;;  %v12006_v3 = vshrl.u32 %v20500_v25, 16  ;;  %v11053_v1 = vcombine.high %v20573_v9, %v20564_v54  ;;  %v20801_v5 = vsel %vm19814_vm4, %v11748_v2, %v11752_v61 }
 0x953   : > { %11083 = vrot.lane.b32.xlu1 %v13348_v7, %s13689_s14  ;;  %10556 = vrot.lane.b32.xlu0 %v13338_v60, %s13676_s23  ;;  %v13018_v7 = vcombine.low %v20754_v44, %v20754_v44  ;;  %v11762_v28 = vrot.slane %v11761_v11, 4  ;;  %v20789_v60 = vsel %vm19814_vm4, %v11790_v37, %v11794_v53  ;;  %v12005_v34 = vshrl.u32 %v20552_v30, 16 }
 0x954   : > { %v20809_v45 = vsel %vm19814_vm4, %v11776_v13, %v11780_v14  ;;  %v12013_v17 = vpack.i.b16 %v12012_v49, %v12011_v42  ;;  %v13035_v59 = vcombine.low %v20781_v36, %v20781_v36  ;;  %v11806_v54 = vshrl.u32 %v20789_v60, 16  ;;  %v11536_v13 = vld [vmem:[#allocation2 + $0x40] sm:$0xf]  ;;  %v11538_v42 = vld [vmem:[#allocation2 + $0x48] sm:$0xf] }
 0x955   : > { %v20805_v52 = vsel %vm19814_vm4, %v11762_v28, %v11766_v0  ;;  %v11431_v9 = vcombine.high %v20651_v47, %v20637_v51  ;;  %v12007_v11 = vpack.i.b16 %v12006_v3, %v12005_v34  ;;  %v11805_v53 = vshrl.u32 %v20809_v45, 16  ;;  %v20839_v0 = vpop.permute.xlu1 %10117 }
 0x956   : > { %v11800_v21 = vshrl.u32 %v20805_v52, 16  ;;  %v20829_v61 = vrot.slane %v11053_v1, %v23295_v24  ;;  %v10823_v51 = vcombine.high %v20731_v20, %v20734_v26  ;;  %v11465_v47 = vcombine.high %v20603_v48, %v20590_v10 }
 0x957   : > { %11495 = vrot.lane.b32.xlu1 %v13356_v32, %s13689_s14  ;;  %10877 = vrot.lane.b32.xlu0 %v13018_v7, %s13687_s12  ;;  %v13329_v32 = vcombine.high %v20611_v50, %v20611_v50  ;;  %v20822_v7 = vrot.slane %v11019_v23, %v23295_v24  ;;  %v11799_v50 = vshrl.u32 %v20801_v5, 16  ;;  %v20837_v2 = vrot.slane %v12013_v17, %v23135_v12 }
 0x958   : > { %v13330_v14 = vcombine.high %v20724_v57, %v20724_v57  ;;  %v11807_v37 = vpack.i.b16 %v11806_v54, %v11805_v53  ;;  %v12218_v49 = vshrl.u32 %v20625_v56, 16  ;;  %v20847_v20 = vrot.slane %v11431_v9, %v23295_v24  ;;  %v20855_v57 = vpop.permute.xlu0 %9967  ;;  %v11542_v54 = vld [vmem:[#allocation2 + $0x58] sm:$0xf] }
 0x959   : > { %23316 = vst [vmem:[#allocation149_spill] sm:$0xff] %v20837_v2  ;;  %v20850_v26 = vrot.slane %v12007_v11, %v23135_v12  ;;  %v11801_v10 = vpack.i.b16 %v11800_v21, %v11799_v50  ;;  %v12217_v48 = vshrl.u32 %v20656_v8, 16  ;;  %v12212_v23 = vshrl.u32 %v20576_v46, 16  ;;  %v20878_v21 = vpop.permute.xlu1 %9822 }
 0x95a   : > { %v13344_v28 = vcombine.high %v20754_v44, %v20754_v44  ;;  %v20865_v1 = vrot.slane %v11465_v47, %v23295_v24  ;;  %v20868_v34 = vrot.slane %v10823_v51, %v23295_v24  ;;  %v20871_v17 = vrot.slane %v11807_v37, %v23135_v12 }
 0x95b   : > { %10882 = vrot.lane.b32.xlu1 %v13343_v63, %s13688_s13  ;;  %11289 = vrot.lane.b32.xlu0 %v13352_v16, %s13689_s14  ;;  %v13028_v63 = vcombine.low %v20822_v7, %v20822_v7  ;;  %23317 = vst [vmem:[#allocation76_spill] sm:$0xff] %v20850_v26  ;;  %v13029_v16 = vcombine.low %v20829_v61, %v20829_v61  ;;  %v12211_v9 = vshrl.u32 %v20633_v35, 16  ;;  %v11545_v51 = vshrl.u32 %v11536_v13, 16 }
 0x95c   : > { %v12064_v3 = vcombine.low %v20850_v26, %v20837_v2  ;;  %v11259_v44 = vcombine.high %v20542_v19, %v20527_v4  ;;  %v13042_v11 = vcombine.low %v20847_v20, %v20847_v20  ;;  %v20882_v53 = vrot.slane %v11801_v10, %v23135_v12 }
 0x95d   : > { %v11548_v50 = vshll.u32 %v11536_v13, 16  ;;  %v11559_v47 = vshrl.u32 %v11538_v42, 16  ;;  %v11587_v4 = vshrl.u32 %v11542_v54, 16  ;;  %v13043_v19 = vcombine.low %v20865_v1, %v20865_v1  ;;  %v20895_v13 = vpop.permute.xlu0 %9669  ;;  %v20911_v2 = vpop.permute.xlu1 %10122 }
 0x95e   : > { %v11590_v10 = vshll.u32 %v11542_v54, 16  ;;  %23319 = vst [vmem:[#allocation148_spill] sm:$0xff] %v20895_v13 }
 0x95f   : > { %11294 = vrot.lane.b32.xlu1 %v13035_v59, %s13690_s27  ;;  %10265 = vrot.lane.b32.xlu0 %v13329_v32, %s13685_s11  ;;  %v11540_v59 = vld [vmem:[#allocation2 + $0x50] sm:$0xf]  ;;  %v12219_v32 = vpack.i.b16 %v12218_v49, %v12217_v48  ;;  %v20888_v49 = vrot.slane %v12064_v3, %v23295_v24  ;;  %v11804_v48 = vpack.i.b16 %v20789_v60, %v20809_v45  ;;  %v11550_v60 = vrot.slane %v11548_v50, 5  ;;  %v11541_v50 = vld [vmem:[#allocation2 + $0x54] sm:$0x1] }
 0x960   : > { %v11573_v37 = vshrl.u32 %v11540_v59, 16  ;;  %v11798_v3 = vpack.i.b16 %v20805_v52, %v20801_v5  ;;  %v11561_v45 = vrot.slane %v11559_v47, 4  ;;  %v11589_v26 = vrot.slane %v11587_v4, 4 }
 0x961   : > { %v13060_v5 = vcombine.low %v20888_v49, %v20888_v49  ;;  %v20916_v52 = vrot.slane %v11804_v48, %v23135_v12  ;;  %v11592_v47 = vrot.slane %v11590_v10, 5  ;;  %v20931_v10 = vpop.permute.xlu0 %9972 }
 0x962   : > { %v20929_v4 = vrot.slane %v11798_v3, %v23135_v12 }
 0x963   : > { %10270 = vrot.lane.b32.xlu1 %v13330_v14, %s13676_s23  ;;  %11088 = vrot.lane.b32.xlu0 %v13028_v63, %s13690_s27  ;;  %v12213_v14 = vpack.i.b16 %v12212_v23, %v12211_v9  ;;  %v11576_v63 = vshll.u32 %v11540_v59, 16  ;;  %v20898_v23 = vrot.slane %v11259_v44, %v23295_v24  ;;  %v11858_v59 = vcombine.low %v20882_v53, %v20871_v17 }
 0x964   : > { %v11562_v9 = vshll.u32 %v11538_v42, 16  ;;  %v11575_v44 = vrot.slane %v11573_v37, 4  ;;  %v12216_v42 = vpack.i.b16 %v20625_v56, %v20656_v8  ;;  %v11537_v56 = vld [vmem:[#allocation2 + $0x44] sm:$0x1] }
 0x965   : > { %v20906_v54 = vrot.slane %v12213_v14, %v23135_v12  ;;  %v11578_v18 = vrot.slane %v11576_v63, 5  ;;  %v13036_v14 = vcombine.low %v20898_v23, %v20898_v23  ;;  %v20923_v37 = vrot.slane %v11858_v59, %v23295_v24 }
 0x966   : > { %v11564_v8 = vrot.slane %v11562_v9, 5  ;;  %v12210_v63 = vpack.i.b16 %v20576_v46, %v20633_v35  ;;  %v13021_v59 = vcombine.low %v20868_v34, %v20868_v34  ;;  %v11582_v9 = vshll.u32 %v11541_v50, 16 }
 0x967   : > { %11093 = vrot.lane.b32.xlu1 %v13029_v16, %s13691_s24  ;;  %11500 = vrot.lane.b32.xlu0 %v13042_v11, %s13690_s27  ;;  %v20893_v16 = vrot.slane %v12219_v32, %v23135_v12  ;;  %v11547_v11 = vrot.slane %v11545_v51, 4  ;;  %23320 = vst [vmem:[#allocation159_spill] sm:$0xff] %v20906_v54  ;;  %v11543_v32 = vld [vmem:[#allocation2 + $0x5c] sm:$0x1]  ;;  %v11539_v51 = vld [vmem:[#allocation2 + $0x4c] sm:$0x1]  ;;  %v20937_v13 = vrot.slane %v12216_v42, %v23135_v12 }
 0x968   : > { %v11596_v48 = vshll.u32 %v11543_v32, 16  ;;  %v11824_v35 = vcombine.low %v20929_v4, %v20916_v52  ;;  %v11554_v3 = vshll.u32 %v11537_v56, 16  ;;  %v13053_v32 = vcombine.low %v20923_v37, %v20923_v37 }
 0x969   : > { %23318 = vst [vmem:[#allocation96_spill] sm:$0xff] %v20893_v16  ;;  %v11584_v50 = vrot.slane %v11582_v9, 5 }
 0x96b   : > { %11505 = vrot.lane.b32.xlu1 %v13043_v19, %s13691_s24  ;;  %10887 = vrot.lane.b32.xlu0 %v13344_v28, %s13689_s14  ;;  %v12270_v28 = vcombine.low %v20906_v54, %v20893_v16  ;;  %v11551_v19 = vor.u32 %v11550_v60, %v11547_v11  ;;  %v11568_v54 = vshll.u32 %v11539_v51, 16  ;;  %v11579_v16 = vor.u32 %v11578_v18, %v11575_v44 }
 0x96c   : > { %v11593_v11 = vor.u32 %v11592_v47, %v11589_v26  ;;  %v12010_v60 = vpack.i.b16 %v20544_v43, %v20587_v38  ;;  %v11565_v18 = vor.u32 %v11564_v8, %v11561_v45  ;;  %v20951_v44 = vrot.slane %v12210_v63, %v23135_v12 }
 0x96d   : > { %v11552_v42 = vrot.slane %v11551_v19, 4  ;;  %v11598_v51 = vrot.slane %v11596_v48, 5  ;;  %v12004_v26 = vpack.i.b16 %v20500_v25, %v20552_v30  ;;  %v11570_v43 = vrot.slane %v11568_v54, 5  ;;  %v20969_v25 = vpop.permute.xlu0 %10376 }
 0x96e   : > { %v11580_v38 = vrot.slane %v11579_v16, 4  ;;  %v12236_v47 = vcombine.low %v20951_v44, %v20937_v13  ;;  %v13353_v45 = vcombine.high %v20781_v36, %v20781_v36  ;;  %v11594_v56 = vrot.slane %v11593_v11, 4 }
 0x96f   : > { %12085 = vrot.lane.b32.xlu1 %v13060_v5, %s13687_s12  ;;  %11299 = vrot.lane.b32.xlu0 %v13036_v14, %s13691_s24  ;;  %v20948_v5 = vrot.slane %v12270_v28, %v23295_v24  ;;  %v20964_v14 = vrot.slane %v11824_v35, %v23295_v24  ;;  %v20967_v8 = vrot.slane %v12010_v60, %v23135_v12  ;;  %v11556_v16 = vrot.slane %v11554_v3, 5 }
 0x970   : > { %v11566_v54 = vrot.slane %v11565_v18, 4  ;;  %v11599_v63 = vsel %vm19814_vm4, %v11594_v56, %v11598_v51  ;;  %v20977_v36 = vrot.slane %v12004_v26, %v23135_v12  ;;  %v20989_v9 = vrot.slane %v12236_v47, %v23295_v24 }
 0x971   : > { %v20939_v46 = vpop.permute.xlu1 %10526  ;;  %v13067_v30 = vcombine.low %v20948_v5, %v20948_v5  ;;  %v11585_v35 = vsel %vm19814_vm4, %v11580_v38, %v11584_v50  ;;  %v13349_v60 = vcombine.high %v20822_v7, %v20822_v7  ;;  %v11610_v18 = vshrl.u32 %v11599_v63, 16 }
 0x972   : > { %v20982_v19 = vsel %vm19814_vm4, %v11566_v54, %v11570_v43  ;;  %v12030_v3 = vcombine.low %v20977_v36, %v20967_v8  ;;  %v11609_v26 = vshrl.u32 %v11585_v35, 16  ;;  %v13371_v38 = vcombine.high %v20989_v9, %v20989_v9 }
 0x973   : > { %10892 = vrot.lane.b32.xlu1 %v13021_v59, %s13690_s27  ;;  %11879 = vrot.lane.b32.xlu0 %v13053_v32, %s13687_s12  ;;  %v13363_v59 = vcombine.high %v20964_v14, %v20964_v14  ;;  %v11557_v32 = vsel %vm19814_vm4, %v11552_v42, %v11556_v16  ;;  %v11604_v51 = vshrl.u32 %v20982_v19, 16  ;;  %v10857_v7 = vcombine.high %v20728_v6, %v20719_v55 }
 0x974   : > { %v11603_v50 = vshrl.u32 %v11557_v32, 16  ;;  %v13357_v42 = vcombine.high %v20847_v20, %v20847_v20  ;;  %v21013_v47 = vrot.slane %v12030_v3, %v23295_v24  ;;  %v13350_v55 = vcombine.high %v20829_v61, %v20829_v61 }
 0x975   : > { %v20959_v28 = vpop.permute.xlu1 %9674  ;;  %v11608_v6 = vpack.i.b16 %v11599_v63, %v11585_v35  ;;  %v21027_v54 = vrot.slane %v10857_v7, %v23295_v24  ;;  %v23321_v35 = vld [vmem:[#allocation142_spill] sm:$0xff] }
 0x976   : > { %v11605_v56 = vpack.i.b16 %v11604_v51, %v11603_v50  ;;  %v13367_v61 = vcombine.high %v21013_v47, %v21013_v47  ;;  %v23324_v51 = vld [vmem:[#allocation67_spill] sm:$0xff] }
 0x977   : > { %11304 = vrot.lane.b32.xlu1 %v13353_v45, %s13685_s11  ;;  %12291 = vrot.lane.b32.xlu0 %v13067_v30, %s13687_s12  ;;  %v11611_v45 = vpack.i.b16 %v11610_v18, %v11609_v26  ;;  %v9836_v30 = vsel %vm9691_vm0, %v20254_v27, %v20691_v31 }
 0x978   : > { %v9838_v20 = vsel %vm9695_vm1, %v9836_v30, %v20697_v39 }
 0x979   : > { %v20984_v48 = vpop.permute.xlu1 %9977  ;;  %v20995_v11 = vpop.permute.xlu0 %10676  ;;  %v9840_v27 = vsel %vm9698_vm5, %v9838_v20, %v20745_v15  ;;  %v21035_v63 = vrot.slane %v11611_v45, %v23135_v12  ;;  %v10136_v15 = vsel %vm9691_vm0, %v23321_v35, %v20703_v41  ;;  %v13358_v41 = vcombine.high %v20865_v1, %v20865_v1 }
 0x97a   : > { %v9842_v39 = vsel %vm9701_vm6, %v9840_v27, %v20793_v62  ;;  %v23322_v62 = vld [vmem:[#allocation136_spill] sm:$0xff]  ;;  %v10138_v26 = vsel %vm9695_vm1, %v10136_v15, %v23324_v51  ;;  %v13022_v45 = vcombine.low %v21027_v54, %v21027_v54  ;;  %v12031_v15 = vcombine.high %v20977_v36, %v20967_v8 }
 0x97b   : > { %11884 = vrot.lane.b32.xlu1 %v13363_v59, %s13688_s13  ;;  %11098 = vrot.lane.b32.xlu0 %v13349_v60, %s13685_s11  ;;  %v11602_v59 = vpack.i.b16 %v20982_v19, %v11557_v32  ;;  %v21041_v19 = vrot.slane %v11605_v56, %v23135_v12  ;;  %v9844_v3 = vsel %vm9704_vm7, %v9842_v39, %v20878_v21  ;;  %v23323_v32 = vld [vmem:[#allocation7_spill] sm:$0xff] }
 0x97c   : > { %v21050_v60 = vrot.slane %v11608_v6, %v23135_v12  ;;  %v9986_v18 = vsel %vm9691_vm0, %v23323_v32, %v23322_v62  ;;  %v10140_v21 = vsel %vm9698_vm5, %v10138_v26, %v20764_v58  ;;  %v23325_v58 = vld [vmem:[#allocation97_spill] sm:$0xff]  ;;  %v13354_v39 = vcombine.high %v20898_v23, %v20898_v23 }
 0x97d   : > { %v21004_v43 = vpop.permute.xlu1 %10381  ;;  %v9828_v22 = vpop.permute.xlu0 %9827  ;;  %v11662_v56 = vcombine.low %v21041_v19, %v21035_v63  ;;  %v21073_v1 = vrot.slane %v11602_v59, %v23135_v12  ;;  %v21120_v51 = vrot.slane %v12031_v15, %v23295_v24  ;;  %v13368_v26 = vcombine.high %v20888_v49, %v20888_v49  ;;  %v23326_v49 = vld [vmem:[#allocation89_spill] sm:$0xff] }
 0x97f   : > { %12296 = vrot.lane.b32.xlu1 %v13371_v38, %s13688_s13  ;;  %11510 = vrot.lane.b32.xlu0 %v13357_v42, %s13685_s11  ;;  %v9846_v38 = vsel %vm9707_vm9, %v9844_v3, %v9828_v22  ;;  %v10142_v22 = vsel %vm9701_vm6, %v10140_v21, %v20839_v0  ;;  %v13364_v0 = vcombine.high %v20923_v37, %v20923_v37 }
 0x980   : > { %v10144_v6 = vsel %vm9704_vm7, %v10142_v22, %v20911_v2  ;;  %v21089_v2 = vrot.slane %v11662_v56, %v23295_v24  ;;  %v11859_v21 = vcombine.high %v20882_v53, %v20871_v17  ;;  %v23327_v17 = vld [vmem:[#allocation148_spill] sm:$0xff] }
 0x981   : > { %v21024_v16 = vpop.permute.xlu1 %10681  ;;  %v10128_v31 = vpop.permute.xlu0 %10127 }
 0x982   : > { %v10146_v20 = vsel %vm9707_vm9, %v10144_v6, %v10128_v31 }
 0x983   : > { %11103 = vrot.lane.b32.xlu1 %v13350_v55, %s13676_s23  ;;  %12090 = vrot.lane.b32.xlu0 %v13367_v61, %s13688_s13  ;;  %v9988_v55 = vsel %vm9695_vm1, %v9986_v18, %v23325_v58  ;;  %v11628_v61 = vcombine.low %v21073_v1, %v21050_v60  ;;  %v13046_v18 = vcombine.low %v21089_v2, %v21089_v2 }
 0x984   : > { %v9990_v31 = vsel %vm9698_vm5, %v9988_v55, %v20774_v33  ;;  %v13372_v33 = vcombine.high %v20948_v5, %v20948_v5 }
 0x985   : > { %v9833_v7 = vpop.permute.xlu1 %9832  ;;  %v21063_v42 = vpop.permute.xlu0 %10531  ;;  %v9992_v37 = vsel %vm9701_vm6, %v9990_v31, %v20855_v57  ;;  %v21106_v62 = vrot.slane %v11628_v61, %v23295_v24 }
 0x986   : > { %v9848_v50 = vsel %vm9710_vm8, %v9846_v38, %v9833_v7  ;;  %v9994_v23 = vsel %vm9704_vm7, %v9992_v37, %v20931_v10  ;;  %v11825_v38 = vcombine.high %v20929_v4, %v20916_v52  ;;  %v13345_v4 = vcombine.high %v20868_v34, %v20868_v34 }
 0x987   : > { %v9850_v30 = vrot.slane %v9848_v50, 6  ;;  %11515 = vrot.lane.b32.xlu1 %v13358_v41, %s13676_s23  ;;  %10897 = vrot.lane.b32.xlu0 %v13022_v45, %s13691_s24  ;;  %v9996_v57 = vsel %vm9707_vm9, %v9994_v23, %v20984_v48  ;;  %v13359_v5 = vcombine.high %v21106_v62, %v21106_v62  ;;  %v13063_v41 = vcombine.low %v21120_v51, %v21120_v51 }
 0x988   : > { %v12237_v50 = vcombine.high %v20951_v44, %v20937_v13  ;;  %v9694_v45 = vsel %vm9691_vm0, %v23326_v49, %v20756_v40  ;;  %v11839_v56 = vrot.slane %v11825_v38, %v23295_v24  ;;  %v23328_v13 = vld [vmem:[#allocation96_spill] sm:$0xff]  ;;  %v23329_v44 = vld [vmem:[#allocation159_spill] sm:$0xff]  ;;  %v13346_v34 = vcombine.high %v21027_v54, %v21027_v54 }
 0x989   : > { %9852 = vst [vmem:[#allocation3] sm:$0xc] %v9850_v30  ;;  %v10133_v27 = vpop.permute.xlu1 %10132  ;;  %v9680_v59 = vpop.permute.xlu0 %9679  ;;  %v9697_v22 = vsel %vm9695_vm1, %v9694_v45, %v20817_v29  ;;  %v12271_v40 = vcombine.high %v23329_v44, %v23328_v13  ;;  %v11873_v29 = vrot.slane %v11859_v21, %v23295_v24 }
 0x98a   : > { %v10148_v12 = vsel %vm9710_vm8, %v10146_v20, %v10133_v27  ;;  %v9700_v53 = vsel %vm9698_vm5, %v9697_v22, %v23327_v17  ;;  %v13056_v20 = vcombine.low %v11839_v56, %v11839_v56  ;;  %v12251_v27 = vrot.slane %v12237_v50, %v23295_v24 }
 0x98b   : > { %v10150_v35 = vrot.slane %v10148_v12, 2  ;;  %11889 = vrot.lane.b32.xlu1 %v13364_v0, %s13689_s14  ;;  %11309 = vrot.lane.b32.xlu0 %v13354_v39, %s13676_s23  ;;  %v9703_v30 = vsel %vm9701_vm6, %v9700_v53, %v20959_v28  ;;  %v13057_v61 = vcombine.low %v11873_v29, %v11873_v29  ;;  %v12285_v12 = vrot.slane %v12271_v40, %v23295_v24  ;;  %v23332_v40 = vld [vmem:[#allocation60_spill] sm:$0xff] }
 0x98c   : > { %v9706_v55 = vsel %vm9704_vm7, %v9703_v30, %v9680_v59  ;;  %v13070_v31 = vcombine.low %v12251_v27, %v12251_v27  ;;  %v23331_v59 = vld [vmem:[#allocation76_spill] sm:$0xff]  ;;  %v11663_v50 = vcombine.high %v21041_v19, %v21035_v63  ;;  %v13366_v45 = vcombine.high %v11873_v29, %v11873_v29 }
 0x98d   : > { %10152 = vst [vmem:[#allocation3] sm:$0xc0] %v10150_v35  ;;  %v21101_v3 = vpop.permute.xlu1 %10386  ;;  %v9983_v32 = vpop.permute.xlu0 %9982  ;;  %v23330_v35 = vld [vmem:[#allocation149_spill] sm:$0xff]  ;;  %v13071_v23 = vcombine.low %v12285_v12, %v12285_v12  ;;  %v13374_v53 = vcombine.high %v12285_v12, %v12285_v12 }
 0x98e   : > { %v9998_v10 = vsel %vm9710_vm8, %v9996_v57, %v9983_v32  ;;  %v12065_v37 = vcombine.high %v23331_v59, %v23330_v35  ;;  %v13360_v57 = vcombine.high %v21089_v2, %v21089_v2  ;;  %v11677_v22 = vrot.slane %v11663_v50, %v23295_v24  ;;  %v12362_v35 = vld [vmem:[%s21541_s3] sm:$0xff] }
 0x98f   : > { %12301 = vrot.lane.b32.xlu1 %v13372_v33, %s13689_s14  ;;  %v10000_v8 = vrot.slane %v9998_v10, 4  ;;  %11683 = vrot.lane.b32.xlu0 %v13046_v18, %s13687_s12  ;;  %v11629_v18 = vcombine.high %v21073_v1, %v21050_v60  ;;  %v13373_v60 = vcombine.high %v12251_v27, %v12251_v27 }
 0x990   : > { %v12079_v32 = vrot.slane %v12065_v37, %v23295_v24  ;;  %v13050_v63 = vcombine.low %v11677_v22, %v11677_v22  ;;  %v13362_v44 = vcombine.high %v11677_v22, %v11677_v22 }
 0x991   : > { %v21115_v36 = vpop.permute.xlu1 %10686  ;;  %10002 = vst [vmem:[#allocation3] sm:$0x30] %v10000_v8  ;;  %v21122_v48 = vpop.permute.xlu0 %10240  ;;  %v13365_v8 = vcombine.high %v11839_v56, %v11839_v56  ;;  %v11643_v2 = vrot.slane %v11629_v18, %v23295_v24  ;;  %v13369_v56 = vcombine.high %v21120_v51, %v21120_v51  ;;  %v10410_v51 = vsel %vm9691_vm0, %v23332_v40, %v20969_v25 }
 0x992   : > { %v13064_v38 = vcombine.low %v12079_v32, %v12079_v32  ;;  %v10412_v24 = vsel %vm9695_vm1, %v10410_v51, %v21004_v43 }
 0x993   : > { %11688 = vrot.lane.b32.xlu1 %v13359_v5, %s13688_s13  ;;  %12095 = vrot.lane.b32.xlu0 %v13368_v26, %s13689_s14  ;;  %v13049_v21 = vcombine.low %v11643_v2, %v11643_v2  ;;  %v10414_v29 = vsel %vm9698_vm5, %v10412_v24, %v21101_v3  ;;  %v13554_v3 = vld [vmem:[%s21540_s2 + $0x20] sm:$0xff]   ;;  %s202_s13 = sand.u32 1, %s13631_s16  }
 0x994   : > { %13403 = vmatprep.mubr.msk.bf16.mxu1 %vm9701_vm6, %v13554_v3 }
 0x995   : > { %v21130_v7 = vpop.permute.xlu1 %10245  ;;  %v21141_v52 = vpop.permute.xlu0 %10536 }
 0x997   : > { %12100 = vrot.lane.b32.xlu1 %v13063_v41, %s13690_s27  ;;  %10902 = vrot.lane.b32.xlu0 %v13345_v4, %s13685_s11 }
 0x999   : > { %v21156_v58 = vpop.permute.xlu1 %10541  ;;  %v9685_v6 = vpop.permute.xlu0 %9684 }
 0x99a   : > { %v9709_v0 = vsel %vm9707_vm9, %v9706_v55, %v9685_v6 }
 0x99b   : > { %10907 = vrot.lane.b32.xlu1 %v13346_v34, %s13676_s23  ;;  %11894 = vrot.lane.b32.xlu0 %v13056_v20, %s13690_s27  ;;  %v13370_v34 = vcombine.high %v12079_v32, %v12079_v32  ;;  %v23333_v20 = vld [vmem:[#allocation31_spill] sm:$0xff] }
 0x99c   : > { %v10710_v25 = vsel %vm9691_vm0, %v23333_v20, %v20995_v11 }
 0x99d   : > { %v9690_v28 = vpop.permute.xlu1 %9689  ;;  %v10392_v39 = vpop.permute.xlu0 %10391  ;;  %v10712_v43 = vsel %vm9695_vm1, %v10710_v25, %v21024_v16 }
 0x99e   : > { %v9712_v54 = vsel %vm9710_vm8, %v9709_v0, %v9690_v28  ;;  %v10416_v55 = vsel %vm9701_vm6, %v10414_v29, %v10392_v39  ;;  %v13361_v0 = vcombine.high %v11643_v2, %v11643_v2  ;;  %v13553_v28 = vld [vmem:[%s21540_s2] sm:$0xff]  }
 0x99f   : > { %9714 = vst [vmem:[#allocation3] sm:$0x3] %v9712_v54  ;;  %11899 = vrot.lane.b32.xlu1 %v13057_v61, %s13691_s24  ;;  %12306 = vrot.lane.b32.xlu0 %v13070_v31, %s13690_s27  ;;  %v10714_v61 = vsel %vm9698_vm5, %v10712_v43, %v21115_v36  ;;  %v23334_v36 = vld [vmem:[#allocation50_spill] sm:$0xff]  ;;  %v12363_v43 = vld [vmem:[%s21541_s3 + $0x8] sm:$0xff] }
 0x9a0   : > { %13395 = vmatprep.mubr.msk.bf16.mxu0 %vm9701_vm6, %v13553_v28  ;;  %v10560_v59 = vsel %vm9691_vm0, %v23334_v36, %v20939_v46  ;;  %v12365_v46 = vld [vmem:[%s21541_s3 + $0x18] sm:$0xff] }
 0x9a1   : > { %v10397_v15 = vpop.permute.xlu1 %10396  ;;  %v10692_v33 = vpop.permute.xlu0 %10691 }
 0x9a2   : > { %v10418_v12 = vsel %vm9704_vm7, %v10416_v55, %v10397_v15  ;;  %v10716_v11 = vsel %vm9701_vm6, %v10714_v61, %v10692_v33  ;;  %v10562_v15 = vsel %vm9695_vm1, %v10560_v59, %v21063_v42  ;;  %v12364_v61 = vld [vmem:[%s21541_s3 + $0x10] sm:$0xff] }
 0x9a3   : > { %12311 = vrot.lane.b32.xlu1 %v13071_v23, %s13691_s24  ;;  %11693 = vrot.lane.b32.xlu0 %v13360_v57, %s13689_s14  ;;  %v10564_v33 = vsel %vm9698_vm5, %v10562_v15, %v21141_v52  ;;  %s12732_s14 = sshll.u32 %s202_s13, 7 }
 0x9a4   : > { %v10566_v42 = vsel %vm9701_vm6, %v10564_v33, %v21156_v58 }
 0x9a5   : > { %v21179_v10 = vpop.permute.xlu1 %10696  ;;  %v21181_v26 = vpop.permute.xlu0 %10250 }
 0x9a6   : > { %v12358_v5 = vld [vmem:[#allocation3] sm:$0xff]  ;;  %v10718_v23 = vsel %vm9704_vm7, %v10716_v11, %v21179_v10 }
 0x9a7   : > { %11904 = vrot.lane.b32.xlu1 %v13365_v8, %s13685_s11  ;;  %13387 = vmatprep.subr.bf16.mxu0 %v12358_v5 }
 0x9a8   : > { %13411 = vmatprep.subr.bf16.mxu1 %v12358_v5  ;;  %13388 = vmatpush3.bf16.msra.mxu0 %v12358_v5 }
 0x9a9   : > { %13415 = vmatpush3.bf16.msra.mxu1 %v12358_v5  ;;  %v21185_v41 = vpop.permute.xlu1 %11279  ;;  %12105 = vrot.lane.b32.xlu0 %v13064_v38, %s13691_s24  ;;  %v10547_v1 = vpop.permute.xlu0 %10546 }
 0x9aa   : > { %v10568_v10 = vsel %vm9704_vm7, %v10566_v42, %v10547_v1  ;;  %v12369_v1 = vld [vmem:[%s21541_s3 + $0x38] sm:$0xff]  ;;  %v23337_v42 = vld [vmem:[#allocation56_spill] sm:$0xff] }
 0x9ab   : > { %12316 = vrot.lane.b32.xlu1 %v13373_v60, %s13685_s11  ;;  %v12367_v60 = vld [vmem:[%s21541_s3 + $0x28] sm:$0xff] }
 0x9ad   : > { %v21191_v49 = vpop.permute.xlu1 %10255  ;;  %11698 = vrot.lane.b32.xlu0 %v13049_v21, %s13690_s27  ;;  %v21194_v4 = vpop.permute.xlu0 %11073  ;;  %s13091_s27 = sshll.u32 %s13643_s19, 5 }
 0x9ae   : > { %s12647_s19 = sadd.s32 %s13639_s18, %s13091_s27 }
 0x9af   : > { %11909 = vrot.lane.b32.xlu1 %v13366_v45, %s13676_s23  ;;  %s13092_s5 = sshll.u32 %s12647_s19, 7 }
 0x9b0   : > { %s21475_s8 = scalar_lea.hbm %s21542_s4, %s13092_s5 }
 0x9b1   : > { %v10552_v17 = vpop.permute.xlu1 %10551  ;;  %12110 = vrot.lane.b32.xlu0 %v13369_v56, %s13685_s11  ;;  %v21201_v13 = vpop.permute.xlu0 %11485  ;;  %v23335_v56 = vld [vmem:[#allocation93_spill] sm:$0xff] }
 0x9b2   : > { %v10570_v38 = vsel %vm9707_vm9, %v10568_v10, %v10552_v17  ;;  %v10274_v22 = vsel %vm9691_vm0, %v23335_v56, %v21122_v48  ;;  %v12376_v56 = vld [vmem:[%s21541_s3 + $0x70] sm:$0xff] }
 0x9b3   : > { %12321 = vrot.lane.b32.xlu1 %v13374_v53, %s13676_s23 }
 0x9b5   : > { %v21204_v19 = vpop.permute.xlu1 %11078  ;;  %11703 = vrot.lane.b32.xlu0 %v13050_v63, %s13691_s24  ;;  %v10402_v30 = vpop.permute.xlu0 %10401  ;;  %v12371_v63 = vld [vmem:[%s21541_s3 + $0x48] sm:$0xff]  ;;  %s21456_s24 = scalar_lea.vmem [#allocation4], %s12732_s14 }
 0x9b6   : > { %v10420_v54 = vsel %vm9707_vm9, %v10418_v12, %v10402_v30  ;;  %s12650_s30 = sshll.u32 %s21456_s24, 4  ;;  %s21468_s30 = int_to_ptr.vmem [resolvable:$true] %s12650_s30 }
 0x9b7   : > { %11713 = vrot.lane.b32.xlu1 %v13362_v44, %s13676_s23  ;;  %v10276_v44 = vsel %vm9695_vm1, %v10274_v22, %v21130_v7  ;;  %s13561_s9 = scalar_lea.vmem %s21468_s30, 2048 }
 0x9b8   : > { %v10278_v40 = vsel %vm9698_vm5, %v10276_v44, %v21181_v26  ;;  %p13562_p13 = scmp.ne.s32.totalorder %s21468_s30, %s13561_s9 }
 0x9b9   : > { %v21216_v6 = vpop.permute.xlu1 %11490  ;;  %12115 = vrot.lane.b32.xlu0 %v13370_v34, %s13676_s23  ;;  %v10702_v27 = vpop.permute.xlu0 %10701  ;;  %v10280_v51 = vsel %vm9701_vm6, %v10278_v40, %v21191_v49  ;;  %v12373_v34 = vld [vmem:[%s21541_s3 + $0x58] sm:$0xff]  ;;  %v12375_v49 = vld [vmem:[%s21541_s3 + $0x68] sm:$0xff]  ;;  %s21486_s23 = scalar_lea.sflag [#allocation5], %s202_s13 }
 0x9ba   : > { %v10720_v57 = vsel %vm9707_vm9, %v10718_v23, %v10702_v27  ;;  %v12377_v27 = vld [vmem:[%s21541_s3 + $0x78] sm:$0xff]  ;;  %v23336_v23 = vld [vmem:[#allocation101_spill] sm:$0xff]  ;;  %p13563_p0 = pnand %p13562_p13, %p13772_p3 }
 0x9bb   : > { %12385 = vperm.xlu1 %13552, %v12363_v43   ;;  %v11107_v33 = vsel %vm9691_vm0, %v23336_v23, %v21194_v4  ;;  %v11519_v4 = vsel %vm9691_vm0, %v23337_v42, %v21201_v13 }
 0x9bc   : > { %p13564_p1 = pneg %p13563_p0 }
 0x9bd   : > { %v10407_v39 = vpop.permute.xlu1 %10406  ;;  %11708 = vrot.lane.b32.xlu0 %v13361_v0, %s13685_s11  ;;  %v21238_v31 = vpop.permute.xlu0 %11284  ;;  %s13565_s11 = sshll.u32 %s13692_s10, 4  ;;  %s13566_s11 = int_to_ptr.vmem [resolvable:$false] %s13565_s11 }
 0x9be   : > { %v10422_v16 = vsel %vm9710_vm8, %v10420_v54, %v10407_v39  ;;  %v12366_v54 = vld [vmem:[%s21541_s3 + $0x20] sm:$0xff]  ;;  %s13567_s12 = scalar_lea.vmem %s13566_s11, 4096  ;;  %p13568_p2 = scmp.lt.s32.totalorder %s21468_s30, %s13566_s11 }
 0x9bf   : > { %v10424_v37 = vrot.slane %v10422_v16, 6  ;;  %12390 = vperm.xlu1 %13552, %v12364_v61   ;;  %p13569_p4 = scmp.lt.s32.totalorder %s13567_s12, %s13561_s9 }
 0x9c1   : > { %10426 = vst [vmem:[#allocation3 + $0x8] sm:$0xc] %v10424_v37  ;;  %v10707_v32 = vpop.permute.xlu1 %10706  ;;  %12380 = vperm.xlu0 %13551, %v12362_v35   ;;  %v10261_v8 = vpop.permute.xlu0 %10260  ;;  %v12368_v35 = vld [vmem:[%s21541_s3 + $0x30] sm:$0xff]  ;;  %v12370_v37 = vld [vmem:[%s21541_s3 + $0x40] sm:$0xff]  ;;  %p13570_p5 = por %p13569_p4, %p13568_p2 }
 0x9c2   : > { %v10722_v18 = vsel %vm9710_vm8, %v10720_v57, %v10707_v32  ;;  %v10282_v48 = vsel %vm9704_vm7, %v10280_v51, %v10261_v8  ;;  %v12372_v32 = vld [vmem:[%s21541_s3 + $0x50] sm:$0xff] }
 0x9c3   : > { %v10724_v5 = vrot.slane %v10722_v18, 2  ;;  %12400 = vperm.xlu1 %13552, %v12366_v54   ;;  %v11109_v18 = vsel %vm9695_vm1, %v11107_v33, %v21204_v19  ;;  %v11521_v19 = vsel %vm9695_vm1, %v11519_v4, %v21216_v6  ;;  %v23338_v6 = vld [vmem:[#allocation138_spill] sm:$0xff]  ;;  %p13571_p6 = pnand %p13570_p5, %p13564_p1 }
 0x9c5   : > { %10726 = vst [vmem:[#allocation3 + $0x8] sm:$0xc0] %v10724_v5  ;;  %v21261_v52 = vpop.permute.xlu1 %11083  ;;  %12395 = vperm.xlu0 %13551, %v12365_v46   ;;  %v10557_v2 = vpop.permute.xlu0 %10556 }
 0x9c6   : > { %v10572_v21 = vsel %vm9710_vm8, %v10570_v38, %v10557_v2  ;;  %v11111_v8 = vsel %vm9698_vm5, %v11109_v18, %v21261_v52  ;;  %v12374_v38 = vld [vmem:[%s21541_s3 + $0x60] sm:$0xff] }
 0x9c7   : > { %v10574_v50 = vrot.slane %v10572_v21, 4  ;;  %12410 = vperm.xlu1 %13552, %v12368_v35  }
 0x9c9   : > { %v21268_v45 = vpop.permute.xlu1 %11495  ;;  %12405 = vperm.xlu0 %13551, %v12367_v60   ;;  %10576 = vst [vmem:[#allocation3 + $0x8] sm:$0x30] %v10574_v50  ;;  %v21270_v58 = vpop.permute.xlu0 %10877 }
 0x9ca   : > { %v11523_v52 = vsel %vm9698_vm5, %v11521_v19, %v21268_v45  ;;  %v11313_v45 = vsel %vm9691_vm0, %v23338_v6, %v21185_v41 }
 0x9cb   : > { %12420 = vperm.xlu1 %13552, %v12370_v37  }
 0x9cd   : > { %v21278_v17 = vpop.permute.xlu1 %10882  ;;  %12415 = vperm.xlu0 %13551, %v12369_v1   ;;  %v21280_v53 = vpop.permute.xlu0 %11289 }
 0x9cf   : > { %12430 = vperm.xlu1 %13552, %v12372_v32  }
 0x9d1   : > { %v21291_v30 = vpop.permute.xlu1 %11294  ;;  %12425 = vperm.xlu0 %13551, %v12371_v63   ;;  %v10266_v24 = vpop.permute.xlu0 %10265  ;;  %v11315_v63 = vsel %vm9695_vm1, %v11313_v45, %v21238_v31 }
 0x9d2   : > { %v10284_v29 = vsel %vm9707_vm9, %v10282_v48, %v10266_v24  ;;  %v11317_v40 = vsel %vm9698_vm5, %v11315_v63, %v21280_v53 }
 0x9d3   : > { %12440 = vperm.xlu1 %13552, %v12374_v38   ;;  %v11319_v41 = vsel %vm9701_vm6, %v11317_v40, %v21291_v30 }
 0x9d5   : > { %v10271_v55 = vpop.permute.xlu1 %10270  ;;  %12435 = vperm.xlu0 %13551, %v12373_v34   ;;  %v11089_v26 = vpop.permute.xlu0 %11088 }
 0x9d6   : > { %v10286_v7 = vsel %vm9710_vm8, %v10284_v29, %v10271_v55  ;;  %v11113_v46 = vsel %vm9701_vm6, %v11111_v8, %v11089_v26 }
 0x9d7   : > { %10288 = vst [vmem:[#allocation3 + $0x8] sm:$0x3] %v10286_v7  ;;  %12450 = vperm.xlu1 %13552, %v12376_v56  }
 0x9d9   : > { %v11094_v20 = vpop.permute.xlu1 %11093  ;;  %12445 = vperm.xlu0 %13551, %v12375_v49   ;;  %v11501_v25 = vpop.permute.xlu0 %11500 }
 0x9da   : > { %v11115_v2 = vsel %vm9704_vm7, %v11113_v46, %v11094_v20  ;;  %v11525_v60 = vsel %vm9701_vm6, %v11523_v52, %v11501_v25 }
 0x9dd   : > { %v11506_v0 = vpop.permute.xlu1 %11505  ;;  %12455 = vperm.xlu0 %13551, %v12377_v27   ;;  %v21308_v3 = vpop.permute.xlu0 %10887  ;;  %v23339_v27 = vld [vmem:[#allocation100_spill] sm:$0xff] }
 0x9de   : > { %v12359_v28 = vld [vmem:[#allocation3 + $0x8] sm:$0xff]  ;;  %v11527_v44 = vsel %vm9704_vm7, %v11525_v60, %v11506_v0  ;;  %v10911_v43 = vsel %vm9691_vm0, %v23339_v27, %v21270_v58  ;;  %v13557_v27 = vld [vmem:[%s21540_s2 + $0x10] sm:$0xff]  }
 0x9df   : > { %13389 = vmatprep.subr.bf16.mxu0 %v12359_v28  ;;  %13412 = vmatprep.subr.bf16.mxu1 %v12359_v28  ;;  %v10913_v30 = vsel %vm9695_vm1, %v10911_v43, %v21278_v17  ;;  %v13558_v43 = vld [vmem:[%s21540_s2 + $0x30] sm:$0xff]  }
 0x9e0   : > { %13390 = vmatpush3.bf16.msra.mxu0 %v12359_v28  ;;  %13416 = vmatpush3.bf16.msra.mxu1 %v12359_v28  ;;  %v10915_v61 = vsel %vm9698_vm5, %v10913_v30, %v21308_v3 }
 0x9e1   : > { %v21313_v12 = vpop.permute.xlu1 %12085  ;;  %v11300_v11 = vpop.permute.xlu0 %11299 }
 0x9e2   : > { %v11321_v55 = vsel %vm9704_vm7, %v11319_v41, %v11300_v11 }
 0x9e5   : > { %v10893_v39 = vpop.permute.xlu1 %10892  ;;  %v21318_v16 = vpop.permute.xlu0 %11879 }
 0x9e6   : > { %v10917_v11 = vsel %vm9701_vm6, %v10915_v61, %v10893_v39  ;;  %v11913_v39 = vsel %vm9691_vm0, %v20964_v14, %v21318_v16 }
 0x9e9   : > { %v11305_v36 = vpop.permute.xlu1 %11304  ;;  %v21323_v59 = vpop.permute.xlu0 %12291 }
 0x9ea   : > { %v11323_v7 = vsel %vm9707_vm9, %v11321_v55, %v11305_v36  ;;  %v12325_v19 = vsel %vm9691_vm0, %v20989_v9, %v21323_v59  ;;  %v12119_v9 = vsel %vm9691_vm0, %v21013_v47, %v21313_v12 }
 0x9ed   : > { %v21328_v15 = vpop.permute.xlu1 %11884  ;;  %v11099_v57 = vpop.permute.xlu0 %11098 }
 0x9ee   : > { %v11117_v21 = vsel %vm9707_vm9, %v11115_v2, %v11099_v57  ;;  %v11915_v46 = vsel %vm9695_vm1, %v11913_v39, %v21328_v15 }
 0x9f1   : > { %v21341_v5 = vpop.permute.xlu1 %12296  ;;  %v11511_v10 = vpop.permute.xlu0 %11510 }
 0x9f2   : > { %v11529_v51 = vsel %vm9707_vm9, %v11527_v44, %v11511_v10  ;;  %v12327_v52 = vsel %vm9695_vm1, %v12325_v19, %v21341_v5 }
 0x9f5   : > { %v11104_v50 = vpop.permute.xlu1 %11103  ;;  %v21357_v1 = vpop.permute.xlu0 %12090 }
 0x9f6   : > { %v11119_v13 = vsel %vm9710_vm8, %v11117_v21, %v11104_v50  ;;  %v12121_v5 = vsel %vm9695_vm1, %v12119_v9, %v21357_v1 }
 0x9f7   : > { %v11121_v22 = vrot.slane %v11119_v13, 6 }
 0x9f9   : > { %11123 = vst [vmem:[#allocation3 + $0x10] sm:$0xc] %v11121_v22  ;;  %v11516_v48 = vpop.permute.xlu1 %11515  ;;  %v10898_v34 = vpop.permute.xlu0 %10897 }
 0x9fa   : > { %v11531_v24 = vsel %vm9710_vm8, %v11529_v51, %v11516_v48  ;;  %v10919_v35 = vsel %vm9704_vm7, %v10917_v11, %v10898_v34 }
 0x9fb   : > { %v11533_v29 = vrot.slane %v11531_v24, 2 }
 0x9fd   : > { %11535 = vst [vmem:[#allocation3 + $0x10] sm:$0xc0] %v11533_v29  ;;  %v11890_v31 = vpop.permute.xlu1 %11889  ;;  %v11310_v26 = vpop.permute.xlu0 %11309 }
 0x9fe   : > { %v11325_v53 = vsel %vm9710_vm8, %v11323_v7, %v11310_v26  ;;  %v11917_v4 = vsel %vm9698_vm5, %v11915_v46, %v11890_v31 }
 0x9ff   : > { %v11327_v49 = vrot.slane %v11325_v53, 4 }
 0xa01   : > { %v12302_v20 = vpop.permute.xlu1 %12301  ;;  %11329 = vst [vmem:[#allocation3 + $0x10] sm:$0x30] %v11327_v49  ;;  %v11684_v25 = vpop.permute.xlu0 %11683 }
 0xa02   : > { %v12329_v60 = vsel %vm9698_vm5, %v12327_v52, %v12302_v20  ;;  %v11717_v51 = vsel %vm9691_vm0, %v21106_v62, %v11684_v25  ;;  %v13555_v20 = vld [vmem:[%s21540_s2 + $0x8] sm:$0xff]  }
 0xa03   : > { %v13556_v25 = vld [vmem:[%s21540_s2 + $0x28] sm:$0xff]  }
 0xa05   : > { %v11689_v0 = vpop.permute.xlu1 %11688  ;;  %v12096_v28 = vpop.permute.xlu0 %12095 }
 0xa06   : > { %v12123_v22 = vsel %vm9698_vm5, %v12121_v5, %v12096_v28  ;;  %v11719_v24 = vsel %vm9695_vm1, %v11717_v51, %v11689_v0  ;;  %v13559_v0 = vld [vmem:[%s21540_s2 + $0x18] sm:$0xff]  }
 0xa07   : > { %v13560_v28 = vld [vmem:[%s21540_s2 + $0x38] sm:$0xff]  }
 0xa09   : > { %v12101_v54 = vpop.permute.xlu1 %12100  ;;  %v10903_v36 = vpop.permute.xlu0 %10902 }
 0xa0a   : > { %v10921_v37 = vsel %vm9707_vm9, %v10919_v35, %v10903_v36  ;;  %v12125_v47 = vsel %vm9701_vm6, %v12123_v22, %v12101_v54 }
 0xa0d   : > { %v10908_v23 = vpop.permute.xlu1 %10907  ;;  %v11895_v58 = vpop.permute.xlu0 %11894 }
 0xa0e   : > { %v10923_v33 = vsel %vm9710_vm8, %v10921_v37, %v10908_v23  ;;  %v11919_v10 = vsel %vm9701_vm6, %v11917_v4, %v11895_v58 }
 0xa0f   : > { %10925 = vst [vmem:[#allocation3 + $0x10] sm:$0x3] %v10923_v33 }
 0xa11   : > { %v11900_v57 = vpop.permute.xlu1 %11899  ;;  %v12307_v32 = vpop.permute.xlu0 %12306 }
 0xa12   : > { %v11921_v14 = vsel %vm9704_vm7, %v11919_v10, %v11900_v57  ;;  %v12331_v16 = vsel %vm9701_vm6, %v12329_v60, %v12307_v32 }
 0xa15   : > { %v12312_v18 = vpop.permute.xlu1 %12311  ;;  %v11694_v8 = vpop.permute.xlu0 %11693 }
 0xa16   : > { %v12360_v17 = vld [vmem:[#allocation3 + $0x10] sm:$0xff]  ;;  %v12333_v59 = vsel %vm9704_vm7, %v12331_v16, %v12312_v18  ;;  %v11721_v29 = vsel %vm9698_vm5, %v11719_v24, %v11694_v8 }
 0xa17   : > { %13391 = vmatprep.subr.bf16.mxu0 %v12360_v17  ;;  %13413 = vmatprep.subr.bf16.mxu1 %v12360_v17 }
 0xa18   : > { %13392 = vmatpush3.bf16.msra.mxu0 %v12360_v17  ;;  %13417 = vmatpush3.bf16.msra.mxu1 %v12360_v17 }
 0xa19   : > { %v11905_v3 = vpop.permute.xlu1 %11904 }
 0xa1a   : > { %v11923_v15 = vsel %vm9707_vm9, %v11921_v14, %v11905_v3 }
 0xa1b   : > { %v12106_v42 = vpop.permute.xlu0 %12105 }
 0xa1c   : > { %v12127_v12 = vsel %vm9704_vm7, %v12125_v47, %v12106_v42 }
 0xa1d   : > { %v12317_v38 = vpop.permute.xlu1 %12316 }
 0xa1e   : > { %v12335_v6 = vsel %vm9707_vm9, %v12333_v59, %v12317_v38 }
 0xa1f   : > { %v11699_v2 = vpop.permute.xlu0 %11698 }
 0xa20   : > { %v11723_v55 = vsel %vm9701_vm6, %v11721_v29, %v11699_v2 }
 0xa21   : > { %v11910_v21 = vpop.permute.xlu1 %11909 }
 0xa22   : > { %v11925_v50 = vsel %vm9710_vm8, %v11923_v15, %v11910_v21 }
 0xa23   : > { %v11927_v13 = vrot.slane %v11925_v50, 6  ;;  %v12111_v56 = vpop.permute.xlu0 %12110 }
 0xa24   : > { %v12129_v1 = vsel %vm9707_vm9, %v12127_v12, %v12111_v56 }
 0xa25   : > { %11929 = vst [vmem:[#allocation3 + $0x18] sm:$0xc] %v11927_v13  ;;  %v12322_v45 = vpop.permute.xlu1 %12321 }
 0xa26   : > { %v12337_v63 = vsel %vm9710_vm8, %v12335_v6, %v12322_v45 }
 0xa27   : > { %v12339_v44 = vrot.slane %v12337_v63, 2  ;;  %v11704_v40 = vpop.permute.xlu0 %11703 }
 0xa28   : > { %v11725_v31 = vsel %vm9704_vm7, %v11723_v55, %v11704_v40 }
 0xa29   : > { %12341 = vst [vmem:[#allocation3 + $0x18] sm:$0xc0] %v12339_v44  ;;  %v11714_v7 = vpop.permute.xlu1 %11713 }
 0xa2b   : > { %v12116_v48 = vpop.permute.xlu0 %12115 }
 0xa2c   : > { %v12131_v34 = vsel %vm9710_vm8, %v12129_v1, %v12116_v48 }
 0xa2d   : > { %v12133_v41 = vrot.slane %v12131_v34, 4 }
 0xa2f   : > { %12135 = vst [vmem:[#allocation3 + $0x18] sm:$0x30] %v12133_v41  ;;  %v11709_v62 = vpop.permute.xlu0 %11708 }
 0xa30   : > { %v11727_v26 = vsel %vm9707_vm9, %v11725_v31, %v11709_v62 }
 0xa31   : > { %v11729_v53 = vsel %vm9710_vm8, %v11727_v26, %v11714_v7 }
 0xa32   : > { %11731 = vst [vmem:[#allocation3 + $0x18] sm:$0x3] %v11729_v53 }
 0xa39   : > { %v12361_v49 = vld [vmem:[#allocation3 + $0x18] sm:$0xff] }
 0xa3a   : > { %13393 = vmatprep.subr.bf16.mxu0 %v12361_v49  ;;  %13414 = vmatprep.subr.bf16.mxu1 %v12361_v49  ;;  %v12386_v61 = vpop.permute.xlu1 %12385 }
 0xa3b   : > { %13394 = vmatpush3.bf16.msra.mxu0 %v12361_v49  ;;  %13418 = vmatpush3.bf16.msra.mxu1 %v12361_v49 }
 0xa3e   : > { %13396 = vmatmul.mubr.msk.bf16.vlgmr.msra.gmra.mrb[0].mxu0 %vm9701_vm6, %v13555_v20  ;;  %13404 = vmatmul.mubr.msk.bf16.vlgmr.msra.gmra.mrb[0].mxu1 %vm9701_vm6, %v13556_v25  ;;  %v12391_v54 = vpop.permute.xlu1 %12390 }
 0xa3f   : > { %13399 = vmatprep.mubr.msk.bf16.mxu0 %vm9701_vm6, %v13557_v27  ;;  %13407 = vmatprep.mubr.msk.bf16.mxu1 %vm9701_vm6, %v13558_v43 }
 0xa40   : > { %v12381_v30 = vpop.permute.xlu0 %12380 }
 0xa42   : > { %v12401_v36 = vpop.permute.xlu1 %12400 }
 0xa44   : > { %v12396_v11 = vpop.permute.xlu0 %12395 }
 0xa46   : > { %13400 = vmatmul.mubr.msk.bf16.gmra.mrb[4].mxu0 %vm9701_vm6, %v13559_v0  ;;  %13408 = vmatmul.mubr.msk.bf16.gmra.mrb[4].mxu1 %vm9701_vm6, %v13560_v28  ;;  %v12411_v23 = vpop.permute.xlu1 %12410 }
 0xa48   : > { %v21450_v35 = vpop.permute.xlu0 %12405 }
 0xa4a   : > { %v12421_v58 = vpop.permute.xlu1 %12420 }
 0xa4c   : > { %v12416_v37 = vpop.permute.xlu0 %12415 }
 0xa4e   : > { %v12431_v32 = vpop.permute.xlu1 %12430 }
 0xa50   : > { %v12426_v33 = vpop.permute.xlu0 %12425 }
 0xa52   : > { %v12441_v17 = vpop.permute.xlu1 %12440 }
 0xa54   : > { %v12436_v57 = vpop.permute.xlu0 %12435 }
 0xa56   : > { %v12451_v13 = vpop.permute.xlu1 %12450 }
 0xa58   : > { %v12446_v18 = vpop.permute.xlu0 %12445 }
 0xa5c   : > { %v12456_v50 = vpop.permute.xlu0 %12455 }
 0xb11   : > { %v13397_v8 = vpop.f32.mrb[0].mxu0  ;;  %v13405_v3 = vpop.f32.mrb[0].mxu1 }
 0xb12   : > { %v12565_v39 = vadd.f32 %v13397_v8, %v12391_v54  ;;  %v12597_v46 = vadd.f32 %v13405_v3, %v12431_v32  ;;  %v12556_v42 = vpop.f32.mrb[1].mxu0  ;;  %v12588_v4 = vpop.f32.mrb[1].mxu1 }
 0xb13   : > { %v12557_v10 = vadd.f32 %v12556_v42, %v12381_v30  ;;  %v12589_v38 = vadd.f32 %v12588_v4, %v12421_v58  ;;  %v13398_v19 = vpop.f32.mrb[2].mxu0  ;;  %v13406_v52 = vpop.f32.mrb[2].mxu1 }
 0xb14   : > { %12621 = vst [vmem:[%s21456_s24 + $0x10] sm:$0xff] %v12565_v39  ;;  %12629 = vst [vmem:[%s21456_s24 + $0x50] sm:$0xff] %v12597_v46  ;;  %v12568_v2 = vadd.f32 %v13398_v19, %v12396_v11  ;;  %v12600_v60 = vadd.f32 %v13406_v52, %v12436_v57  ;;  %v12559_v14 = vpop.f32.mrb[3].mxu0  ;;  %v12591_v16 = vpop.f32.mrb[3].mxu1 }
 0xb15   : > { %12619 = vst [vmem:[%s21456_s24] sm:$0xff] %v12557_v10  ;;  %12627 = vst [vmem:[%s21456_s24 + $0x40] sm:$0xff] %v12589_v38  ;;  %v12560_v15 = vadd.f32 %v12559_v14, %v12386_v61  ;;  %v12592_v21 = vadd.f32 %v12591_v16, %v12426_v33 }
 0xb16   : > { %12622 = vst [vmem:[%s21456_s24 + $0x18] sm:$0xff] %v12568_v2  ;;  %12630 = vst [vmem:[%s21456_s24 + $0x58] sm:$0xff] %v12600_v60 }
 0xb17   : > { %12620 = vst [vmem:[%s21456_s24 + $0x8] sm:$0xff] %v12560_v15  ;;  %12628 = vst [vmem:[%s21456_s24 + $0x48] sm:$0xff] %v12592_v21 }
 0xb19   : > { %v13401_v56 = vpop.f32.mrb[4].mxu0  ;;  %v13409_v9 = vpop.f32.mrb[4].mxu1 }
 0xb1a   : > { %v12581_v59 = vadd.f32 %v13401_v56, %v12411_v23  ;;  %v12613_v5 = vadd.f32 %v13409_v9, %v12451_v13  ;;  %v12572_v6 = vpop.f32.mrb[5].mxu0  ;;  %v12604_v45 = vpop.f32.mrb[5].mxu1 }
 0xb1b   : > { %v12573_v22 = vadd.f32 %v12572_v6, %v12401_v36  ;;  %v12605_v63 = vadd.f32 %v12604_v45, %v12441_v17  ;;  %v13402_v44 = vpop.f32.mrb[6].mxu0  ;;  %v13410_v40 = vpop.f32.mrb[6].mxu1 }
 0xb1c   : > { %12625 = vst [vmem:[%s21456_s24 + $0x30] sm:$0xff] %v12581_v59  ;;  %12633 = vst [vmem:[%s21456_s24 + $0x70] sm:$0xff] %v12613_v5  ;;  %v12584_v51 = vadd.f32 %v13402_v44, %v12416_v37  ;;  %v12616_v47 = vadd.f32 %v13410_v40, %v12456_v50  ;;  %v12575_v12 = vpop.f32.mrb[7].mxu0  ;;  %v12607_v1 = vpop.f32.mrb[7].mxu1 }
 0xb1d   : > { %12623 = vst [vmem:[%s21456_s24 + $0x20] sm:$0xff] %v12573_v22  ;;  %12631 = vst [vmem:[%s21456_s24 + $0x60] sm:$0xff] %v12605_v63  ;;  %v12576_v48 = vadd.f32 %v12575_v12, %v21450_v35  ;;  %v12608_v24 = vadd.f32 %v12607_v1, %v12446_v18 }
 0xb1e   : > { %12626 = vst [vmem:[%s21456_s24 + $0x38] sm:$0xff] %v12584_v51  ;;  %12634 = vst [vmem:[%s21456_s24 + $0x78] sm:$0xff] %v12616_v47 }
 0xb1f   : > { %12624 = vst [vmem:[%s21456_s24 + $0x28] sm:$0xff] %v12576_v48  ;;  %12632 = vst [vmem:[%s21456_s24 + $0x68] sm:$0xff] %v12608_v24 }
 0xb20   : > { %13574 = shalt.err (!%p13571_p6)
}
 0xb21   : > { %s13575_s13 = scalar_lea.hbm %s21475_s8, 2048  ;;  %s13579_s24 = scalar_lea.hbm %s21542_s4, 8192 }
 0xb22   : > { %p13576_p7 = scmp.ne.s32.totalorder %s21475_s8, %s13575_s13  ;;  %p13580_p11 = scmp.lt.u32.totalorder %s21475_s8, %s21542_s4 }
 0xb23   : > { %p13581_p12 = scmp.lt.u32.totalorder %s13579_s24, %s13575_s13  ;;  %p13583_p0 = scmp.lt.u32.totalorder %s13575_s13, %s21475_s8 }
 0xb24   : > { %p13577_p9 = pnand %p13576_p7, %p13772_p3 }
 0xb25   : > { %p13582_p13 = por %p13581_p12, %p13580_p11 }
 0xb26   : > { %p13578_p10 = pneg %p13577_p9 }
 0xb27   : > { %p13584_p1 = por %p13583_p0, %p13582_p13 }
 0xb29   : > { %p13585_p2 = pnand %p13584_p1, %p13578_p10 }
 0xb2b   : > { %13588 = shalt.err (!%p13585_p2)
}
 0xb2c   : > { %s13693_s18 = smov 128   ;;  %s13694_s6 = smov 256  }
 0xb2d   : > { %s13695_s9 = smov 8  }
 0xb2e   : > { %13420 = dma.vmem_to_hbm [thread:$0]  (%p13772_p3), %s21468_s30, 2048, %s21475_s8, %s21486_s23, %s13693_s18, %s13694_s6, %s13695_s9  }
 0xb2f PF: > { %p13426_p4 = scmp.ge.s32.totalorder %s13655_s22, 2  ;;  %s12665_s10 = sand.u32 1, %s13627_s15  }
 0xb30   : > { %s12666_s11 = scalar_lea.sflag [#allocation5], %s12665_s10 }
 0xb31   : > { %p13423_p5 = pnand %p13426_p4, %p13781_p8 }
 0xb33   : > { %13622 = dma.done.wait (!%p13423_p5), %s12666_s11, 2048  }
 0xb34   : > { %13624 = vsyncadd (!%p13423_p5), %s12666_s11, 4294965248  ;;  %s17_s22 = sadd.s32 1, %s13655_s22   ;;  %s23340_s15 = smov %s13631_s16 }
 0xb35   : > { %p14_p6 = scmp.ge.s32.totalorder %s17_s22, 6   ;;  %s23341_s16 = smov %s13635_s17 }
 0xb36   : > { %s23342_s17 = smov %s13790_s7  ;;  %s23343_s18 = smov %s13647_s20 }
 0xb37   : > { %s23344_s19 = smov %s13651_s21  ;;  %s23345_s20 = smov %s23348_s25 }
 0xb38   : > { %s23346_s21 = smov %s23352_s26  ;;  %16 = sbr.rel (!%p14_p6) target bundleno = 5 (0x5), region = 75 }
 0xb3f   :  { %12671 = vsyncpa [#allocation5], 1 }
 0xb40   :  { %12673 = vsyncpa [#allocation5 + $0x1], 1 }

</bundles_post_ra>
